<compile_context>
chip_gen: v7x
topology: tpu7x:2x2x1
jax: 0.10.0
libtpu: 0.0.40
codegen_flags: <defaults>
</compile_context>

<pallas_src>
import jax
import jax.numpy as jnp
from jax.experimental import pallas as pl
from jax.experimental.pallas import tpu as pltpu

POS_EMB_DIM = 5
INPUT_DIM = POS_EMB_DIM * 3 * 2 + 3          # 33
HIDDEN = 64
MAX_TM = 1024                                 # max points per grid step


# --------------------------------------------------------------------------- reference helpers
def embedding_fn(x, n_freq=POS_EMB_DIM, keep_ori=True):
    """Sin/cos positional embedding (JAX mirror of the PyTorch embedding_fn).

    Used only by the pure-JAX reference; the Pallas kernel fuses this computation.
    """
    embedded = []
    if keep_ori:
        embedded.append(x)
    freqs = 2.0 ** jnp.linspace(0.0, n_freq - 1, n_freq)
    for f in freqs:
        for fn in (jnp.sin, jnp.cos):
            embedded.append(fn(f * x))
    return jnp.concatenate(embedded, axis=1)


def _embedding_constants():
    """[5, 33] f32 lane-constant table driving the fused in-kernel embedding.

    row 0: frequency multiplier per output column
    row 1: 1.0 where the column is the raw coordinate (keep_ori part)
    row 2: 1.0 where the column is a sin() column (else cos)
    row 3: 1.0 where the source coordinate is x[..., 0]
    row 4: 1.0 where the source coordinate is x[..., 1]   (else x[..., 2])
    """
    j = jnp.arange(INPUT_DIM)
    coord = j % 3
    blk = jnp.maximum(j - 3, 0) // 3                       # 0..9 over the sin/cos columns
    freq = jnp.where(j < 3, 1.0, 2.0 ** (blk // 2).astype(jnp.float32))
    rows = [
        freq,
        (j < 3).astype(jnp.float32),
        ((blk % 2) == 0).astype(jnp.float32),
        (coord == 0).astype(jnp.float32),
        (coord == 1).astype(jnp.float32),
    ]
    return jnp.stack(rows).astype(jnp.float32)


# --------------------------------------------------------------------------- kernel
def _nerf_kernel(pts_ref, emb_ref,
                 w33_ref, wsq_ref, b64_ref,
                 wld_ref, bld_ref, wc1_ref, bc1_ref, wc2p_ref, bc2p_ref,
                 out_ref):
    f32, bf16 = jnp.float32, jnp.bfloat16
    relu = lambda v: jnp.maximum(v, 0.0)

    def dotf(a, w):
        return jnp.dot(a, w, preferred_element_type=f32)

    def bias(k):
        return b64_ref[k]                                   # [1, 64] f32

    x = pts_ref[...]                                        # [TM, 3] f32

    # ---- fused positional embedding (VPU selects + EUP sin/cos; no concat/reshape) ----
    ec = emb_ref[...]                                       # [5, 33] f32
    freq  = ec[0:1, :]
    m_ori = ec[1:2, :] > 0.5
    m_sin = ec[2:3, :] > 0.5
    m_c0  = ec[3:4, :] > 0.5
    m_c1  = ec[4:5, :] > 0.5
    x0, x1, x2 = x[:, 0:1], x[:, 1:2], x[:, 2:3]
    xg = jnp.where(m_c0, x0, jnp.where(m_c1, x1, x2))       # [TM, 33] = x[:, j % 3]
    arg = xg * freq
    enc = jnp.where(m_ori, xg, jnp.where(m_sin, jnp.sin(arg), jnp.cos(arg)))
    enc_b = enc.astype(bf16)

    # ---- decoder_mlp_layer_0 ----
    h = relu(dotf(enc_b, w33_ref[0]) + bias(0))
    h = relu(dotf(h.astype(bf16), wsq_ref[0]) + bias(1))
    h = relu(dotf(h.astype(bf16), wsq_ref[1]) + bias(2))    # [TM, 64]

    # ---- decoder_mlp_layer_1 on cat([enc, h]) via split weights (no in-kernel concat) ----
    g = relu(dotf(enc_b, w33_ref[1]) + dotf(h.astype(bf16), wsq_ref[2]) + bias(3))
    g = relu(dotf(g.astype(bf16), wsq_ref[3]) + bias(4))
    g = relu(dotf(g.astype(bf16), wsq_ref[4]) + bias(5))    # [TM, 64]

    # ---- fused decoder_latent | decoder_density head (one [64, 65] matmul) ----
    dl = dotf(g.astype(bf16), wld_ref[...]) + bld_ref[...]  # [TM, 65]
    latent = dl[:, :HIDDEN]                                 # [TM, 64]
    raw_density = dl[:, HIDDEN:HIDDEN + 1]                  # [TM, 1]

    # ---- decoder_color (second layer zero-padded to width 4: column 0 is unused) ----
    cf = relu(dotf(latent.astype(bf16), wc1_ref[...]) + bc1_ref[...])        # [TM, 16]
    raw4 = dotf(cf.astype(bf16), wc2p_ref[...]) + bc2p_ref[...]              # [TM, 4]

    # final activations, single full-width store: [relu(density), (tanh(rgb)+1)/2]
    lane = jax.lax.broadcasted_iota(jnp.int32, (1, 4), 1)
    out4 = jnp.where(lane == 0, relu(raw_density), (jnp.tanh(raw4) + 1.0) * 0.5)
    out_ref[...] = out4.astype(out_ref.dtype)


# --------------------------------------------------------------------------- wrapper
def _round_up(x, m):
    return -(-x // m) * m


def _choose_tm(n_points, max_tm=MAX_TM):
    """Largest tile <= max_tm that still yields >= 2 grid steps (v7x has 2 TensorCores)."""
    if n_points >= 2 * max_tm:
        return max_tm
    return max(8, min(max_tm, _round_up(_round_up(n_points, 2) // 2, 8)))


def _pack_params(params):
    f32, bf16 = jnp.float32, jnp.bfloat16
    w33 = jnp.stack([params["w0a"], params["w1a_e"]]).astype(bf16)              # [2,33,64]
    wsq = jnp.stack([params["w0b"], params["w0c"], params["w1a_h"],
                     params["w1b"], params["w1c"]]).astype(bf16)                # [5,64,64]
    b64 = jnp.stack([params["b0a"], params["b0b"], params["b0c"],
                     params["b1a"], params["b1b"], params["b1c"]]).astype(f32)  # [6,1,64]
    wld = jnp.concatenate([params["wl"], params["wd"]], axis=1).astype(bf16)    # [64,65]
    bld = jnp.concatenate([params["bl"], params["bd"]], axis=1).astype(f32)     # [1,65]
    wc1 = params["wc1"].astype(bf16)                                            # [64,16]
    bc1 = params["bc1"].astype(f32)                                             # [1,16]
    wc2p = jnp.concatenate(
        [jnp.zeros((HIDDEN // 4, 1), f32), params["wc2"]], axis=1).astype(bf16)  # [16,4]
    bc2p = jnp.concatenate(
        [jnp.zeros((1, 1), f32), params["bc2"]], axis=1).astype(f32)             # [1,4]
    return [w33, wsq, b64, wld, bld, wc1, bc1, wc2p, bc2p]


def _const_spec(p):
    zeros = (0,) * p.ndim
    return pl.BlockSpec(p.shape, lambda i, _z=zeros: _z)     # VMEM-resident every step


def nerf_ind_forward(pts, params, max_tm=MAX_TM):
    """pts: [P, 3] float32 -> [P, 4] float32 (density, r, g, b)."""
    P = pts.shape[0]
    tm = _choose_tm(P, max_tm)
    p_pad = _round_up(P, tm)
    if p_pad != P:
        pts = jnp.pad(pts, ((0, p_pad - P), (0, 0)))

    const_inputs = [_embedding_constants()] + _pack_params(params)

    in_specs = [pl.BlockSpec((tm, 3), lambda i: (i, 0))]
    in_specs += [_const_spec(p) for p in const_inputs]

    out = pl.pallas_call(
        _nerf_kernel,
        out_shape=jax.ShapeDtypeStruct((p_pad, 4), jnp.float32),
        grid_spec=pltpu.PrefetchScalarGridSpec(
            num_scalar_prefetch=0,
            grid=(p_pad // tm,),
            in_specs=in_specs,
            out_specs=pl.BlockSpec((tm, 4), lambda i: (i, 0)),
        ),
        compiler_params=pltpu.CompilerParams(
            dimension_semantics=("parallel",),
            vmem_limit_bytes=32 * 1024 * 1024,
        ),
    )(pts, *const_inputs)
    return out[:P]


# --------------------------------------------------------------------------- params & reference
def init_params(key):
    """Deterministic synthetic params; shapes mirror NeRF_Ind.__init__ (weights stored [in, out])."""
    def linear(k, fan_in, fan_out):
        kw, kb = jax.random.split(k)
        bound = 1.0 / jnp.sqrt(fan_in)
        w = jax.random.uniform(kw, (fan_in, fan_out), jnp.float32, -bound, bound)
        b = jax.random.uniform(kb, (1, fan_out), jnp.float32, -bound, bound)
        return w, b

    keys = jax.random.split(key, 12)
    p = {}
    p["w0a"], p["b0a"] = linear(keys[0], INPUT_DIM, HIDDEN)
    p["w0b"], p["b0b"] = linear(keys[1], HIDDEN, HIDDEN)
    p["w0c"], p["b0c"] = linear(keys[2], HIDDEN, HIDDEN)
    # layer_1 first Linear has fan_in = HIDDEN + INPUT_DIM = 97; split into [enc | h] halves.
    w1a, p["b1a"] = linear(keys[3], HIDDEN + INPUT_DIM, HIDDEN)
    p["w1a_e"] = w1a[:INPUT_DIM]
    p["w1a_h"] = w1a[INPUT_DIM:]
    p["w1b"], p["b1b"] = linear(keys[4], HIDDEN, HIDDEN)
    p["w1c"], p["b1c"] = linear(keys[5], HIDDEN, HIDDEN)
    p["wd"], p["bd"] = linear(keys[6], HIDDEN, 1)
    p["wl"], p["bl"] = linear(keys[7], HIDDEN, HIDDEN)
    p["wc1"], p["bc1"] = linear(keys[8], HIDDEN, HIDDEN // 4)
    p["wc2"], p["bc2"] = linear(keys[9], HIDDEN // 4, 3)
    return p


def nerf_ind_reference(pts, params):
    """Pure-JAX (f32) reference mirroring the PyTorch forward."""
    enc = embedding_fn(pts)
    relu = lambda v: jnp.maximum(v, 0.0)
    h = relu(enc @ params["w0a"] + params["b0a"])
    h = relu(h @ params["w0b"] + params["b0b"])
    h = relu(h @ params["w0c"] + params["b0c"])
    cat = jnp.concatenate([enc, h], axis=-1)
    w1a = jnp.concatenate([params["w1a_e"], params["w1a_h"]], axis=0)
    g = relu(cat @ w1a + params["b1a"])
    g = relu(g @ params["w1b"] + params["b1b"])
    g = relu(g @ params["w1c"] + params["b1c"])
    raw_density = g @ params["wd"] + params["bd"]
    latent = g @ params["wl"] + params["bl"]
    c = relu(latent @ params["wc1"] + params["bc1"])
    raw_color = c @ params["wc2"] + params["bc2"]
    density = relu(raw_density)
    rgb = (jnp.tanh(raw_color) + 1.0) / 2.0
    return jnp.concatenate([density, rgb], axis=-1)


if __name__ == "__main__":
    key = jax.random.PRNGKey(0)
    k_pts, k_par = jax.random.split(key)

    P = 512                                               # small point count for the example
    pts = jax.random.normal(k_pts, (P, 3), jnp.float32)   # [P, 3] 3-D coordinates
    params = init_params(k_par)

    out = jax.block_until_ready(nerf_ind_forward(pts, params))
    ref = nerf_ind_reference(pts, params)

    assert out.shape == (P, 4)
    # bf16 MXU inputs with f32 accumulation -> looser tolerance than a pure-f32 kernel.
    assert jnp.allclose(out, ref, atol=5e-2, rtol=5e-2), "Pallas output mismatch vs JAX reference"

    print("KERNEL_OK")
</pallas_src>

<mosaic_0001>
module attributes {stable_mosaic.version = 11 : i64} {
  func.func @_nerf_kernel(%arg0: i32, %arg1: memref<256x3xf32, #tpu.memory_space<vmem>>, %arg2: memref<5x33xf32, #tpu.memory_space<vmem>>, %arg3: memref<2x33x64xbf16, #tpu.memory_space<vmem>>, %arg4: memref<5x64x64xbf16, #tpu.memory_space<vmem>>, %arg5: memref<6x1x64xf32, #tpu.memory_space<vmem>>, %arg6: memref<64x65xbf16, #tpu.memory_space<vmem>>, %arg7: memref<1x65xf32, #tpu.memory_space<vmem>>, %arg8: memref<64x16xbf16, #tpu.memory_space<vmem>>, %arg9: memref<1x16xf32, #tpu.memory_space<vmem>>, %arg10: memref<16x4xbf16, #tpu.memory_space<vmem>>, %arg11: memref<1x4xf32, #tpu.memory_space<vmem>>, %arg12: memref<256x4xf32, #tpu.memory_space<vmem>>) attributes {dimension_semantics = [#tpu.dimension_semantics<parallel>], iteration_bounds = array<i64: 2>, scalar_prefetch = 0 : i64, scratch_operands = 0 : i64, tpu.core_type = #tpu.core_type<tc>, window_params = [{transform_indices = @transform_0, window_bounds = array<i64: 256, 3>}, {pipeline_mode = #tpu.pipeline_mode<synchronous>, transform_indices = @transform_1, window_bounds = array<i64: 5, 33>}, {pipeline_mode = #tpu.pipeline_mode<synchronous>, transform_indices = @transform_2, window_bounds = array<i64: 2, 33, 64>}, {pipeline_mode = #tpu.pipeline_mode<synchronous>, transform_indices = @transform_3, window_bounds = array<i64: 5, 64, 64>}, {pipeline_mode = #tpu.pipeline_mode<synchronous>, transform_indices = @transform_4, window_bounds = array<i64: 6, 1, 64>}, {pipeline_mode = #tpu.pipeline_mode<synchronous>, transform_indices = @transform_5, window_bounds = array<i64: 64, 65>}, {pipeline_mode = #tpu.pipeline_mode<synchronous>, transform_indices = @transform_6, window_bounds = array<i64: 1, 65>}, {pipeline_mode = #tpu.pipeline_mode<synchronous>, transform_indices = @transform_7, window_bounds = array<i64: 64, 16>}, {pipeline_mode = #tpu.pipeline_mode<synchronous>, transform_indices = @transform_8, window_bounds = array<i64: 1, 16>}, {pipeline_mode = #tpu.pipeline_mode<synchronous>, transform_indices = @transform_9, window_bounds = array<i64: 16, 4>}, {pipeline_mode = #tpu.pipeline_mode<synchronous>, transform_indices = @transform_10, window_bounds = array<i64: 1, 4>}, {transform_indices = @transform_11, window_bounds = array<i64: 256, 4>}]} {
    %c0 = arith.constant 0 : index
    %c0_0 = arith.constant 0 : index
    %0 = vector.load %arg1[%c0, %c0_0] : memref<256x3xf32, #tpu.memory_space<vmem>>, vector<256x3xf32>
    %c0_1 = arith.constant 0 : index
    %c0_2 = arith.constant 0 : index
    %1 = vector.load %arg2[%c0_1, %c0_2] : memref<5x33xf32, #tpu.memory_space<vmem>>, vector<5x33xf32>
    %2 = vector.extract_strided_slice %1 {offsets = [0, 0], sizes = [1, 33], strides = [1, 1]} : vector<5x33xf32> to vector<1x33xf32>
    %3 = vector.extract_strided_slice %1 {offsets = [1, 0], sizes = [1, 33], strides = [1, 1]} : vector<5x33xf32> to vector<1x33xf32>
    %cst = arith.constant 5.000000e-01 : f32
    %4 = vector.broadcast %cst : f32 to vector<1x33xf32>
    %5 = arith.cmpf ogt, %3, %4 : vector<1x33xf32>
    %6 = vector.extract_strided_slice %1 {offsets = [2, 0], sizes = [1, 33], strides = [1, 1]} : vector<5x33xf32> to vector<1x33xf32>
    %cst_3 = arith.constant 5.000000e-01 : f32
    %7 = vector.broadcast %cst_3 : f32 to vector<1x33xf32>
    %8 = arith.cmpf ogt, %6, %7 : vector<1x33xf32>
    %9 = vector.extract_strided_slice %1 {offsets = [3, 0], sizes = [1, 33], strides = [1, 1]} : vector<5x33xf32> to vector<1x33xf32>
    %cst_4 = arith.constant 5.000000e-01 : f32
    %10 = vector.broadcast %cst_4 : f32 to vector<1x33xf32>
    %11 = arith.cmpf ogt, %9, %10 : vector<1x33xf32>
    %12 = vector.extract_strided_slice %1 {offsets = [4, 0], sizes = [1, 33], strides = [1, 1]} : vector<5x33xf32> to vector<1x33xf32>
    %cst_5 = arith.constant 5.000000e-01 : f32
    %13 = vector.broadcast %cst_5 : f32 to vector<1x33xf32>
    %14 = arith.cmpf ogt, %12, %13 : vector<1x33xf32>
    %15 = vector.extract_strided_slice %0 {offsets = [0, 0], sizes = [256, 1], strides = [1, 1]} : vector<256x3xf32> to vector<256x1xf32>
    %16 = vector.extract_strided_slice %0 {offsets = [0, 1], sizes = [256, 1], strides = [1, 1]} : vector<256x3xf32> to vector<256x1xf32>
    %17 = vector.extract_strided_slice %0 {offsets = [0, 2], sizes = [256, 1], strides = [1, 1]} : vector<256x3xf32> to vector<256x1xf32>
    %18 = vector.shape_cast %14 : vector<1x33xi1> to vector<1x33xi1>
    %19 = vector.broadcast %18 : vector<1x33xi1> to vector<256x33xi1>
    %20 = vector.shape_cast %16 : vector<256x1xf32> to vector<256x1xf32>
    %21 = vector.broadcast %20 : vector<256x1xf32> to vector<256x33xf32>
    %22 = vector.shape_cast %17 : vector<256x1xf32> to vector<256x1xf32>
    %23 = vector.broadcast %22 : vector<256x1xf32> to vector<256x33xf32>
    %24 = arith.select %19, %21, %23 : vector<256x33xi1>, vector<256x33xf32>
    %25 = vector.shape_cast %11 : vector<1x33xi1> to vector<1x33xi1>
    %26 = vector.broadcast %25 : vector<1x33xi1> to vector<256x33xi1>
    %27 = vector.shape_cast %15 : vector<256x1xf32> to vector<256x1xf32>
    %28 = vector.broadcast %27 : vector<256x1xf32> to vector<256x33xf32>
    %29 = arith.select %26, %28, %24 : vector<256x33xi1>, vector<256x33xf32>
    %30 = vector.broadcast %2 : vector<1x33xf32> to vector<256x33xf32>
    %31 = arith.mulf %29, %30 : vector<256x33xf32>
    %32 = math.sin %31 : vector<256x33xf32>
    %33 = math.cos %31 : vector<256x33xf32>
    %34 = vector.shape_cast %8 : vector<1x33xi1> to vector<1x33xi1>
    %35 = vector.broadcast %34 : vector<1x33xi1> to vector<256x33xi1>
    %36 = arith.select %35, %32, %33 : vector<256x33xi1>, vector<256x33xf32>
    %37 = vector.shape_cast %5 : vector<1x33xi1> to vector<1x33xi1>
    %38 = vector.broadcast %37 : vector<1x33xi1> to vector<256x33xi1>
    %39 = arith.select %38, %29, %36 : vector<256x33xi1>, vector<256x33xf32>
    %40 = arith.truncf %39 : vector<256x33xf32> to vector<256x33xbf16>
    %c0_6 = arith.constant 0 : index
    %c0_7 = arith.constant 0 : index
    %c0_8 = arith.constant 0 : index
    %41 = vector.load %arg3[%c0_6, %c0_7, %c0_8] : memref<2x33x64xbf16, #tpu.memory_space<vmem>>, vector<1x33x64xbf16>
    %42 = vector.shape_cast %41 : vector<1x33x64xbf16> to vector<33x64xbf16>
    %cst_9 = arith.constant dense<0.000000e+00> : vector<256x64xf32>
    %43 = tpu.matmul %40, %42, %cst_9 {dimension_numbers = #tpu.dot_dimension_numbers<[1], [0], [0], [1], [0, 0, 1, 1], [], []>} : vector<256x33xbf16>, vector<33x64xbf16>, vector<256x64xf32> -> vector<256x64xf32>
    %c0_10 = arith.constant 0 : index
    %c0_11 = arith.constant 0 : index
    %c0_12 = arith.constant 0 : index
    %44 = vector.load %arg5[%c0_10, %c0_11, %c0_12] : memref<6x1x64xf32, #tpu.memory_space<vmem>>, vector<1x1x64xf32>
    %45 = vector.shape_cast %44 : vector<1x1x64xf32> to vector<1x64xf32>
    %46 = vector.broadcast %45 : vector<1x64xf32> to vector<256x64xf32>
    %47 = arith.addf %43, %46 : vector<256x64xf32>
    %cst_13 = arith.constant 0.000000e+00 : f32
    %48 = vector.broadcast %cst_13 : f32 to vector<256x64xf32>
    %49 = arith.maximumf %47, %48 : vector<256x64xf32>
    %50 = arith.truncf %49 : vector<256x64xf32> to vector<256x64xbf16>
    %c0_14 = arith.constant 0 : index
    %c0_15 = arith.constant 0 : index
    %c0_16 = arith.constant 0 : index
    %51 = vector.load %arg4[%c0_14, %c0_15, %c0_16] : memref<5x64x64xbf16, #tpu.memory_space<vmem>>, vector<1x64x64xbf16>
    %52 = vector.shape_cast %51 : vector<1x64x64xbf16> to vector<64x64xbf16>
    %cst_17 = arith.constant dense<0.000000e+00> : vector<256x64xf32>
    %53 = tpu.matmul %50, %52, %cst_17 {dimension_numbers = #tpu.dot_dimension_numbers<[1], [0], [0], [1], [0, 0, 1, 1], [], []>} : vector<256x64xbf16>, vector<64x64xbf16>, vector<256x64xf32> -> vector<256x64xf32>
    %c1 = arith.constant 1 : index
    %c0_18 = arith.constant 0 : index
    %c0_19 = arith.constant 0 : index
    %54 = vector.load %arg5[%c1, %c0_18, %c0_19] : memref<6x1x64xf32, #tpu.memory_space<vmem>>, vector<1x1x64xf32>
    %55 = vector.shape_cast %54 : vector<1x1x64xf32> to vector<1x64xf32>
    %56 = vector.broadcast %55 : vector<1x64xf32> to vector<256x64xf32>
    %57 = arith.addf %53, %56 : vector<256x64xf32>
    %cst_20 = arith.constant 0.000000e+00 : f32
    %58 = vector.broadcast %cst_20 : f32 to vector<256x64xf32>
    %59 = arith.maximumf %57, %58 : vector<256x64xf32>
    %60 = arith.truncf %59 : vector<256x64xf32> to vector<256x64xbf16>
    %c1_21 = arith.constant 1 : index
    %c0_22 = arith.constant 0 : index
    %c0_23 = arith.constant 0 : index
    %61 = vector.load %arg4[%c1_21, %c0_22, %c0_23] : memref<5x64x64xbf16, #tpu.memory_space<vmem>>, vector<1x64x64xbf16>
    %62 = vector.shape_cast %61 : vector<1x64x64xbf16> to vector<64x64xbf16>
    %cst_24 = arith.constant dense<0.000000e+00> : vector<256x64xf32>
    %63 = tpu.matmul %60, %62, %cst_24 {dimension_numbers = #tpu.dot_dimension_numbers<[1], [0], [0], [1], [0, 0, 1, 1], [], []>} : vector<256x64xbf16>, vector<64x64xbf16>, vector<256x64xf32> -> vector<256x64xf32>
    %c2 = arith.constant 2 : index
    %c0_25 = arith.constant 0 : index
    %c0_26 = arith.constant 0 : index
    %64 = vector.load %arg5[%c2, %c0_25, %c0_26] : memref<6x1x64xf32, #tpu.memory_space<vmem>>, vector<1x1x64xf32>
    %65 = vector.shape_cast %64 : vector<1x1x64xf32> to vector<1x64xf32>
    %66 = vector.broadcast %65 : vector<1x64xf32> to vector<256x64xf32>
    %67 = arith.addf %63, %66 : vector<256x64xf32>
    %cst_27 = arith.constant 0.000000e+00 : f32
    %68 = vector.broadcast %cst_27 : f32 to vector<256x64xf32>
    %69 = arith.maximumf %67, %68 : vector<256x64xf32>
    %c1_28 = arith.constant 1 : index
    %c0_29 = arith.constant 0 : index
    %c0_30 = arith.constant 0 : index
    %70 = vector.load %arg3[%c1_28, %c0_29, %c0_30] : memref<2x33x64xbf16, #tpu.memory_space<vmem>>, vector<1x33x64xbf16>
    %71 = vector.shape_cast %70 : vector<1x33x64xbf16> to vector<33x64xbf16>
    %cst_31 = arith.constant dense<0.000000e+00> : vector<256x64xf32>
    %72 = tpu.matmul %40, %71, %cst_31 {dimension_numbers = #tpu.dot_dimension_numbers<[1], [0], [0], [1], [0, 0, 1, 1], [], []>} : vector<256x33xbf16>, vector<33x64xbf16>, vector<256x64xf32> -> vector<256x64xf32>
    %73 = arith.truncf %69 : vector<256x64xf32> to vector<256x64xbf16>
    %c2_32 = arith.constant 2 : index
    %c0_33 = arith.constant 0 : index
    %c0_34 = arith.constant 0 : index
    %74 = vector.load %arg4[%c2_32, %c0_33, %c0_34] : memref<5x64x64xbf16, #tpu.memory_space<vmem>>, vector<1x64x64xbf16>
    %75 = vector.shape_cast %74 : vector<1x64x64xbf16> to vector<64x64xbf16>
    %cst_35 = arith.constant dense<0.000000e+00> : vector<256x64xf32>
    %76 = tpu.matmul %73, %75, %cst_35 {dimension_numbers = #tpu.dot_dimension_numbers<[1], [0], [0], [1], [0, 0, 1, 1], [], []>} : vector<256x64xbf16>, vector<64x64xbf16>, vector<256x64xf32> -> vector<256x64xf32>
    %77 = arith.addf %72, %76 : vector<256x64xf32>
    %c3 = arith.constant 3 : index
    %c0_36 = arith.constant 0 : index
    %c0_37 = arith.constant 0 : index
    %78 = vector.load %arg5[%c3, %c0_36, %c0_37] : memref<6x1x64xf32, #tpu.memory_space<vmem>>, vector<1x1x64xf32>
    %79 = vector.shape_cast %78 : vector<1x1x64xf32> to vector<1x64xf32>
    %80 = vector.broadcast %79 : vector<1x64xf32> to vector<256x64xf32>
    %81 = arith.addf %77, %80 : vector<256x64xf32>
    %cst_38 = arith.constant 0.000000e+00 : f32
    %82 = vector.broadcast %cst_38 : f32 to vector<256x64xf32>
    %83 = arith.maximumf %81, %82 : vector<256x64xf32>
    %84 = arith.truncf %83 : vector<256x64xf32> to vector<256x64xbf16>
    %c3_39 = arith.constant 3 : index
    %c0_40 = arith.constant 0 : index
    %c0_41 = arith.constant 0 : index
    %85 = vector.load %arg4[%c3_39, %c0_40, %c0_41] : memref<5x64x64xbf16, #tpu.memory_space<vmem>>, vector<1x64x64xbf16>
    %86 = vector.shape_cast %85 : vector<1x64x64xbf16> to vector<64x64xbf16>
    %cst_42 = arith.constant dense<0.000000e+00> : vector<256x64xf32>
    %87 = tpu.matmul %84, %86, %cst_42 {dimension_numbers = #tpu.dot_dimension_numbers<[1], [0], [0], [1], [0, 0, 1, 1], [], []>} : vector<256x64xbf16>, vector<64x64xbf16>, vector<256x64xf32> -> vector<256x64xf32>
    %c4 = arith.constant 4 : index
    %c0_43 = arith.constant 0 : index
    %c0_44 = arith.constant 0 : index
    %88 = vector.load %arg5[%c4, %c0_43, %c0_44] : memref<6x1x64xf32, #tpu.memory_space<vmem>>, vector<1x1x64xf32>
    %89 = vector.shape_cast %88 : vector<1x1x64xf32> to vector<1x64xf32>
    %90 = vector.broadcast %89 : vector<1x64xf32> to vector<256x64xf32>
    %91 = arith.addf %87, %90 : vector<256x64xf32>
    %cst_45 = arith.constant 0.000000e+00 : f32
    %92 = vector.broadcast %cst_45 : f32 to vector<256x64xf32>
    %93 = arith.maximumf %91, %92 : vector<256x64xf32>
    %94 = arith.truncf %93 : vector<256x64xf32> to vector<256x64xbf16>
    %c4_46 = arith.constant 4 : index
    %c0_47 = arith.constant 0 : index
    %c0_48 = arith.constant 0 : index
    %95 = vector.load %arg4[%c4_46, %c0_47, %c0_48] : memref<5x64x64xbf16, #tpu.memory_space<vmem>>, vector<1x64x64xbf16>
    %96 = vector.shape_cast %95 : vector<1x64x64xbf16> to vector<64x64xbf16>
    %cst_49 = arith.constant dense<0.000000e+00> : vector<256x64xf32>
    %97 = tpu.matmul %94, %96, %cst_49 {dimension_numbers = #tpu.dot_dimension_numbers<[1], [0], [0], [1], [0, 0, 1, 1], [], []>} : vector<256x64xbf16>, vector<64x64xbf16>, vector<256x64xf32> -> vector<256x64xf32>
    %c5 = arith.constant 5 : index
    %c0_50 = arith.constant 0 : index
    %c0_51 = arith.constant 0 : index
    %98 = vector.load %arg5[%c5, %c0_50, %c0_51] : memref<6x1x64xf32, #tpu.memory_space<vmem>>, vector<1x1x64xf32>
    %99 = vector.shape_cast %98 : vector<1x1x64xf32> to vector<1x64xf32>
    %100 = vector.broadcast %99 : vector<1x64xf32> to vector<256x64xf32>
    %101 = arith.addf %97, %100 : vector<256x64xf32>
    %cst_52 = arith.constant 0.000000e+00 : f32
    %102 = vector.broadcast %cst_52 : f32 to vector<256x64xf32>
    %103 = arith.maximumf %101, %102 : vector<256x64xf32>
    %104 = arith.truncf %103 : vector<256x64xf32> to vector<256x64xbf16>
    %c0_53 = arith.constant 0 : index
    %c0_54 = arith.constant 0 : index
    %105 = vector.load %arg6[%c0_53, %c0_54] : memref<64x65xbf16, #tpu.memory_space<vmem>>, vector<64x65xbf16>
    %cst_55 = arith.constant dense<0.000000e+00> : vector<256x65xf32>
    %106 = tpu.matmul %104, %105, %cst_55 {dimension_numbers = #tpu.dot_dimension_numbers<[1], [0], [0], [1], [0, 0, 1, 1], [], []>} : vector<256x64xbf16>, vector<64x65xbf16>, vector<256x65xf32> -> vector<256x65xf32>
    %c0_56 = arith.constant 0 : index
    %c0_57 = arith.constant 0 : index
    %107 = vector.load %arg7[%c0_56, %c0_57] : memref<1x65xf32, #tpu.memory_space<vmem>>, vector<1x65xf32>
    %108 = vector.broadcast %107 : vector<1x65xf32> to vector<256x65xf32>
    %109 = arith.addf %106, %108 : vector<256x65xf32>
    %110 = vector.extract_strided_slice %109 {offsets = [0, 0], sizes = [256, 64], strides = [1, 1]} : vector<256x65xf32> to vector<256x64xf32>
    %111 = vector.extract_strided_slice %109 {offsets = [0, 64], sizes = [256, 1], strides = [1, 1]} : vector<256x65xf32> to vector<256x1xf32>
    %112 = arith.truncf %110 : vector<256x64xf32> to vector<256x64xbf16>
    %c0_58 = arith.constant 0 : index
    %c0_59 = arith.constant 0 : index
    %113 = vector.load %arg8[%c0_58, %c0_59] : memref<64x16xbf16, #tpu.memory_space<vmem>>, vector<64x16xbf16>
    %cst_60 = arith.constant dense<0.000000e+00> : vector<256x16xf32>
    %114 = tpu.matmul %112, %113, %cst_60 {dimension_numbers = #tpu.dot_dimension_numbers<[1], [0], [0], [1], [0, 0, 1, 1], [], []>} : vector<256x64xbf16>, vector<64x16xbf16>, vector<256x16xf32> -> vector<256x16xf32>
    %c0_61 = arith.constant 0 : index
    %c0_62 = arith.constant 0 : index
    %115 = vector.load %arg9[%c0_61, %c0_62] : memref<1x16xf32, #tpu.memory_space<vmem>>, vector<1x16xf32>
    %116 = vector.broadcast %115 : vector<1x16xf32> to vector<256x16xf32>
    %117 = arith.addf %114, %116 : vector<256x16xf32>
    %cst_63 = arith.constant 0.000000e+00 : f32
    %118 = vector.broadcast %cst_63 : f32 to vector<256x16xf32>
    %119 = arith.maximumf %117, %118 : vector<256x16xf32>
    %120 = arith.truncf %119 : vector<256x16xf32> to vector<256x16xbf16>
    %c0_64 = arith.constant 0 : index
    %c0_65 = arith.constant 0 : index
    %121 = vector.load %arg10[%c0_64, %c0_65] : memref<16x4xbf16, #tpu.memory_space<vmem>>, vector<16x4xbf16>
    %cst_66 = arith.constant dense<0.000000e+00> : vector<256x4xf32>
    %122 = tpu.matmul %120, %121, %cst_66 {dimension_numbers = #tpu.dot_dimension_numbers<[1], [0], [0], [1], [0, 0, 1, 1], [], []>} : vector<256x16xbf16>, vector<16x4xbf16>, vector<256x4xf32> -> vector<256x4xf32>
    %c0_67 = arith.constant 0 : index
    %c0_68 = arith.constant 0 : index
    %123 = vector.load %arg11[%c0_67, %c0_68] : memref<1x4xf32, #tpu.memory_space<vmem>>, vector<1x4xf32>
    %124 = vector.broadcast %123 : vector<1x4xf32> to vector<256x4xf32>
    %125 = arith.addf %122, %124 : vector<256x4xf32>
    %126 = tpu.iota {dimensions = array<i32: 1>} : vector<1x4xi32>
    %c0_i32 = arith.constant 0 : i32
    %127 = vector.broadcast %c0_i32 : i32 to vector<1x4xi32>
    %128 = arith.cmpi eq, %126, %127 : vector<1x4xi32>
    %cst_69 = arith.constant 0.000000e+00 : f32
    %129 = vector.broadcast %cst_69 : f32 to vector<256x1xf32>
    %130 = arith.maximumf %111, %129 : vector<256x1xf32>
    %131 = math.tanh %125 : vector<256x4xf32>
    %cst_70 = arith.constant 1.000000e+00 : f32
    %132 = vector.broadcast %cst_70 : f32 to vector<256x4xf32>
    %133 = arith.addf %131, %132 : vector<256x4xf32>
    %cst_71 = arith.constant 5.000000e-01 : f32
    %134 = vector.broadcast %cst_71 : f32 to vector<256x4xf32>
    %135 = arith.mulf %133, %134 : vector<256x4xf32>
    %136 = vector.shape_cast %128 : vector<1x4xi1> to vector<1x4xi1>
    %137 = vector.broadcast %136 : vector<1x4xi1> to vector<256x4xi1>
    %138 = vector.shape_cast %130 : vector<256x1xf32> to vector<256x1xf32>
    %139 = vector.broadcast %138 : vector<256x1xf32> to vector<256x4xf32>
    %140 = arith.select %137, %139, %135 : vector<256x4xi1>, vector<256x4xf32>
    %c0_72 = arith.constant 0 : index
    %c0_73 = arith.constant 0 : index
    %141 = vector.load %arg12[%c0_72, %c0_73] : memref<256x4xf32, #tpu.memory_space<vmem>>, vector<256x4xf32>
    tpu.vector_store %arg12[%c0_72, %c0_73], %140 {strides = array<i32>} : memref<256x4xf32, #tpu.memory_space<vmem>>, vector<256x4xf32>,
    return
  }
  func.func @transform_0(%arg0: i32) -> (i32, i32) {
    %c0_i32 = arith.constant 0 : i32
    %c0_i32_0 = arith.constant 0 : i32
    return %arg0, %c0_i32 : i32, i32
  }
  func.func @transform_1(%arg0: i32) -> (i32, i32) {
    %c0_i32 = arith.constant 0 : i32
    %c0_i32_0 = arith.constant 0 : i32
    %c0_i32_1 = arith.constant 0 : i32
    return %c0_i32, %c0_i32_0 : i32, i32
  }
  func.func @transform_2(%arg0: i32) -> (i32, i32, i32) {
    %c0_i32 = arith.constant 0 : i32
    %c0_i32_0 = arith.constant 0 : i32
    %c0_i32_1 = arith.constant 0 : i32
    %c0_i32_2 = arith.constant 0 : i32
    return %c0_i32, %c0_i32_0, %c0_i32_1 : i32, i32, i32
  }
  func.func @transform_3(%arg0: i32) -> (i32, i32, i32) {
    %c0_i32 = arith.constant 0 : i32
    %c0_i32_0 = arith.constant 0 : i32
    %c0_i32_1 = arith.constant 0 : i32
    %c0_i32_2 = arith.constant 0 : i32
    return %c0_i32, %c0_i32_0, %c0_i32_1 : i32, i32, i32
  }
  func.func @transform_4(%arg0: i32) -> (i32, i32, i32) {
    %c0_i32 = arith.constant 0 : i32
    %c0_i32_0 = arith.constant 0 : i32
    %c0_i32_1 = arith.constant 0 : i32
    %c0_i32_2 = arith.constant 0 : i32
    return %c0_i32, %c0_i32_0, %c0_i32_1 : i32, i32, i32
  }
  func.func @transform_5(%arg0: i32) -> (i32, i32) {
    %c0_i32 = arith.constant 0 : i32
    %c0_i32_0 = arith.constant 0 : i32
    %c0_i32_1 = arith.constant 0 : i32
    return %c0_i32, %c0_i32_0 : i32, i32
  }
  func.func @transform_6(%arg0: i32) -> (i32, i32) {
    %c0_i32 = arith.constant 0 : i32
    %c0_i32_0 = arith.constant 0 : i32
    %c0_i32_1 = arith.constant 0 : i32
    return %c0_i32, %c0_i32_0 : i32, i32
  }
  func.func @transform_7(%arg0: i32) -> (i32, i32) {
    %c0_i32 = arith.constant 0 : i32
    %c0_i32_0 = arith.constant 0 : i32
    %c0_i32_1 = arith.constant 0 : i32
    return %c0_i32, %c0_i32_0 : i32, i32
  }
  func.func @transform_8(%arg0: i32) -> (i32, i32) {
    %c0_i32 = arith.constant 0 : i32
    %c0_i32_0 = arith.constant 0 : i32
    %c0_i32_1 = arith.constant 0 : i32
    return %c0_i32, %c0_i32_0 : i32, i32
  }
  func.func @transform_9(%arg0: i32) -> (i32, i32) {
    %c0_i32 = arith.constant 0 : i32
    %c0_i32_0 = arith.constant 0 : i32
    %c0_i32_1 = arith.constant 0 : i32
    return %c0_i32, %c0_i32_0 : i32, i32
  }
  func.func @transform_10(%arg0: i32) -> (i32, i32) {
    %c0_i32 = arith.constant 0 : i32
    %c0_i32_0 = arith.constant 0 : i32
    %c0_i32_1 = arith.constant 0 : i32
    return %c0_i32, %c0_i32_0 : i32, i32
  }
  func.func @transform_11(%arg0: i32) -> (i32, i32) {
    %c0_i32 = arith.constant 0 : i32
    %c0_i32_0 = arith.constant 0 : i32
    return %arg0, %c0_i32 : i32, i32
  }
}

</mosaic_0001>

<bundles_post_ra>
// kernel: tpu_custom_call.1
= control target key start
LH: loop header
LB: loop body
LE: loop exit
PB: predicated region body
PF: predicated region fallthrough
CT: control target
= control target key end

     0   :  { %s12493_s17 = smov 0   ;;  %s17505_s0 = inlined_call_operand.vmem [shape: f32[512,3], index: 0, kind: input, shape index: {}]   ;;  %s17506_s1 = inlined_call_operand.vmem [shape: f32[5,33], index: 1, kind: input, shape index: {}]   ;;  %s17507_s2 = inlined_call_operand.vmem [shape: bf16[2,33,64], index: 2, kind: input, shape index: {}]   ;;  %s17508_s3 = inlined_call_operand.vmem [shape: bf16[5,64,64], index: 3, kind: input, shape index: {}]   ;;  %s17509_s4 = inlined_call_operand.vmem [shape: f32[6,1,64], index: 4, kind: input, shape index: {}]   ;;  %s17510_s5 = inlined_call_operand.vmem [shape: bf16[64,65], index: 5, kind: input, shape index: {}]   ;;  %s17511_s6 = inlined_call_operand.vmem [shape: f32[1,65], index: 6, kind: input, shape index: {}]   ;;  %s17512_s7 = inlined_call_operand.vmem [shape: bf16[64,16], index: 7, kind: input, shape index: {}]   ;;  %s17513_s8 = inlined_call_operand.vmem [shape: f32[1,16], index: 8, kind: input, shape index: {}]   ;;  %s17514_s9 = inlined_call_operand.vmem [shape: bf16[16,4], index: 9, kind: input, shape index: {}]   ;;  %s17515_s10 = inlined_call_operand.vmem [shape: f32[1,4], index: 10, kind: input, shape index: {}]   ;;  %s17516_s11 = inlined_call_operand.vmem [shape: f32[512,4], index: 11, kind: output, shape index: {}]  }
   0x1 LB: > { %s10863_s18 = sadd.s32 4294967295, %s12421_s17   ;;  %p10867_p0 = scmp.ge.s32.totalorder %s12421_s17, 1  ;;  %s12421_s17 = sphi %s12493_s17, %s21_s17  }
   0x2   : > { %p338_p1 = scmp.lt.s32.totalorder %s12421_s17, 3 }
   0x4   : > { %p339_p2 = pnand %p10867_p0, %p338_p1 }
   0x6   : > { %342 = sbr.rel (%p339_p2) target bundleno = 3204 (0xc84), region = 64 }
   0xd   : > { %s10868_s19 = sshll.u32 %s10863_s18, 5  ;;  %v12504_v0 = vld [vmem:[%s17506_s1] sm:$0x1f]  ;;  %v17517_v1 = vlaneseq  ;;  %v17532_v2 = vmov 2   ;;  %v17530_v5 = vmov 0   ;;  %v17536_v16 = vmov 1  }
   0xe   : > { %12141 = vset.pattern.permute.xlu0 %v17532_v2  ;;  %12139 = vset.pattern.permute.xlu1 %v17532_v2  ;;  %p379_p3 = scmp.lt.s32.totalorder %s10868_s19, 63  ;;  %vm424_vm0 = vcmp.gt.f32.partialorder %v12504_v0, 0.5 }
   0xf   : > { %v12510_v3 = vshrl.u32 %v17517_v1, 7  ;;  %v12517_v6 = vsel %vm424_vm0, 1, %v17530_v5 }
  0x10   : > { %s17892_s19 = smov (!%p379_p3, %s10868_s19), 63 }
  0x11   : > { %v7578_v4 = vsub.s32 2, %v12510_v3  ;;  %s10869_s22 = sshll.u32 %s17892_s19, 3  ;;  %v7615_v7 = vsub.s32 1, %v12510_v3  ;;  %v428_v45 = vsub.s32 4, %v12510_v3  ;;  %v753_v46 = vsub.s32 3, %v12510_v3 }
  0x12   : > { %s12525_s25 = scalar_lea.vmem %s17505_s0, %s10869_s22  ;;  %v918_v52 = vsub.s32 0, %v12510_v3  ;;  %s17310_s18 = scalar_lea.vmem %s17516_s11, %s10869_s22 }
  0x13   : > { %v12528_v8 = vrot.slane %v12517_v6, %v7578_v4  ;;  %v393_v9 = vld [vmem:[%s12525_s25 + $0x10] sm:$0xff]  ;;  %v391_v10 = vld [vmem:[%s12525_s25] sm:$0xff]  ;;  %v12533_v11 = vrot.slane %v12517_v6, %v7615_v7  ;;  %v396_v12 = vld [vmem:[%s12525_s25 + $0x28] sm:$0xff]  ;;  %v12642_v50 = vrot.slane %v12517_v6, %v428_v45  ;;  %v12645_v51 = vrot.slane %v12517_v6, %v753_v46 }
  0x14   : > { %600 = vperm.xlu0 %12141, %v393_v9   ;;  %592 = vperm.xlu1 %12139, %v391_v10   ;;  %v392_v13 = vld [vmem:[%s12525_s25 + $0x8] sm:$0xff]  ;;  %v397_v14 = vld [vmem:[%s12525_s25 + $0x30] sm:$0xff]  ;;  %v394_v15 = vld [vmem:[%s12525_s25 + $0x18] sm:$0xff]  ;;  %v12656_v55 = vrot.slane %v12504_v0, %v918_v52  ;;  %v17525_v45 = vmov 920167782  }
  0x15   : > { %17623 = vst [vmem:[#allocation2_spill] sm:$0xff] %v12528_v8  ;;  %17624 = vst [vmem:[#allocation3_spill] sm:$0xff] %v12533_v11  ;;  %v395_v17 = vld [vmem:[%s12525_s25 + $0x20] sm:$0xff]  ;;  %v398_v18 = vld [vmem:[%s12525_s25 + $0x38] sm:$0xff]  ;;  %vm17602_vm1 = vcmp.eq.s32.totalorder %v12642_v50, 1  ;;  %vm17601_vm2 = vcmp.eq.s32.totalorder %v12645_v51, 1 }
  0x16   : > { %v400_v19 = vld [vmem:[%s12525_s25 + $0x48] sm:$0xff]  ;;  %v12547_v20 = vld [vmem:[%s12525_s25 + $0x60] sm:$0xff]  ;;  %v12551_v21 = vld [vmem:[%s12525_s25 + $0x78] sm:$0xff]  ;;  %17625 = vst [vmem:[#allocation4_spill] sm:$0xff] %v12656_v55  ;;  %v17523_v52 = vmov 1326507024  }
  0x17   : > { %v12556_v22 = vld [vmem:[%s12525_s25 + $0x88] sm:$0xff]  ;;  %v12561_v23 = vld [vmem:[%s12525_s25 + $0xa0] sm:$0xff]  ;;  %v12566_v24 = vld [vmem:[%s12525_s25 + $0xb8] sm:$0xff] }
  0x18   : > { %612 = vperm.xlu0 %12141, %v396_v12   ;;  %596 = vperm.xlu1 %12139, %v392_v13   ;;  %v12570_v25 = vld [vmem:[%s12525_s25 + $0xc8] sm:$0xff]  ;;  %v399_v26 = vld [vmem:[%s12525_s25 + $0x40] sm:$0xff]  ;;  %v401_v27 = vld [vmem:[%s12525_s25 + $0x50] sm:$0xff] }
  0x19   : > { %v402_v28 = vld [vmem:[%s12525_s25 + $0x58] sm:$0xff]  ;;  %v12586_v29 = vld [vmem:[%s12525_s25 + $0x90] sm:$0xff]  ;;  %v419_v31 = vld [vmem:[%s12525_s25 + $0xe0] sm:$0xff] }
  0x1a   : > { %v12593_v30 = vld [vmem:[%s12525_s25 + $0xd0] sm:$0xff]  ;;  %v404_v32 = vld [vmem:[%s12525_s25 + $0x68] sm:$0xff]  ;;  %v407_v40 = vld [vmem:[%s12525_s25 + $0x80] sm:$0xff] }
  0x1b   : > { %v405_v33 = vld [vmem:[%s12525_s25 + $0x70] sm:$0xff]  ;;  %v12608_v34 = vld [vmem:[%s12525_s25 + $0xa8] sm:$0xff]  ;;  %v410_v49 = vld [vmem:[%s12525_s25 + $0x98] sm:$0xff] }
  0x1c   : > { %616 = vperm.xlu0 %12141, %v397_v14   ;;  %12140 = vset.pattern.permute.xlu1 %v17536_v16  ;;  %v12613_v35 = vld [vmem:[%s12525_s25 + $0xb0] sm:$0xff] }
  0x1d   : > { %448 = vperm.xlu1 %12140, %v394_v15  }
  0x20   : > { %12147 = vset.pattern.permute.xlu0 %v17530_v5 }
  0x21   : > { %761 = vperm.xlu0 %12147, %v392_v13   ;;  %12142 = vset.pattern.permute.xlu1 %v17532_v2 }
  0x22   : > { %604 = vperm.xlu1 %12142, %v394_v15  }
  0x25   : > { %773 = vperm.xlu0 %12147, %v395_v17  }
  0x26   : > { %12143 = vset.pattern.permute.xlu1 %v17530_v5 }
  0x27   : > { %757 = vperm.xlu1 %12143, %v391_v10  }
  0x29   : > { %785 = vperm.xlu0 %12147, %v398_v18  }
  0x2b   : > { %765 = vperm.xlu1 %12143, %v393_v9  }
  0x2d   : > { %793 = vperm.xlu0 %12147, %v400_v19  }
  0x2f   : > { %769 = vperm.xlu1 %12143, %v394_v15  }
  0x31   : > { %805 = vperm.xlu0 %12147, %v12547_v20  }
  0x33   : > { %12144 = vset.pattern.permute.xlu1 %v17536_v16 }
  0x34   : > { %458 = vperm.xlu1 %12144, %v396_v12  }
  0x35   : > { %817 = vperm.xlu0 %12147, %v12551_v21  }
  0x38   : > { %12145 = vset.pattern.permute.xlu1 %v17532_v2 }
  0x39   : > { %825 = vperm.xlu0 %12147, %v12556_v22   ;;  %608 = vperm.xlu1 %12145, %v395_v17  }
  0x3d   : > { %837 = vperm.xlu0 %12147, %v12561_v23   ;;  %12146 = vset.pattern.permute.xlu1 %v17536_v16 }
  0x3e   : > { %463 = vperm.xlu1 %12146, %v397_v14  }
  0x41   : > { %849 = vperm.xlu0 %12147, %v12566_v24  }
  0x42   : > { %468 = vperm.xlu1 %12146, %v398_v18  }
  0x45   : > { %857 = vperm.xlu0 %12147, %v12570_v25  }
  0x46   : > { %12148 = vset.pattern.permute.xlu1 %v17532_v2 }
  0x47   : > { %620 = vperm.xlu1 %12148, %v398_v18  }
  0x49   : > { %12175 = vset.pattern.permute.xlu0 %v17536_v16 }
  0x4a   : > { %433 = vperm.xlu0 %12175, %v391_v10  }
  0x4b   : > { %12149 = vset.pattern.permute.xlu1 %v17530_v5 }
  0x4c   : > { %777 = vperm.xlu1 %12149, %v396_v12  }
  0x4e   : > { %438 = vperm.xlu0 %12175, %v392_v13  }
  0x50   : > { %781 = vperm.xlu1 %12149, %v397_v14  }
  0x52   : > { %443 = vperm.xlu0 %12175, %v393_v9  }
  0x54   : > { %12150 = vset.pattern.permute.xlu1 %v17536_v16 }
  0x55   : > { %473 = vperm.xlu1 %12150, %v399_v26  }
  0x56   : > { %453 = vperm.xlu0 %12175, %v395_v17  }
  0x59   : > { %12151 = vset.pattern.permute.xlu1 %v17532_v2 }
  0x5a   : > { %478 = vperm.xlu0 %12175, %v400_v19   ;;  %624 = vperm.xlu1 %12151, %v399_v26  }
  0x5e   : > { %483 = vperm.xlu0 %12175, %v401_v27   ;;  %628 = vperm.xlu1 %12151, %v400_v19  }
  0x62   : > { %493 = vperm.xlu0 %12175, %v12547_v20   ;;  %12152 = vset.pattern.permute.xlu1 %v17536_v16 }
  0x63   : > { %488 = vperm.xlu1 %12152, %v402_v28  }
  0x66   : > { %518 = vperm.xlu0 %12175, %v12556_v22  }
  0x67   : > { %12153 = vset.pattern.permute.xlu1 %v17532_v2 }
  0x68   : > { %636 = vperm.xlu1 %12153, %v402_v28  }
  0x6a   : > { %523 = vperm.xlu0 %12175, %v12586_v29  }
  0x6c   : > { %12154 = vset.pattern.permute.xlu1 %v17530_v5 }
  0x6d   : > { %789 = vperm.xlu1 %12154, %v399_v26   ;;  %v17527_v26 = vmov 2475754826  }
  0x6e   : > { %533 = vperm.xlu0 %12175, %v12561_v23  }
  0x71   : > { %797 = vperm.xlu1 %12154, %v401_v27  }
  0x72   : > { %558 = vperm.xlu0 %12175, %v12570_v25  }
  0x75   : > { %801 = vperm.xlu1 %12154, %v402_v28  }
  0x76   : > { %563 = vperm.xlu0 %12175, %v12593_v30  }
  0x79   : > { %12155 = vset.pattern.permute.xlu1 %v17536_v16 }
  0x7a   : > { %573 = vperm.xlu0 %12175, %v419_v31   ;;  %498 = vperm.xlu1 %12155, %v404_v32  }
  0x7e   : > { %12176 = vset.pattern.permute.xlu0 %v17532_v2  ;;  %12156 = vset.pattern.permute.xlu1 %v17532_v2 }
  0x7f   : > { %632 = vperm.xlu0 %12176, %v401_v27   ;;  %640 = vperm.xlu1 %12156, %v12547_v20  }
  0x83   : > { %644 = vperm.xlu0 %12176, %v404_v32   ;;  %12157 = vset.pattern.permute.xlu1 %v17536_v16 }
  0x84   : > { %503 = vperm.xlu1 %12157, %v405_v33  }
  0x87   : > { %648 = vperm.xlu0 %12176, %v405_v33  }
  0x88   : > { %508 = vperm.xlu1 %12157, %v12551_v21  }
  0x8b   : > { %664 = vperm.xlu0 %12176, %v12586_v29  }
  0x8c   : > { %12158 = vset.pattern.permute.xlu1 %v17532_v2 }
  0x8d   : > { %652 = vperm.xlu1 %12158, %v12551_v21   ;;  %v17534_v21 = vmov 683565275  }
  0x8f   : > { %676 = vperm.xlu0 %12176, %v12608_v34  }
  0x91   : > { %12159 = vset.pattern.permute.xlu1 %v17530_v5 }
  0x92   : > { %809 = vperm.xlu1 %12159, %v404_v32  }
  0x93   : > { %v12616_v36 = vpop.permute.xlu1 %592  ;;  %v12618_v37 = vpop.permute.xlu0 %600  ;;  %680 = vperm.xlu0 %12176, %v12613_v35  }
  0x96   : > { %813 = vperm.xlu1 %12159, %v405_v33   ;;  %v17519_v33 = vmov 2102212464  }
  0x97   : > { %v12621_v38 = vpop.permute.xlu1 %596  ;;  %v12623_v39 = vpop.permute.xlu0 %612  ;;  %696 = vperm.xlu0 %12176, %v12593_v30  }
  0x9a   : > { %12160 = vset.pattern.permute.xlu1 %v17536_v16 }
  0x9b   : > { %513 = vperm.xlu1 %12160, %v407_v40   ;;  %v12628_v41 = vpop.permute.xlu0 %616 }
  0x9c   : > { %v449_v42 = vpop.permute.xlu1 %448 }
  0x9f   : > { %12161 = vset.pattern.permute.xlu1 %v17532_v2 }
  0xa0   : > { %656 = vperm.xlu1 %12161, %v407_v40   ;;  %v12631_v43 = vpop.permute.xlu0 %761 }
  0xa1   : > { %v605_v44 = vpop.permute.xlu1 %604 }
  0xa2   : > { %v722_v57 = vsel %vm17602_vm1, %v449_v42, %v605_v44 }
  0xa4   : > { %660 = vperm.xlu1 %12161, %v12556_v22   ;;  %v12636_v47 = vpop.permute.xlu0 %773 }
  0xa6   : > { %v12638_v48 = vpop.permute.xlu1 %757 }
  0xa8   : > { %12162 = vset.pattern.permute.xlu1 %v17536_v16  ;;  %v12649_v53 = vpop.permute.xlu0 %785 }
  0xa9   : > { %528 = vperm.xlu1 %12162, %v410_v49  }
  0xaa   : > { %v12651_v54 = vpop.permute.xlu1 %765 }
  0xac   : > { %v12658_v56 = vpop.permute.xlu0 %793 }
  0xad   : > { %17626 = vst [vmem:[#allocation5_spill] sm:$0xff] %v12658_v56  ;;  %12163 = vset.pattern.permute.xlu1 %v17532_v2 }
  0xae   : > { %668 = vperm.xlu1 %12163, %v410_v49   ;;  %v770_v58 = vpop.permute.xlu1 %769 }
  0xaf   : > { %v12665_v59 = vsel %vm17601_vm2, %v770_v58, %v722_v57 }
  0xb0   : > { %v12669_v60 = vmul.f32 %v12656_v55, %v12665_v59  ;;  %v12671_v61 = vpop.permute.xlu0 %805 }
  0xb1   : > { %17627 = vst [vmem:[#allocation6_spill] sm:$0xff] %v12671_v61 }
  0xb2   : > { %v1267_v62 = vand.u32 2139095040, %v12669_v60  ;;  %12164 = vset.pattern.permute.xlu1 %v17530_v5  ;;  %v17518_v6 = vand.u32 2147483647, %v12669_v60 }
  0xb3   : > { %821 = vperm.xlu1 %12164, %v407_v40   ;;  %v12675_v63 = vpop.permute.xlu1 %458 }
  0xb4   : > { %v1268_v0 = vshrl.u32 %v1267_v62, 23  ;;  %v12677_v3 = vpop.permute.xlu0 %817  ;;  %v1271_v12 = vand.u32 8388607, %v17518_v6 }
  0xb5   : > { %17628 = vst [vmem:[#allocation7_spill] sm:$0xff] %v12677_v3 }
  0xb6   : > { %v10884_v4 = vadd.s32 4294967169, %v1268_v0  ;;  %v1272_v19 = vor.u32 8388608, %v1271_v12 }
  0xb7   : > { %829 = vperm.xlu1 %12164, %v12586_v29   ;;  %v17521_v29 = vmov 2131351028  }
  0xb8   : > { %v1274_v7 = vadd.s32 1, %v10884_v4  ;;  %v12681_v9 = vpop.permute.xlu1 %608  ;;  %v12683_v10 = vpop.permute.xlu0 %825 }
  0xb9   : > { %17629 = vst [vmem:[#allocation8_spill] sm:$0xff] %v12683_v10 }
  0xba   : > { %vm1275_vm3 = vcmp.gt.s32.totalorder %v1274_v7, 0 }
  0xbb   : > { %v1276_v13 = vsel %vm1275_vm3, %v1274_v7, 0  ;;  %833 = vperm.xlu1 %12164, %v410_v49  }
  0xbc   : > { %v1278_v14 = vand.u32 31, %v1276_v13  ;;  %v12687_v15 = vpop.permute.xlu0 %837  ;;  %v1277_v20 = vshrl.u32 %v1276_v13, 5 }
  0xbd   : > { %17630 = vst [vmem:[#allocation9_spill] sm:$0xff] %v12687_v15  ;;  %v12689_v17 = vpop.permute.xlu1 %463 }
  0xbe   : > { %v1279_v18 = vsub.s32 32, %v1278_v14  ;;  %v1281_v22 = vshll.u32 %v17534_v21, %v1278_v14  ;;  %v1284_v27 = vshll.u32 %v17527_v26, %v1278_v14  ;;  %v1287_v32 = vshll.u32 %v17521_v29, %v1278_v14 }
  0xbf   : > { %12165 = vset.pattern.permute.xlu1 %v17536_v16  ;;  %v1290_v44 = vshll.u32 %v17519_v33, %v1278_v14  ;;  %v1293_v49 = vshll.u32 %v17525_v45, %v1278_v14  ;;  %vm1296_vm4 = vcmp.lt.s32.totalorder %v1277_v20, 1  ;;  %vm1299_vm5 = vcmp.lt.s32.totalorder %v1277_v20, 4 }
  0xc0   : > { %v1282_v28 = vshrl.u32 %v17527_v26, %v1279_v18  ;;  %v1285_v31 = vshrl.u32 %v17521_v29, %v1279_v18  ;;  %v1288_v40 = vshrl.u32 %v17519_v33, %v1279_v18  ;;  %538 = vperm.xlu1 %12165, %v12608_v34   ;;  %v12699_v42 = vpop.permute.xlu0 %849  ;;  %v1291_v46 = vshrl.u32 %v17525_v45, %v1279_v18 }
  0xc1   : > { %17631 = vst [vmem:[#allocation10_spill] sm:$0xff] %v12699_v42  ;;  %v1294_v57 = vshrl.u32 %v17523_v52, %v1279_v18  ;;  %v469_v58 = vpop.permute.xlu1 %468  ;;  %v1280_v13 = vshrl.u32 %v17534_v21, %v1279_v18  ;;  %vm1298_vm6 = vcmp.lt.s32.totalorder %v1277_v20, 3  ;;  %v1312_v45 = vshll.u32 %v1272_v19, 8 }
  0xc2   : > { %v1283_v62 = vor.u32 %v1282_v28, %v1281_v22  ;;  %v1286_v0 = vor.u32 %v1285_v31, %v1284_v27  ;;  %v1289_v4 = vor.u32 %v1288_v40, %v1287_v32  ;;  %v1292_v7 = vor.u32 %v1291_v46, %v1290_v44 }
  0xc3   : > { %v1295_v12 = vor.u32 %v1294_v57, %v1293_v49  ;;  %vm1297_vm7 = vcmp.lt.s32.totalorder %v1277_v20, 2  ;;  %v17644_v42 = vmov 683565275  }
  0xc4   : > { %v1301_v1 = vsel %vm1299_vm5, %v1289_v4, 2102212464  ;;  %v1304_v6 = vsel %vm1296_vm4, %v1283_v62, %v1286_v0  ;;  %v1308_v33 = vsel %vm1296_vm4, %v1286_v0, %v1289_v4  ;;  %12166 = vset.pattern.permute.xlu1 %v17532_v2  ;;  %v12707_v29 = vpop.permute.xlu0 %857  ;;  %v1305_v14 = vsel %vm1299_vm5, %v1292_v7, 920167782 }
  0xc5   : > { %17632 = vst [vmem:[#allocation11_spill] sm:$0xff] %v12707_v29  ;;  %v1309_v52 = vsel %vm1299_vm5, %v1295_v12, 1326507024  ;;  %672 = vperm.xlu1 %12166, %v12561_v23   ;;  %v1300_v22 = vsel %vm1296_vm4, %v1280_v13, %v1283_v62  ;;  %v1306_v27 = vsel %vm1298_vm6, %v1289_v4, %v1305_v14  ;;  %v1302_v32 = vsel %vm1298_vm6, %v1286_v0, %v1301_v1 }
  0xc6   : > { %v1310_v28 = vsel %vm1298_vm6, %v1292_v7, %v1309_v52  ;;  %v621_v31 = vpop.permute.xlu1 %620  ;;  %v1307_v18 = vsel %vm1297_vm7, %v1304_v6, %v1306_v27  ;;  %v1303_v1 = vsel %vm1297_vm7, %v1300_v22, %v1302_v32 }
  0xc7   : > { %v1311_v40 = vsel %vm1297_vm7, %v1308_v33, %v1310_v28  ;;  %v726_v44 = vsel %vm17602_vm1, %v469_v58, %v621_v31  ;;  %v12715_v57 = vmul.u32.u64.low %v1312_v45, %v1307_v18  ;;  %v12716_v26 = vmul.u32.u64.high %v1312_v45, %v1307_v18, %v12715_v57 }
  0xc8   : > { %v12712_v46 = vmul.u32.u64.low %v1312_v45, %v1311_v40  ;;  %v12713_v49 = vmul.u32.u64.high %v1312_v45, %v1311_v40, %v12712_v46  ;;  %v12722_v23 = vsel %vm17601_vm2, %v12649_v53, %v726_v44  ;;  %v1319_v52 = vmul.u32 %v1312_v45, %v1303_v1 }
  0xc9   : > { %17633 = vst [vmem:[#allocation12_spill] sm:$0xff] %v12722_v23  ;;  %v434_v19 = vpop.permute.xlu0 %433  ;;  %12167 = vset.pattern.permute.xlu1 %v17536_v16  ;;  %v12727_v6 = vmul.f32 %v12656_v55, %v12722_v23  ;;  %v1322_v53 = vadd.s32 1, %v12716_v26 }
  0xca   : > { %v719_v20 = vsel %vm17602_vm1, %v434_v19, %v12616_v36  ;;  %543 = vperm.xlu1 %12167, %v12613_v35   ;;  %vm1321_vm8 = vc.u32 %v12713_v49, %v12715_v57  ;;  %v1320_v3 = vadd.s32 %v12715_v57, %v12713_v49 }
  0xcb   : > { %17634 = vst [vmem:[#allocation13_spill] sm:$0xff] %v12727_v6  ;;  %v12739_v33 = vsel %vm17601_vm2, %v12638_v48, %v719_v20  ;;  %v1683_v58 = vand.u32 2139095040, %v12727_v6  ;;  %v1323_v62 = vsel %vm1321_vm8, %v1322_v53, %v12716_v26  ;;  %v778_v13 = vpop.permute.xlu1 %777  ;;  %v17529_v14 = vand.u32 2147483647, %v12727_v6 }
  0xcc   : > { %17635 = vst [vmem:[#allocation14_spill] sm:$0xff] %v12739_v33  ;;  %v1324_v36 = vadd.s32 %v1323_v62, %v1319_v52  ;;  %v12746_v4 = vmul.f32 %v12656_v55, %v12739_v33  ;;  %v724_v26 = vsel %vm17602_vm1, %v12675_v63, %v12623_v39  ;;  %v17638_v52 = vmov 2475754826  }
  0xcd   : > { %v1684_v0 = vshrl.u32 %v1683_v58, 23  ;;  %v12760_v27 = vsel %vm17601_vm2, %v778_v13, %v724_v26  ;;  %v1687_v31 = vand.u32 8388607, %v17529_v14  ;;  %v17640_v13 = vmov 2102212464  }
  0xce   : > { %548 = vperm.xlu1 %12167, %v12566_v24   ;;  %17636 = vst [vmem:[#allocation15_spill] sm:$0xff] %v12746_v4  ;;  %v1325_v7 = vadd.s32 536870912, %v1324_v36  ;;  %v955_v22 = vand.u32 2139095040, %v12746_v4  ;;  %17637 = vst [vmem:[#allocation16_spill] sm:$0xff] %v12760_v27  ;;  %v12769_v63 = vmul.f32 %v12656_v55, %v12760_v27 }
  0xcf   : > { %v10900_v12 = vadd.s32 4294967169, %v1684_v0  ;;  %v1688_v19 = vor.u32 8388608, %v1687_v31  ;;  %v17641_v31 = vmov 920167782  }
  0xd0   : > { %v12750_v48 = vshrl.u32 %v1325_v7, 30  ;;  %v956_v39 = vshrl.u32 %v955_v22, 23  ;;  %v1475_v20 = vand.u32 2139095040, %v12769_v63 }
  0xd1   : > { %v1690_v45 = vadd.s32 1, %v10900_v12  ;;  %v1728_v29 = vshll.u32 %v1688_v19, 8 }
  0xd2   : > { %12168 = vset.pattern.permute.xlu1 %v17532_v2  ;;  %v1327_v28 = vshll.u32 %v12750_v48, 30  ;;  %v10872_v1 = vadd.s32 4294967169, %v956_v39 }
  0xd3   : > { %684 = vperm.xlu1 %12168, %v12566_v24   ;;  %vm1691_vm9 = vcmp.gt.s32.totalorder %v1690_v45, 0 }
  0xd4   : > { %v1692_v32 = vsel %vm1691_vm9, %v1690_v45, 0  ;;  %v12765_v18 = vsub.s32 %v1324_v36, %v1327_v28  ;;  %v17639_v36 = vmov 2131351028  }
  0xd5   : > { %v1694_v40 = vand.u32 31, %v1692_v32  ;;  %v1693_v7 = vshrl.u32 %v1692_v32, 5 }
  0xd6   : > { %v1330_v24 = vsub.s32 0, %v12765_v18 }
  0xd7   : > { %12169 = vset.pattern.permute.xlu1 %v17530_v5  ;;  %v1695_v44 = vsub.s32 32, %v1694_v40  ;;  %v1697_v53 = vshll.u32 %v17534_v21, %v1694_v40  ;;  %v1700_v62 = vshll.u32 %v17638_v52, %v1694_v40  ;;  %v1703_v12 = vshll.u32 %v17639_v36, %v1694_v40 }
  0xd8   : > { %841 = vperm.xlu1 %12169, %v12608_v34   ;;  %v10885_v46 = vmin.u32 %v1330_v24, %v12765_v18  ;;  %v1706_v26 = vshll.u32 %v17640_v13, %v1694_v40  ;;  %v1709_v14 = vshll.u32 %v17641_v31, %v1694_v40  ;;  %v17642_v5 = vmov 1326507024  }
  0xd9   : > { %v1698_v58 = vshrl.u32 %v17638_v52, %v1695_v44  ;;  %v1701_v0 = vshrl.u32 %v17639_v36, %v1695_v44  ;;  %v1704_v28 = vshrl.u32 %v17640_v13, %v1695_v44  ;;  %v1707_v39 = vshrl.u32 %v17641_v31, %v1695_v44 }
  0xda   : > { %v1332_v34 = vclz %v10885_v46  ;;  %v1710_v2 = vshrl.u32 %v17642_v5, %v1695_v44  ;;  %v962_v21 = vadd.s32 1, %v10872_v1  ;;  %v17643_v46 = vmov 1  }
  0xdb   : > { %v1699_v45 = vor.u32 %v1698_v58, %v1697_v53  ;;  %v1702_v22 = vor.u32 %v1701_v0, %v1700_v62  ;;  %v1705_v16 = vor.u32 %v1704_v28, %v1703_v12  ;;  %vm1712_vm10 = vcmp.lt.s32.totalorder %v1693_v7, 1 }
  0xdc   : > { %845 = vperm.xlu1 %12169, %v12613_v35   ;;  %v10886_v24 = vadd.s32 4294967294, %v1332_v34  ;;  %v1708_v35 = vor.u32 %v1707_v39, %v1706_v26  ;;  %v1711_v32 = vor.u32 %v1710_v2, %v1709_v14  ;;  %vm1715_vm11 = vcmp.lt.s32.totalorder %v1693_v7, 4 }
  0xdd   : > { %v1717_v53 = vsel %vm1715_vm11, %v1705_v16, 2102212464  ;;  %v1720_v58 = vsel %vm1712_vm10, %v1699_v45, %v1702_v22  ;;  %v1476_v0 = vshrl.u32 %v1475_v20, 23  ;;  %v1696_v34 = vshrl.u32 %v17644_v42, %v1695_v44 }
  0xde   : > { %v1721_v62 = vsel %vm1715_vm11, %v1708_v35, 920167782  ;;  %vm10887_vm12 = vcmp.lt.s32.totalorder %v10886_v24, 0  ;;  %vm1714_vm13 = vcmp.lt.s32.totalorder %v1693_v7, 3  ;;  %vm963_vm14 = vcmp.gt.s32.totalorder %v962_v21, 0 }
  0xdf   : > { %vm1713_vm15 = vcmp.lt.s32.totalorder %v1693_v7, 2  ;;  %v1722_v40 = vsel %vm1714_vm13, %v1705_v16, %v1721_v62  ;;  %v1724_v1 = vsel %vm1712_vm10, %v1702_v22, %v1705_v16  ;;  %v1725_v12 = vsel %vm1715_vm11, %v1711_v32, 1326507024 }
  0xe0   : > { %12170 = vset.pattern.permute.xlu1 %v17643_v46  ;;  %v1716_v26 = vsel %vm1712_vm10, %v1696_v34, %v1699_v45  ;;  %v1718_v28 = vsel %vm1714_vm13, %v1702_v22, %v1717_v53  ;;  %v1723_v39 = vsel %vm1713_vm15, %v1720_v58, %v1722_v40  ;;  %v1726_v2 = vsel %vm1714_vm13, %v1708_v35, %v1725_v12 }
  0xe1   : > { %v12789_v14 = vsel %vm10887_vm12, 0, %v10886_v24  ;;  %v1727_v19 = vsel %vm1713_vm15, %v1724_v1, %v1726_v2  ;;  %v12791_v15 = vmul.u32.u64.low %v1728_v29, %v1723_v39  ;;  %v12792_v33 = vmul.u32.u64.high %v1728_v29, %v1723_v39, %v12791_v15 }
  0xe2   : > { %v12795_v20 = vmul.u32.u64.low %v1728_v29, %v1727_v19  ;;  %v12796_v10 = vmul.u32.u64.high %v1728_v29, %v1727_v19, %v12795_v20  ;;  %v1719_v44 = vsel %vm1713_vm15, %v1716_v26, %v1718_v28  ;;  %v17539_v7 = vand.u32 2147483647, %v12746_v4 }
  0xe3   : > { %v964_v16 = vsel %vm963_vm14, %v962_v21, 0  ;;  %v1340_v45 = vsub.s32 4294967266, %v12789_v14  ;;  %v10892_v32 = vadd.s32 4294967169, %v1476_v0  ;;  %v1738_v24 = vadd.s32 1, %v12792_v33 }
  0xe4   : > { %v966_v22 = vand.u32 31, %v964_v16  ;;  %v1735_v35 = vmul.u32 %v1728_v29, %v1719_v44  ;;  %vm1737_vm0 = vc.u32 %v12796_v10, %v12791_v15  ;;  %v959_v62 = vand.u32 8388607, %v17539_v7 }
  0xe5   : > { %v1739_v58 = vsel %vm1737_vm0, %v1738_v24, %v12792_v33  ;;  %v1341_v34 = vadd.s32 127, %v1340_v45  ;;  %v1482_v1 = vadd.s32 1, %v10892_v32  ;;  %v12812_v39 = vshrl.u32 %v964_v16, 5 }
  0xe6   : > { %v967_v53 = vsub.s32 32, %v966_v22  ;;  %v1740_v40 = vadd.s32 %v1739_v58, %v1735_v35  ;;  %v978_v29 = vshll.u32 %v17640_v13, %v966_v22  ;;  %v969_v33 = vshll.u32 %v17644_v42, %v966_v22 }
  0xe7   : > { %v972_v2 = vshll.u32 %v17638_v52, %v966_v22  ;;  %v975_v19 = vshll.u32 %v17639_v36, %v966_v22  ;;  %v981_v44 = vshll.u32 %v17641_v31, %v966_v22  ;;  %v1336_v32 = vsub.s32 32, %v12789_v14 }
  0xe8   : > { %v970_v21 = vshrl.u32 %v17638_v52, %v967_v53  ;;  %v973_v12 = vshrl.u32 %v17639_v36, %v967_v53  ;;  %v976_v0 = vshrl.u32 %v17640_v13, %v967_v53  ;;  %v979_v26 = vshrl.u32 %v17641_v31, %v967_v53 }
  0xe9   : > { %v1741_v28 = vadd.s32 536870912, %v1740_v40  ;;  %v982_v45 = vshrl.u32 %v17642_v5, %v967_v53  ;;  %vm1483_vm3 = vcmp.gt.s32.totalorder %v1482_v1, 0  ;;  %vm987_vm4 = vcmp.lt.s32.totalorder %v12812_v39, 4 }
  0xea   : > { %v980_v20 = vor.u32 %v979_v26, %v978_v29  ;;  %v971_v35 = vor.u32 %v970_v21, %v969_v33  ;;  %v974_v58 = vor.u32 %v973_v12, %v972_v2  ;;  %v977_v16 = vor.u32 %v976_v0, %v975_v19 }
  0xeb   : > { %v12820_v24 = vshrl.u32 %v1741_v28, 30  ;;  %v983_v7 = vor.u32 %v982_v45, %v981_v44  ;;  %v1342_v29 = vshll.u32 %v1341_v34, 23  ;;  %v960_v22 = vor.u32 8388608, %v959_v62  ;;  %v439_v34 = vpop.permute.xlu0 %438 }
  0xec   : > { %v993_v26 = vsel %vm987_vm4, %v980_v20, 920167782  ;;  %v1338_v27 = vshrl.u32 %v1320_v3, %v1336_v32  ;;  %vm984_vm5 = vcmp.lt.s32.totalorder %v12812_v39, 1  ;;  %vm986_vm6 = vcmp.lt.s32.totalorder %v12812_v39, 3 }
  0xed   : > { %v1743_v61 = vshll.u32 %v12820_v24, 30  ;;  %v1484_v21 = vsel %vm1483_vm3, %v1482_v1, 0  ;;  %v992_v49 = vsel %vm984_vm5, %v971_v35, %v974_v58  ;;  %v994_v57 = vsel %vm986_vm6, %v977_v16, %v993_v26 }
  0xee   : > { %v997_v62 = vsel %vm987_vm4, %v983_v7, 1326507024  ;;  %v996_v3 = vsel %vm984_vm5, %v974_v58, %v977_v16  ;;  %v17541_v1 = vand.u32 2147483647, %v12769_v63  ;;  %vm985_vm7 = vcmp.lt.s32.totalorder %v12812_v39, 2 }
  0xef   : > { %v12830_v12 = vsub.s32 %v1740_v40, %v1743_v61  ;;  %v998_v0 = vsel %vm986_vm6, %v980_v20, %v997_v62  ;;  %v1337_v61 = vshll.u32 %v12765_v18, %v12789_v14  ;;  %v1343_v40 = vor.u32 4788187, %v1342_v29 }
  0xf0   : > { %v1486_v28 = vand.u32 31, %v1484_v21  ;;  %v995_v33 = vsel %vm985_vm7, %v992_v49, %v994_v57  ;;  %v720_v7 = vsel %vm17602_vm1, %v439_v34, %v12621_v38  ;;  %v999_v20 = vsel %vm985_vm7, %v996_v3, %v998_v0 }
  0xf1   : > { %v1339_v2 = vor.u32 %v1338_v27, %v1337_v61  ;;  %v1746_v19 = vsub.s32 0, %v12830_v12  ;;  %v12854_v44 = vshll.u32 %v960_v22, 8  ;;  %v989_v18 = vsel %vm987_vm4, %v977_v16, 2102212464 }
  0xf2   : > { %v1479_v14 = vand.u32 8388607, %v17541_v1  ;;  %v1487_v45 = vsub.s32 32, %v1486_v28  ;;  %v1344_v32 = vand.u32 2147483647, %v1343_v40  ;;  %v968_v29 = vshrl.u32 %v17644_v42, %v967_v53 }
  0xf3   : > { %v12862_v38 = vmul.u32.u64.low %v12854_v44, %v995_v33  ;;  %v12863_v27 = vmul.u32.u64.high %v12854_v44, %v995_v33, %v12862_v38  ;;  %v12867_v26 = vmul.u32.u64.low %v12854_v44, %v999_v20  ;;  %v12868_v49 = vmul.u32.u64.high %v12854_v44, %v999_v20, %v12867_v26 }
  0xf4   : > { %v12873_v16 = vsel %vm17601_vm2, %v12631_v43, %v720_v7  ;;  %v1346_v22 = vcvt.s32.f32 %v1339_v2  ;;  %v10901_v57 = vmin.u32 %v1746_v19, %v12830_v12  ;;  %v988_v53 = vsel %vm984_vm5, %v968_v29, %v971_v35 }
  0xf5   : > { %17645 = vst [vmem:[#allocation17_spill] sm:$0xff] %v12873_v16  ;;  %v990_v62 = vsel %vm986_vm6, %v974_v58, %v989_v18  ;;  %v1490_v34 = vshrl.u32 %v17638_v52, %v1487_v45  ;;  %v1493_v3 = vshrl.u32 %v17639_v36, %v1487_v45  ;;  %v1496_v0 = vshrl.u32 %v17640_v13, %v1487_v45 }
  0xf6   : > { %v1347_v61 = vmul.f32 %v1346_v22, %v1344_v32  ;;  %v1480_v40 = vor.u32 8388608, %v1479_v14  ;;  %v1499_v43 = vshrl.u32 %v17641_v31, %v1487_v45  ;;  %v12886_v33 = vmul.f32 %v12656_v55, %v12873_v16  ;;  %v12896_v32 = vld [vmem:[%s12525_s25 + $0xc0] sm:$0xff] }
  0xf7   : > { %v991_v35 = vsel %vm985_vm7, %v988_v53, %v990_v62  ;;  %v1489_v58 = vshll.u32 %v17644_v42, %v1486_v28  ;;  %v1492_v7 = vshll.u32 %v17638_v52, %v1486_v28  ;;  %v1495_v2 = vshll.u32 %v17639_v36, %v1486_v28  ;;  %553 = vperm.xlu1 %12170, %v12896_v32  }
  0xf8   : > { %17646 = vst [vmem:[#allocation18_spill] sm:$0xff] %v12886_v33  ;;  %v1748_v19 = vclz %v10901_v57  ;;  %v1485_v20 = vshrl.u32 %v1484_v21, 5  ;;  %v1498_v18 = vshll.u32 %v17640_v13, %v1486_v28  ;;  %v1501_v14 = vshll.u32 %v17641_v31, %v1486_v28 }
  0xf9   : > { %v1491_v29 = vor.u32 %v1490_v34, %v1489_v58  ;;  %v1494_v26 = vor.u32 %v1493_v3, %v1492_v7  ;;  %v1497_v22 = vor.u32 %v1496_v0, %v1495_v2  ;;  %v1502_v39 = vshrl.u32 %v17642_v5, %v1487_v45 }
  0xfa   : > { %v1010_v53 = vadd.s32 1, %v12863_v27  ;;  %v1500_v62 = vor.u32 %v1499_v43, %v1498_v18  ;;  %vm1009_vm8 = vc.u32 %v12868_v49, %v12862_v38  ;;  %v1520_v57 = vshll.u32 %v1480_v40, 8 }
  0xfb   : > { %v1503_v21 = vor.u32 %v1502_v39, %v1501_v14  ;;  %v1348_v1 = vxor.u32 2147483648, %v1347_v61  ;;  %v1007_v28 = vmul.u32 %v12854_v44, %v991_v35  ;;  %vm1504_vm9 = vcmp.lt.s32.totalorder %v1485_v20, 1 }
  0xfc   : > { %vm1507_vm10 = vcmp.lt.s32.totalorder %v1485_v20, 4  ;;  %v10902_v34 = vadd.s32 4294967294, %v1748_v19  ;;  %v1512_v0 = vsel %vm1504_vm9, %v1491_v29, %v1494_v26  ;;  %v1059_v58 = vand.u32 2139095040, %v12886_v33 }
  0xfd   : > { %v1509_v3 = vsel %vm1507_vm10, %v1497_v22, 2102212464  ;;  %v17647_v7 = vmov 2   ;;  %v1011_v43 = vsel %vm1009_vm8, %v1010_v53, %v12863_v27  ;;  %v1488_v2 = vshrl.u32 %v17644_v42, %v1487_v45 }
  0xfe   : > { %12171 = vset.pattern.permute.xlu1 %v17647_v7  ;;  %vm1506_vm11 = vcmp.lt.s32.totalorder %v1485_v20, 3  ;;  %v1513_v18 = vsel %vm1507_vm10, %v1500_v62, 920167782  ;;  %vm1505_vm12 = vcmp.lt.s32.totalorder %v1485_v20, 2  ;;  %v1516_v40 = vsel %vm1504_vm9, %v1494_v26, %v1497_v22 }
  0xff   : > { %688 = vperm.xlu1 %12171, %v12896_v32   ;;  %v1514_v44 = vsel %vm1506_vm11, %v1497_v22, %v1513_v18  ;;  %v1517_v35 = vsel %vm1507_vm10, %v1503_v21, 1326507024  ;;  %v1508_v19 = vsel %vm1504_vm9, %v1488_v2, %v1491_v29  ;;  %v1510_v14 = vsel %vm1506_vm11, %v1494_v26, %v1509_v3 }
 0x100   : > { %v1515_v39 = vsel %vm1505_vm12, %v1512_v0, %v1514_v44  ;;  %v1518_v16 = vsel %vm1506_vm11, %v1500_v62, %v1517_v35  ;;  %vm10903_vm13 = vcmp.lt.s32.totalorder %v10902_v34, 0  ;;  %vm1266_vm14 = vcmp.lt.s32.totalorder %v12669_v60, 0  ;;  %v418_v35 = vld [vmem:[%s12525_s25 + $0xd8] sm:$0xff] }
 0x101   : > { %v1519_v23 = vsel %vm1505_vm12, %v1516_v40, %v1518_v16  ;;  %v12912_v56 = vmul.u32.u64.low %v1520_v57, %v1515_v39  ;;  %v12913_v27 = vmul.u32.u64.high %v1520_v57, %v1515_v39, %v12912_v56  ;;  %v1012_v22 = vadd.s32 %v1011_v43, %v1007_v28 }
 0x102   : > { %v12916_v45 = vmul.u32.u64.low %v1520_v57, %v1519_v23  ;;  %v12917_v53 = vmul.u32.u64.high %v1520_v57, %v1519_v23, %v12916_v45  ;;  %v1511_v21 = vsel %vm1505_vm12, %v1508_v19, %v1510_v14  ;;  %v1349_v20 = vsel %vm1266_vm14, %v1348_v1, %v1347_v61 }
 0x103   : > { %692 = vperm.xlu1 %12171, %v12570_v25   ;;  %v1751_v29 = vsel %vm10903_vm13, 0, %v10902_v34  ;;  %v1060_v26 = vshrl.u32 %v1059_v58, 23  ;;  %v1530_v16 = vadd.s32 1, %v12913_v27  ;;  %v17648_v62 = vand.u32 2147483647, %v12669_v60 }
 0x104   : > { %v1527_v23 = vmul.u32 %v1520_v57, %v1511_v21  ;;  %vm1529_vm0 = vc.u32 %v12917_v53, %v12912_v56  ;;  %v1756_v1 = vsub.s32 4294967266, %v1751_v29  ;;  %v1013_v61 = vadd.s32 536870912, %v1012_v22 }
 0x105   : > { %vm12926_vm15 = vcmp.le.f32.partialorder %v17648_v62, 0.7853982  ;;  %v1531_v28 = vsel %vm1529_vm0, %v1530_v16, %v12913_v27  ;;  %v1350_v34 = vsub.s32 4, %v12750_v48  ;;  %v10876_v58 = vadd.s32 4294967169, %v1060_v26 }
 0x106   : > { %v1352_v25 = vsel %vm12926_vm15, %v12669_v60, %v1349_v20  ;;  %v1532_v0 = vadd.s32 %v1531_v28, %v1527_v23  ;;  %v1757_v43 = vadd.s32 127, %v1756_v1  ;;  %v12938_v2 = vshrl.u32 %v1013_v61, 30 }
 0x107   : > { %12172 = vset.pattern.permute.xlu1 %v17643_v46  ;;  %12220 = vcosq.f32 %v1352_v25  ;;  %v1351_v18 = vsel %vm1266_vm14, %v1350_v34, %v12750_v48  ;;  %v1066_v40 = vadd.s32 1, %v10876_v58  ;;  %v1752_v19 = vsub.s32 32, %v1751_v29 }
 0x108   : > { %v1533_v57 = vadd.s32 536870912, %v1532_v0  ;;  %12222 = vsinq.f32 %v1352_v25  ;;  %17651 = vst [vmem:[#allocation19_spill] sm:$0xff] %v12938_v2  ;;  %568 = vperm.xlu1 %12172, %v418_v35   ;;  %v1353_v14 = vsel %vm12926_vm15, 0, %v1351_v18  ;;  %v1736_v39 = vadd.s32 %v12791_v15, %v12796_v10 }
 0x109   : > { %v1758_v27 = vshll.u32 %v1757_v43, 23  ;;  %v1015_v45 = vshll.u32 %v12938_v2, 30  ;;  %vm1067_vm3 = vcmp.gt.s32.totalorder %v1066_v40, 0  ;;  %v1357_v48 = vadd.s32 3, %v1353_v14 }
 0x10a   : > { %v12943_v44 = vshrl.u32 %v1533_v57, 30  ;;  %v1754_v20 = vshrl.u32 %v1736_v39, %v1752_v19  ;;  %v1753_v26 = vshll.u32 %v12830_v12, %v1751_v29  ;;  %v1068_v3 = vsel %vm1067_vm3, %v1066_v40, 0  ;;  %v782_v19 = vpop.permute.xlu1 %781 }
 0x10b   : > { %v1759_v16 = vor.u32 4788187, %v1758_v27  ;;  %v12954_v62 = vsub.s32 %v1012_v22, %v1015_v45  ;;  %v4682_v1 = vand.u32 3, %v1353_v14  ;;  %v1070_v61 = vand.u32 31, %v1068_v3 }
 0x10c   : > { %v1535_v21 = vshll.u32 %v12943_v44, 30  ;;  %12173 = vset.pattern.permute.xlu1 %v17647_v7  ;;  %v1755_v15 = vor.u32 %v1754_v20, %v1753_v26  ;;  %v17652_v28 = vmov 0   ;;  %v1358_v34 = vand.u32 3, %v1357_v48 }
 0x10d   : > { %700 = vperm.xlu1 %12173, %v418_v35   ;;  %v1760_v58 = vand.u32 2147483647, %v1759_v16  ;;  %v1018_v57 = vsub.s32 0, %v12954_v62  ;;  %vm4683_vm4 = vcmp.lt.s32.totalorder %v4682_v1, 2  ;;  %vm1682_vm5 = vcmp.lt.s32.totalorder %v12727_v6, 0 }
 0x10e   : > { %v12956_v25 = vsub.s32 %v1532_v0, %v1535_v21  ;;  %v725_v0 = vsel %vm17602_vm1, %v12689_v17, %v12628_v41  ;;  %v1762_v43 = vcvt.s32.f32 %v1755_v15  ;;  %v1766_v18 = vsub.s32 4, %v12820_v24 }
 0x10f   : > { %v12968_v40 = vsub.s32 32, %v1070_v61  ;;  %vm1360_vm6 = vcmp.eq.s32.totalorder %v1358_v34, 0  ;;  %vm1363_vm7 = vcmp.eq.s32.totalorder %v1358_v34, 2  ;;  %v10873_v14 = vmin.u32 %v1018_v57, %v12954_v62 }
 0x110   : > { %v1538_v22 = vsub.s32 0, %v12956_v25  ;;  %vm4684_vm8 = vcmp.eq.s32.totalorder %v4682_v1, 0  ;;  %vm1356_vm9 = vweird.f32 %v12669_v60  ;;  %vm1359_vm10 = vcmp.lt.s32.totalorder %v1358_v34, 2 }
 0x111   : > { %v12221_v23 = vpop.eup %12220  ;;  %12174 = vset.pattern.permute.xlu1 %v17652_v28  ;;  %vm4687_vm11 = vcmp.eq.s32.totalorder %v4682_v1, 2  ;;  %v17653_v17 = vand.u32 2147483647, %v12727_v6  ;;  %v17544_v21 = vand.u32 2147483647, %v12886_v33  ;;  %v1767_v26 = vsel %vm1682_vm5, %v1766_v18, %v12820_v24 }
 0x112   : > { %v12223_v10 = vpop.eup %12222  ;;  %853 = vperm.xlu1 %12174, %v12896_v32   ;;  %v1364_v29 = vxor.u32 2147483648, %v12221_v23  ;;  %v1763_v32 = vmul.f32 %v1762_v43, %v1760_v58  ;;  %v10893_v41 = vmin.u32 %v1538_v22, %v12956_v25  ;;  %v1083_v16 = vshrl.u32 %v17641_v31, %v12968_v40 }
 0x113   : > { %v1361_v12 = vxor.u32 2147483648, %v12223_v10  ;;  %vm12976_vm12 = vcmp.le.f32.partialorder %v17653_v17, 0.7853982  ;;  %v1020_v58 = vclz %v10873_v14  ;;  %v1086_v57 = vshrl.u32 %v17642_v5, %v12968_v40 }
 0x114   : > { %v1365_v27 = vsel %vm1363_vm7, %v1364_v29, %v12223_v10  ;;  %v4689_v48 = vsel %vm4687_vm11, %v1364_v29, %v12223_v10  ;;  %v1764_v34 = vxor.u32 2147483648, %v1763_v32  ;;  %v1540_v22 = vclz %v10893_v41 }
 0x115   : > { %v1362_v39 = vsel %vm1360_vm6, %v12221_v23, %v1361_v12  ;;  %v4686_v20 = vsel %vm4684_vm8, %v12221_v23, %v1361_v12  ;;  %v1082_v23 = vshll.u32 %v17640_v13, %v1070_v61  ;;  %v12999_v24 = vshrl.u32 %v1068_v3, 5 }
 0x116   : > { %861 = vperm.xlu1 %12174, %v12593_v30   ;;  %v12983_v30 = vsel %vm17601_vm2, %v782_v19, %v725_v0  ;;  %v1366_v15 = vsel %vm1359_vm10, %v1362_v39, %v1365_v27  ;;  %v1074_v0 = vshrl.u32 %v17638_v52, %v12968_v40  ;;  %v1077_v12 = vshrl.u32 %v17639_v36, %v12968_v40 }
 0x117   : > { %17656 = vst [vmem:[#allocation20_spill] sm:$0xff] %v12983_v30  ;;  %v12997_v10 = vmul.f32 %v12656_v55, %v12983_v30  ;;  %v1080_v29 = vshrl.u32 %v17640_v13, %v12968_v40  ;;  %v4690_v43 = vsel %vm4683_vm4, %v4686_v20, %v4689_v48  ;;  %v1063_v18 = vand.u32 8388607, %v17544_v21 }
 0x118   : > { %v1073_v19 = vshll.u32 %v17644_v42, %v1070_v61  ;;  %v1084_v14 = vor.u32 %v1083_v16, %v1082_v23  ;;  %v10874_v39 = vadd.s32 4294967294, %v1020_v58  ;;  %v1076_v3 = vshll.u32 %v17638_v52, %v1070_v61 }
 0x119   : > { %17657 = vst [vmem:[#allocation21_spill] sm:$0xff] %v12997_v10  ;;  %v1079_v27 = vshll.u32 %v17639_v36, %v1070_v61  ;;  %v1765_v17 = vsel %vm1682_vm5, %v1764_v34, %v1763_v32  ;;  %v13017_v1 = vadd.s32 %v12862_v38, %v12868_v49  ;;  %v10894_v20 = vadd.s32 4294967294, %v1540_v22  ;;  %v444_v22 = vpop.permute.xlu0 %443 }
 0x11a   : > { %865 = vperm.xlu1 %12174, %v418_v35   ;;  %v1085_v35 = vshll.u32 %v17641_v31, %v1070_v61  ;;  %v1075_v48 = vor.u32 %v1074_v0, %v1073_v19  ;;  %v1078_v21 = vor.u32 %v1077_v12, %v1076_v3  ;;  %vm1091_vm13 = vcmp.lt.s32.totalorder %v12999_v24, 4  ;;  %v420_v19 = vld [vmem:[%s12525_s25 + $0xe8] sm:$0xff] }
 0x11b   : > { %v1081_v2 = vor.u32 %v1080_v29, %v1079_v27  ;;  %v1579_v16 = vand.u32 2139095040, %v12997_v10  ;;  %v13023_v61 = vsel %vm1356_vm9, nan, %v1366_v15  ;;  %v13027_v58 = vsel %vm1356_vm9, nan, %v4690_v43  ;;  %708 = vperm.xlu0 %12176, %v420_v19  }
 0x11c   : > { %v1087_v41 = vor.u32 %v1086_v57, %v1085_v35  ;;  %v1097_v38 = vsel %vm1091_vm13, %v1084_v14, 920167782  ;;  %v13033_v49 = vsel %vm12976_vm12, 0, %v1767_v26  ;;  %vm10875_vm14 = vcmp.lt.s32.totalorder %v10874_v39, 0 }
 0x11d   : > { %v1064_v32 = vor.u32 8388608, %v1063_v18  ;;  %v1580_v57 = vshrl.u32 %v1579_v16, 23  ;;  %v1768_v60 = vsel %vm12976_vm12, %v12727_v6, %v1765_v17  ;;  %vm10895_vm15 = vcmp.lt.s32.totalorder %v10894_v20, 0  ;;  %v454_v4 = vpop.permute.xlu0 %453 }
 0x11e   : > { %12177 = vset.pattern.permute.xlu1 %v17643_v46  ;;  %v1101_v34 = vsel %vm1091_vm13, %v1087_v41, 1326507024  ;;  %vm1088_vm0 = vcmp.lt.s32.totalorder %v12999_v24, 1  ;;  %vm1090_vm3 = vcmp.lt.s32.totalorder %v12999_v24, 3  ;;  %v13047_v0 = vadd.s32 3, %v13033_v49 }
 0x11f   : > { %v1096_v26 = vsel %vm1088_vm0, %v1075_v48, %v1078_v21  ;;  %v1098_v15 = vsel %vm1090_vm3, %v1081_v2, %v1097_v38  ;;  %v10896_v23 = vadd.s32 4294967169, %v1580_v57  ;;  %v13049_v12 = vsel %vm10875_vm14, 0, %v10874_v39  ;;  %578 = vperm.xlu1 %12177, %v420_v19  }
 0x120   : > { %v1100_v45 = vsel %vm1088_vm0, %v1078_v21, %v1081_v2  ;;  %v1102_v29 = vsel %vm1090_vm3, %v1084_v14, %v1101_v34  ;;  %v721_v35 = vsel %vm17602_vm1, %v444_v22, %v12618_v37  ;;  %12224 = vcosq.f32 %v1768_v60 }
 0x121   : > { %v13058_v43 = vsel %vm10895_vm15, 0, %v10894_v20  ;;  %vm1089_vm4 = vcmp.lt.s32.totalorder %v12999_v24, 2  ;;  %v1586_v18 = vadd.s32 1, %v10896_v23  ;;  %12226 = vsinq.f32 %v1768_v60 }
 0x122   : > { %v1528_v39 = vadd.s32 %v12912_v56, %v12917_v53  ;;  %v1099_v3 = vsel %vm1089_vm4, %v1096_v26, %v1098_v15  ;;  %v13066_v14 = vshll.u32 %v1064_v32, 8  ;;  %v1103_v27 = vsel %vm1089_vm4, %v1100_v45, %v1102_v29  ;;  %v12412_v45 = vld [vmem:[%s12525_s25 + $0xe0] sm:$0xff] }
 0x123   : > { %vm1587_vm5 = vcmp.gt.s32.totalorder %v1586_v18, 0  ;;  %v13074_v41 = vsel %vm17601_vm2, %v12651_v54, %v721_v35  ;;  %v1028_v56 = vsub.s32 4294967266, %v13049_v12  ;;  %v1548_v53 = vsub.s32 4294967266, %v13058_v43  ;;  %v421_v54 = vld [vmem:[%s12525_s25 + $0xf0] sm:$0xff]  ;;  %12178 = vset.pattern.permute.xlu1 %v17647_v7 }
 0x124   : > { %17658 = vst [vmem:[#allocation22_spill] sm:$0xff] %v13074_v41  ;;  %v1093_v17 = vsel %vm1091_vm13, %v1081_v2, 2102212464  ;;  %v1588_v20 = vsel %vm1587_vm5, %v1586_v18, 0  ;;  %v1072_v16 = vshrl.u32 %v17644_v42, %v12968_v40  ;;  %v17559_v60 = vand.u32 2147483647, %v12997_v10  ;;  %712 = vperm.xlu0 %12176, %v421_v54   ;;  %704 = vperm.xlu1 %12178, %v12412_v45  }
 0x125   : > { %v13083_v38 = vmul.u32.u64.low %v13066_v14, %v1099_v3  ;;  %v13084_v32 = vmul.u32.u64.high %v13066_v14, %v1099_v3, %v13083_v38  ;;  %v1590_v34 = vand.u32 31, %v1588_v20  ;;  %v13095_v2 = vmul.f32 %v12656_v55, %v13074_v41 }
 0x126   : > { %v13089_v57 = vmul.u32.u64.low %v13066_v14, %v1103_v27  ;;  %v13090_v22 = vmul.u32.u64.high %v13066_v14, %v1103_v27, %v13089_v57  ;;  %v1544_v40 = vsub.s32 32, %v13058_v43  ;;  %v1092_v26 = vsel %vm1088_vm0, %v1072_v16, %v1075_v48 }
 0x127   : > { %17659 = vst [vmem:[#allocation23_spill] sm:$0xff] %v13095_v2  ;;  %v1094_v15 = vsel %vm1090_vm3, %v1078_v21, %v1093_v17  ;;  %v1591_v23 = vsub.s32 32, %v1590_v34  ;;  %v1545_v29 = vshll.u32 %v12956_v25, %v13058_v43  ;;  %v1549_v35 = vadd.s32 127, %v1548_v53 }
 0x128   : > { %v13106_v18 = vshrl.u32 %v1588_v20, 5  ;;  %v1593_v19 = vshll.u32 %v17644_v42, %v1590_v34  ;;  %v1596_v27 = vshll.u32 %v17638_v52, %v1590_v34  ;;  %v1599_v21 = vshll.u32 %v17639_v36, %v1590_v34  ;;  %12181 = vset.pattern.permute.xlu0 %v17652_v28  ;;  %12179 = vset.pattern.permute.xlu1 %v17643_v46 }
 0x129   : > { %v1594_v3 = vshrl.u32 %v17638_v52, %v1591_v23  ;;  %v1597_v48 = vshrl.u32 %v17639_v36, %v1591_v23  ;;  %v1600_v16 = vshrl.u32 %v17640_v13, %v1591_v23  ;;  %v1602_v17 = vshll.u32 %v17640_v13, %v1590_v34  ;;  %869 = vperm.xlu0 %12181, %v12412_v45  }
 0x12a   : > { %v1603_v57 = vshrl.u32 %v17641_v31, %v1591_v23  ;;  %v1163_v25 = vand.u32 2139095040, %v13095_v2  ;;  %v13118_v43 = vpop.eup %12224  ;;  %v1583_v53 = vand.u32 8388607, %v17559_v60  ;;  %v1606_v41 = vshrl.u32 %v17642_v5, %v1591_v23  ;;  %583 = vperm.xlu1 %12179, %v421_v54  }
 0x12b   : > { %v1595_v20 = vor.u32 %v1594_v3, %v1593_v19  ;;  %v1598_v37 = vor.u32 %v1597_v48, %v1596_v27  ;;  %v13124_v30 = vpop.eup %12226  ;;  %v1546_v33 = vshrl.u32 %v1528_v39, %v1544_v40  ;;  %v1550_v7 = vshll.u32 %v1549_v35, 23 }
 0x12c   : > { %v1095_v6 = vsel %vm1089_vm4, %v1092_v26, %v1094_v15  ;;  %v1604_v28 = vor.u32 %v1603_v57, %v1602_v17  ;;  %v1114_v10 = vadd.s32 1, %v13084_v32  ;;  %v1601_v60 = vor.u32 %v1600_v16, %v1599_v21 }
 0x12d   : > { %v1605_v19 = vshll.u32 %v17641_v31, %v1590_v34  ;;  %vm1611_vm6 = vcmp.lt.s32.totalorder %v13106_v18, 4  ;;  %vm1113_vm7 = vc.u32 %v13090_v22, %v13083_v38  ;;  %vm1608_vm8 = vcmp.lt.s32.totalorder %v13106_v18, 1 }
 0x12e   : > { %v1617_v46 = vsel %vm1611_vm6, %v1604_v28, 920167782  ;;  %v1164_v24 = vshrl.u32 %v1163_v25, 23  ;;  %v1584_v39 = vor.u32 8388608, %v1583_v53  ;;  %v1616_v54 = vsel %vm1608_vm8, %v1595_v20, %v1598_v37 }
 0x12f   : > { %v1607_v40 = vor.u32 %v1606_v41, %v1605_v19  ;;  %v723_v34 = vsel %vm17602_vm1, %v454_v4, %v12681_v9  ;;  %v1029_v26 = vadd.s32 127, %v1028_v56  ;;  %v1547_v15 = vor.u32 %v1546_v33, %v1545_v29 }
 0x130   : > { %v1111_v45 = vmul.u32 %v13066_v14, %v1095_v6  ;;  %vm1610_vm9 = vcmp.lt.s32.totalorder %v13106_v18, 3  ;;  %v1115_v35 = vsel %vm1113_vm7, %v1114_v10, %v13084_v32  ;;  %vm1609_vm10 = vcmp.lt.s32.totalorder %v13106_v18, 2 }
 0x131   : > { %v1613_v41 = vsel %vm1611_vm6, %v1601_v60, 2102212464  ;;  %v1618_v3 = vsel %vm1610_vm9, %v1601_v60, %v1617_v46  ;;  %vm1474_vm11 = vcmp.lt.s32.totalorder %v12769_v63, 0  ;;  %v1592_v9 = vshrl.u32 %v17644_v42, %v1591_v23 }
 0x132   : > { %v1619_v4 = vsel %vm1609_vm10, %v1616_v54, %v1618_v3  ;;  %v10880_v6 = vadd.s32 4294967169, %v1164_v24  ;;  %v13156_v33 = vsel %vm17601_vm2, %v12636_v47, %v723_v34  ;;  %v1551_v10 = vor.u32 4788187, %v1550_v7 }
 0x133   : > { %17660 = vst [vmem:[#allocation24_spill] sm:$0xff] %v13156_v33  ;;  %v1620_v14 = vsel %vm1608_vm8, %v1598_v37, %v1601_v60  ;;  %v1621_v56 = vsel %vm1611_vm6, %v1607_v40, 1326507024  ;;  %v1624_v32 = vshll.u32 %v1584_v39, 8  ;;  %v13162_v29 = vadd.s32 %v1115_v35, %v1111_v45 }
 0x134   : > { %v1612_v23 = vsel %vm1608_vm8, %v1592_v9, %v1595_v20  ;;  %v1614_v27 = vsel %vm1610_vm9, %v1598_v37, %v1613_v41  ;;  %v1622_v47 = vsel %vm1610_vm9, %v1604_v28, %v1621_v56  ;;  %v13178_v16 = vmul.f32 %v12656_v55, %v13156_v33 }
 0x135   : > { %v1623_v7 = vsel %vm1609_vm10, %v1620_v14, %v1622_v47  ;;  %v13172_v48 = vmul.u32.u64.low %v1624_v32, %v1619_v4  ;;  %v13173_v60 = vmul.u32.u64.high %v1624_v32, %v1619_v4, %v13172_v48  ;;  %v17661_v21 = vsub.s32 32, %v13049_v12 }
 0x136   : > { %v13183_v57 = vmul.u32.u64.low %v1624_v32, %v1623_v7  ;;  %v13184_v37 = vmul.u32.u64.high %v1624_v32, %v1623_v7, %v13183_v57  ;;  %v1170_v25 = vadd.s32 1, %v10880_v6  ;;  %v1030_v28 = vshll.u32 %v1029_v26, 23 }
 0x137   : > { %v1026_v17 = vshrl.u32 %v13017_v1, %v17661_v21  ;;  %v1552_v53 = vand.u32 2147483647, %v1551_v10  ;;  %v1558_v20 = vsub.s32 4, %v12943_v44  ;;  %v1615_v19 = vsel %vm1609_vm10, %v1612_v23, %v1614_v27 }
 0x138   : > { %v1025_v46 = vshll.u32 %v12954_v62, %v13049_v12  ;;  %v1117_v24 = vadd.s32 536870912, %v13162_v29  ;;  %v17560_v39 = vand.u32 2147483647, %v13095_v2  ;;  %vm1171_vm12 = vcmp.gt.s32.totalorder %v1170_v25, 0 }
 0x139   : > { %v1554_v1 = vcvt.s32.f32 %v1547_v15  ;;  %v1634_v40 = vadd.s32 1, %v13173_v60  ;;  %v1172_v54 = vsel %vm1171_vm12, %v1170_v25, 0  ;;  %v1371_v34 = vand.u32 2139095040, %v13178_v16 }
 0x13a   : > { %v13195_v26 = vor.u32 %v1026_v17, %v1025_v46  ;;  %v17662_v45 = vand.u32 2147483647, %v12769_v63  ;;  %v1631_v62 = vmul.u32 %v1624_v32, %v1615_v19  ;;  %vm1633_vm14 = vc.u32 %v13184_v37, %v13172_v48 }
 0x13b   : > { %v1174_v12 = vand.u32 31, %v1172_v54  ;;  %v13205_v35 = vor.u32 4788187, %v1030_v28  ;;  %v13207_v15 = vmul.f32 %v1554_v1, %v1552_v53  ;;  %v1559_v41 = vsel %vm1474_vm11, %v1558_v20, %v12943_v44 }
 0x13c   : > { %vm13199_vm13 = vcmp.le.f32.partialorder %v17662_v45, 0.7853982  ;;  %v1635_v3 = vsel %vm1633_vm14, %v1634_v40, %v13173_v60  ;;  %v13213_v9 = vshrl.u32 %v1117_v24, 30  ;;  %v1167_v6 = vand.u32 8388607, %v17560_v39 }
 0x13d   : > { %v1636_v4 = vadd.s32 %v1635_v3, %v1631_v62  ;;  %v1175_v10 = vsub.s32 32, %v1174_v12  ;;  %vm7580_vm15 = vcmp.eq.s32.totalorder %v12528_v8, 1  ;;  %v13218_v14 = vshrl.u32 %v1172_v54, 5 }
 0x13e   : > { %17665 = vst [vmem:[#allocation25_spill] sm:$0xff] %v13213_v9  ;;  %v1177_v56 = vshll.u32 %v17644_v42, %v1174_v12  ;;  %v1180_v32 = vshll.u32 %v17638_v52, %v1174_v12  ;;  %v1372_v23 = vshrl.u32 %v1371_v34, 23  ;;  %v1183_v7 = vshll.u32 %v17639_v36, %v1174_v12 }
 0x13f   : > { %v1637_v27 = vadd.s32 536870912, %v1636_v4  ;;  %v1178_v44 = vshrl.u32 %v17638_v52, %v1175_v10  ;;  %v1181_v47 = vshrl.u32 %v17639_v36, %v1175_v10  ;;  %v1184_v60 = vshrl.u32 %v17640_v13, %v1175_v10 }
 0x140   : > { %v1186_v21 = vshll.u32 %v17640_v13, %v1174_v12  ;;  %v1187_v17 = vshrl.u32 %v17641_v31, %v1175_v10  ;;  %v1190_v57 = vshrl.u32 %v17642_v5, %v1175_v10  ;;  %v1189_v20 = vshll.u32 %v17641_v31, %v1174_v12 }
 0x141   : > { %v13229_v25 = vshrl.u32 %v1637_v27, 30  ;;  %v1179_v28 = vor.u32 %v1178_v44, %v1177_v56  ;;  %v1182_v53 = vor.u32 %v1181_v47, %v1180_v32  ;;  %v1168_v19 = vor.u32 8388608, %v1167_v6 }
 0x142   : > { %v1185_v46 = vor.u32 %v1184_v60, %v1183_v7  ;;  %v1188_v24 = vor.u32 %v1187_v17, %v1186_v21  ;;  %v10888_v1 = vadd.s32 4294967169, %v1372_v23  ;;  %v1191_v54 = vor.u32 %v1190_v57, %v1189_v20 }
 0x143   : > { %v1639_v40 = vshll.u32 %v13229_v25, 30  ;;  %vm1192_vm0 = vcmp.lt.s32.totalorder %v13218_v14, 1  ;;  %vm1195_vm3 = vcmp.lt.s32.totalorder %v13218_v14, 4  ;;  %v1561_v34 = vsel %vm13199_vm13, 0, %v1559_v41 }
 0x144   : > { %vm1194_vm4 = vcmp.lt.s32.totalorder %v13218_v14, 3  ;;  %v1200_v45 = vsel %vm1192_vm0, %v1179_v28, %v1182_v53  ;;  %v1201_v62 = vsel %vm1195_vm3, %v1188_v24, 920167782  ;;  %v1119_v12 = vshll.u32 %v13213_v9, 30 }
 0x145   : > { %v13243_v3 = vsub.s32 %v1636_v4, %v1639_v40  ;;  %vm1193_vm5 = vcmp.lt.s32.totalorder %v13218_v14, 2  ;;  %v1202_v6 = vsel %vm1194_vm4, %v1185_v46, %v1201_v62  ;;  %v1556_v56 = vxor.u32 2147483648, %v13207_v15 }
 0x146   : > { %v1203_v41 = vsel %vm1193_vm5, %v1200_v45, %v1202_v6  ;;  %v1208_v32 = vshll.u32 %v1168_v19, 8  ;;  %v1378_v23 = vadd.s32 1, %v10888_v1  ;;  %v1197_v44 = vsel %vm1195_vm3, %v1185_v46, 2102212464 }
 0x147   : > { %v1642_v27 = vsub.s32 0, %v13243_v3  ;;  %v1204_v4 = vsel %vm1192_vm0, %v1182_v53, %v1185_v46  ;;  %v1205_v47 = vsel %vm1195_vm3, %v1191_v54, 1326507024  ;;  %v1176_v7 = vshrl.u32 %v17644_v42, %v1175_v10  ;;  %v13274_v10 = vpop.permute.xlu1 %473 }
 0x148   : > { %v1206_v60 = vsel %vm1194_vm4, %v1188_v24, %v1205_v47  ;;  %v13261_v21 = vmul.u32.u64.low %v1208_v32, %v1203_v41  ;;  %v13262_v17 = vmul.u32.u64.high %v1208_v32, %v1203_v41, %v13261_v21  ;;  %vm17590_vm6 = vcmp.eq.s32.totalorder %v12533_v11, 1 }
 0x149   : > { %v7584_v57 = vsel %vm7580_vm15, %v13023_v61, %v13027_v58  ;;  %v1032_v20 = vand.u32 2147483647, %v13205_v35  ;;  %v13272_v19 = vsub.s32 %v13162_v29, %v1119_v12  ;;  %v1196_v46 = vsel %vm1192_vm0, %v1176_v7, %v1179_v28 }
 0x14a   : > { %v1198_v24 = vsel %vm1194_vm4, %v1182_v53, %v1197_v44  ;;  %v1207_v1 = vsel %vm1193_vm5, %v1204_v4, %v1206_v60  ;;  %vm1379_vm7 = vcmp.gt.s32.totalorder %v1378_v23, 0  ;;  %v1034_v40 = vcvt.s32.f32 %v13195_v26 }
 0x14b   : > { %v1565_v61 = vadd.s32 3, %v1561_v34  ;;  %v13284_v58 = vand.u32 3, %v13047_v0  ;;  %v10897_v29 = vmin.u32 %v1642_v27, %v13243_v3  ;;  %v1557_v35 = vsel %vm1474_vm11, %v1556_v56, %v13207_v15  ;;  %v13313_v27 = vpop.permute.xlu1 %624 }
 0x14c   : > { %v13290_v28 = vmul.u32.u64.low %v1208_v32, %v1207_v1  ;;  %v13291_v54 = vmul.u32.u64.high %v1208_v32, %v1207_v1, %v13290_v28  ;;  %v1380_v53 = vsel %vm1379_vm7, %v1378_v23, 0  ;;  %v1122_v45 = vsub.s32 0, %v13272_v19 }
 0x14d   : > { %v1199_v62 = vsel %vm1193_vm5, %v1196_v46, %v1198_v24  ;;  %v1218_v26 = vadd.s32 1, %v13262_v17  ;;  %v1382_v12 = vand.u32 31, %v1380_v53  ;;  %v13300_v0 = vsel %vm17590_vm6, %v12665_v59, %v7584_v57 }
 0x14e   : > { %17666 = vst [vmem:[#allocation26_spill] sm:$0xff] %v13300_v0  ;;  %v13302_v6 = vmul.f32 %v1034_v40, %v1032_v20  ;;  %v1777_v15 = vxor.u32 2147483648, %v13124_v30  ;;  %v13306_v56 = vand.u32 3, %v13033_v49  ;;  %v1560_v14 = vsel %vm13199_vm13, %v12769_v63, %v1557_v35 }
 0x14f   : > { %vm1776_vm8 = vcmp.eq.s32.totalorder %v13284_v58, 0  ;;  %v1780_v41 = vxor.u32 2147483648, %v13118_v43  ;;  %v1644_v23 = vclz %v10897_v29  ;;  %vm1779_vm9 = vcmp.eq.s32.totalorder %v13284_v58, 2  ;;  %v629_v28 = vpop.permute.xlu1 %628 }
 0x150   : > { %v1215_v59 = vmul.u32 %v1208_v32, %v1199_v62  ;;  %vm1217_vm10 = vc.u32 %v13291_v54, %v13261_v21  ;;  %v13318_v44 = vsub.s32 32, %v1382_v12  ;;  %v13320_v49 = vand.u32 3, %v1565_v61 }
 0x151   : > { %v13322_v4 = vand.u32 3, %v1561_v34  ;;  %v10877_v18 = vmin.u32 %v1122_v45, %v13272_v19  ;;  %v1219_v47 = vsel %vm1217_vm10, %v1218_v26, %v13262_v17  ;;  %12228 = vcosq.f32 %v1560_v14 }
 0x152   : > { %vm1775_vm11 = vcmp.lt.s32.totalorder %v13284_v58, 2  ;;  %v1778_v32 = vsel %vm1776_vm8, %v13118_v43, %v1777_v15  ;;  %vm5096_vm12 = vcmp.eq.s32.totalorder %v13306_v56, 0  ;;  %vm5099_vm13 = vcmp.eq.s32.totalorder %v13306_v56, 2 }
 0x153   : > { %v1220_v60 = vadd.s32 %v1219_v47, %v1215_v59  ;;  %12230 = vsinq.f32 %v1560_v14  ;;  %v1781_v34 = vsel %vm1779_vm9, %v1780_v41, %v13124_v30  ;;  %v10898_v57 = vadd.s32 4294967294, %v1644_v23 }
 0x154   : > { %v17568_v17 = vand.u32 2147483647, %v13178_v16  ;;  %v1386_v46 = vshrl.u32 %v17638_v52, %v13318_v44  ;;  %v1394_v24 = vshll.u32 %v17640_v13, %v1382_v12  ;;  %v1395_v1 = vshrl.u32 %v17641_v31, %v13318_v44 }
 0x155   : > { %v1221_v20 = vadd.s32 536870912, %v1220_v60  ;;  %v1124_v40 = vclz %v10877_v18  ;;  %v13340_v61 = vshrl.u32 %v1380_v53, 5  ;;  %v1389_v29 = vshrl.u32 %v17639_v36, %v13318_v44  ;;  %v479_v18 = vpop.permute.xlu0 %478 }
 0x156   : > { %v1392_v35 = vshrl.u32 %v17640_v13, %v13318_v44  ;;  %v1385_v62 = vshll.u32 %v17644_v42, %v1382_v12  ;;  %v1396_v26 = vor.u32 %v1395_v1, %v1394_v24  ;;  %v1398_v14 = vshrl.u32 %v17642_v5, %v13318_v44 }
 0x157   : > { %v13346_v45 = vshrl.u32 %v1221_v20, 30  ;;  %vm5095_vm14 = vcmp.lt.s32.totalorder %v13306_v56, 2  ;;  %vm10899_vm0 = vcmp.lt.s32.totalorder %v10898_v57, 0  ;;  %v1388_v53 = vshll.u32 %v17638_v52, %v1382_v12 }
 0x158   : > { %v1391_v23 = vshll.u32 %v17639_v36, %v1382_v12  ;;  %v1397_v59 = vshll.u32 %v17641_v31, %v1382_v12  ;;  %v1375_v20 = vand.u32 8388607, %v17568_v17  ;;  %v1387_v39 = vor.u32 %v1386_v46, %v1385_v62  ;;  %v17669_v17 = vld [vmem:[#allocation13_spill] sm:$0xff] }
 0x159   : > { %17667 = vst [vmem:[#allocation27_spill] sm:$0xff] %v13346_v45  ;;  %v1223_v47 = vshll.u32 %v13346_v45, 30  ;;  %v728_v24 = vsel %vm17602_vm1, %v479_v18, %v629_v28  ;;  %v1390_v1 = vor.u32 %v1389_v29, %v1388_v53  ;;  %vm1403_vm3 = vcmp.lt.s32.totalorder %v13340_v61, 4  ;;  %v17668_v45 = vld [vmem:[#allocation15_spill] sm:$0xff]  ;;  %v13403_v53 = vpop.permute.xlu1 %488 }
 0x15a   : > { %v1393_v7 = vor.u32 %v1392_v35, %v1391_v23  ;;  %v1399_v9 = vor.u32 %v1398_v14, %v1397_v59  ;;  %v10878_v33 = vadd.s32 4294967294, %v1124_v40  ;;  %v13361_v0 = vsel %vm10899_vm0, 0, %v10898_v57 }
 0x15b   : > { %v13363_v2 = vsub.s32 %v1220_v60, %v1223_v47  ;;  %v1409_v12 = vsel %vm1403_vm3, %v1396_v26, 920167782  ;;  %vm17589_vm4 = vcmp.lt.s32.totalorder %v17668_v45, 0  ;;  %vm1772_vm5 = vweird.f32 %v17669_v17  ;;  %v17670_v60 = vld [vmem:[#allocation5_spill] sm:$0xff]  ;;  %v13382_v35 = vpop.eup %12228 }
 0x15c   : > { %v1782_v46 = vsel %vm1775_vm11, %v1778_v32, %v1781_v34  ;;  %v5098_v29 = vsel %vm5096_vm12, %v13118_v43, %v1777_v15  ;;  %v5101_v57 = vsel %vm5099_vm13, %v1780_v41, %v13124_v30  ;;  %v13380_v40 = vsel %vm17601_vm2, %v17670_v60, %v728_v24 }
 0x15d   : > { %v1226_v28 = vsub.s32 0, %v13363_v2  ;;  %v1376_v62 = vor.u32 8388608, %v1375_v20  ;;  %vm1400_vm7 = vcmp.lt.s32.totalorder %v13340_v61, 1  ;;  %vm1402_vm8 = vcmp.lt.s32.totalorder %v13340_v61, 3  ;;  %v13387_v58 = vpop.eup %12230 }
 0x15e   : > { %v1652_v43 = vsub.s32 4294967266, %v13361_v0  ;;  %v1408_v30 = vsel %vm1400_vm7, %v1387_v39, %v1390_v1  ;;  %v1410_v15 = vsel %vm1402_vm8, %v1393_v7, %v1409_v12  ;;  %v1413_v41 = vsel %vm1403_vm3, %v1399_v9, 1326507024 }
 0x15f   : > { %vm10879_vm9 = vcmp.lt.s32.totalorder %v10878_v33, 0  ;;  %v10881_v32 = vmin.u32 %v1226_v28, %v13363_v2  ;;  %v1412_v34 = vsel %vm1400_vm7, %v1390_v1, %v1393_v7  ;;  %v13401_v14 = vmul.f32 %v12656_v55, %v13380_v40 }
 0x160   : > { %v1384_v23 = vshrl.u32 %v17644_v42, %v13318_v44  ;;  %vm1401_vm10 = vcmp.lt.s32.totalorder %v13340_v61, 2  ;;  %v1405_v9 = vsel %vm1403_vm3, %v1393_v7, 2102212464  ;;  %v1414_v59 = vsel %vm1402_vm8, %v1396_v26, %v1413_v41 }
 0x161   : > { %v5102_v18 = vsel %vm5095_vm14, %v5098_v29, %v5101_v57  ;;  %v1228_v47 = vclz %v10881_v32  ;;  %v1411_v20 = vsel %vm1401_vm10, %v1408_v30, %v1410_v15  ;;  %v1416_v24 = vshll.u32 %v1376_v62, 8  ;;  %v13446_v15 = vpop.permute.xlu1 %636 }
 0x162   : > { %v13416_v12 = vsel %vm10879_vm9, 0, %v10878_v33  ;;  %v1653_v60 = vadd.s32 127, %v1652_v43  ;;  %v1404_v44 = vsel %vm1400_vm7, %v1384_v23, %v1387_v39  ;;  %v1415_v7 = vsel %vm1401_vm10, %v1412_v34, %v1414_v59 }
 0x163   : > { %vm4893_vm11 = vcmp.eq.s32.totalorder %v13322_v4, 2  ;;  %v10882_v26 = vadd.s32 4294967294, %v1228_v47  ;;  %v1406_v56 = vsel %vm1402_vm8, %v1390_v1, %v1405_v9  ;;  %vm1568_vm12 = vcmp.eq.s32.totalorder %v13320_v49, 0 }
 0x164   : > { %v13425_v29 = vmul.u32.u64.low %v1416_v24, %v1415_v7  ;;  %v13426_v57 = vmul.u32.u64.high %v1416_v24, %v1415_v7, %v13425_v29  ;;  %vm4890_vm13 = vcmp.eq.s32.totalorder %v13322_v4, 0  ;;  %v1891_v39 = vand.u32 2139095040, %v13401_v14 }
 0x165   : > { %v13430_v33 = vmul.u32.u64.low %v1416_v24, %v1411_v20  ;;  %v13431_v28 = vmul.u32.u64.high %v1416_v24, %v1411_v20, %v13430_v33  ;;  %v17671_v62 = vxor.u32 2147483648, %v13302_v6  ;;  %vm1571_vm14 = vcmp.eq.s32.totalorder %v13320_v49, 2 }
 0x166   : > { %v1783_v1 = vsel %vm1772_vm5, nan, %v1782_v46  ;;  %v1648_v30 = vsub.s32 32, %v13361_v0  ;;  %vm1567_vm0 = vcmp.lt.s32.totalorder %v13320_v49, 2  ;;  %v1132_v41 = vsub.s32 4294967266, %v13416_v12 }
 0x167   : > { %v13440_v43 = vsel %vm17589_vm4, %v17671_v62, %v13302_v6  ;;  %v5103_v32 = vsel %vm1772_vm5, nan, %v5102_v18  ;;  %v1407_v6 = vsel %vm1401_vm10, %v1404_v44, %v1406_v56  ;;  %v1892_v34 = vshrl.u32 %v1891_v39, 23 }
 0x168   : > { %17672 = vst [vmem:[#allocation13_spill] sm:$0xff] %v13440_v43  ;;  %v1572_v23 = vxor.u32 2147483648, %v13382_v35  ;;  %vm4889_vm3 = vcmp.lt.s32.totalorder %v13322_v4, 2  ;;  %v1632_v46 = vadd.s32 %v13172_v48, %v13184_v37  ;;  %v1654_v9 = vshll.u32 %v1653_v60, 23 }
 0x169   : > { %vm10883_vm7 = vcmp.lt.s32.totalorder %v10882_v26, 0  ;;  %v1569_v59 = vxor.u32 2147483648, %v13387_v58  ;;  %vm1425_vm8 = vc.u32 %v13426_v57, %v13430_v33  ;;  %v1426_v17 = vadd.s32 1, %v13431_v28 }
 0x16a   : > { %v10908_v18 = vadd.s32 4294967169, %v1892_v34  ;;  %vm1564_vm5 = vweird.f32 %v12769_v63  ;;  %v1112_v61 = vadd.s32 %v13083_v38, %v13090_v22  ;;  %v1128_v47 = vsub.s32 32, %v13416_v12  ;;  %v790_v22 = vpop.permute.xlu1 %789 }
 0x16b   : > { %v1650_v20 = vshrl.u32 %v1632_v46, %v1648_v30  ;;  %v1423_v44 = vmul.u32 %v1416_v24, %v1407_v6  ;;  %v1133_v48 = vadd.s32 127, %v1132_v41  ;;  %v13466_v37 = vsel %vm10883_vm7, 0, %v10882_v26 }
 0x16c   : > { %v1427_v60 = vsel %vm1425_vm8, %v1426_v17, %v13431_v28  ;;  %v1898_v7 = vadd.s32 1, %v10908_v18  ;;  %v1649_v56 = vshll.u32 %v13243_v3, %v13361_v0  ;;  %v1655_v29 = vor.u32 4788187, %v1654_v9 }
 0x16d   : > { %v1428_v39 = vadd.s32 %v1427_v60, %v1423_v44  ;;  %v727_v38 = vsel %vm17602_vm1, %v13274_v10, %v13313_v27  ;;  %v1570_v24 = vsel %vm1568_vm12, %v13382_v35, %v1569_v59  ;;  %v1573_v26 = vsel %vm1571_vm14, %v1572_v23, %v13387_v58  ;;  %v17674_v60 = vld [vmem:[#allocation12_spill] sm:$0xff] }
 0x16e   : > { %v4895_v3 = vsel %vm4893_vm11, %v1572_v23, %v13387_v58  ;;  %vm1899_vm9 = vcmp.gt.s32.totalorder %v1898_v7, 0  ;;  %v4892_v0 = vsel %vm4890_vm13, %v13382_v35, %v1569_v59  ;;  %v1651_v28 = vor.u32 %v1650_v20, %v1649_v56  ;;  %v17675_v56 = vld [vmem:[#allocation21_spill] sm:$0xff] }
 0x16f   : > { %v1236_v10 = vsub.s32 4294967266, %v13466_v37  ;;  %v1429_v27 = vadd.s32 536870912, %v1428_v39  ;;  %v1130_v62 = vshrl.u32 %v1112_v61, %v1128_v47  ;;  %v1134_v30 = vshll.u32 %v1133_v48, 23 }
 0x170   : > { %v1900_v41 = vsel %vm1899_vm9, %v1898_v7, 0  ;;  %v13490_v6 = vsel %vm17601_vm2, %v790_v22, %v727_v38  ;;  %v1574_v34 = vsel %vm1567_vm0, %v1570_v24, %v1573_v26  ;;  %v7588_v58 = vsel %vm7580_vm15, %v1783_v1, %v5103_v32 }
 0x171   : > { %17673 = vst [vmem:[#allocation5_spill] sm:$0xff] %v13490_v6  ;;  %v1656_v23 = vand.u32 2147483647, %v1655_v29  ;;  %v13496_v46 = vshrl.u32 %v1429_v27, 30  ;;  %v4896_v35 = vsel %vm4889_vm3, %v4892_v0, %v4895_v3  ;;  %v1129_v9 = vshll.u32 %v13272_v19, %v13416_v12 }
 0x172   : > { %v17569_v59 = vand.u32 2147483647, %v13401_v14  ;;  %v1902_v17 = vand.u32 31, %v1900_v41  ;;  %v1658_v18 = vcvt.s32.f32 %v1651_v28  ;;  %v1237_v61 = vadd.s32 127, %v1236_v10 }
 0x173   : > { %v1431_v49 = vshll.u32 %v13496_v46, 30  ;;  %v13506_v47 = vmul.f32 %v12656_v55, %v13490_v6  ;;  %v1575_v1 = vsel %vm1564_vm5, nan, %v1574_v34  ;;  %v13510_v32 = vor.u32 %v1130_v62, %v1129_v9 }
 0x174   : > { %v13512_v4 = vor.u32 4788187, %v1134_v30  ;;  %v1662_v19 = vsub.s32 4, %v13229_v25  ;;  %v4897_v12 = vsel %vm1564_vm5, nan, %v4896_v35  ;;  %v1659_v20 = vmul.f32 %v1658_v18, %v1656_v23 }
 0x175   : > { %v13517_v44 = vsub.s32 %v1428_v39, %v1431_v49  ;;  %v13519_v48 = vsub.s32 32, %v1902_v17  ;;  %v13524_v7 = vsel %vm17590_vm6, %v17674_v60, %v7588_v58  ;;  %v17676_v29 = vand.u32 2147483647, %v17675_v56  ;;  %v13535_v39 = vpop.permute.xlu0 %483 }
 0x176   : > { %vm1578_vm11 = vcmp.lt.s32.totalorder %v17675_v56, 0  ;;  %v1895_v63 = vand.u32 8388607, %v17569_v59  ;;  %v1232_v22 = vsub.s32 32, %v13466_v37  ;;  %v1238_v24 = vshll.u32 %v1237_v61, 23 }
 0x177   : > { %vm13528_vm10 = vcmp.le.f32.partialorder %v17676_v29, 0.7853982  ;;  %v1434_v26 = vsub.s32 0, %v13517_v44  ;;  %v1787_v3 = vand.u32 2139095040, %v13506_v47  ;;  %v13542_v0 = vsel %vm7580_vm15, %v1575_v1, %v4897_v12 }
 0x178   : > { %v1138_v10 = vcvt.s32.f32 %v13510_v32  ;;  %v1663_v27 = vsel %vm1578_vm11, %v1662_v19, %v13229_v25  ;;  %v1660_v62 = vxor.u32 2147483648, %v1659_v20  ;;  %v1216_v30 = vadd.s32 %v13261_v21, %v13291_v54 }
 0x179   : > { %v10889_v34 = vmin.u32 %v1434_v26, %v13517_v44  ;;  %v1906_v58 = vshrl.u32 %v17638_v52, %v13519_v48  ;;  %v1233_v23 = vshll.u32 %v13363_v2, %v13466_v37  ;;  %v1896_v35 = vor.u32 8388608, %v1895_v63  ;;  %v13564_v2 = vpop.permute.xlu0 %493 }
 0x17a   : > { %v1909_v9 = vshrl.u32 %v17639_v36, %v13519_v48  ;;  %v17570_v18 = vand.u32 2147483647, %v13506_v47  ;;  %v1234_v61 = vshrl.u32 %v1216_v30, %v1232_v22  ;;  %v1239_v25 = vor.u32 4788187, %v1238_v24 }
 0x17b   : > { %v1905_v49 = vshll.u32 %v17644_v42, %v1902_v17  ;;  %v1788_v1 = vshrl.u32 %v1787_v3, 23  ;;  %v1436_v21 = vclz %v10889_v34  ;;  %v1908_v54 = vshll.u32 %v17638_v52, %v1902_v17 }
 0x17c   : > { %v1911_v32 = vshll.u32 %v17639_v36, %v1902_v17  ;;  %v1912_v19 = vshrl.u32 %v17640_v13, %v13519_v48  ;;  %v1901_v37 = vshrl.u32 %v1900_v41, 5  ;;  %v1914_v60 = vshll.u32 %v17640_v13, %v1902_v17 }
 0x17d   : > { %v1907_v12 = vor.u32 %v1906_v58, %v1905_v49  ;;  %v1915_v29 = vshrl.u32 %v17641_v31, %v13519_v48  ;;  %v1910_v63 = vor.u32 %v1909_v9, %v1908_v54  ;;  %v1917_v24 = vshll.u32 %v17641_v31, %v1902_v17  ;;  %v13578_v9 = vpop.permute.xlu1 %797 }
 0x17e   : > { %v1913_v22 = vor.u32 %v1912_v19, %v1911_v32  ;;  %v1918_v26 = vshrl.u32 %v17642_v5, %v13519_v48  ;;  %v1665_v3 = vsel %vm13528_vm10, 0, %v1663_v27  ;;  %v1235_v30 = vor.u32 %v1234_v61, %v1233_v23  ;;  %v17680_v32 = vld [vmem:[#allocation23_spill] sm:$0xff] }
 0x17f   : > { %v1916_v34 = vor.u32 %v1915_v29, %v1914_v60  ;;  %v10904_v59 = vadd.s32 4294967169, %v1788_v1  ;;  %v1661_v41 = vsel %vm1578_vm11, %v1660_v62, %v1659_v20  ;;  %v10890_v58 = vadd.s32 4294967294, %v1436_v21  ;;  %v13584_v1 = vpop.permute.xlu0 %518 }
 0x180   : > { %v1919_v49 = vor.u32 %v1918_v26, %v1917_v24  ;;  %v13576_v28 = vshll.u32 %v1896_v35, 8  ;;  %v1240_v54 = vand.u32 2147483647, %v1239_v25  ;;  %vm1920_vm12 = vcmp.lt.s32.totalorder %v1901_v37, 1  ;;  %17679 = vst [vmem:[#allocation12_spill] sm:$0xff] %v13584_v1 }
 0x181   : > { %vm1923_vm13 = vcmp.lt.s32.totalorder %v1901_v37, 4  ;;  %v1791_v17 = vand.u32 8388607, %v17570_v18  ;;  %vm1922_vm14 = vcmp.lt.s32.totalorder %v1901_v37, 3  ;;  %v1928_v27 = vsel %vm1920_vm12, %v1907_v12, %v1910_v63 }
 0x182   : > { %v1929_v23 = vsel %vm1923_vm13, %v1916_v34, 920167782  ;;  %v1932_v61 = vsel %vm1920_vm12, %v1910_v63, %v1913_v22  ;;  %v1242_v20 = vcvt.s32.f32 %v1235_v30  ;;  %v1933_v35 = vsel %vm1923_vm13, %v1919_v49, 1326507024 }
 0x183   : > { %v1930_v62 = vsel %vm1922_vm14, %v1913_v22, %v1929_v23  ;;  %v1794_v21 = vadd.s32 1, %v10904_v59  ;;  %vm1162_vm0 = vcmp.lt.s32.totalorder %v17680_v32, 0  ;;  %vm10891_vm3 = vcmp.lt.s32.totalorder %v10890_v58, 0 }
 0x184   : > { %vm1921_vm7 = vcmp.lt.s32.totalorder %v1901_v37, 2  ;;  %v1925_v25 = vsel %vm1923_vm13, %v1913_v22, 2102212464  ;;  %v1934_v19 = vsel %vm1922_vm14, %v1916_v34, %v1933_v35  ;;  %v1243_v60 = vmul.f32 %v1242_v20, %v1240_v54  ;;  %v802_v22 = vpop.permute.xlu1 %801 }
 0x185   : > { %v1904_v29 = vshrl.u32 %v17644_v42, %v13519_v48  ;;  %v1931_v24 = vsel %vm1921_vm7, %v1928_v27, %v1930_v62  ;;  %v1935_v26 = vsel %vm1921_vm7, %v1932_v61, %v1934_v19  ;;  %v1669_v30 = vadd.s32 3, %v1665_v3  ;;  %v17687_v19 = vld [vmem:[#allocation27_spill] sm:$0xff] }
 0x186   : > { %v13594_v23 = vmul.u32.u64.low %v13576_v28, %v1935_v26  ;;  %v13595_v49 = vmul.u32.u64.high %v13576_v28, %v1935_v26, %v13594_v23  ;;  %v730_v59 = vsel %vm17602_vm1, %v13403_v53, %v13446_v15  ;;  %v17681_v34 = vand.u32 2147483647, %v13512_v4  ;;  %v13619_v15 = vpop.permute.xlu0 %523 }
 0x187   : > { %v13605_v48 = vsel %vm10891_vm3, 0, %v10890_v58  ;;  %v1924_v27 = vsel %vm1920_vm12, %v1904_v29, %v1907_v12  ;;  %v1926_v61 = vsel %vm1922_vm14, %v1910_v63, %v1925_v25  ;;  %v1664_v20 = vsel %vm13528_vm10, %v17675_v56, %v1661_v41  ;;  %17682 = vst [vmem:[#allocation21_spill] sm:$0xff] %v13619_v15 }
 0x188   : > { %v13603_v54 = vmul.f32 %v1138_v10, %v17681_v34  ;;  %v13612_v62 = vand.u32 3, %v1665_v3  ;;  %v13615_v35 = vmul.u32.u64.low %v13576_v28, %v1931_v24  ;;  %v13616_v53 = vmul.u32.u64.high %v13576_v28, %v1931_v24, %v13615_v35 }
 0x189   : > { %v17683_v4 = vand.u32 2147483647, %v17680_v32  ;;  %v1244_v12 = vxor.u32 2147483648, %v1243_v60  ;;  %v1792_v63 = vor.u32 8388608, %v1791_v17  ;;  %vm1795_vm5 = vcmp.gt.s32.totalorder %v1794_v21, 0 }
 0x18a   : > { %v13629_v38 = vsel %vm17601_vm2, %v802_v22, %v730_v59  ;;  %v13631_v3 = vand.u32 3, %v1669_v30  ;;  %v1444_v41 = vsub.s32 4294967266, %v13605_v48  ;;  %v1927_v58 = vsel %vm1921_vm7, %v1924_v27, %v1926_v61 }
 0x18b   : > { %vm13623_vm8 = vcmp.le.f32.partialorder %v17683_v4, 0.7853982  ;;  %17686 = vst [vmem:[#allocation23_spill] sm:$0xff] %v13629_v38  ;;  %v1796_v25 = vsel %vm1795_vm5, %v1794_v21, 0  ;;  %12232 = vcosq.f32 %v1664_v20  ;;  %vm1945_vm9 = vc.u32 %v13595_v49, %v13615_v35 }
 0x18c   : > { %v1798_v24 = vand.u32 31, %v1796_v25  ;;  %12234 = vsinq.f32 %v1664_v20  ;;  %v1424_v17 = vadd.s32 %v13430_v33, %v13426_v57  ;;  %v1946_v26 = vadd.s32 1, %v13616_v53  ;;  %v13654_v33 = vpop.permute.xlu0 %533 }
 0x18d   : > { %v13643_v30 = vmul.f32 %v12656_v55, %v13629_v38  ;;  %v1245_v37 = vsel %vm1162_vm0, %v1244_v12, %v1243_v60  ;;  %v1943_v21 = vmul.u32 %v13576_v28, %v1927_v58  ;;  %v13648_v59 = vshll.u32 %v1792_v63, 8  ;;  %17688 = vst [vmem:[#allocation27_spill] sm:$0xff] %v13654_v33  ;;  %v422_v33 = vld [vmem:[%s12525_s25 + $0xf8] sm:$0xff] }
 0x18e   : > { %v1799_v23 = vsub.s32 32, %v1798_v24  ;;  %v1445_v22 = vadd.s32 127, %v1444_v41  ;;  %v1947_v34 = vsel %vm1945_vm9, %v1946_v26, %v13616_v53  ;;  %v13651_v27 = vshrl.u32 %v1796_v25, 5  ;;  %588 = vperm.xlu1 %12179, %v422_v33   ;;  %881 = vperm.xlu0 %12181, %v422_v33  }
 0x18f   : > { %v1801_v57 = vshll.u32 %v17644_v42, %v1798_v24  ;;  %v1948_v61 = vadd.s32 %v1947_v34, %v1943_v21  ;;  %v1804_v60 = vshll.u32 %v17638_v52, %v1798_v24  ;;  %v1807_v28 = vshll.u32 %v17639_v36, %v1798_v24 }
 0x190   : > { %v1802_v20 = vshrl.u32 %v17638_v52, %v1799_v23  ;;  %v1805_v4 = vshrl.u32 %v17639_v36, %v1799_v23  ;;  %v1808_v12 = vshrl.u32 %v17640_v13, %v1799_v23  ;;  %v1810_v53 = vshll.u32 %v17640_v13, %v1798_v24 }
 0x191   : > { %v1811_v63 = vshrl.u32 %v17641_v31, %v1799_v23  ;;  %v1949_v41 = vadd.s32 536870912, %v1948_v61  ;;  %v1813_v25 = vshll.u32 %v17641_v31, %v1798_v24  ;;  %v1814_v26 = vshrl.u32 %v17642_v5, %v1799_v23 }
 0x192   : > { %v1803_v58 = vor.u32 %v1802_v20, %v1801_v57  ;;  %v13668_v21 = vsel %vm13623_vm8, %v17680_v32, %v1245_v37  ;;  %v1806_v34 = vor.u32 %v1805_v4, %v1804_v60  ;;  %v1809_v18 = vor.u32 %v1808_v12, %v1807_v28  ;;  %v13680_v20 = vpop.permute.xlu0 %558 }
 0x193   : > { %v1812_v29 = vor.u32 %v1811_v63, %v1810_v53  ;;  %v1440_v38 = vsub.s32 32, %v13605_v48  ;;  %v13672_v15 = vshrl.u32 %v1949_v41, 30  ;;  %v1815_v43 = vor.u32 %v1814_v26, %v1813_v25  ;;  %17689 = vst [vmem:[#allocation28_spill] sm:$0xff] %v13680_v20 }
 0x194   : > { %vm1816_vm10 = vcmp.lt.s32.totalorder %v13651_v27, 1  ;;  %v1441_v24 = vshll.u32 %v13517_v44, %v13605_v48  ;;  %v1446_v57 = vshll.u32 %v1445_v22, 23  ;;  %vm1819_vm11 = vcmp.lt.s32.totalorder %v13651_v27, 4 }
 0x195   : > { %v1824_v37 = vsel %vm1816_vm10, %v1803_v58, %v1806_v34  ;;  %v12233_v60 = vpop.eup %12232  ;;  %vm4993_vm12 = vcmp.eq.s32.totalorder %v13612_v62, 0  ;;  %vm4996_vm13 = vcmp.eq.s32.totalorder %v13612_v62, 2  ;;  %v1951_v28 = vshll.u32 %v13672_v15, 30 }
 0x196   : > { %vm1817_vm14 = vcmp.lt.s32.totalorder %v13651_v27, 2  ;;  %vm1818_vm3 = vcmp.lt.s32.totalorder %v13651_v27, 3  ;;  %v1825_v44 = vsel %vm1819_vm11, %v1812_v29, 920167782  ;;  %v12235_v48 = vpop.eup %12234  ;;  %v1821_v22 = vsel %vm1819_vm11, %v1809_v18, 2102212464 }
 0x197   : > { %v1826_v4 = vsel %vm1818_vm3, %v1809_v18, %v1825_v44  ;;  %v1828_v12 = vsel %vm1816_vm10, %v1806_v34, %v1809_v18  ;;  %v1829_v53 = vsel %vm1819_vm11, %v1815_v43, 1326507024  ;;  %v1442_v63 = vshrl.u32 %v1424_v17, %v1440_v38  ;;  %v17694_v27 = vld [vmem:[#allocation18_spill] sm:$0xff] }
 0x198   : > { %v13691_v41 = vsub.s32 %v1948_v61, %v1951_v28  ;;  %v1800_v25 = vshrl.u32 %v17644_v42, %v1799_v23  ;;  %v1827_v26 = vsel %vm1817_vm14, %v1824_v37, %v1826_v4  ;;  %v17690_v20 = vmov 2   ;;  %v13715_v37 = vpop.permute.xlu0 %563 }
 0x199   : > { %12180 = vset.pattern.permute.xlu1 %v17690_v20  ;;  %v1447_v45 = vor.u32 4788187, %v1446_v57  ;;  %v1830_v1 = vsel %vm1818_vm3, %v1812_v29, %v1829_v53  ;;  %v13700_v44 = vmul.u32.u64.low %v13648_v59, %v1827_v26  ;;  %v13701_v6 = vmul.u32.u64.high %v13648_v59, %v1827_v26, %v13700_v44  ;;  %17691 = vst [vmem:[#allocation29_spill] sm:$0xff] %v13715_v37  ;;  %v12413_v53 = vld [vmem:[%s12525_s25 + $0xe8] sm:$0xff] }
 0x19a   : > { %716 = vperm.xlu1 %12180, %v422_v33   ;;  %v1954_v43 = vsub.s32 0, %v13691_v41  ;;  %v1820_v18 = vsel %vm1816_vm10, %v1800_v25, %v1803_v58  ;;  %v1822_v38 = vsel %vm1818_vm3, %v1806_v34, %v1821_v22  ;;  %v1831_v17 = vsel %vm1817_vm14, %v1828_v12, %v1830_v1 }
 0x19b   : > { %v1673_v23 = vxor.u32 2147483648, %v12235_v48  ;;  %v1676_v61 = vxor.u32 2147483648, %v12233_v60  ;;  %v13712_v29 = vmul.u32.u64.low %v13648_v59, %v1831_v17  ;;  %v13713_v57 = vmul.u32.u64.high %v13648_v59, %v1831_v17, %v13712_v29 }
 0x19c   : > { %vm1671_vm7 = vcmp.lt.s32.totalorder %v13631_v3, 2  ;;  %vm1672_vm5 = vcmp.eq.s32.totalorder %v13631_v3, 0  ;;  %v1443_v33 = vor.u32 %v1442_v63, %v1441_v24  ;;  %v10909_v58 = vmin.u32 %v1954_v43, %v13691_v41 }
 0x19d   : > { %12236 = vcosq.f32 %v13668_v21  ;;  %v1823_v1 = vsel %vm1817_vm14, %v1820_v18, %v1822_v38  ;;  %v1842_v34 = vadd.s32 1, %v13701_v6  ;;  %v2099_v20 = vand.u32 2139095040, %v13643_v30 }
 0x19e   : > { %v17692_v28 = vmov 0   ;;  %vm1675_vm9 = vcmp.eq.s32.totalorder %v13631_v3, 2  ;;  %v17693_v22 = vsub.s32 4, %v17687_v19  ;;  %v1448_v4 = vand.u32 2147483647, %v1447_v45 }
 0x19f   : > { %12182 = vset.pattern.permute.xlu1 %v17692_v28  ;;  %v1956_v12 = vclz %v10909_v58  ;;  %vm17588_vm10 = vcmp.lt.s32.totalorder %v17694_v27, 0  ;;  %v1674_v63 = vsel %vm1672_vm5, %v12233_v60, %v1673_v23  ;;  %v1677_v25 = vsel %vm1675_vm9, %v1676_v61, %v12235_v48 }
 0x1a0   : > { %v1247_v24 = vsel %vm1162_vm0, %v17693_v22, %v17687_v19  ;;  %873 = vperm.xlu1 %12182, %v12413_v53   ;;  %v4995_v26 = vsel %vm4993_vm12, %v12233_v60, %v1673_v23  ;;  %v4998_v43 = vsel %vm4996_vm13, %v1676_v61, %v12235_v48  ;;  %v1450_v18 = vcvt.s32.f32 %v1443_v33  ;;  %v13747_v60 = vpop.permute.xlu0 %573  ;;  %v13752_v61 = vpop.permute.xlu1 %498  ;;  %v12414_v33 = vld [vmem:[%s12525_s25 + $0xf0] sm:$0xff] }
 0x1a1   : > { %v10910_v38 = vadd.s32 4294967294, %v1956_v12  ;;  %v1839_v45 = vmul.u32 %v13648_v59, %v1823_v1  ;;  %vm1841_vm0 = vc.u32 %v13713_v57, %v13700_v44  ;;  %v1249_v19 = vsel %vm13623_vm8, 0, %v1247_v24  ;;  %17695 = vst [vmem:[#allocation30_spill] sm:$0xff] %v13747_v60 }
 0x1a2   : > { %12238 = vsinq.f32 %v13668_v21  ;;  %v1843_v17 = vsel %vm1841_vm0, %v1842_v34, %v13701_v6  ;;  %v2100_v29 = vshrl.u32 %v2099_v20, 23  ;;  %v1678_v48 = vsel %vm1671_vm7, %v1674_v63, %v1677_v25 }
 0x1a3   : > { %vm4992_vm11 = vcmp.lt.s32.totalorder %v13612_v62, 2  ;;  %v1451_v23 = vmul.f32 %v1450_v18, %v1448_v4  ;;  %v1844_v59 = vadd.s32 %v1843_v17, %v1839_v45  ;;  %v1454_v58 = vsub.s32 4, %v13496_v46  ;;  %v17696_v62 = vld [vmem:[#allocation16_spill] sm:$0xff] }
 0x1a4   : > { %877 = vperm.xlu1 %12182, %v12414_v33   ;;  %v4999_v10 = vsel %vm4992_vm11, %v4995_v26, %v4998_v43  ;;  %vm10911_vm8 = vcmp.lt.s32.totalorder %v10910_v38, 0  ;;  %v10916_v21 = vadd.s32 4294967169, %v2100_v29  ;;  %v1140_v6 = vxor.u32 2147483648, %v13603_v54  ;;  %v633_v43 = vpop.permute.xlu0 %632 }
 0x1a5   : > { %vm1668_vm12 = vweird.f32 %v17675_v56  ;;  %v1253_v1 = vadd.s32 3, %v1249_v19  ;;  %vm1370_vm13 = vcmp.lt.s32.totalorder %v13178_v16, 0  ;;  %v13763_v3 = vsel %vm17590_vm6, %v17696_v62, %v13542_v0 }
 0x1a6   : > { %v17697_v34 = vand.u32 2147483647, %v13178_v16  ;;  %v1845_v22 = vadd.s32 536870912, %v1844_v59  ;;  %v2106_v24 = vadd.s32 1, %v10916_v21  ;;  %v1679_v4 = vsel %vm1668_vm12, nan, %v1678_v48 }
 0x1a7   : > { %v5000_v12 = vsel %vm1668_vm12, nan, %v4999_v10  ;;  %v1452_v56 = vxor.u32 2147483648, %v1451_v23  ;;  %v13771_v53 = vsel %vm10911_vm8, 0, %v10910_v38  ;;  %v13773_v63 = vpop.eup %12236  ;;  %v13775_v25 = vand.u32 3, %v1249_v19  ;;  %v641_v19 = vpop.permute.xlu1 %640 }
 0x1a8   : > { %vm13767_vm14 = vcmp.le.f32.partialorder %v17697_v34, 0.7853982  ;;  %v1455_v0 = vsel %vm1370_vm13, %v1454_v58, %v13496_v46  ;;  %v13780_v26 = vshrl.u32 %v1845_v22, 30  ;;  %vm2107_vm3 = vcmp.gt.s32.totalorder %v2106_v24, 0 }
 0x1a9   : > { %v13785_v18 = vsel %vm17588_vm10, %v1140_v6, %v13603_v54  ;;  %v13787_v45 = vand.u32 3, %v1253_v1  ;;  %v17574_v38 = vand.u32 2147483647, %v13643_v30  ;;  %v2108_v17 = vsel %vm2107_vm3, %v2106_v24, 0 }
 0x1aa   : > { %17700 = vst [vmem:[#allocation16_spill] sm:$0xff] %v13785_v18  ;;  %v7587_v29 = vsel %vm7580_vm15, %v1679_v4, %v5000_v12  ;;  %v1964_v46 = vsub.s32 4294967266, %v13771_v53  ;;  %v1847_v48 = vshll.u32 %v13780_v26, 30  ;;  %v2110_v33 = vand.u32 31, %v2108_v17 }
 0x1ab   : > { %v1260_v10 = vxor.u32 2147483648, %v13773_v63  ;;  %v1453_v54 = vsel %vm1370_vm13, %v1452_v56, %v1451_v23  ;;  %v1457_v58 = vsel %vm13767_vm14, 0, %v1455_v0  ;;  %v729_v21 = vsel %vm17602_vm1, %v13535_v39, %v633_v43  ;;  %v17701_v23 = vld [vmem:[#allocation20_spill] sm:$0xff] }
 0x1ac   : > { %v13802_v6 = vpop.eup %12238  ;;  %vm4584_vm7 = vcmp.eq.s32.totalorder %v13775_v25, 2  ;;  %v13805_v1 = vsub.s32 %v1844_v59, %v1847_v48  ;;  %v2111_v62 = vsub.s32 32, %v2110_v33  ;;  %v13810_v34 = vsel %vm17602_vm1, %v13564_v2, %v641_v19 }
 0x1ad   : > { %v13815_v22 = vsel %vm17590_vm6, %v17701_v23, %v7587_v29  ;;  %vm1259_vm5 = vcmp.eq.s32.totalorder %v13787_v45, 2  ;;  %v1960_v39 = vsub.s32 32, %v13771_v53  ;;  %v2103_v24 = vand.u32 8388607, %v17574_v38 }
 0x1ae   : > { %v1456_v59 = vsel %vm13767_vm14, %v13178_v16, %v1453_v54  ;;  %v13824_v4 = vadd.s32 3, %v1457_v58  ;;  %v1965_v2 = vadd.s32 127, %v1964_v46  ;;  %v1850_v12 = vsub.s32 0, %v13805_v1 }
 0x1af   : > { %v13829_v0 = vsel %vm1259_vm5, %v1260_v10, %v13802_v6  ;;  %v13831_v43 = vand.u32 3, %v1457_v58  ;;  %v1944_v19 = vadd.s32 %v13615_v35, %v13595_v49  ;;  %v13838_v20 = vsel %vm4584_vm7, %v1260_v10, %v13802_v6 }
 0x1b0   : > { %v10905_v29 = vmin.u32 %v1850_v12, %v13805_v1  ;;  %v2114_v46 = vshrl.u32 %v17638_v52, %v2111_v62  ;;  %v2117_v48 = vshrl.u32 %v17639_v36, %v2111_v62  ;;  %12240 = vcosq.f32 %v1456_v59 }
 0x1b1   : > { %v1962_v54 = vshrl.u32 %v1944_v19, %v1960_v39  ;;  %v2104_v23 = vor.u32 8388608, %v2103_v24  ;;  %v2120_v58 = vshrl.u32 %v17640_v13, %v2111_v62  ;;  %v1966_v38 = vshll.u32 %v1965_v2, 23 }
 0x1b2   : > { %v2109_v56 = vshrl.u32 %v2108_v17, 5  ;;  %v2113_v49 = vshll.u32 %v17644_v42, %v2110_v33  ;;  %v2116_v35 = vshll.u32 %v17638_v52, %v2110_v33  ;;  %v1852_v60 = vclz %v10905_v29 }
 0x1b3   : > { %v2119_v10 = vshll.u32 %v17639_v36, %v2110_v33  ;;  %v2122_v12 = vshll.u32 %v17640_v13, %v2110_v33  ;;  %v2123_v37 = vshrl.u32 %v17641_v31, %v2111_v62  ;;  %v2125_v39 = vshll.u32 %v17641_v31, %v2110_v33 }
 0x1b4   : > { %v2115_v18 = vor.u32 %v2114_v46, %v2113_v49  ;;  %v2118_v27 = vor.u32 %v2117_v48, %v2116_v35  ;;  %v2126_v24 = vshrl.u32 %v17642_v5, %v2111_v62  ;;  %vm1256_vm9 = vcmp.eq.s32.totalorder %v13787_v45, 0 }
 0x1b5   : > { %vm4581_vm0 = vcmp.eq.s32.totalorder %v13775_v25, 0  ;;  %v1961_v17 = vshll.u32 %v13691_v41, %v13771_v53  ;;  %v2121_v2 = vor.u32 %v2120_v58, %v2119_v10  ;;  %v2124_v19 = vor.u32 %v2123_v37, %v2122_v12 }
 0x1b6   : > { %v13858_v29 = vsel %vm17601_vm2, %v13578_v9, %v729_v21  ;;  %12242 = vsinq.f32 %v1456_v59  ;;  %v1967_v46 = vor.u32 4788187, %v1966_v38  ;;  %v1974_v33 = vsub.s32 4, %v13672_v15 }
 0x1b7   : > { %17702 = vst [vmem:[#allocation20_spill] sm:$0xff] %v13858_v29  ;;  %v2127_v48 = vor.u32 %v2126_v24, %v2125_v39  ;;  %v1963_v49 = vor.u32 %v1962_v54, %v1961_v17  ;;  %v10906_v35 = vadd.s32 4294967294, %v1852_v60  ;;  %vm2128_vm11 = vcmp.lt.s32.totalorder %v2109_v56, 1 }
 0x1b8   : > { %v13861_v28 = vshll.u32 %v2104_v23, 8  ;;  %vm1255_vm8 = vcmp.lt.s32.totalorder %v13787_v45, 2  ;;  %vm4580_vm12 = vcmp.lt.s32.totalorder %v13775_v25, 2  ;;  %vm2130_vm13 = vcmp.lt.s32.totalorder %v2109_v56, 3 }
 0x1b9   : > { %vm2131_vm14 = vcmp.lt.s32.totalorder %v2109_v56, 4  ;;  %v2136_v41 = vsel %vm2128_vm11, %v2115_v18, %v2118_v27  ;;  %v13868_v9 = vmul.f32 %v12656_v55, %v13858_v29  ;;  %v2140_v38 = vsel %vm2128_vm11, %v2118_v27, %v2121_v2 }
 0x1ba   : > { %v2133_v37 = vsel %vm2131_vm14, %v2121_v2, 2102212464  ;;  %v2137_v53 = vsel %vm2131_vm14, %v2124_v19, 920167782  ;;  %v2141_v60 = vsel %vm2131_vm14, %v2127_v48, 1326507024  ;;  %v2112_v59 = vshrl.u32 %v17644_v42, %v2111_v62  ;;  %v13873_v23 = vpop.eup %12240 }
 0x1bb   : > { %v1968_v21 = vand.u32 2147483647, %v1967_v46  ;;  %vm2129_vm3 = vcmp.lt.s32.totalorder %v2109_v56, 2  ;;  %v2138_v54 = vsel %vm2130_vm13, %v2121_v2, %v2137_v53  ;;  %vm1252_vm7 = vweird.f32 %v17680_v32  ;;  %v12185_v2 = vld [vmem:[%s17507_s2] sm:$0xff]  }
 0x1bc   : > { %v1970_v58 = vcvt.s32.f32 %v1963_v49  ;;  %vm10907_vm5 = vcmp.lt.s32.totalorder %v10906_v35, 0  ;;  %v2139_v10 = vsel %vm2129_vm3, %v2136_v41, %v2138_v54  ;;  %v2142_v12 = vsel %vm2130_vm13, %v2124_v19, %v2141_v60  ;;  %11571 = vmatprep.subr.bf16.mxu0 %v12185_v2 }
 0x1bd   : > { %v2132_v39 = vsel %vm2128_vm11, %v2112_v59, %v2115_v18  ;;  %v2134_v24 = vsel %vm2130_vm13, %v2118_v27, %v2133_v37  ;;  %v2143_v17 = vsel %vm2129_vm3, %v2140_v38, %v2142_v12  ;;  %v1995_v62 = vand.u32 2139095040, %v13868_v9  ;;  %11572 = vmatpush3.bf16.msra.mxu0 %v12185_v2 }
 0x1be   : > { %v13886_v46 = vmul.u32.u64.low %v13861_v28, %v2143_v17  ;;  %v13887_v48 = vmul.u32.u64.high %v13861_v28, %v2143_v17, %v13886_v46  ;;  %v13890_v49 = vmul.u32.u64.low %v13861_v28, %v2139_v10  ;;  %v13891_v41 = vmul.u32.u64.high %v13861_v28, %v2139_v10, %v13890_v49 }
 0x1bf   : > { %v17703_v18 = vxor.u32 2147483648, %v13802_v6  ;;  %v1971_v53 = vmul.f32 %v1970_v58, %v1968_v21  ;;  %v1996_v38 = vshrl.u32 %v1995_v62, 23  ;;  %v13906_v60 = vpack.c.bf16 %v13524_v7, %v13815_v22  ;;  %v12186_v58 = vld [vmem:[%s17507_s2 + $0x8] sm:$0xff]  }
 0x1c0   : > { %v17706_v59 = vand.u32 2147483647, %v13401_v14  ;;  %v2135_v6 = vsel %vm2129_vm3, %v2132_v39, %v2134_v24  ;;  %v12243_v10 = vpop.eup %12242  ;;  %v13921_v7 = vsel %vm10907_vm5, 0, %v10906_v35  ;;  %vm4786_vm13 = vcmp.lt.s32.totalorder %v13831_v43, 2  ;;  %11573 = vmatprep.subr.bf16.mxu0 %v12186_v58 }
 0x1c1   : > { %v1258_v27 = vsel %vm1256_vm9, %v13773_v63, %v17703_v18  ;;  %v17704_v19 = vmov %v17703_v18  ;;  %17705 = vst [vmem:[#allocation31_spill] sm:$0xff] %v13906_v60  ;;  %vm1890_vm9 = vcmp.lt.s32.totalorder %v13401_v14, 0  ;;  %v10912_v22 = vadd.s32 4294967169, %v1996_v38  ;;  %11574 = vmatpush3.bf16.msra.mxu0 %v12186_v58  ;;  %v17709_v58 = vld [vmem:[#allocation22_spill] sm:$0xff] }
 0x1c2   : > { %v4583_v37 = vsel %vm4581_vm0, %v13773_v63, %v17704_v19  ;;  %vm13910_vm11 = vcmp.le.f32.partialorder %v17706_v59, 0.7853982  ;;  %v1462_v63 = vand.u32 3, %v13824_v4  ;;  %v1975_v21 = vsel %vm1890_vm9, %v1974_v33, %v13672_v15 }
 0x1c3   : > { %v1262_v56 = vsel %vm1255_vm8, %v1258_v27, %v13829_v0  ;;  %v4587_v4 = vsel %vm4580_vm12, %v4583_v37, %v13838_v20  ;;  %vm2153_vm0 = vc.u32 %v13887_v48, %v13890_v49  ;;  %v2154_v15 = vadd.s32 1, %v13891_v41 }
 0x1c4   : > { %vm4787_vm14 = vcmp.eq.s32.totalorder %v13831_v43, 0  ;;  %v1972_v33 = vxor.u32 2147483648, %v1971_v53  ;;  %v2151_v35 = vmul.u32 %v13861_v28, %v2135_v6  ;;  %v2002_v12 = vadd.s32 1, %v10912_v22 }
 0x1c5   : > { %v1468_v45 = vxor.u32 2147483648, %v13873_v23  ;;  %v1977_v25 = vsel %vm13910_vm11, 0, %v1975_v21  ;;  %v1860_v0 = vsub.s32 4294967266, %v13921_v7  ;;  %v2155_v20 = vsel %vm2153_vm0, %v2154_v15, %v13891_v41 }
 0x1c6   : > { %v1263_v39 = vsel %vm1252_vm7, nan, %v1262_v56  ;;  %v4588_v24 = vsel %vm1252_vm7, nan, %v4587_v4  ;;  %v1465_v17 = vxor.u32 2147483648, %v12243_v10  ;;  %v2156_v28 = vadd.s32 %v2155_v20, %v2151_v35 }
 0x1c7   : > { %vm1464_vm8 = vcmp.eq.s32.totalorder %v1462_v63, 0  ;;  %vm1467_vm12 = vcmp.eq.s32.totalorder %v1462_v63, 2  ;;  %vm4790_vm3 = vcmp.eq.s32.totalorder %v13831_v43, 2  ;;  %vm2003_vm5 = vcmp.gt.s32.totalorder %v2002_v12, 0 }
 0x1c8   : > { %v1973_v62 = vsel %vm1890_vm9, %v1972_v33, %v1971_v53  ;;  %v1981_v2 = vadd.s32 3, %v1977_v25  ;;  %v2157_v46 = vadd.s32 536870912, %v2156_v28  ;;  %v2004_v41 = vsel %vm2003_vm5, %v2002_v12, 0 }
 0x1c9   : > { %v7583_v18 = vsel %vm7580_vm15, %v1263_v39, %v4588_v24  ;;  %v1469_v27 = vsel %vm1467_vm12, %v1468_v45, %v12243_v10  ;;  %v1861_v19 = vadd.s32 127, %v1860_v0  ;;  %v2006_v32 = vand.u32 31, %v2004_v41 }
 0x1ca   : > { %v1466_v37 = vsel %vm1464_vm8, %v13873_v23, %v1465_v17  ;;  %v4789_v38 = vsel %vm4787_vm14, %v13873_v23, %v1465_v17  ;;  %v4792_v59 = vsel %vm4790_vm3, %v1468_v45, %v12243_v10  ;;  %v13956_v6 = vshrl.u32 %v2157_v46, 30 }
 0x1cb   : > { %vm1463_vm7 = vcmp.lt.s32.totalorder %v1462_v63, 2  ;;  %v1976_v53 = vsel %vm13910_vm11, %v13401_v14, %v1973_v62  ;;  %v1856_v21 = vsub.s32 32, %v13921_v7  ;;  %v13962_v22 = vsub.s32 32, %v2006_v32 }
 0x1cc   : > { %v13967_v56 = vsel %vm17590_vm6, %v17709_v58, %v7583_v18  ;;  %v13969_v4 = vand.u32 3, %v1981_v2  ;;  %v13971_v23 = vand.u32 3, %v1977_v25  ;;  %v2159_v10 = vshll.u32 %v13956_v6, 30 }
 0x1cd   : > { %vm1460_vm9 = vweird.f32 %v13178_v16  ;;  %v1470_v63 = vsel %vm1463_vm7, %v1466_v37, %v1469_v27  ;;  %v4793_v54 = vsel %vm4786_vm13, %v4789_v38, %v4792_v59  ;;  %v1840_v15 = vadd.s32 %v13700_v44, %v13713_v57 }
 0x1ce   : > { %v1862_v33 = vshll.u32 %v1861_v19, 23  ;;  %12244 = vcosq.f32 %v1976_v53  ;;  %v13979_v35 = vsub.s32 %v2156_v28, %v2159_v10  ;;  %v17577_v12 = vand.u32 2147483647, %v13868_v9 }
 0x1cf   : > { %v2019_v45 = vshrl.u32 %v17641_v31, %v13962_v22  ;;  %v1857_v25 = vshll.u32 %v13805_v1, %v13921_v7  ;;  %v1858_v0 = vshrl.u32 %v1840_v15, %v1856_v21  ;;  %v2010_v43 = vshrl.u32 %v17638_v52, %v13962_v22 }
 0x1d0   : > { %v2018_v20 = vshll.u32 %v17640_v13, %v2006_v32  ;;  %vm1786_vm11 = vcmp.lt.s32.totalorder %v13506_v47, 0  ;;  %v2162_v44 = vsub.s32 0, %v13979_v35  ;;  %v13991_v57 = vshrl.u32 %v2004_v41, 5 }
 0x1d1   : > { %v2013_v39 = vshrl.u32 %v17639_v36, %v13962_v22  ;;  %v2016_v24 = vshrl.u32 %v17640_v13, %v13962_v22  ;;  %v1863_v17 = vor.u32 4788187, %v1862_v33  ;;  %v2009_v1 = vshll.u32 %v17644_v42, %v2006_v32  ;;  %v17713_v33 = vld [vmem:[#allocation6_spill] sm:$0xff] }
 0x1d2   : > { %v2020_v7 = vor.u32 %v2019_v45, %v2018_v20  ;;  %v2022_v28 = vshrl.u32 %v17642_v5, %v13962_v22  ;;  %v10917_v62 = vmin.u32 %v2162_v44, %v13979_v35  ;;  %v1999_v2 = vand.u32 8388607, %v17577_v12  ;;  %v14024_v20 = vpop.permute.xlu1 %503 }
 0x1d3   : > { %v2012_v46 = vshll.u32 %v17638_v52, %v2006_v32  ;;  %v2015_v41 = vshll.u32 %v17639_v36, %v2006_v32  ;;  %12246 = vsinq.f32 %v1976_v53  ;;  %v1859_v18 = vor.u32 %v1858_v0, %v1857_v25 }
 0x1d4   : > { %v2011_v27 = vor.u32 %v2010_v43, %v2009_v1  ;;  %v2021_v19 = vshll.u32 %v17641_v31, %v2006_v32  ;;  %v2164_v37 = vclz %v10917_v62  ;;  %vm2027_vm0 = vcmp.lt.s32.totalorder %v13991_v57, 4 }
 0x1d5   : > { %v2014_v38 = vor.u32 %v2013_v39, %v2012_v46  ;;  %v2017_v59 = vor.u32 %v2016_v24, %v2015_v41  ;;  %v17710_v21 = vand.u32 2147483647, %v13506_v47  ;;  %v1870_v10 = vsub.s32 4, %v13780_v26 }
 0x1d6   : > { %v2023_v15 = vor.u32 %v2022_v28, %v2021_v19  ;;  %v2033_v53 = vsel %vm2027_vm0, %v2020_v7, 920167782  ;;  %v14020_v32 = vsel %vm17601_vm2, %v17713_v33, %v13810_v34  ;;  %v1471_v45 = vsel %vm1460_vm9, nan, %v1470_v63 }
 0x1d7   : > { %vm14009_vm13 = vcmp.le.f32.partialorder %v17710_v21, 0.7853982  ;;  %17714 = vst [vmem:[#allocation22_spill] sm:$0xff] %v14020_v32  ;;  %v1864_v25 = vand.u32 2147483647, %v1863_v17  ;;  %v10918_v0 = vadd.s32 4294967294, %v2164_v37  ;;  %v1866_v39 = vcvt.s32.f32 %v1859_v18 }
 0x1d8   : > { %v2000_v43 = vor.u32 8388608, %v1999_v2  ;;  %v4794_v44 = vsel %vm1460_vm9, nan, %v4793_v54  ;;  %vm2024_vm14 = vcmp.lt.s32.totalorder %v13991_v57, 1  ;;  %vm2026_vm8 = vcmp.lt.s32.totalorder %v13991_v57, 3  ;;  %v14030_v24 = vpop.eup %12244  ;;  %v17715_v37 = vld [vmem:[#allocation26_spill] sm:$0xff] }
 0x1d9   : > { %vm10919_vm12 = vcmp.lt.s32.totalorder %v10918_v0, 0  ;;  %v2032_v34 = vsel %vm2024_vm14, %v2011_v27, %v2014_v38  ;;  %v2034_v63 = vsel %vm2026_vm8, %v2017_v59, %v2033_v53  ;;  %v14038_v17 = vmul.f32 %v12656_v55, %v14020_v32  ;;  %v509_v53 = vpop.permute.xlu1 %508 }
 0x1da   : > { %v1871_v16 = vsel %vm1786_vm11, %v1870_v10, %v13780_v26  ;;  %v14043_v54 = vsel %vm10919_vm12, 0, %v10918_v0  ;;  %v2036_v1 = vsel %vm2024_vm14, %v2014_v38, %v2017_v59  ;;  %v2037_v28 = vsel %vm2027_vm0, %v2023_v15, 1326507024 }
 0x1db   : > { %v1867_v62 = vmul.f32 %v1866_v39, %v1864_v25  ;;  %vm2025_vm3 = vcmp.lt.s32.totalorder %v13991_v57, 2  ;;  %v2029_v2 = vsel %vm2027_vm0, %v2017_v59, 2102212464  ;;  %v2040_v46 = vshll.u32 %v2000_v43, 8 }
 0x1dc   : > { %v2172_v41 = vsub.s32 4294967266, %v14043_v54  ;;  %v2008_v26 = vshrl.u32 %v17644_v42, %v13962_v22  ;;  %v2035_v18 = vsel %vm2025_vm3, %v2032_v34, %v2034_v63  ;;  %v2038_v19 = vsel %vm2026_vm8, %v2020_v7, %v2037_v28 }
 0x1dd   : > { %v14061_v21 = vpack.c.bf16 %v17715_v37, %v13967_v56  ;;  %v7585_v10 = vsel %vm7580_vm15, %v1471_v45, %v4794_v44  ;;  %v2039_v59 = vsel %vm2025_vm3, %v2036_v1, %v2038_v19  ;;  %v2203_v15 = vand.u32 2139095040, %v14038_v17  ;;  %v12247_v22 = vpop.eup %12246  ;;  %v653_v57 = vpop.permute.xlu1 %652 }
 0x1de   : > { %v2028_v33 = vsel %vm2024_vm14, %v2008_v26, %v2011_v27  ;;  %v2030_v7 = vsel %vm2026_vm8, %v2014_v38, %v2029_v2  ;;  %v14072_v25 = vmul.u32.u64.low %v2040_v46, %v2039_v59  ;;  %v14073_v0 = vmul.u32.u64.high %v2040_v46, %v2039_v59, %v14072_v25 }
 0x1df   : > { %17716 = vst [vmem:[#allocation6_spill] sm:$0xff] %v14061_v21  ;;  %v1873_v56 = vsel %vm14009_vm13, 0, %v1871_v16  ;;  %v14077_v45 = vmul.u32.u64.low %v2040_v46, %v2035_v18  ;;  %v14078_v43 = vmul.u32.u64.high %v2040_v46, %v2035_v18, %v14077_v45  ;;  %v2204_v44 = vshrl.u32 %v2203_v15, 23  ;;  %v17717_v16 = vld [vmem:[#allocation24_spill] sm:$0xff] }
 0x1e0   : > { %vm1984_vm5 = vcmp.eq.s32.totalorder %v13969_v4, 0  ;;  %vm5302_vm7 = vcmp.eq.s32.totalorder %v13971_v23, 0  ;;  %vm5305_vm9 = vcmp.eq.s32.totalorder %v13971_v23, 2  ;;  %v1868_v27 = vxor.u32 2147483648, %v1867_v62 }
 0x1e1   : > { %v2173_v39 = vadd.s32 127, %v2172_v41  ;;  %vm1983_vm0 = vcmp.lt.s32.totalorder %v13969_v4, 2  ;;  %vm1987_vm14 = vcmp.eq.s32.totalorder %v13969_v4, 2  ;;  %v1988_v38 = vxor.u32 2147483648, %v14030_v24 }
 0x1e2   : > { %v2031_v34 = vsel %vm2025_vm3, %v2028_v33, %v2030_v7  ;;  %v10920_v63 = vadd.s32 4294967169, %v2204_v44  ;;  %v14092_v1 = vsel %vm17590_vm6, %v17717_v16, %v7585_v10  ;;  %v1985_v28 = vxor.u32 2147483648, %v12247_v22 }
 0x1e3   : > { %v1877_v2 = vadd.s32 3, %v1873_v56  ;;  %vm2049_vm8 = vc.u32 %v14073_v0, %v14077_v45  ;;  %v2168_v41 = vsub.s32 32, %v14043_v54  ;;  %v2050_v26 = vadd.s32 1, %v14078_v43 }
 0x1e4   : > { %v17576_v18 = vand.u32 2147483647, %v14038_v17  ;;  %v2210_v19 = vadd.s32 1, %v10920_v63  ;;  %v1869_v37 = vsel %vm1786_vm11, %v1868_v27, %v1867_v62  ;;  %v14101_v59 = vand.u32 3, %v1873_v56 }
 0x1e5   : > { %v2174_v10 = vshll.u32 %v2173_v39, 23  ;;  %v2047_v15 = vmul.u32 %v2040_v46, %v2031_v34  ;;  %v1989_v33 = vsel %vm1987_vm14, %v1988_v38, %v12247_v22  ;;  %v2152_v7 = vadd.s32 %v13890_v49, %v13887_v48 }
 0x1e6   : > { %v2051_v25 = vsel %vm2049_vm8, %v2050_v26, %v14078_v43  ;;  %vm2211_vm12 = vcmp.gt.s32.totalorder %v2210_v19, 0  ;;  %v1986_v44 = vsel %vm1984_vm5, %v14030_v24, %v1985_v28  ;;  %v734_v62 = vsel %vm17602_vm1, %v509_v53, %v653_v57  ;;  %v17718_v26 = vld [vmem:[#allocation7_spill] sm:$0xff] }
 0x1e7   : > { %v2052_v63 = vadd.s32 %v2051_v25, %v2047_v15  ;;  %v2212_v16 = vsel %vm2211_vm12, %v2210_v19, 0  ;;  %vm5301_vm11 = vcmp.lt.s32.totalorder %v13971_v23, 2  ;;  %v1872_v46 = vsel %vm14009_vm13, %v13506_v47, %v1869_v37 }
 0x1e8   : > { %v2170_v56 = vshrl.u32 %v2152_v7, %v2168_v41  ;;  %v2207_v48 = vand.u32 8388607, %v17576_v18  ;;  %v2214_v49 = vand.u32 31, %v2212_v16  ;;  %v5307_v43 = vsel %vm5305_vm9, %v1988_v38, %v12247_v22 }
 0x1e9   : > { %v14121_v27 = vand.u32 3, %v1877_v2  ;;  %vm2098_vm3 = vcmp.lt.s32.totalorder %v13643_v30, 0  ;;  %v2175_v39 = vor.u32 4788187, %v2174_v10  ;;  %v2053_v53 = vadd.s32 536870912, %v2052_v63 }
 0x1ea   : > { %v5304_v34 = vsel %vm5302_vm7, %v14030_v24, %v1985_v28  ;;  %v2169_v58 = vshll.u32 %v13979_v35, %v14043_v54  ;;  %v2215_v41 = vsub.s32 32, %v2214_v49  ;;  %v14132_v19 = vsel %vm17601_vm2, %v17718_v26, %v734_v62 }
 0x1eb   : > { %17719 = vst [vmem:[#allocation26_spill] sm:$0xff] %v14132_v19  ;;  %v14136_v22 = vsel %vm1983_vm0, %v1986_v44, %v1989_v33  ;;  %12248 = vcosq.f32 %v1872_v46  ;;  %v2182_v38 = vsub.s32 4, %v13956_v6  ;;  %v14139_v2 = vshrl.u32 %v2053_v53, 30 }
 0x1ec   : > { %v2171_v57 = vor.u32 %v2170_v56, %v2169_v58  ;;  %v2208_v24 = vor.u32 8388608, %v2207_v48  ;;  %v2218_v28 = vshrl.u32 %v17638_v52, %v2215_v41  ;;  %v2221_v35 = vshrl.u32 %v17639_v36, %v2215_v41 }
 0x1ed   : > { %v2176_v54 = vand.u32 2147483647, %v2175_v39  ;;  %v2055_v37 = vshll.u32 %v14139_v2, 30  ;;  %v2224_v10 = vshrl.u32 %v17640_v13, %v2215_v41  ;;  %v14147_v4 = vmul.f32 %v12656_v55, %v14132_v19 }
 0x1ee   : > { %v2217_v15 = vshll.u32 %v17644_v42, %v2214_v49  ;;  %v2220_v33 = vshll.u32 %v17638_v52, %v2214_v49  ;;  %v2226_v7 = vshll.u32 %v17640_v13, %v2214_v49  ;;  %v2227_v25 = vshrl.u32 %v17641_v31, %v2215_v41 }
 0x1ef   : > { %v14153_v44 = vsub.s32 %v2052_v63, %v2055_v37  ;;  %v2213_v62 = vshrl.u32 %v2212_v16, 5  ;;  %v2223_v56 = vshll.u32 %v17639_v36, %v2214_v49  ;;  %v2230_v48 = vshrl.u32 %v17642_v5, %v2215_v41 }
 0x1f0   : > { %v17720_v39 = vand.u32 2147483647, %v13643_v30  ;;  %v2219_v58 = vor.u32 %v2218_v28, %v2217_v15  ;;  %v2222_v26 = vor.u32 %v2221_v35, %v2220_v33  ;;  %v2228_v18 = vor.u32 %v2227_v25, %v2226_v7 }
 0x1f1   : > { %v2229_v12 = vshll.u32 %v17641_v31, %v2214_v49  ;;  %v5308_v63 = vsel %vm5301_vm11, %v5304_v34, %v5307_v43  ;;  %12250 = vsinq.f32 %v1872_v46  ;;  %v2058_v16 = vsub.s32 0, %v14153_v44 }
 0x1f2   : > { %vm14159_vm13 = vcmp.le.f32.partialorder %v17720_v39, 0.7853982  ;;  %v2225_v37 = vor.u32 %v2224_v10, %v2223_v56  ;;  %vm1980_vm5 = vweird.f32 %v13401_v14  ;;  %v2178_v60 = vcvt.s32.f32 %v2171_v57 }
 0x1f3   : > { %v2183_v39 = vsel %vm2098_vm3, %v2182_v38, %v13956_v6  ;;  %v2231_v19 = vor.u32 %v2230_v48, %v2229_v12  ;;  %v2515_v28 = vand.u32 2139095040, %v14147_v4  ;;  %v10913_v35 = vmin.u32 %v2058_v16, %v14153_v44 }
 0x1f4   : > { %vm2232_vm7 = vcmp.lt.s32.totalorder %v2213_v62, 1  ;;  %vm2235_vm9 = vcmp.lt.s32.totalorder %v2213_v62, 4  ;;  %v2248_v23 = vshll.u32 %v2208_v24, 8  ;;  %v2179_v49 = vmul.f32 %v2178_v60, %v2176_v54 }
 0x1f5   : > { %v2216_v46 = vshrl.u32 %v17644_v42, %v2215_v41  ;;  %v2240_v43 = vsel %vm2232_vm7, %v2219_v58, %v2222_v26  ;;  %v2241_v34 = vsel %vm2235_vm9, %v2228_v18, 920167782  ;;  %v12249_v10 = vpop.eup %12248  ;;  %v2060_v57 = vclz %v10913_v35 }
 0x1f6   : > { %vm2234_vm0 = vcmp.lt.s32.totalorder %v2213_v62, 3  ;;  %v2237_v15 = vsel %vm2235_vm9, %v2225_v37, 2102212464  ;;  %v2244_v6 = vsel %vm2232_vm7, %v2222_v26, %v2225_v37  ;;  %vm2233_vm14 = vcmp.lt.s32.totalorder %v2213_v62, 2 }
 0x1f7   : > { %v2242_v12 = vsel %vm2234_vm0, %v2225_v37, %v2241_v34  ;;  %v2245_v38 = vsel %vm2235_vm9, %v2231_v19, 1326507024  ;;  %v2516_v33 = vshrl.u32 %v2515_v28, 23  ;;  %v10914_v7 = vadd.s32 4294967294, %v2060_v57 }
 0x1f8   : > { %v2236_v25 = vsel %vm2232_vm7, %v2216_v46, %v2219_v58  ;;  %v2243_v60 = vsel %vm2233_vm14, %v2240_v43, %v2242_v12  ;;  %v2246_v24 = vsel %vm2234_vm0, %v2228_v18, %v2245_v38  ;;  %v2238_v41 = vsel %vm2234_vm0, %v2222_v26, %v2237_v15  ;;  %v645_v26 = vpop.permute.xlu0 %644  ;;  %v810_v15 = vpop.permute.xlu1 %809 }
 0x1f9   : > { %v2247_v54 = vsel %vm2233_vm14, %v2244_v6, %v2246_v24  ;;  %v14179_v56 = vmul.u32.u64.low %v2248_v23, %v2243_v60  ;;  %v14180_v48 = vmul.u32.u64.high %v2248_v23, %v2243_v60, %v14179_v56  ;;  %v14185_v16 = vsel %vm14159_vm13, 0, %v2183_v39 }
 0x1fa   : > { %vm10915_vm8 = vcmp.lt.s32.totalorder %v10914_v7, 0  ;;  %v14187_v19 = vmul.u32.u64.low %v2248_v23, %v2247_v54  ;;  %v14188_v37 = vmul.u32.u64.high %v2248_v23, %v2247_v54, %v14187_v19  ;;  %v14192_v58 = vpack.c.bf16 %v13763_v3, %v14092_v1 }
 0x1fb   : > { %vm5199_vm12 = vcmp.eq.s32.totalorder %v14101_v59, 0  ;;  %vm5202_vm11 = vcmp.eq.s32.totalorder %v14101_v59, 2  ;;  %v2180_v18 = vxor.u32 2147483648, %v2179_v49  ;;  %v12251_v28 = vpop.eup %12250  ;;  %v1991_v39 = vsel %vm1980_vm5, nan, %v14136_v22 }
 0x1fc   : > { %17723 = vst [vmem:[#allocation24_spill] sm:$0xff] %v14192_v58  ;;  %v14199_v35 = vsel %vm10915_vm8, 0, %v10914_v7  ;;  %v2239_v46 = vsel %vm2233_vm14, %v2236_v25, %v2238_v41  ;;  %v10932_v43 = vadd.s32 4294967169, %v2516_v33  ;;  %v5309_v3 = vsel %vm1980_vm5, nan, %v5308_v63 }
 0x1fd   : > { %v1884_v1 = vxor.u32 2147483648, %v12249_v10  ;;  %v2189_v34 = vadd.s32 3, %v14185_v16  ;;  %v2258_v57 = vadd.s32 1, %v14180_v48  ;;  %vm1880_vm7 = vcmp.eq.s32.totalorder %v14121_v27, 0 }
 0x1fe   : > { %vm1883_vm9 = vcmp.eq.s32.totalorder %v14121_v27, 2  ;;  %v732_v22 = vsel %vm17602_vm1, %v13752_v61, %v645_v26  ;;  %v17580_v62 = vand.u32 2147483647, %v14147_v4  ;;  %v2181_v14 = vsel %vm2098_vm3, %v2180_v18, %v2179_v49 }
 0x1ff   : > { %v2068_v63 = vsub.s32 4294967266, %v14199_v35  ;;  %v2255_v6 = vmul.u32 %v2248_v23, %v2239_v46  ;;  %vm2257_vm5 = vc.u32 %v14188_v37, %v14179_v56  ;;  %v14219_v12 = vsel %vm7580_vm15, %v1991_v39, %v5309_v3 }
 0x200   : > { %v1881_v38 = vxor.u32 2147483648, %v12251_v28  ;;  %v2259_v33 = vsel %vm2257_vm5, %v2258_v57, %v14180_v48  ;;  %v2522_v61 = vadd.s32 1, %v10932_v43  ;;  %v14222_v7 = vsel %vm1883_vm9, %v1884_v1, %v12251_v28 }
 0x201   : > { %v14224_v25 = vand.u32 3, %v2189_v34  ;;  %v2260_v60 = vadd.s32 %v2259_v33, %v2255_v6  ;;  %v14228_v49 = vsel %vm17601_vm2, %v810_v15, %v732_v22  ;;  %v2184_v23 = vsel %vm14159_vm13, %v13643_v30, %v2181_v14 }
 0x202   : > { %17724 = vst [vmem:[#allocation7_spill] sm:$0xff] %v14228_v49  ;;  %v2064_v24 = vsub.s32 32, %v14199_v35  ;;  %v2519_v41 = vand.u32 8388607, %v17580_v62  ;;  %vm2523_vm3 = vcmp.gt.s32.totalorder %v2522_v61, 0  ;;  %v14238_v54 = vsel %vm5202_vm11, %v1884_v1, %v12251_v28 }
 0x203   : > { %v2069_v48 = vadd.s32 127, %v2068_v63  ;;  %v2261_v19 = vadd.s32 536870912, %v2260_v60  ;;  %v2524_v18 = vsel %vm2523_vm3, %v2522_v61, 0  ;;  %v14242_v26 = vsel %vm1880_vm7, %v12249_v10, %v1881_v38 }
 0x204   : > { %v14246_v53 = vsel %vm5199_vm12, %v12249_v10, %v1881_v38  ;;  %v2048_v39 = vadd.s32 %v14077_v45, %v14073_v0  ;;  %v2526_v46 = vand.u32 31, %v2524_v18  ;;  %12252 = vcosq.f32 %v2184_v23 }
 0x205   : > { %v14251_v28 = vshrl.u32 %v2261_v19, 30  ;;  %v14255_v3 = vmul.f32 %v12656_v55, %v14228_v49  ;;  %12254 = vsinq.f32 %v2184_v23  ;;  %v2520_v34 = vor.u32 8388608, %v2519_v41 }
 0x206   : > { %v2066_v1 = vshrl.u32 %v2048_v39, %v2064_v24  ;;  %v2527_v57 = vsub.s32 32, %v2526_v46  ;;  %v2070_v22 = vshll.u32 %v2069_v48, 23  ;;  %v2529_v15 = vshll.u32 %v17644_v42, %v2526_v46 }
 0x207   : > { %v2263_v10 = vshll.u32 %v14251_v28, 30  ;;  %v2532_v0 = vshll.u32 %v17638_v52, %v2526_v46  ;;  %v2535_v63 = vshll.u32 %v17639_v36, %v2526_v46  ;;  %v2525_v33 = vshrl.u32 %v2524_v18, 5 }
 0x208   : > { %v2530_v45 = vshrl.u32 %v17638_v52, %v2527_v57  ;;  %v2533_v14 = vshrl.u32 %v17639_v36, %v2527_v57  ;;  %v2536_v6 = vshrl.u32 %v17640_v13, %v2527_v57  ;;  %v2538_v61 = vshll.u32 %v17640_v13, %v2526_v46 }
 0x209   : > { %v14264_v38 = vsub.s32 %v2260_v60, %v2263_v10  ;;  %v2539_v23 = vshrl.u32 %v17641_v31, %v2527_v57  ;;  %v2065_v24 = vshll.u32 %v14153_v44, %v14199_v35  ;;  %vm1879_vm13 = vcmp.lt.s32.totalorder %v14121_v27, 2 }
 0x20a   : > { %v2531_v41 = vor.u32 %v2530_v45, %v2529_v15  ;;  %v2534_v48 = vor.u32 %v2533_v14, %v2532_v0  ;;  %v2537_v19 = vor.u32 %v2536_v6, %v2535_v63  ;;  %vm5198_vm0 = vcmp.lt.s32.totalorder %v14101_v59, 2 }
 0x20b   : > { %v2266_v39 = vsub.s32 0, %v14264_v38  ;;  %v2540_v62 = vor.u32 %v2539_v23, %v2538_v61  ;;  %v2541_v60 = vshll.u32 %v17641_v31, %v2526_v46  ;;  %v2542_v18 = vshrl.u32 %v17642_v5, %v2527_v57 }
 0x20c   : > { %vm1994_vm14 = vcmp.lt.s32.totalorder %v13868_v9, 0  ;;  %v2067_v10 = vor.u32 %v2066_v1, %v2065_v24  ;;  %v2071_v43 = vor.u32 4788187, %v2070_v22  ;;  %v2560_v32 = vshll.u32 %v2520_v34, 8 }
 0x20d   : > { %v2307_v44 = vand.u32 2139095040, %v14255_v3  ;;  %v10921_v35 = vmin.u32 %v2266_v39, %v14264_v38  ;;  %v2543_v15 = vor.u32 %v2542_v18, %v2541_v60  ;;  %vm2544_vm8 = vcmp.lt.s32.totalorder %v2525_v33, 1 }
 0x20e   : > { %vm2547_vm12 = vcmp.lt.s32.totalorder %v2525_v33, 4  ;;  %v2528_v0 = vshrl.u32 %v17644_v42, %v2527_v57  ;;  %vm2545_vm11 = vcmp.lt.s32.totalorder %v2525_v33, 2  ;;  %v2552_v46 = vsel %vm2544_vm8, %v2531_v41, %v2534_v48  ;;  %v14280_v14 = vpop.eup %12252 }
 0x20f   : > { %v2549_v45 = vsel %vm2547_vm12, %v2537_v19, 2102212464  ;;  %vm1876_vm7 = vweird.f32 %v13506_v47  ;;  %v17725_v1 = vand.u32 2147483647, %v13868_v9  ;;  %v2268_v22 = vclz %v10921_v35  ;;  %v14290_v57 = vpop.eup %12254 }
 0x210   : > { %vm2546_vm5 = vcmp.lt.s32.totalorder %v2525_v33, 3  ;;  %v2553_v63 = vsel %vm2547_vm12, %v2540_v62, 920167782  ;;  %v2556_v6 = vsel %vm2544_vm8, %v2534_v48, %v2537_v19  ;;  %v2548_v61 = vsel %vm2544_vm8, %v2528_v0, %v2531_v41 }
 0x211   : > { %vm14285_vm9 = vcmp.le.f32.partialorder %v17725_v1, 0.7853982  ;;  %v2550_v23 = vsel %vm2546_vm5, %v2534_v48, %v2549_v45  ;;  %v2554_v24 = vsel %vm2546_vm5, %v2537_v19, %v2553_v63  ;;  %v2557_v39 = vsel %vm2547_vm12, %v2543_v15, 1326507024 }
 0x212   : > { %v10922_v60 = vadd.s32 4294967294, %v2268_v22  ;;  %v2555_v18 = vsel %vm2545_vm11, %v2552_v46, %v2554_v24  ;;  %v2558_v49 = vsel %vm2546_vm5, %v2540_v62, %v2557_v39  ;;  %v2308_v1 = vshrl.u32 %v2307_v44, 23 }
 0x213   : > { %v2072_v58 = vand.u32 2147483647, %v2071_v43  ;;  %v2559_v21 = vsel %vm2545_vm11, %v2556_v6, %v2558_v49  ;;  %v14295_v35 = vmul.u32.u64.low %v2560_v32, %v2555_v18  ;;  %v14296_v29 = vmul.u32.u64.high %v2560_v32, %v2555_v18, %v14295_v35 }
 0x214   : > { %vm10923_vm3 = vcmp.lt.s32.totalorder %v10922_v60, 0  ;;  %v2551_v55 = vsel %vm2545_vm11, %v2548_v61, %v2550_v23  ;;  %v14300_v41 = vmul.u32.u64.low %v2560_v32, %v2559_v21  ;;  %v14301_v48 = vmul.u32.u64.high %v2560_v32, %v2559_v21, %v14300_v41 }
 0x215   : > { %v1886_v19 = vsel %vm1879_vm13, %v14242_v26, %v14222_v7  ;;  %v5205_v62 = vsel %vm5198_vm0, %v14246_v53, %v14238_v54  ;;  %v2074_v49 = vcvt.s32.f32 %v2067_v10  ;;  %v2271_v43 = vsel %vm10923_vm3, 0, %v10922_v60  ;;  %v649_v10 = vpop.permute.xlu0 %648  ;;  %v17729_v41 = vld [vmem:[#allocation5_spill] sm:$0xff] }
 0x216   : > { %v17728_v44 = vsub.s32 4, %v14139_v2  ;;  %v2256_v21 = vadd.s32 %v14179_v56, %v14188_v37  ;;  %v2272_v15 = vsub.s32 32, %v2271_v43  ;;  %v2276_v0 = vsub.s32 4294967266, %v2271_v43 }
 0x217   : > { %v2075_v27 = vmul.f32 %v2074_v49, %v2072_v58  ;;  %v2567_v7 = vmul.u32 %v2560_v32, %v2551_v55  ;;  %v2570_v26 = vadd.s32 1, %v14296_v29  ;;  %v10924_v45 = vadd.s32 4294967169, %v2308_v1 }
 0x218   : > { %v2079_v33 = vsel %vm1994_vm14, %v17728_v44, %v14139_v2  ;;  %v2273_v59 = vshll.u32 %v14264_v38, %v2271_v43  ;;  %v2274_v54 = vshrl.u32 %v2256_v21, %v2272_v15  ;;  %v2277_v53 = vadd.s32 127, %v2276_v0 }
 0x219   : > { %vm2569_vm13 = vc.u32 %v14301_v48, %v14295_v35  ;;  %v1887_v2 = vsel %vm1876_vm7, nan, %v1886_v19  ;;  %v5206_v56 = vsel %vm1876_vm7, nan, %v5205_v62  ;;  %v2081_v55 = vsel %vm14285_vm9, 0, %v2079_v33 }
 0x21a   : > { %v2571_v32 = vsel %vm2569_vm13, %v2570_v26, %v14296_v29  ;;  %v2275_v37 = vor.u32 %v2274_v54, %v2273_v59  ;;  %v2278_v58 = vshll.u32 %v2277_v53, 23  ;;  %v2304_v46 = vand.u32 2147483647, %v14255_v3 }
 0x21b   : > { %v2572_v38 = vadd.s32 %v2571_v32, %v2567_v7  ;;  %v14334_v22 = vsel %vm17590_vm6, %v13380_v40, %v14219_v12  ;;  %v2076_v63 = vxor.u32 2147483648, %v2075_v27  ;;  %v733_v47 = vsel %vm17602_vm1, %v14024_v20, %v649_v10  ;;  %v814_v12 = vpop.permute.xlu1 %813 }
 0x21c   : > { %v2314_v6 = vadd.s32 1, %v10924_v45  ;;  %v7589_v29 = vsel %vm7580_vm15, %v1887_v2, %v5206_v56  ;;  %v14342_v61 = vand.u32 3, %v14185_v16  ;;  %v2085_v23 = vadd.s32 3, %v2081_v55 }
 0x21d   : > { %v2279_v24 = vor.u32 4788187, %v2278_v58  ;;  %vm2195_vm0 = vcmp.eq.s32.totalorder %v14224_v25, 2  ;;  %v2196_v39 = vxor.u32 2147483648, %v14280_v14  ;;  %v2573_v40 = vadd.s32 536870912, %v2572_v38 }
 0x21e   : > { %vm2315_vm8 = vcmp.gt.s32.totalorder %v2314_v6, 0  ;;  %v2282_v18 = vcvt.s32.f32 %v2275_v37  ;;  %v2311_v20 = vand.u32 8388607, %v2304_v46  ;;  %v14351_v16 = vsel %vm17590_vm6, %v17729_v41, %v7589_v29 }
 0x21f   : > { %v2280_v60 = vand.u32 2147483647, %v2279_v24  ;;  %v2316_v1 = vsel %vm2315_vm8, %v2314_v6, 0  ;;  %v2077_v19 = vsel %vm1994_vm14, %v2076_v63, %v2075_v27  ;;  %vm2202_vm12 = vcmp.lt.s32.totalorder %v14038_v17, 0 }
 0x220   : > { %v14356_v62 = vshrl.u32 %v2573_v40, 30  ;;  %v2318_v49 = vand.u32 31, %v2316_v1  ;;  %v14358_v43 = vand.u32 3, %v2085_v23  ;;  %v14360_v44 = vand.u32 3, %v2081_v55 }
 0x221   : > { %v2283_v33 = vmul.f32 %v2282_v18, %v2280_v60  ;;  %v14364_v21 = vsel %vm17601_vm2, %v814_v12, %v733_v47  ;;  %v2193_v15 = vxor.u32 2147483648, %v14290_v57  ;;  %v14372_v0 = vsel %vm2195_vm0, %v2196_v39, %v14290_v57 }
 0x222   : > { %v2575_v27 = vshll.u32 %v14356_v62, 30  ;;  %v2319_v7 = vsub.s32 32, %v2318_v49  ;;  %v2080_v26 = vsel %vm14285_vm9, %v13868_v9, %v2077_v19  ;;  %v2286_v45 = vsub.s32 4, %v14251_v28 }
 0x223   : > { %v2312_v59 = vor.u32 8388608, %v2311_v20  ;;  %v14379_v54 = vshrl.u32 %v2316_v1, 5  ;;  %v2284_v53 = vxor.u32 2147483648, %v2283_v33  ;;  %v2321_v2 = vshll.u32 %v17644_v42, %v2318_v49 }
 0x224   : > { %v14381_v10 = vsub.s32 %v2572_v38, %v2575_v27  ;;  %v2322_v56 = vshrl.u32 %v17638_v52, %v2319_v7  ;;  %v2324_v55 = vshll.u32 %v17638_v52, %v2318_v49  ;;  %v2325_v32 = vshrl.u32 %v17639_v36, %v2319_v7 }
 0x225   : > { %v2327_v37 = vshll.u32 %v17639_v36, %v2318_v49  ;;  %v2328_v34 = vshrl.u32 %v17640_v13, %v2319_v7  ;;  %12256 = vcosq.f32 %v2080_v26  ;;  %v2330_v63 = vshll.u32 %v17640_v13, %v2318_v49 }
 0x226   : > { %v2578_v58 = vsub.s32 0, %v14381_v10  ;;  %v2331_v38 = vshrl.u32 %v17641_v31, %v2319_v7  ;;  %12258 = vsinq.f32 %v2080_v26  ;;  %v17730_v47 = vand.u32 2147483647, %v14038_v17 }
 0x227   : > { %v2323_v29 = vor.u32 %v2322_v56, %v2321_v2  ;;  %v2326_v23 = vor.u32 %v2325_v32, %v2324_v55  ;;  %v2329_v24 = vor.u32 %v2328_v34, %v2327_v37  ;;  %vm2192_vm11 = vcmp.eq.s32.totalorder %v14224_v25, 0 }
 0x228   : > { %vm14394_vm14 = vcmp.le.f32.partialorder %v17730_v47, 0.7853982  ;;  %vm5511_vm7 = vcmp.eq.s32.totalorder %v14342_v61, 2  ;;  %v10933_v40 = vmin.u32 %v2578_v58, %v14381_v10  ;;  %v2332_v12 = vor.u32 %v2331_v38, %v2330_v63 }
 0x229   : > { %v2333_v60 = vshll.u32 %v17641_v31, %v2318_v49  ;;  %v2334_v18 = vshrl.u32 %v17642_v5, %v2319_v7  ;;  %v2285_v20 = vsel %vm2202_vm12, %v2284_v53, %v2283_v33  ;;  %v2320_v1 = vshrl.u32 %v17644_v42, %v2319_v7 }
 0x22a   : > { %vm2339_vm9 = vcmp.lt.s32.totalorder %v14379_v54, 4  ;;  %v14407_v41 = vshll.u32 %v2312_v59, 8  ;;  %vm5508_vm5 = vcmp.eq.s32.totalorder %v14342_v61, 0  ;;  %v2580_v19 = vclz %v10933_v40 }
 0x22b   : > { %v2335_v27 = vor.u32 %v2334_v18, %v2333_v60  ;;  %vm2336_vm3 = vcmp.lt.s32.totalorder %v14379_v54, 1  ;;  %v2341_v26 = vsel %vm2339_vm9, %v2329_v24, 2102212464  ;;  %vm2338_vm13 = vcmp.lt.s32.totalorder %v14379_v54, 3 }
 0x22c   : > { %v2344_v49 = vsel %vm2336_vm3, %v2323_v29, %v2326_v23  ;;  %v2345_v2 = vsel %vm2339_vm9, %v2332_v12, 920167782  ;;  %v2348_v56 = vsel %vm2336_vm3, %v2326_v23, %v2329_v24  ;;  %v10934_v55 = vadd.s32 4294967294, %v2580_v19 }
 0x22d   : > { %vm2337_vm0 = vcmp.lt.s32.totalorder %v14379_v54, 2  ;;  %v2346_v33 = vsel %vm2338_vm13, %v2329_v24, %v2345_v2  ;;  %v2349_v7 = vsel %vm2339_vm9, %v2335_v27, 1326507024  ;;  %v2340_v53 = vsel %vm2336_vm3, %v2320_v1, %v2323_v29 }
 0x22e   : > { %v2342_v59 = vsel %vm2338_vm13, %v2326_v23, %v2341_v26  ;;  %v2347_v32 = vsel %vm2337_vm0, %v2344_v49, %v2346_v33  ;;  %v2350_v37 = vsel %vm2338_vm13, %v2332_v12, %v2349_v7  ;;  %vm2191_vm8 = vcmp.lt.s32.totalorder %v14224_v25, 2  ;;  %v12187_v25 = vld [vmem:[%s17507_s2 + $0x10] ss:$0 sps:$4 sm:$0x11]  }
 0x22f   : > { %vm5507_vm10 = vcmp.lt.s32.totalorder %v14342_v61, 2  ;;  %vm10935_vm4 = vcmp.lt.s32.totalorder %v10934_v55, 0  ;;  %v2351_v34 = vsel %vm2337_vm0, %v2348_v56, %v2350_v37  ;;  %vm5408_vm9 = vcmp.eq.s32.totalorder %v14360_v44, 2  ;;  %v12257_v24 = vpop.eup %12256 }
 0x230   : > { %v14420_v58 = vmul.u32.u64.low %v14407_v41, %v2347_v32  ;;  %v14421_v63 = vmul.u32.u64.high %v14407_v41, %v2347_v32, %v14420_v58  ;;  %v2287_v38 = vsel %vm2202_vm12, %v2286_v45, %v14251_v28  ;;  %v2583_v47 = vsel %vm10935_vm4, 0, %v10934_v55  ;;  %v12259_v1 = vpop.eup %12258 }
 0x231   : > { %v14429_v29 = vmul.u32.u64.low %v14407_v41, %v2351_v34  ;;  %v14430_v23 = vmul.u32.u64.high %v14407_v41, %v2351_v34, %v14429_v29  ;;  %vm5405_vm3 = vcmp.eq.s32.totalorder %v14360_v44, 0  ;;  %v2288_v40 = vsel %vm14394_vm14, %v14038_v17, %v2285_v20 }
 0x232   : > { %v2568_v12 = vadd.s32 %v14295_v35, %v14301_v48  ;;  %v2584_v60 = vsub.s32 32, %v2583_v47  ;;  %v2588_v18 = vsub.s32 4294967266, %v2583_v47  ;;  %vm2188_vm12 = vweird.f32 %v13643_v30  ;;  %v17733_v48 = vld [vmem:[#allocation4_spill] sm:$0xff] }
 0x233   : > { %v2194_v28 = vsel %vm2192_vm11, %v14280_v14, %v2193_v15  ;;  %v5513_v45 = vsel %vm5511_vm7, %v2196_v39, %v14290_v57  ;;  %vm2514_vm4 = vcmp.lt.s32.totalorder %v14147_v4, 0  ;;  %v2343_v35 = vsel %vm2337_vm0, %v2340_v53, %v2342_v59 }
 0x234   : > { %v14454_v20 = vmul.f32 %v17733_v48, %v14364_v21  ;;  %v2585_v19 = vshll.u32 %v14381_v10, %v2583_v47  ;;  %v2586_v27 = vshrl.u32 %v2568_v12, %v2584_v60  ;;  %v2589_v26 = vadd.s32 127, %v2588_v18  ;;  %v514_v10 = vpop.permute.xlu1 %513 }
 0x235   : > { %v2362_v49 = vadd.s32 1, %v14421_v63  ;;  %v5510_v39 = vsel %vm5508_vm5, %v14280_v14, %v2193_v15  ;;  %vm2087_vm11 = vcmp.lt.s32.totalorder %v14358_v43, 2  ;;  %vm5404_vm7 = vcmp.lt.s32.totalorder %v14360_v44, 2 }
 0x236   : > { %12260 = vcosq.f32 %v2288_v40  ;;  %v2289_v54 = vsel %vm14394_vm14, 0, %v2287_v38  ;;  %vm2361_vm13 = vc.u32 %v14430_v23, %v14420_v58  ;;  %v2089_v2 = vxor.u32 2147483648, %v12259_v1 }
 0x237   : > { %v2092_v56 = vxor.u32 2147483648, %v12257_v24  ;;  %v17734_v57 = vand.u32 2147483647, %v14147_v4  ;;  %v2587_v14 = vor.u32 %v2586_v27, %v2585_v19  ;;  %v2590_v15 = vshll.u32 %v2589_v26, 23 }
 0x238   : > { %12262 = vsinq.f32 %v2288_v40  ;;  %v2359_v33 = vmul.u32 %v14407_v41, %v2343_v35  ;;  %v2363_v6 = vsel %vm2361_vm13, %v2362_v49, %v14421_v63  ;;  %v2411_v7 = vand.u32 2139095040, %v14454_v20  ;;  %v657_v35 = vpop.permute.xlu1 %656 }
 0x239   : > { %vm14471_vm0 = vcmp.le.f32.partialorder %v17734_v57, 0.7853982  ;;  %vm2084_vm14 = vweird.f32 %v13868_v9  ;;  %vm2088_vm5 = vcmp.eq.s32.totalorder %v14358_v43, 0  ;;  %vm2091_vm6 = vcmp.eq.s32.totalorder %v14358_v43, 2 }
 0x23a   : > { %v2591_v53 = vor.u32 4788187, %v2590_v15  ;;  %v2598_v59 = vsub.s32 4, %v14356_v62  ;;  %v2198_v32 = vsel %vm2191_vm8, %v2194_v28, %v14372_v0  ;;  %v5514_v41 = vsel %vm5507_vm10, %v5510_v39, %v5513_v45 }
 0x23b   : > { %v2293_v37 = vadd.s32 3, %v2289_v54  ;;  %v2364_v34 = vadd.s32 %v2363_v6, %v2359_v33  ;;  %v2093_v63 = vsel %vm2091_vm6, %v2092_v56, %v12259_v1  ;;  %v5410_v38 = vsel %vm5408_vm9, %v2092_v56, %v12259_v1 }
 0x23c   : > { %v2592_v47 = vand.u32 2147483647, %v2591_v53  ;;  %v2594_v29 = vcvt.s32.f32 %v2587_v14  ;;  %v2090_v40 = vsel %vm2088_vm5, %v12257_v24, %v2089_v2  ;;  %v5407_v12 = vsel %vm5405_vm3, %v12257_v24, %v2089_v2 }
 0x23d   : > { %v2365_v60 = vadd.s32 536870912, %v2364_v34  ;;  %v2412_v18 = vshrl.u32 %v2411_v7, 23  ;;  %v2199_v61 = vsel %vm2188_vm12, nan, %v2198_v32  ;;  %v5515_v0 = vsel %vm2188_vm12, nan, %v5514_v41 }
 0x23e   : > { %v2595_v1 = vmul.f32 %v2594_v29, %v2592_v47  ;;  %v2599_v28 = vsel %vm2514_vm4, %v2598_v59, %v14356_v62  ;;  %v14501_v45 = vand.u32 3, %v2293_v37  ;;  %vm7742_vm6 = vcmask 1040384  }
 0x23f   : > { %v14503_v24 = vshrl.u32 %v2365_v60, 30  ;;  %v10928_v19 = vadd.s32 4294967169, %v2412_v18  ;;  %v2094_v27 = vsel %vm2087_vm11, %v2090_v40, %v2093_v63  ;;  %v5411_v26 = vsel %vm5404_vm7, %v5407_v12, %v5410_v38  ;;  %v17740_v38 = vld [vmem:[#allocation12_spill] sm:$0xff] }
 0x240   : > { %v2408_v30 = vand.u32 2147483647, %v14454_v20  ;;  %v17737_v49 = vmov 0   ;;  %v12261_v2 = vpop.eup %12260  ;;  %v14516_v56 = vsel %vm14471_vm0, 0, %v2599_v28  ;;  %v14521_v43 = vpack.c.bf16 %v14334_v22, %v14351_v16  ;;  %v661_v22 = vpop.permute.xlu1 %660 }
 0x241   : > { %v14511_v39 = vsel %vm7742_vm6, 65535, %v17737_v49  ;;  %v2367_v62 = vshll.u32 %v14503_v24, 30  ;;  %v2418_v57 = vadd.s32 1, %v10928_v19  ;;  %v14525_v44 = vsel %vm7580_vm15, %v2199_v61, %v5515_v0 }
 0x242   : > { %17738 = vst [vmem:[#allocation5_spill] sm:$0xff] %v14511_v39  ;;  %v7746_v14 = vand.u32 %v12187_v25, %v14511_v39  ;;  %17739 = vst [vmem:[#allocation4_spill] sm:$0xff] %v14521_v43  ;;  %v2596_v15 = vxor.u32 2147483648, %v2595_v1  ;;  %v14529_v33 = vsel %vm17602_vm1, %v514_v10, %v657_v35  ;;  %v12263_v6 = vpop.eup %12262  ;;  %v2095_v7 = vsel %vm2084_vm14, nan, %v2094_v27 }
 0x243   : > { %v14533_v53 = vand.u32 3, %v2289_v54  ;;  %v14535_v59 = vsub.s32 %v2364_v34, %v2367_v62  ;;  %vm2419_vm10 = vcmp.gt.s32.totalorder %v2418_v57, 0  ;;  %v5412_v16 = vsel %vm2084_vm14, nan, %v5411_v26 }
 0x244   : > { %11575 = vmatprep.subr.bf16.mxu0 %v7746_v14  ;;  %v2300_v32 = vxor.u32 2147483648, %v12261_v2  ;;  %v2605_v41 = vadd.s32 3, %v14516_v56  ;;  %v2420_v37 = vsel %vm2419_vm10, %v2418_v57, 0  ;;  %vm2296_vm8 = vcmp.eq.s32.totalorder %v14501_v45, 0 }
 0x245   : > { %11576 = vmatpush3.bf16.msra.mxu0 %v7746_v14  ;;  %vm2299_vm9 = vcmp.eq.s32.totalorder %v14501_v45, 2  ;;  %v2370_v54 = vsub.s32 0, %v14535_v59  ;;  %v14545_v10 = vand.u32 8388607, %v2408_v30  ;;  %v2597_v34 = vsel %vm2514_vm4, %v2596_v15, %v2595_v1  ;;  %v17741_v1 = vld [vmem:[#allocation8_spill] sm:$0xff] }
 0x246   : > { %v2297_v9 = vxor.u32 2147483648, %v12263_v6  ;;  %v2422_v63 = vand.u32 31, %v2420_v37  ;;  %v736_v47 = vsel %vm17602_vm1, %v17740_v38, %v661_v22  ;;  %v14554_v29 = vsel %vm7580_vm15, %v2095_v7, %v5412_v16 }
 0x247   : > { %vm5611_vm3 = vcmp.eq.s32.totalorder %v14533_v53, 0  ;;  %vm5614_vm12 = vcmp.eq.s32.totalorder %v14533_v53, 2  ;;  %v10925_v40 = vmin.u32 %v2370_v54, %v14535_v59  ;;  %v14559_v12 = vsel %vm2299_vm9, %v2300_v32, %v12263_v6 }
 0x248   : > { %v2360_v60 = vadd.s32 %v14420_v58, %v14430_v23  ;;  %v14563_v18 = vand.u32 3, %v2605_v41  ;;  %v2423_v35 = vsub.s32 32, %v2422_v63  ;;  %v2600_v25 = vsel %vm14471_vm0, %v14147_v4, %v2597_v34 }
 0x249   : > { %v14568_v61 = vsel %vm5614_vm12, %v2300_v32, %v12263_v6  ;;  %v2372_v0 = vclz %v10925_v40  ;;  %v14573_v28 = vsel %vm17601_vm2, %v17741_v1, %v736_v47  ;;  %v2298_v19 = vsel %vm2296_vm8, %v12261_v2, %v2297_v9 }
 0x24a   : > { %v5613_v27 = vsel %vm5611_vm3, %v12261_v2, %v2297_v9  ;;  %v2416_v58 = vor.u32 8388608, %v14545_v10  ;;  %v2426_v23 = vshrl.u32 %v17638_v52, %v2423_v35  ;;  %v2429_v55 = vshrl.u32 %v17639_v36, %v2423_v35 }
 0x24b   : > { %v10926_v26 = vadd.s32 4294967294, %v2372_v0  ;;  %v2432_v49 = vshrl.u32 %v17640_v13, %v2423_v35  ;;  %v2435_v62 = vshrl.u32 %v17641_v31, %v2423_v35  ;;  %12264 = vcosq.f32 %v2600_v25 }
 0x24c   : > { %v2431_v57 = vshll.u32 %v17639_v36, %v2422_v63  ;;  %v2434_v14 = vshll.u32 %v17640_v13, %v2422_v63  ;;  %v14586_v15 = vmul.f32 %v17733_v48, %v14573_v28  ;;  %v2421_v2 = vshrl.u32 %v2420_v37, 5 }
 0x24d   : > { %vm10927_vm4 = vcmp.lt.s32.totalorder %v10926_v26, 0  ;;  %v2425_v6 = vshll.u32 %v17644_v42, %v2422_v63  ;;  %v2428_v7 = vshll.u32 %v17638_v52, %v2422_v63  ;;  %v2438_v41 = vshrl.u32 %v17642_v5, %v2423_v35 }
 0x24e   : > { %v2375_v22 = vsel %vm10927_vm4, 0, %v10926_v26  ;;  %v2433_v16 = vor.u32 %v2432_v49, %v2431_v57  ;;  %v2436_v32 = vor.u32 %v2435_v62, %v2434_v14  ;;  %vm2295_vm11 = vcmp.lt.s32.totalorder %v14501_v45, 2  ;;  %v17744_v45 = vld [vmem:[#allocation20_spill] sm:$0xff] }
 0x24f   : > { %vm5610_vm7 = vcmp.lt.s32.totalorder %v14533_v53, 2  ;;  %v2376_v54 = vsub.s32 32, %v2375_v22  ;;  %v2380_v10 = vsub.s32 4294967266, %v2375_v22  ;;  %v2427_v34 = vor.u32 %v2426_v23, %v2425_v6 }
 0x250   : > { %v2430_v9 = vor.u32 %v2429_v55, %v2428_v7  ;;  %12266 = vsinq.f32 %v2600_v25  ;;  %vm2306_vm13 = vcmp.lt.s32.totalorder %v14255_v3, 0  ;;  %v2424_v37 = vshrl.u32 %v17644_v42, %v2423_v35 }
 0x251   : > { %v2437_v38 = vshll.u32 %v17641_v31, %v2422_v63  ;;  %v2723_v47 = vand.u32 2139095040, %v14586_v15  ;;  %v2377_v40 = vshll.u32 %v14535_v59, %v2375_v22  ;;  %v2378_v0 = vshrl.u32 %v2360_v60, %v2376_v54 }
 0x252   : > { %v2381_v1 = vadd.s32 127, %v2380_v10  ;;  %vm2443_vm0 = vcmp.lt.s32.totalorder %v2421_v2, 4  ;;  %vm2292_vm14 = vweird.f32 %v14038_v17  ;;  %vm2440_vm5 = vcmp.lt.s32.totalorder %v2421_v2, 1 }
 0x253   : > { %v2439_v26 = vor.u32 %v2438_v41, %v2437_v38  ;;  %v2445_v23 = vsel %vm2443_vm0, %v2433_v16, 2102212464  ;;  %v2449_v25 = vsel %vm2443_vm0, %v2436_v32, 920167782  ;;  %vm14603_vm6 = vcmp.le.f32.partialorder %v2304_v46, 0.7853982 }
 0x254   : > { %v2379_v63 = vor.u32 %v2378_v0, %v2377_v40  ;;  %v2382_v55 = vshll.u32 %v2381_v1, 23  ;;  %vm2442_vm10 = vcmp.lt.s32.totalorder %v2421_v2, 3  ;;  %v2448_v59 = vsel %vm2440_vm5, %v2427_v34, %v2430_v9 }
 0x255   : > { %v2390_v60 = vsub.s32 4, %v14503_v24  ;;  %v2450_v49 = vsel %vm2442_vm10, %v2433_v16, %v2449_v25  ;;  %v2456_v62 = vshll.u32 %v2416_v58, 8  ;;  %v2724_v57 = vshrl.u32 %v2723_v47, 23  ;;  %v14612_v7 = vpop.eup %12264 }
 0x256   : > { %v2383_v14 = vor.u32 4788187, %v2382_v55  ;;  %vm2441_vm8 = vcmp.lt.s32.totalorder %v2421_v2, 2  ;;  %v2444_v6 = vsel %vm2440_vm5, %v2424_v37, %v2427_v34  ;;  %v2446_v46 = vsel %vm2442_vm10, %v2430_v9, %v2445_v23 }
 0x257   : > { %v2386_v22 = vcvt.s32.f32 %v2379_v63  ;;  %v2451_v41 = vsel %vm2441_vm8, %v2448_v59, %v2450_v49  ;;  %v2452_v54 = vsel %vm2440_vm5, %v2430_v9, %v2433_v16  ;;  %v2453_v10 = vsel %vm2443_vm0, %v2439_v26, 1326507024 }
 0x258   : > { %v2384_v38 = vand.u32 2147483647, %v2383_v14  ;;  %v2454_v40 = vsel %vm2442_vm10, %v2436_v32, %v2453_v10  ;;  %v14618_v58 = vmul.u32.u64.low %v2456_v62, %v2451_v41  ;;  %v14619_v47 = vmul.u32.u64.high %v2456_v62, %v2451_v41, %v14618_v58 }
 0x259   : > { %v2302_v34 = vsel %vm2295_vm11, %v2298_v19, %v14559_v12  ;;  %v5617_v37 = vsel %vm5610_vm7, %v5613_v27, %v14568_v61  ;;  %v2455_v0 = vsel %vm2441_vm8, %v2452_v54, %v2454_v40  ;;  %v10940_v16 = vadd.s32 4294967169, %v2724_v57 }
 0x25a   : > { %v2387_v9 = vmul.f32 %v2386_v22, %v2384_v38  ;;  %v2391_v32 = vsel %vm2306_vm13, %v2390_v60, %v14503_v24  ;;  %v14632_v1 = vmul.u32.u64.low %v2456_v62, %v2455_v0  ;;  %v14633_v26 = vmul.u32.u64.high %v2456_v62, %v2455_v0, %v14632_v1  ;;  %v14635_v23 = vpop.eup %12266 }
 0x25b   : > { %vm17745_vm9 = vcmp.eq.s32.totalorder %v12533_v11, 1  ;;  %v14644_v53 = vand.u32 3, %v14516_v56  ;;  %v2447_v61 = vsel %vm2441_vm8, %v2444_v6, %v2446_v46  ;;  %v2730_v19 = vadd.s32 1, %v10940_v16 }
 0x25c   : > { %v14641_v12 = vsel %vm17745_vm9, %v17744_v45, %v14554_v29  ;;  %v2303_v24 = vsel %vm2292_vm14, nan, %v2302_v34  ;;  %v5618_v27 = vsel %vm2292_vm14, nan, %v5617_v37  ;;  %v2388_v25 = vxor.u32 2147483648, %v2387_v9  ;;  %v17750_v45 = vld [vmem:[#allocation13_spill] sm:$0xff] }
 0x25d   : > { %v2466_v63 = vadd.s32 1, %v14619_v47  ;;  %v2393_v55 = vsel %vm14603_vm6, 0, %v2391_v32  ;;  %v2612_v29 = vxor.u32 2147483648, %v14612_v7  ;;  %v17591_v56 = vand.u32 2147483647, %v14586_v15 }
 0x25e   : > { %vm2731_vm3 = vcmp.gt.s32.totalorder %v2730_v19, 0  ;;  %vm2611_vm12 = vcmp.eq.s32.totalorder %v14563_v18, 2  ;;  %v2463_v2 = vmul.u32 %v2456_v62, %v2447_v61  ;;  %vm2465_vm4 = vc.u32 %v14633_v26, %v14618_v58 }
 0x25f   : > { %v2732_v59 = vsel %vm2731_vm3, %v2730_v19, 0  ;;  %v14661_v17 = vsel %vm7580_vm15, %v2303_v24, %v5618_v27  ;;  %v2389_v60 = vsel %vm2306_vm13, %v2388_v25, %v2387_v9  ;;  %v2467_v49 = vsel %vm2465_vm4, %v2466_v63, %v14619_v47  ;;  %v17746_v47 = vld [vmem:[#allocation15_spill] sm:$0xff] }
 0x260   : > { %v2734_v57 = vand.u32 31, %v2732_v59  ;;  %v2397_v14 = vadd.s32 3, %v2393_v55  ;;  %v14666_v6 = vand.u32 3, %v2393_v55  ;;  %vm2608_vm11 = vcmp.eq.s32.totalorder %v14563_v18, 0 }
 0x261   : > { %vm5920_vm7 = vcmp.eq.s32.totalorder %v14644_v53, 0  ;;  %vm5923_vm0 = vcmp.eq.s32.totalorder %v14644_v53, 2  ;;  %v2468_v62 = vadd.s32 %v2467_v49, %v2463_v2  ;;  %v2609_v46 = vxor.u32 2147483648, %v14635_v23 }
 0x262   : > { %v2613_v22 = vsel %vm2611_vm12, %v2612_v29, %v14635_v23  ;;  %v2727_v41 = vand.u32 8388607, %v17591_v56  ;;  %v2735_v54 = vsub.s32 32, %v2734_v57  ;;  %v2392_v10 = vsel %vm14603_vm6, %v14255_v3, %v2389_v60 }
 0x263   : > { %v5925_v38 = vsel %vm5923_vm0, %v2612_v29, %v14635_v23  ;;  %v2469_v40 = vadd.s32 536870912, %v2468_v62  ;;  %v17747_v34 = vand.u32 2147483647, %v17746_v47  ;;  %v14685_v0 = vshrl.u32 %v2732_v59, 5 }
 0x264   : > { %v2738_v16 = vshrl.u32 %v17638_v52, %v2735_v54  ;;  %v2741_v9 = vshrl.u32 %v17639_v36, %v2735_v54  ;;  %v2744_v32 = vshrl.u32 %v17640_v13, %v2735_v54  ;;  %v2746_v35 = vshll.u32 %v17640_v13, %v2734_v57 }
 0x265   : > { %vm14681_vm13 = vcmp.le.f32.partialorder %v17747_v34, 0.7853982  ;;  %v2470_v1 = vshrl.u32 %v2469_v40, 30  ;;  %v2747_v23 = vshrl.u32 %v17641_v31, %v2735_v54  ;;  %v2737_v19 = vshll.u32 %v17644_v42, %v2734_v57  ;;  %v17751_v34 = vld [vmem:[#allocation19_spill] sm:$0xff] }
 0x266   : > { %v1040_v61 = vsel %vm14681_vm13, %v17746_v47, %v17750_v45  ;;  %v2740_v24 = vshll.u32 %v17638_v52, %v2734_v57  ;;  %v2743_v27 = vshll.u32 %v17639_v36, %v2734_v57  ;;  %v2750_v25 = vshrl.u32 %v17642_v5, %v2735_v54 }
 0x267   : > { %12268 = vcosq.f32 %v2392_v10  ;;  %vm2607_vm14 = vcmp.lt.s32.totalorder %v14563_v18, 2  ;;  %vm5919_vm5 = vcmp.lt.s32.totalorder %v14644_v53, 2  ;;  %v2471_v63 = vshll.u32 %v2470_v1, 30 }
 0x268   : > { %v2748_v55 = vor.u32 %v2747_v23, %v2746_v35  ;;  %v2749_v29 = vshll.u32 %v17641_v31, %v2734_v57  ;;  %vm2410_vm6 = vcmp.lt.s32.totalorder %v14454_v20, 0  ;;  %v2739_v2 = vor.u32 %v2738_v16, %v2737_v19 }
 0x269   : > { %v2742_v59 = vor.u32 %v2741_v9, %v2740_v24  ;;  %v2745_v60 = vor.u32 %v2744_v32, %v2743_v27  ;;  %vm2755_vm10 = vcmp.lt.s32.totalorder %v14685_v0, 4  ;;  %12270 = vsinq.f32 %v2392_v10 }
 0x26a   : > { %v14705_v49 = vsub.s32 %v2468_v62, %v2471_v63  ;;  %v2761_v40 = vsel %vm2755_vm10, %v2748_v55, 920167782  ;;  %v1038_v45 = vsub.s32 4, %v17751_v34  ;;  %v2610_v35 = vsel %vm2608_vm11, %v14612_v7, %v2609_v46 }
 0x26b   : > { %v5922_v57 = vsel %vm5920_vm7, %v14612_v7, %v2609_v46  ;;  %v2728_v16 = vor.u32 8388608, %v2727_v41  ;;  %v2751_v9 = vor.u32 %v2750_v25, %v2749_v29  ;;  %vm14718_vm8 = vcmp.le.f32.partialorder %v2408_v30, 0.7853982 }
 0x26c   : > { %v2474_v10 = vsub.s32 0, %v14705_v49  ;;  %vm2752_vm9 = vcmp.lt.s32.totalorder %v14685_v0, 1  ;;  %vm2754_vm3 = vcmp.lt.s32.totalorder %v14685_v0, 3  ;;  %12272 = vcosq.f32 %v1040_v61 }
 0x26d   : > { %v2736_v32 = vshrl.u32 %v17644_v42, %v2735_v54  ;;  %v2757_v7 = vsel %vm2755_vm10, %v2745_v60, 2102212464  ;;  %v2760_v46 = vsel %vm2752_vm9, %v2739_v2, %v2742_v59  ;;  %v2762_v30 = vsel %vm2754_vm3, %v2745_v60, %v2761_v40 }
 0x26e   : > { %v10929_v41 = vmin.u32 %v2474_v10, %v14705_v49  ;;  %v2494_v23 = vsub.s32 4, %v2470_v1  ;;  %vm17754_vm12 = vcmp.lt.s32.totalorder %v17746_v47, 0  ;;  %12274 = vsinq.f32 %v1040_v61 }
 0x26f   : > { %v1039_v19 = vsel %vm17754_vm12, %v1038_v45, %v17751_v34  ;;  %v14736_v24 = vand.u32 3, %v2397_v14  ;;  %vm2753_vm4 = vcmp.lt.s32.totalorder %v14685_v0, 2  ;;  %v2756_v54 = vsel %vm2752_vm9, %v2736_v32, %v2739_v2 }
 0x270   : > { %v2765_v27 = vsel %vm2755_vm10, %v2751_v9, 1326507024  ;;  %vm2604_vm11 = vweird.f32 %v14147_v4  ;;  %v2476_v25 = vclz %v10929_v41  ;;  %v2758_v63 = vsel %vm2754_vm3, %v2742_v59, %v2757_v7 }
 0x271   : > { %v2763_v29 = vsel %vm2753_vm4, %v2760_v46, %v2762_v30  ;;  %v2764_v14 = vsel %vm2752_vm9, %v2742_v59, %v2745_v60  ;;  %v2614_v61 = vsel %vm2607_vm14, %v2610_v35, %v2613_v22  ;;  %v5926_v2 = vsel %vm5919_vm5, %v5922_v57, %v5925_v38  ;;  %v14756_v45 = vpop.eup %12268  ;;  %v17755_v59 = vld [vmem:[#allocation25_spill] sm:$0xff]  ;;  %v17756_v35 = vld [vmem:[#allocation18_spill] sm:$0xff] }
 0x272   : > { %v2768_v40 = vshll.u32 %v2728_v16, 8  ;;  %v1041_v34 = vsel %vm14681_vm13, 0, %v1039_v19  ;;  %v10930_v9 = vadd.s32 4294967294, %v2476_v25  ;;  %v2495_v10 = vsel %vm2410_vm6, %v2494_v23, %v2470_v1 }
 0x273   : > { %v2766_v32 = vsel %vm2754_vm3, %v2748_v55, %v2765_v27  ;;  %v1142_v60 = vsub.s32 4, %v17755_v59  ;;  %vm2400_vm7 = vcmp.eq.s32.totalorder %v14736_v24, 0  ;;  %vm2403_vm0 = vcmp.eq.s32.totalorder %v14736_v24, 2  ;;  %v12271_v37 = vpop.eup %12270 }
 0x274   : > { %v2759_v18 = vsel %vm2753_vm4, %v2756_v54, %v2758_v63  ;;  %v2767_v53 = vsel %vm2753_vm4, %v2764_v14, %v2766_v32  ;;  %v14769_v22 = vmul.u32.u64.low %v2768_v40, %v2763_v29  ;;  %v14770_v38 = vmul.u32.u64.high %v2768_v40, %v2763_v29, %v14769_v22 }
 0x275   : > { %vm10931_vm13 = vcmp.lt.s32.totalorder %v10930_v9, 0  ;;  %v14773_v1 = vmul.u32.u64.low %v2768_v40, %v2767_v53  ;;  %v14774_v55 = vmul.u32.u64.high %v2768_v40, %v2767_v53, %v14773_v1  ;;  %v17757_v57 = vand.u32 2147483647, %v17756_v35 }
 0x276   : > { %v2464_v7 = vadd.s32 %v14618_v58, %v14633_v26  ;;  %v2479_v0 = vsel %vm10931_vm13, 0, %v10930_v9  ;;  %v14786_v46 = vsel %vm14718_vm8, 0, %v2495_v10  ;;  %v1045_v30 = vadd.s32 3, %v1041_v34  ;;  %v12273_v41 = vpop.eup %12272  ;;  %v17761_v10 = vld [vmem:[#allocation16_spill] sm:$0xff] }
 0x277   : > { %vm14778_vm14 = vcmp.le.f32.partialorder %v17757_v57, 0.7853982  ;;  %v2404_v23 = vxor.u32 2147483648, %v14756_v45  ;;  %vm5714_vm5 = vcmp.eq.s32.totalorder %v14666_v6, 0  ;;  %vm5717_vm10 = vcmp.eq.s32.totalorder %v14666_v6, 2 }
 0x278   : > { %v2480_v19 = vsub.s32 32, %v2479_v0  ;;  %v2484_v54 = vsub.s32 4294967266, %v2479_v0  ;;  %v2775_v27 = vmul.u32 %v2768_v40, %v2759_v18  ;;  %v2401_v25 = vxor.u32 2147483648, %v12271_v37  ;;  %v12275_v29 = vpop.eup %12274 }
 0x279   : > { %v2481_v63 = vshll.u32 %v14705_v49, %v2479_v0  ;;  %v2778_v58 = vadd.s32 1, %v14770_v38  ;;  %vm17760_vm9 = vcmp.lt.s32.totalorder %v17756_v35, 0  ;;  %vm2399_vm3 = vcmp.lt.s32.totalorder %v14736_v24, 2  ;;  %v14803_v49 = vpop.permute.xlu1 %528 }
 0x27a   : > { %v1143_v26 = vsel %vm17760_vm9, %v1142_v60, %v17755_v59  ;;  %v2482_v14 = vshrl.u32 %v2464_v7, %v2480_v19  ;;  %v2485_v9 = vadd.s32 127, %v2484_v54  ;;  %vm2777_vm12 = vc.u32 %v14774_v55, %v14769_v22 }
 0x27b   : > { %v1144_v40 = vsel %vm14778_vm14, %v17756_v35, %v17761_v10  ;;  %v14807_v32 = vsel %vm2604_vm11, nan, %v2614_v61  ;;  %v14811_v59 = vsel %vm2604_vm11, nan, %v5926_v2  ;;  %v2779_v60 = vsel %vm2777_vm12, %v2778_v58, %v14770_v38 }
 0x27c   : > { %v1046_v18 = vand.u32 3, %v1045_v30  ;;  %v2483_v53 = vor.u32 %v2482_v14, %v2481_v63  ;;  %v2486_v1 = vshll.u32 %v2485_v9, 23  ;;  %v2501_v57 = vadd.s32 3, %v14786_v46 }
 0x27d   : > { %v2780_v7 = vadd.s32 %v2779_v60, %v2775_v27  ;;  %v1049_v0 = vxor.u32 2147483648, %v12275_v29  ;;  %v1052_v19 = vxor.u32 2147483648, %v12273_v41  ;;  %v1145_v54 = vsel %vm14778_vm14, 0, %v1143_v26  ;;  %v14826_v26 = vpop.permute.xlu1 %668 }
 0x27e   : > { %12276 = vcosq.f32 %v1144_v40  ;;  %vm2396_vm4 = vweird.f32 %v14255_v3  ;;  %v2402_v4 = vsel %vm2400_vm7, %v14756_v45, %v2401_v25  ;;  %v2405_v61 = vsel %vm2403_vm0, %v2404_v23, %v12271_v37 }
 0x27f   : > { %vm5713_vm11 = vcmp.lt.s32.totalorder %v14666_v6, 2  ;;  %v2487_v2 = vor.u32 4788187, %v2486_v1  ;;  %v2781_v38 = vadd.s32 536870912, %v2780_v7  ;;  %vm1048_vm13 = vcmp.eq.s32.totalorder %v1046_v18, 0 }
 0x280   : > { %vm1051_vm9 = vcmp.eq.s32.totalorder %v1046_v18, 2  ;;  %12278 = vsinq.f32 %v1144_v40  ;;  %v4373_v30 = vand.u32 3, %v1041_v34  ;;  %v2490_v27 = vcvt.s32.f32 %v2483_v53 }
 0x281   : > { %v2488_v16 = vand.u32 2147483647, %v2487_v2  ;;  %v14824_v63 = vshrl.u32 %v2781_v38, 30  ;;  %v1149_v58 = vadd.s32 3, %v1145_v54  ;;  %v5716_v14 = vsel %vm5714_vm5, %v14756_v45, %v2401_v25 }
 0x282   : > { %v5719_v9 = vsel %vm5717_vm10, %v2404_v23, %v12271_v37  ;;  %v1050_v10 = vsel %vm1048_vm13, %v12273_v41, %v1049_v0  ;;  %v1053_v60 = vsel %vm1051_vm9, %v1052_v19, %v12275_v29  ;;  %vm4375_vm7 = vcmp.eq.s32.totalorder %v4373_v30, 0 }
 0x283   : > { %v2491_v1 = vmul.f32 %v2490_v27, %v2488_v16  ;;  %v2783_v40 = vshll.u32 %v14824_v63, 30  ;;  %vm4378_vm0 = vcmp.eq.s32.totalorder %v4373_v30, 2  ;;  %v2406_v34 = vsel %vm2399_vm3, %v2402_v4, %v2405_v61 }
 0x284   : > { %vm1047_vm14 = vcmp.lt.s32.totalorder %v1046_v18, 2  ;;  %v4377_v53 = vsel %vm4375_vm7, %v12273_v41, %v1049_v0  ;;  %v4380_v2 = vsel %vm4378_vm0, %v1052_v19, %v12275_v29  ;;  %v1150_v25 = vand.u32 3, %v1149_v58  ;;  %v822_v18 = vpop.permute.xlu1 %821 }
 0x285   : > { %v2492_v38 = vxor.u32 2147483648, %v2491_v1  ;;  %v14836_v56 = vsub.s32 %v2780_v7, %v2783_v40  ;;  %v1054_v45 = vsel %vm1047_vm14, %v1050_v10, %v1053_v60  ;;  %v14839_v37 = vand.u32 3, %v14786_v46 }
 0x286   : > { %vm1044_vm5 = vweird.f32 %v17746_v47  ;;  %vm4374_vm10 = vcmp.lt.s32.totalorder %v4373_v30, 2  ;;  %v4476_v23 = vand.u32 3, %v1145_v54  ;;  %v14844_v24 = vand.u32 3, %v2501_v57 }
 0x287   : > { %v2493_v16 = vsel %vm2410_vm6, %v2492_v38, %v2491_v1  ;;  %v2786_v41 = vsub.s32 0, %v14836_v56  ;;  %v4381_v29 = vsel %vm4374_vm10, %v4377_v53, %v4380_v2  ;;  %v14849_v0 = vsel %vm2396_vm4, nan, %v2406_v34  ;;  %v665_v34 = vpop.permute.xlu0 %664 }
 0x288   : > { %v12277_v7 = vpop.eup %12276  ;;  %v5720_v46 = vsel %vm5713_vm11, %v5716_v14, %v5719_v9  ;;  %v2496_v19 = vsel %vm14718_vm8, %v14454_v20, %v2493_v16  ;;  %v1055_v57 = vsel %vm1044_vm5, nan, %v1054_v45  ;;  %vm1155_vm6 = vcmp.eq.s32.totalorder %v1150_v25, 2 }
 0x289   : > { %12280 = vcosq.f32 %v2496_v19  ;;  %v10941_v54 = vmin.u32 %v2786_v41, %v14836_v56  ;;  %v1156_v4 = vxor.u32 2147483648, %v12277_v7  ;;  %v4382_v30 = vsel %vm1044_vm5, nan, %v4381_v29  ;;  %v17764_v29 = vld [vmem:[#allocation17_spill] sm:$0xff] }
 0x28a   : > { %v12279_v61 = vpop.eup %12278  ;;  %12282 = vsinq.f32 %v2496_v19  ;;  %vm4481_vm3 = vcmp.eq.s32.totalorder %v4476_v23, 2  ;;  %v14864_v6 = vsel %vm17601_vm2, %v822_v18, %v14529_v33  ;;  %vm1151_vm8 = vcmp.lt.s32.totalorder %v1150_v25, 2 }
 0x28b   : > { %v2788_v62 = vclz %v10941_v54  ;;  %v1153_v27 = vxor.u32 2147483648, %v12279_v61  ;;  %v1157_v58 = vsel %vm1155_vm6, %v1156_v4, %v12279_v61  ;;  %v4483_v14 = vsel %vm4481_vm3, %v1156_v4, %v12279_v61 }
 0x28c   : > { %vm1152_vm12 = vcmp.eq.s32.totalorder %v1150_v25, 0  ;;  %vm4477_vm11 = vcmp.lt.s32.totalorder %v4476_v23, 2  ;;  %vm4478_vm13 = vcmp.eq.s32.totalorder %v4476_v23, 0  ;;  %vm5820_vm9 = vcmp.eq.s32.totalorder %v14839_v37, 2  ;;  %v17762_v25 = vld [vmem:[#allocation14_spill] sm:$0xff] }
 0x28d   : > { %v10942_v9 = vadd.s32 4294967294, %v2788_v62  ;;  %v1154_v10 = vsel %vm1152_vm12, %v12277_v7, %v1153_v27  ;;  %v4480_v47 = vsel %vm4478_vm13, %v12277_v7, %v1153_v27  ;;  %v7581_v60 = vsel %vm7580_vm15, %v1055_v57, %v4382_v30  ;;  %v17766_v7 = vld [vmem:[#allocation21_spill] sm:$0xff] }
 0x28e   : > { %vm5817_vm7 = vcmp.eq.s32.totalorder %v14839_v37, 0  ;;  %vm1148_vm0 = vweird.f32 %v17756_v35  ;;  %v1158_v33 = vsel %vm1151_vm8, %v1154_v10, %v1157_v58  ;;  %v4484_v1 = vsel %vm4477_vm11, %v4480_v47, %v4483_v14 }
 0x28f   : > { %v14873_v40 = vmul.f32 %v17733_v48, %v14864_v6  ;;  %vm2503_vm14 = vcmp.lt.s32.totalorder %v14844_v24, 2  ;;  %vm5816_vm5 = vcmp.lt.s32.totalorder %v14839_v37, 2  ;;  %v2776_v53 = vadd.s32 %v14769_v22, %v14774_v55  ;;  %v830_v55 = vpop.permute.xlu1 %829 }
 0x290   : > { %vm10943_vm10 = vcmp.lt.s32.totalorder %v10942_v9, 0  ;;  %v1159_v2 = vsel %vm1148_vm0, nan, %v1158_v33  ;;  %v4485_v38 = vsel %vm1148_vm0, nan, %v4484_v1  ;;  %vm17763_vm6 = vcmp.eq.s32.totalorder %v12533_v11, 1 }
 0x291   : > { %v2791_v45 = vsel %vm10943_vm10, 0, %v10942_v9  ;;  %v7582_v35 = vsel %vm7580_vm15, %v1159_v2, %v4485_v38  ;;  %v7618_v23 = vsel %vm17763_vm6, %v17762_v25, %v7581_v60  ;;  %vm7693_vm3 = vcmask 269312   ;;  %vm17765_vm8 = vmmov %vm17763_vm6  ;;  %v17768_v60 = vld [vmem:[#allocation6_spill] sm:$0xff] }
 0x292   : > { %v2792_v16 = vsub.s32 32, %v2791_v45  ;;  %v2796_v41 = vsub.s32 4294967266, %v2791_v45  ;;  %v7619_v18 = vsel %vm17765_vm8, %v17764_v29, %v7582_v35  ;;  %v737_v22 = vsel %vm17602_vm1, %v17766_v7, %v665_v34  ;;  %v17769_v34 = vld [vmem:[#allocation24_spill] sm:$0xff]  ;;  %vm17771_vm13 = vmmov %vm17763_vm6 }
 0x293   : > { %v5721_v19 = vsel %vm2396_vm4, nan, %v5720_v46  ;;  %v14892_v57 = vpack.c.bf16 %v7619_v18, %v7618_v23  ;;  %v2616_v54 = vand.u32 2147483647, %v14873_v40  ;;  %v2619_v4 = vand.u32 2139095040, %v14873_v40  ;;  %v12281_v61 = vpop.eup %12280  ;;  %vm17776_vm0 = vmmov %vm17763_vm6 }
 0x294   : > { %vm2504_vm12 = vcmp.eq.s32.totalorder %v14844_v24, 0  ;;  %v2793_v30 = vshll.u32 %v14836_v56, %v2791_v45  ;;  %v2794_v62 = vshrl.u32 %v2776_v53, %v2792_v16  ;;  %v2797_v27 = vadd.s32 127, %v2796_v41  ;;  %v12283_v58 = vpop.eup %12282  ;;  %vm17781_vm10 = vmmov %vm17776_vm0 }
 0x295   : > { %17767 = vst [vmem:[#allocation12_spill] sm:$0xff] %v14892_v57  ;;  %vm2507_vm11 = vcmp.eq.s32.totalorder %v14844_v24, 2  ;;  %v2508_v14 = vxor.u32 2147483648, %v12281_v61  ;;  %11577 = vmatprep.mubr.msk.bf16.mxu0 %vm7693_vm3, %v14892_v57  ;;  %v2620_v3 = vshrl.u32 %v2619_v4, 23  ;;  %v14903_v46 = vsel %vm17601_vm2, %v830_v55, %v737_v22  ;;  %v17770_v22 = vld [vmem:[#allocation7_spill] sm:$0xff] }
 0x296   : > { %v7594_v9 = vsel %vm7580_vm15, %v14849_v0, %v5721_v19  ;;  %v2505_v10 = vxor.u32 2147483648, %v12283_v58  ;;  %v2795_v56 = vor.u32 %v2794_v62, %v2793_v30  ;;  %v2798_v47 = vshll.u32 %v2797_v27, 23  ;;  %11578 = vmatmul.mubr.msk.bf16.vlgmr.msra.gmra.mrb[0].mxu0 %vm7693_vm3, %v17768_v60  ;;  %v17772_v24 = vld [vmem:[#allocation23_spill] sm:$0xff]  ;;  %v17775_v27 = vld [vmem:[#allocation22_spill] sm:$0xff] }
 0x297   : > { %v2509_v33 = vsel %vm2507_vm11, %v2508_v14, %v12283_v58  ;;  %v5822_v1 = vsel %vm5820_vm9, %v2508_v14, %v12283_v58  ;;  %11581 = vmatprep.mubr.msk.bf16.mxu0 %vm7693_vm3, %v17769_v34  ;;  %v10936_v53 = vadd.s32 4294967169, %v2620_v3  ;;  %v2623_v2 = vand.u32 8388607, %v2616_v54  ;;  %v17778_v3 = vld [vmem:[#allocation26_spill] sm:$0xff] }
 0x298   : > { %v2506_v0 = vsel %vm2504_vm12, %v12281_v61, %v2505_v10  ;;  %v5819_v38 = vsel %vm5817_vm7, %v12281_v61, %v2505_v10  ;;  %v2799_v45 = vor.u32 4788187, %v2798_v47  ;;  %v14922_v35 = vmul.f32 %v17733_v48, %v14903_v46  ;;  %vm17773_vm7 = vmmov %vm17763_vm6 }
 0x299   : > { %vm2500_vm4 = vweird.f32 %v14454_v20  ;;  %v2510_v25 = vsel %vm2503_vm14, %v2506_v0, %v2509_v33  ;;  %v5823_v23 = vsel %vm5816_vm5, %v5819_v38, %v5822_v1  ;;  %v2626_v16 = vadd.s32 1, %v10936_v53  ;;  %vm17779_vm14 = vmmov %vm17776_vm0 }
 0x29a   : > { %v2511_v41 = vsel %vm2500_vm4, nan, %v2510_v25  ;;  %v5824_v29 = vsel %vm2500_vm4, nan, %v5823_v23  ;;  %v2800_v18 = vand.u32 2147483647, %v2799_v45  ;;  %v2802_v7 = vcvt.s32.f32 %v2795_v56 }
 0x29b   : > { %v7631_v55 = vsel %vm17771_vm13, %v17770_v22, %v7594_v9  ;;  %v7596_v20 = vsel %vm7580_vm15, %v14807_v32, %v14811_v59  ;;  %v2624_v19 = vor.u32 8388608, %v2623_v2  ;;  %vm2627_vm9 = vcmp.gt.s32.totalorder %v2626_v16, 0  ;;  %v17780_v9 = vld [vmem:[#allocation31_spill] sm:$0xff] }
 0x29c   : > { %v7629_v37 = vsel %vm17773_vm7, %v17772_v24, %v14525_v44  ;;  %v2803_v4 = vmul.f32 %v2802_v7, %v2800_v18  ;;  %v2628_v61 = vsel %vm2627_vm9, %v2626_v16, 0  ;;  %v2827_v30 = vand.u32 2139095040, %v14922_v35 }
 0x29d   : > { %v14942_v62 = vpack.c.bf16 %v7629_v37, %v14641_v12  ;;  %v7630_v58 = vsel %vm17776_vm0, %v17775_v27, %v14661_v17  ;;  %v7595_v32 = vsel %vm7580_vm15, %v2511_v41, %v5824_v29  ;;  %v2630_v59 = vand.u32 31, %v2628_v61 }
 0x29e   : > { %v14950_v14 = vpack.c.bf16 %v7631_v55, %v7630_v58  ;;  %v7633_v44 = vsel %vm17779_vm14, %v17778_v3, %v7596_v20  ;;  %vm2722_vm5 = vcmp.lt.s32.totalorder %v14586_v15, 0  ;;  %v2806_v12 = vsub.s32 4, %v14824_v63  ;;  %11582 = vmatmul.mubr.msk.bf16.gmra.mrb[4].mxu0 %vm7693_vm3, %v17780_v9 }
 0x29f   : > { %17774 = vst [vmem:[#allocation8_spill] sm:$0xff] %v14942_v62  ;;  %v2804_v10 = vxor.u32 2147483648, %v2803_v4  ;;  %v2629_v56 = vshrl.u32 %v2628_v61, 5  ;;  %v2631_v17 = vsub.s32 32, %v2630_v59  ;;  %v14959_v47 = vshll.u32 %v2624_v19, 8  ;;  %11585 = vmatprep.mubr.msk.bf16.mxu0 %vm7693_vm3, %v14521_v43 }
 0x2a0   : > { %17777 = vst [vmem:[#allocation20_spill] sm:$0xff] %v14950_v14  ;;  %v7632_v33 = vsel %vm17781_vm10, %v14364_v21, %v7595_v32  ;;  %v2633_v1 = vshll.u32 %v17644_v42, %v2630_v59  ;;  %v2636_v53 = vshll.u32 %v17638_v52, %v2630_v59  ;;  %v2828_v2 = vshrl.u32 %v2827_v30, 23 }
 0x2a1   : > { %v2634_v0 = vshrl.u32 %v17638_v52, %v2631_v17  ;;  %v2637_v38 = vshrl.u32 %v17639_v36, %v2631_v17  ;;  %v2639_v45 = vshll.u32 %v17639_v36, %v2630_v59  ;;  %v2642_v25 = vshll.u32 %v17640_v13, %v2630_v59 }
 0x2a2   : > { %v2640_v23 = vshrl.u32 %v17640_v13, %v2631_v17  ;;  %v2643_v16 = vshrl.u32 %v17641_v31, %v2631_v17  ;;  %v2645_v41 = vshll.u32 %v17641_v31, %v2630_v59  ;;  %v2646_v21 = vshrl.u32 %v17642_v5, %v2631_v17 }
 0x2a3   : > { %v2805_v29 = vsel %vm2722_vm5, %v2804_v10, %v2803_v4  ;;  %v2635_v18 = vor.u32 %v2634_v0, %v2633_v1  ;;  %v2638_v7 = vor.u32 %v2637_v38, %v2636_v53  ;;  %vm2648_vm6 = vcmp.lt.s32.totalorder %v2629_v56, 1 }
 0x2a4   : > { %v2632_v22 = vshrl.u32 %v17644_v42, %v2631_v17  ;;  %v2641_v55 = vor.u32 %v2640_v23, %v2639_v45  ;;  %v2644_v20 = vor.u32 %v2643_v16, %v2642_v25  ;;  %v2647_v19 = vor.u32 %v2646_v21, %v2645_v41 }
 0x2a5   : > { %vm2650_vm8 = vcmp.lt.s32.totalorder %v2629_v56, 3  ;;  %vm2651_vm12 = vcmp.lt.s32.totalorder %v2629_v56, 4  ;;  %v2656_v24 = vsel %vm2648_vm6, %v2635_v18, %v2638_v7  ;;  %v10944_v37 = vadd.s32 4294967169, %v2828_v2 }
 0x2a6   : > { %v2653_v61 = vsel %vm2651_vm12, %v2641_v55, 2102212464  ;;  %v2657_v30 = vsel %vm2651_vm12, %v2644_v20, 920167782  ;;  %v2660_v27 = vsel %vm2648_vm6, %v2638_v7, %v2641_v55  ;;  %v2661_v58 = vsel %vm2651_vm12, %v2647_v19, 1326507024  ;;  %11586 = vmatmul.mubr.msk.bf16.gmra.mrb[8].mxu0 %vm7693_vm3, %v14942_v62 }
 0x2a7   : > { %vm2649_vm11 = vcmp.lt.s32.totalorder %v2629_v56, 2  ;;  %v2658_v4 = vsel %vm2650_vm8, %v2641_v55, %v2657_v30  ;;  %v2662_v32 = vsel %vm2650_vm8, %v2644_v20, %v2661_v58  ;;  %v2834_v59 = vadd.s32 1, %v10944_v37  ;;  %11589 = vmatprep.mubr.msk.bf16.mxu0 %vm7693_vm3, %v14950_v14  ;;  %v17805_v14 = vld [vmem:[#allocation11_spill] sm:$0xff] }
 0x2a8   : > { %v2652_v3 = vsel %vm2648_vm6, %v2632_v22, %v2635_v18  ;;  %v2654_v10 = vsel %vm2650_vm8, %v2638_v7, %v2653_v61  ;;  %v2659_v17 = vsel %vm2649_vm11, %v2656_v24, %v2658_v4  ;;  %v2663_v1 = vsel %vm2649_vm11, %v2660_v27, %v2662_v32 }
 0x2a9   : > { %v14989_v53 = vmul.u32.u64.low %v14959_v47, %v2663_v1  ;;  %v14990_v2 = vmul.u32.u64.high %v14959_v47, %v2663_v1, %v14989_v53  ;;  %v14993_v0 = vmul.u32.u64.low %v14959_v47, %v2659_v17  ;;  %v14994_v38 = vmul.u32.u64.high %v14959_v47, %v2659_v17, %v14993_v0 }
 0x2aa   : > { %v14997_v45 = vpack.c.bf16 %v7633_v44, %v7632_v33  ;;  %v17783_v25 = vand.u32 2147483647, %v14586_v15  ;;  %v2807_v23 = vsel %vm2722_vm5, %v2806_v12, %v14824_v63  ;;  %vm2835_vm13 = vcmp.gt.s32.totalorder %v2834_v59, 0  ;;  %v834_v33 = vpop.permute.xlu1 %833 }
 0x2ab   : > { %v2655_v41 = vsel %vm2649_vm11, %v2652_v3, %v2654_v10  ;;  %v2836_v21 = vsel %vm2835_vm13, %v2834_v59, 0  ;;  %vm2673_vm9 = vc.u32 %v14990_v2, %v14993_v0  ;;  %v2674_v44 = vadd.s32 1, %v14994_v38 }
 0x2ac   : > { %17782 = vst [vmem:[#allocation15_spill] sm:$0xff] %v14997_v45  ;;  %vm2721_vm4 = vcmp.le.f32.partialorder %v17783_v25, 0.7853982  ;;  %v2838_v18 = vand.u32 31, %v2836_v21  ;;  %v2671_v22 = vmul.u32 %v14959_v47, %v2655_v41  ;;  %v17593_v55 = vand.u32 2147483647, %v14922_v35 }
 0x2ad   : > { %v2808_v16 = vsel %vm2721_vm4, %v14586_v15, %v2805_v29  ;;  %v2809_v7 = vsel %vm2721_vm4, 0, %v2807_v23  ;;  %v738_v12 = vsel %vm17602_vm1, %v14803_v49, %v14826_v26  ;;  %v2675_v56 = vsel %vm2673_vm9, %v2674_v44, %v14994_v38 }
 0x2ae   : > { %12284 = vcosq.f32 %v2808_v16  ;;  %v2839_v63 = vsub.s32 32, %v2838_v18  ;;  %11590 = vmatmul.mubr.msk.bf16.gmra.mrb[12].mxu0 %vm7693_vm3, %v14997_v45  ;;  %v2813_v29 = vadd.s32 3, %v2809_v7  ;;  %v2676_v20 = vadd.s32 %v2675_v56, %v2671_v22 }
 0x2af   : > { %12286 = vsinq.f32 %v2808_v16  ;;  %v15020_v19 = vsel %vm17601_vm2, %v834_v33, %v738_v12  ;;  %v15022_v47 = vand.u32 3, %v2809_v7  ;;  %v2841_v24 = vshll.u32 %v17644_v42, %v2838_v18 }
 0x2b0   : > { %v2842_v37 = vshrl.u32 %v17638_v52, %v2839_v63  ;;  %v2845_v61 = vshrl.u32 %v17639_v36, %v2839_v63  ;;  %v2677_v30 = vadd.s32 536870912, %v2676_v20  ;;  %v2831_v49 = vand.u32 8388607, %v17593_v55 }
 0x2b1   : > { %v2844_v26 = vshll.u32 %v17638_v52, %v2838_v18  ;;  %v2848_v27 = vshrl.u32 %v17640_v13, %v2839_v63  ;;  %v15031_v58 = vshrl.u32 %v2836_v21, 5  ;;  %v2847_v32 = vshll.u32 %v17639_v36, %v2838_v18 }
 0x2b2   : > { %v2843_v4 = vor.u32 %v2842_v37, %v2841_v24  ;;  %v15036_v59 = vmul.f32 %v17733_v48, %v15020_v19  ;;  %v15038_v3 = vshrl.u32 %v2677_v30, 30  ;;  %v2850_v17 = vshll.u32 %v17640_v13, %v2838_v18 }
 0x2b3   : > { %v2846_v10 = vor.u32 %v2845_v61, %v2844_v26  ;;  %v2851_v1 = vshrl.u32 %v17641_v31, %v2839_v63  ;;  %v15042_v53 = vand.u32 3, %v2813_v29  ;;  %v2849_v38 = vor.u32 %v2848_v27, %v2847_v32 }
 0x2b4   : > { %v2853_v25 = vshll.u32 %v17641_v31, %v2838_v18  ;;  %v2854_v23 = vshrl.u32 %v17642_v5, %v2839_v63  ;;  %v2679_v16 = vshll.u32 %v15038_v3, 30  ;;  %v2832_v41 = vor.u32 8388608, %v2831_v49 }
 0x2b5   : > { %v2852_v21 = vor.u32 %v2851_v1, %v2850_v17  ;;  %vm2856_vm7 = vcmp.lt.s32.totalorder %v15031_v58, 1  ;;  %vm2859_vm0 = vcmp.lt.s32.totalorder %v15031_v58, 4  ;;  %v2931_v44 = vand.u32 2139095040, %v15036_v59 }
 0x2b6   : > { %v2855_v7 = vor.u32 %v2854_v23, %v2853_v25  ;;  %v15050_v22 = vsub.s32 %v2676_v20, %v2679_v16  ;;  %vm2858_vm14 = vcmp.lt.s32.totalorder %v15031_v58, 3  ;;  %v2864_v18 = vsel %vm2856_vm7, %v2843_v4, %v2846_v10 }
 0x2b7   : > { %v2865_v12 = vsel %vm2859_vm0, %v2852_v21, 920167782  ;;  %vm2816_vm5 = vcmp.eq.s32.totalorder %v15042_v53, 0  ;;  %vm6126_vm10 = vcmp.eq.s32.totalorder %v15022_v47, 0  ;;  %vm6129_vm6 = vcmp.eq.s32.totalorder %v15022_v47, 2 }
 0x2b8   : > { %v12285_v33 = vpop.eup %12284  ;;  %v2866_v29 = vsel %vm2858_vm14, %v2849_v38, %v2865_v12  ;;  %vm2819_vm8 = vcmp.eq.s32.totalorder %v15042_v53, 2  ;;  %v2682_v20 = vsub.s32 0, %v15050_v22  ;;  %vm2857_vm12 = vcmp.lt.s32.totalorder %v15031_v58, 2  ;;  %v539_v12 = vpop.permute.xlu1 %538 }
 0x2b9   : > { %v12287_v56 = vpop.eup %12286  ;;  %v2872_v24 = vshll.u32 %v2832_v41, 8  ;;  %vm2815_vm11 = vcmp.lt.s32.totalorder %v15042_v53, 2  ;;  %v2820_v37 = vxor.u32 2147483648, %v12285_v33  ;;  %v2867_v61 = vsel %vm2857_vm12, %v2864_v18, %v2866_v29 }
 0x2ba   : > { %v2869_v30 = vsel %vm2859_vm0, %v2855_v7, 1326507024  ;;  %v2932_v49 = vshrl.u32 %v2931_v44, 23  ;;  %v2817_v26 = vxor.u32 2147483648, %v12287_v56  ;;  %vm6125_vm4 = vcmp.lt.s32.totalorder %v15022_v47, 2 }
 0x2bb   : > { %v10937_v27 = vmin.u32 %v2682_v20, %v15050_v22  ;;  %v2861_v32 = vsel %vm2859_vm0, %v2849_v38, 2102212464  ;;  %v2868_v17 = vsel %vm2856_vm7, %v2846_v10, %v2849_v38  ;;  %v2840_v1 = vshrl.u32 %v17644_v42, %v2839_v63 }
 0x2bc   : > { %v2870_v25 = vsel %vm2858_vm14, %v2852_v21, %v2869_v30  ;;  %v15079_v23 = vmul.u32.u64.low %v2872_v24, %v2867_v61  ;;  %v15080_v16 = vmul.u32.u64.high %v2872_v24, %v2867_v61, %v15079_v23  ;;  %vm15085_vm13 = vcmp.le.f32.partialorder %v2616_v54, 0.7853982 }
 0x2bd   : > { %vm2618_vm9 = vcmp.lt.s32.totalorder %v14873_v40, 0  ;;  %v2684_v7 = vclz %v10937_v27  ;;  %v17592_v38 = vand.u32 2147483647, %v15036_v59  ;;  %v2860_v63 = vsel %vm2856_vm7, %v2840_v1, %v2843_v4 }
 0x2be   : > { %v2862_v21 = vsel %vm2858_vm14, %v2846_v10, %v2861_v32  ;;  %v2871_v44 = vsel %vm2857_vm12, %v2868_v17, %v2870_v25  ;;  %v10948_v18 = vadd.s32 4294967169, %v2932_v49  ;;  %v2702_v29 = vsub.s32 4, %v15038_v3 }
 0x2bf   : > { %v10938_v54 = vadd.s32 4294967294, %v2684_v7  ;;  %v15098_v20 = vmul.u32.u64.low %v2872_v24, %v2871_v44  ;;  %v15099_v61 = vmul.u32.u64.high %v2872_v24, %v2871_v44, %v15098_v20  ;;  %v2818_v30 = vsel %vm2816_vm5, %v12285_v33, %v2817_v26 }
 0x2c0   : > { %v2821_v4 = vsel %vm2819_vm8, %v2820_v37, %v12287_v56  ;;  %v6131_v10 = vsel %vm6129_vm6, %v2820_v37, %v12287_v56  ;;  %v2938_v27 = vadd.s32 1, %v10948_v18  ;;  %v6128_v49 = vsel %vm6126_vm10, %v12285_v33, %v2817_v26 }
 0x2c1   : > { %vm10939_vm7 = vcmp.lt.s32.totalorder %v10938_v54, 0  ;;  %v2863_v32 = vsel %vm2857_vm12, %v2860_v63, %v2862_v21  ;;  %v2882_v17 = vadd.s32 1, %v15080_v16  ;;  %v2672_v1 = vadd.s32 %v14993_v0, %v14990_v2  ;;  %v673_v0 = vpop.permute.xlu1 %672 }
 0x2c2   : > { %v2687_v25 = vsel %vm10939_vm7, 0, %v10938_v54  ;;  %v2935_v7 = vand.u32 8388607, %v17592_v38  ;;  %vm2939_vm0 = vcmp.gt.s32.totalorder %v2938_v27, 0  ;;  %v2822_v56 = vsel %vm2815_vm11, %v2818_v30, %v2821_v4  ;;  %v17786_v4 = vld [vmem:[#allocation27_spill] sm:$0xff] }
 0x2c3   : > { %v2688_v37 = vsub.s32 32, %v2687_v25  ;;  %v2692_v44 = vsub.s32 4294967266, %v2687_v25  ;;  %v2703_v58 = vsel %vm2618_vm9, %v2702_v29, %v15038_v3  ;;  %v6132_v33 = vsel %vm6125_vm4, %v6128_v49, %v6131_v10  ;;  %v677_v29 = vpop.permute.xlu0 %676 }
 0x2c4   : > { %v2879_v26 = vmul.u32 %v2872_v24, %v2863_v32  ;;  %vm2881_vm14 = vc.u32 %v15099_v61, %v15079_v23  ;;  %v2940_v2 = vsel %vm2939_vm0, %v2938_v27, 0  ;;  %v2689_v63 = vshll.u32 %v15050_v22, %v2687_v25 }
 0x2c5   : > { %v2690_v21 = vshrl.u32 %v2672_v1, %v2688_v37  ;;  %v2693_v53 = vadd.s32 127, %v2692_v44  ;;  %v2883_v18 = vsel %vm2881_vm14, %v2882_v17, %v15080_v16  ;;  %vm2812_vm5 = vweird.f32 %v14586_v15 }
 0x2c6   : > { %v2705_v3 = vsel %vm15085_vm13, 0, %v2703_v58  ;;  %v2884_v54 = vadd.s32 %v2883_v18, %v2879_v26  ;;  %v2942_v47 = vand.u32 31, %v2940_v2  ;;  %v15132_v30 = vsel %vm17602_vm1, %v539_v12, %v677_v29  ;;  %v17787_v12 = vld [vmem:[#allocation9_spill] sm:$0xff]  ;;  %v15153_v18 = vpop.permute.xlu1 %543 }
 0x2c7   : > { %v2691_v24 = vor.u32 %v2690_v21, %v2689_v63  ;;  %v2694_v20 = vshll.u32 %v2693_v53, 23  ;;  %v739_v22 = vsel %vm17602_vm1, %v17786_v4, %v673_v0  ;;  %v2823_v10 = vsel %vm2812_vm5, nan, %v2822_v56 }
 0x2c8   : > { %v6133_v16 = vsel %vm2812_vm5, nan, %v6132_v33  ;;  %v2885_v27 = vadd.s32 536870912, %v2884_v54  ;;  %v2943_v15 = vsub.s32 32, %v2942_v47  ;;  %v2709_v32 = vadd.s32 3, %v2705_v3 }
 0x2c9   : > { %v2695_v49 = vor.u32 4788187, %v2694_v20  ;;  %v15137_v17 = vand.u32 3, %v2705_v3  ;;  %v2936_v1 = vor.u32 8388608, %v2935_v7  ;;  %v2698_v25 = vcvt.s32.f32 %v2691_v24 }
 0x2ca   : > { %v15139_v37 = vshrl.u32 %v2885_v27, 30  ;;  %v2946_v44 = vshrl.u32 %v17638_v52, %v2943_v15  ;;  %v15145_v58 = vsel %vm17601_vm2, %v17787_v12, %v739_v22  ;;  %v2949_v56 = vshrl.u32 %v17639_v36, %v2943_v15 }
 0x2cb   : > { %v2696_v26 = vand.u32 2147483647, %v2695_v49  ;;  %v2952_v33 = vshrl.u32 %v17640_v13, %v2943_v15  ;;  %v2955_v0 = vshrl.u32 %v17641_v31, %v2943_v15  ;;  %v2941_v7 = vshrl.u32 %v2940_v2, 5 }
 0x2cc   : > { %v2887_v63 = vshll.u32 %v15139_v37, 30  ;;  %v2951_v21 = vshll.u32 %v17639_v36, %v2942_v47  ;;  %v2954_v53 = vshll.u32 %v17640_v13, %v2942_v47  ;;  %v2945_v29 = vshll.u32 %v17644_v42, %v2942_v47 }
 0x2cd   : > { %v2699_v3 = vmul.f32 %v2698_v25, %v2696_v26  ;;  %v2948_v24 = vshll.u32 %v17638_v52, %v2942_v47  ;;  %v2958_v20 = vshrl.u32 %v17642_v5, %v2943_v15  ;;  %v15162_v2 = vmul.f32 %v17733_v48, %v15145_v58 }
 0x2ce   : > { %v15158_v4 = vsub.s32 %v2884_v54, %v2887_v63  ;;  %v2953_v22 = vor.u32 %v2952_v33, %v2951_v21  ;;  %v2956_v27 = vor.u32 %v2955_v0, %v2954_v53  ;;  %v2947_v12 = vor.u32 %v2946_v44, %v2945_v29  ;;  %v549_v63 = vpop.permute.xlu1 %548 }
 0x2cf   : > { %v2700_v49 = vxor.u32 2147483648, %v2699_v3  ;;  %v2950_v38 = vor.u32 %v2949_v56, %v2948_v24  ;;  %v2957_v55 = vshll.u32 %v17641_v31, %v2942_v47  ;;  %v15165_v25 = vand.u32 3, %v2709_v32 }
 0x2d0   : > { %v2890_v26 = vsub.s32 0, %v15158_v4  ;;  %vm2960_vm10 = vcmp.lt.s32.totalorder %v2941_v7, 1  ;;  %v15168_v45 = vshll.u32 %v2936_v1, 8  ;;  %v2944_v33 = vshrl.u32 %v17644_v42, %v2943_v15 }
 0x2d1   : > { %v2701_v54 = vsel %vm2618_vm9, %v2700_v49, %v2699_v3  ;;  %v2959_v0 = vor.u32 %v2958_v20, %v2957_v55  ;;  %vm2963_vm6 = vcmp.lt.s32.totalorder %v2941_v7, 4  ;;  %vm2961_vm8 = vcmp.lt.s32.totalorder %v2941_v7, 2 }
 0x2d2   : > { %v2704_v44 = vsel %vm15085_vm13, %v14873_v40, %v2701_v54  ;;  %v10945_v47 = vmin.u32 %v2890_v26, %v15158_v4  ;;  %v2965_v32 = vsel %vm2963_vm6, %v2953_v22, 2102212464  ;;  %v2969_v56 = vsel %vm2963_vm6, %v2956_v27, 920167782 }
 0x2d3   : > { %12288 = vcosq.f32 %v2704_v44  ;;  %v2968_v1 = vsel %vm2960_vm10, %v2947_v12, %v2950_v38  ;;  %v3035_v21 = vand.u32 2139095040, %v15162_v2  ;;  %vm2826_vm12 = vcmp.lt.s32.totalorder %v14922_v35, 0 }
 0x2d4   : > { %12290 = vsinq.f32 %v2704_v44  ;;  %v2892_v55 = vclz %v10945_v47  ;;  %vm2962_vm11 = vcmp.lt.s32.totalorder %v2941_v7, 3  ;;  %v2964_v41 = vsel %vm2960_vm10, %v2944_v33, %v2947_v12  ;;  %v685_v44 = vpop.permute.xlu1 %684 }
 0x2d5   : > { %v2966_v15 = vsel %vm2962_vm11, %v2950_v38, %v2965_v32  ;;  %v2970_v53 = vsel %vm2962_vm11, %v2953_v22, %v2969_v56  ;;  %v2972_v3 = vsel %vm2960_vm10, %v2950_v38, %v2953_v22  ;;  %v2973_v29 = vsel %vm2963_vm6, %v2959_v0, 1326507024 }
 0x2d6   : > { %v15187_v24 = vsel %vm7580_vm15, %v2823_v10, %v6133_v16  ;;  %v10946_v20 = vadd.s32 4294967294, %v2892_v55  ;;  %v2971_v49 = vsel %vm2961_vm8, %v2968_v1, %v2970_v53  ;;  %v2974_v26 = vsel %vm2962_vm11, %v2956_v27, %v2973_v29 }
 0x2d7   : > { %vm6026_vm4 = vcmp.eq.s32.totalorder %v15137_v17, 2  ;;  %v17788_v54 = vand.u32 2147483647, %v14922_v35  ;;  %v2975_v38 = vsel %vm2961_vm8, %v2972_v3, %v2974_v26  ;;  %v3036_v10 = vshrl.u32 %v3035_v21, 23 }
 0x2d8   : > { %v15199_v22 = vmul.u32.u64.low %v15168_v45, %v2971_v49  ;;  %v15200_v33 = vmul.u32.u64.high %v15168_v45, %v2971_v49, %v15199_v22  ;;  %vm6023_vm9 = vcmp.eq.s32.totalorder %v15137_v17, 0  ;;  %vm10947_vm7 = vcmp.lt.s32.totalorder %v10946_v20, 0 }
 0x2d9   : > { %vm15193_vm13 = vcmp.le.f32.partialorder %v17788_v54, 0.7853982  ;;  %v2967_v16 = vsel %vm2961_vm8, %v2964_v41, %v2966_v15  ;;  %v15206_v27 = vmul.u32.u64.low %v15168_v45, %v2975_v38  ;;  %v15207_v0 = vmul.u32.u64.high %v15168_v45, %v2975_v38, %v15206_v27 }
 0x2da   : > { %vm2711_vm0 = vcmp.lt.s32.totalorder %v15165_v25, 2  ;;  %vm6022_vm14 = vcmp.lt.s32.totalorder %v15137_v17, 2  ;;  %v2895_v47 = vsel %vm10947_vm7, 0, %v10946_v20  ;;  %v2910_v32 = vsub.s32 4, %v15139_v37  ;;  %v17791_v27 = vld [vmem:[#allocation10_spill] sm:$0xff] }
 0x2db   : > { %v10952_v56 = vadd.s32 4294967169, %v3036_v10  ;;  %vm2708_vm5 = vweird.f32 %v14873_v40  ;;  %vm2712_vm10 = vcmp.eq.s32.totalorder %v15165_v25, 0  ;;  %v2880_v7 = vadd.s32 %v15079_v23, %v15099_v61 }
 0x2dc   : > { %v2896_v1 = vsub.s32 32, %v2895_v47  ;;  %v2900_v21 = vsub.s32 4294967266, %v2895_v47  ;;  %v2983_v55 = vmul.u32 %v15168_v45, %v2967_v16  ;;  %v2986_v41 = vadd.s32 1, %v15200_v33 }
 0x2dd   : > { %v3042_v15 = vadd.s32 1, %v10952_v56  ;;  %v742_v53 = vsel %vm17602_vm1, %v549_v63, %v685_v44  ;;  %v2897_v3 = vshll.u32 %v15158_v4, %v2895_v47  ;;  %vm2985_vm6 = vc.u32 %v15207_v0, %v15199_v22  ;;  %v12289_v49 = vpop.eup %12288 }
 0x2de   : > { %v2898_v29 = vshrl.u32 %v2880_v7, %v2896_v1  ;;  %v2901_v20 = vadd.s32 127, %v2900_v21  ;;  %vm2715_vm8 = vcmp.eq.s32.totalorder %v15165_v25, 2  ;;  %v2911_v45 = vsel %vm2826_vm12, %v2910_v32, %v15139_v37  ;;  %v12291_v61 = vpop.eup %12290 }
 0x2df   : > { %v2987_v23 = vsel %vm2985_vm6, %v2986_v41, %v15200_v33  ;;  %vm3043_vm11 = vcmp.gt.s32.totalorder %v3042_v15, 0  ;;  %v2716_v26 = vxor.u32 2147483648, %v12289_v49  ;;  %v2713_v38 = vxor.u32 2147483648, %v12291_v61 }
 0x2e0   : > { %v2899_v63 = vor.u32 %v2898_v29, %v2897_v3  ;;  %v2902_v54 = vshll.u32 %v2901_v20, 23  ;;  %v2988_v4 = vadd.s32 %v2987_v23, %v2983_v55  ;;  %v3032_v10 = vand.u32 2147483647, %v15162_v2  ;;  %v842_v3 = vpop.permute.xlu1 %841 }
 0x2e1   : > { %v3044_v16 = vsel %vm3043_vm11, %v3042_v15, 0  ;;  %v15232_v44 = vsel %vm17601_vm2, %v17791_v27, %v742_v53  ;;  %v2717_v47 = vsel %vm2715_vm8, %v2716_v26, %v12291_v61  ;;  %v6028_v37 = vsel %vm6026_vm4, %v2716_v26, %v12291_v61 }
 0x2e2   : > { %v2903_v33 = vor.u32 4788187, %v2902_v54  ;;  %v2913_v32 = vsel %vm15193_vm13, 0, %v2911_v45  ;;  %v2714_v56 = vsel %vm2712_vm10, %v12289_v49, %v2713_v38  ;;  %v6025_v7 = vsel %vm6023_vm9, %v12289_v49, %v2713_v38 }
 0x2e3   : > { %v2906_v1 = vcvt.s32.f32 %v2899_v63  ;;  %v2989_v21 = vadd.s32 536870912, %v2988_v4  ;;  %v2718_v55 = vsel %vm2711_vm0, %v2714_v56, %v2717_v47  ;;  %v6029_v41 = vsel %vm6022_vm14, %v6025_v7, %v6028_v37 }
 0x2e4   : > { %v2904_v15 = vand.u32 2147483647, %v2903_v33  ;;  %v3046_v53 = vand.u32 31, %v3044_v16  ;;  %v2719_v29 = vsel %vm2708_vm5, nan, %v2718_v55  ;;  %v6030_v20 = vsel %vm2708_vm5, nan, %v6029_v41 }
 0x2e5   : > { %v2917_v45 = vadd.s32 3, %v2913_v32  ;;  %v2990_v23 = vshrl.u32 %v2989_v21, 30  ;;  %v7597_v49 = vsel %vm7580_vm15, %v2719_v29, %v6030_v20  ;;  %v3039_v25 = vand.u32 8388607, %v3032_v10 }
 0x2e6   : > { %v2907_v61 = vmul.f32 %v2906_v1, %v2904_v15  ;;  %v3047_v17 = vsub.s32 32, %v3046_v53  ;;  %vm17792_vm4 = vcmp.eq.s32.totalorder %v12533_v11, 1  ;;  %v15264_v54 = vsel %vm17601_vm2, %v842_v3, %v15132_v30 }
 0x2e7   : > { %v7635_v26 = vsel %vm17792_vm4, %v14573_v28, %v15187_v24  ;;  %vm17793_vm9 = vmmov %vm17792_vm4  ;;  %v2991_v63 = vshll.u32 %v2990_v23, 30  ;;  %v15268_v47 = vand.u32 3, %v2913_v32  ;;  %v15272_v37 = vmul.f32 %v17733_v48, %v15232_v44 }
 0x2e8   : > { %v7634_v40 = vsel %vm17793_vm9, %v14864_v6, %v7597_v49  ;;  %v2908_v27 = vxor.u32 2147483648, %v2907_v61  ;;  %v15274_v28 = vand.u32 3, %v2917_v45  ;;  %v3050_v6 = vshrl.u32 %v17638_v52, %v3047_v17 }
 0x2e9   : > { %v15266_v38 = vpack.c.bf16 %v7635_v26, %v7634_v40  ;;  %v15276_v24 = vsub.s32 %v2988_v4, %v2991_v63  ;;  %v3053_v33 = vshrl.u32 %v17639_v36, %v3047_v17  ;;  %v3040_v56 = vor.u32 8388608, %v3039_v25 }
 0x2ea   : > { %v2909_v30 = vsel %vm2826_vm12, %v2908_v27, %v2907_v61  ;;  %v15282_v7 = vshrl.u32 %v3044_v16, 5  ;;  %v3056_v32 = vshrl.u32 %v17640_v13, %v3047_v17  ;;  %vm2930_vm7 = vcmp.lt.s32.totalorder %v15036_v59, 0 }
 0x2eb   : > { %17794 = vst [vmem:[#allocation13_spill] sm:$0xff] %v15266_v38  ;;  %11593 = vmatprep.mubr.msk.bf16.mxu0 %vm7693_vm3, %v15266_v38  ;;  %v2912_v4 = vsel %vm15193_vm13, %v14922_v35, %v2909_v30  ;;  %v2994_v1 = vsub.s32 0, %v15276_v24  ;;  %v3049_v21 = vshll.u32 %v17644_v42, %v3046_v53  ;;  %v3052_v55 = vshll.u32 %v17638_v52, %v3046_v53 }
 0x2ec   : > { %12292 = vcosq.f32 %v2912_v4  ;;  %v2984_v16 = vadd.s32 %v15199_v22, %v15207_v0  ;;  %v3055_v41 = vshll.u32 %v17639_v36, %v3046_v53  ;;  %v3344_v15 = vand.u32 2147483647, %v15272_v37 }
 0x2ed   : > { %12294 = vsinq.f32 %v2912_v4  ;;  %v10949_v12 = vmin.u32 %v2994_v1, %v15276_v24  ;;  %v3051_v3 = vor.u32 %v3050_v6, %v3049_v21  ;;  %v3054_v29 = vor.u32 %v3053_v33, %v3052_v55 }
 0x2ee   : > { %v3057_v20 = vor.u32 %v3056_v32, %v3055_v41  ;;  %v3058_v45 = vshll.u32 %v17640_v13, %v3046_v53  ;;  %v3059_v49 = vshrl.u32 %v17641_v31, %v3047_v17  ;;  %v15301_v61 = vshll.u32 %v3040_v56, 8 }
 0x2ef   : > { %v17795_v25 = vand.u32 2147483647, %v15036_v59  ;;  %v2996_v0 = vclz %v10949_v12  ;;  %v3014_v26 = vsub.s32 4, %v2990_v23  ;;  %vm3064_vm13 = vcmp.lt.s32.totalorder %v15282_v7, 1 }
 0x2f0   : > { %v3347_v40 = vand.u32 2139095040, %v15272_v37  ;;  %v3048_v63 = vshrl.u32 %v17644_v42, %v3047_v17  ;;  %v3060_v27 = vor.u32 %v3059_v49, %v3058_v45  ;;  %v3061_v6 = vshll.u32 %v17641_v31, %v3046_v53 }
 0x2f1   : > { %vm15305_vm12 = vcmp.le.f32.partialorder %v17795_v25, 0.7853982  ;;  %v3062_v33 = vshrl.u32 %v17642_v5, %v3047_v17  ;;  %v10950_v30 = vadd.s32 4294967294, %v2996_v0  ;;  %vm3065_vm0 = vcmp.lt.s32.totalorder %v15282_v7, 2 }
 0x2f2   : > { %vm3067_vm14 = vcmp.lt.s32.totalorder %v15282_v7, 4  ;;  %v3072_v56 = vsel %vm3064_vm13, %v3051_v3, %v3054_v29  ;;  %vm3066_vm5 = vcmp.lt.s32.totalorder %v15282_v7, 3  ;;  %v3076_v53 = vsel %vm3064_vm13, %v3054_v29, %v3057_v20 }
 0x2f3   : > { %v3063_v32 = vor.u32 %v3062_v33, %v3061_v6  ;;  %v3069_v4 = vsel %vm3067_vm14, %v3057_v20, 2102212464  ;;  %v3073_v1 = vsel %vm3067_vm14, %v3060_v27, 920167782  ;;  %vm10951_vm10 = vcmp.lt.s32.totalorder %v10950_v30, 0 }
 0x2f4   : > { %v3074_v21 = vsel %vm3066_vm5, %v3057_v20, %v3073_v1  ;;  %v3348_v17 = vshrl.u32 %v3347_v40, 23  ;;  %v2999_v55 = vsel %vm10951_vm10, 0, %v10950_v30  ;;  %v3015_v41 = vsel %vm2930_vm7, %v3014_v26, %v2990_v23 }
 0x2f5   : > { %v3075_v12 = vsel %vm3065_vm0, %v3072_v56, %v3074_v21  ;;  %v3077_v45 = vsel %vm3067_vm14, %v3063_v32, 1326507024  ;;  %vm6229_vm6 = vcmp.eq.s32.totalorder %v15268_v47, 0  ;;  %v3000_v49 = vsub.s32 32, %v2999_v55 }
 0x2f6   : > { %v3004_v25 = vsub.s32 4294967266, %v2999_v55  ;;  %v3068_v0 = vsel %vm3064_vm13, %v3048_v63, %v3051_v3  ;;  %v3078_v6 = vsel %vm3066_vm5, %v3060_v27, %v3077_v45  ;;  %v12293_v20 = vpop.eup %12292  ;;  %v3070_v40 = vsel %vm3066_vm5, %v3054_v29, %v3069_v4 }
 0x2f7   : > { %v3079_v23 = vsel %vm3065_vm0, %v3076_v53, %v3078_v6  ;;  %v15337_v26 = vmul.u32.u64.low %v15301_v61, %v3075_v12  ;;  %v15338_v33 = vmul.u32.u64.high %v15301_v61, %v3075_v12, %v15337_v26  ;;  %v12295_v30 = vpop.eup %12294  ;;  %v3001_v56 = vshll.u32 %v15276_v24, %v2999_v55 }
 0x2f8   : > { %v3002_v32 = vshrl.u32 %v2984_v16, %v3000_v49  ;;  %v3005_v3 = vadd.s32 127, %v3004_v25  ;;  %v10964_v63 = vadd.s32 4294967169, %v3348_v17  ;;  %v2924_v1 = vxor.u32 2147483648, %v12293_v20 }
 0x2f9   : > { %v3017_v27 = vsel %vm15305_vm12, 0, %v3015_v41  ;;  %v15345_v29 = vmul.u32.u64.low %v15301_v61, %v3079_v23  ;;  %v15346_v4 = vmul.u32.u64.high %v15301_v61, %v3079_v23, %v15345_v29  ;;  %vm6232_vm8 = vcmp.eq.s32.totalorder %v15268_v47, 2 }
 0x2fa   : > { %v3003_v21 = vor.u32 %v3002_v32, %v3001_v56  ;;  %v3006_v53 = vshll.u32 %v3005_v3, 23  ;;  %v3071_v12 = vsel %vm3065_vm0, %v3068_v0, %v3070_v40  ;;  %vm2920_vm11 = vcmp.eq.s32.totalorder %v15274_v28, 0 }
 0x2fb   : > { %v2921_v24 = vxor.u32 2147483648, %v12295_v30  ;;  %v3090_v16 = vadd.s32 1, %v15338_v33  ;;  %v3354_v17 = vadd.s32 1, %v10964_v63  ;;  %vm2923_vm4 = vcmp.eq.s32.totalorder %v15274_v28, 2 }
 0x2fc   : > { %v3007_v55 = vor.u32 4788187, %v3006_v53  ;;  %v3021_v41 = vadd.s32 3, %v3017_v27  ;;  %v3351_v45 = vand.u32 8388607, %v3344_v15  ;;  %v2925_v49 = vsel %vm2923_vm4, %v2924_v1, %v12295_v30 }
 0x2fd   : > { %v6234_v25 = vsel %vm6232_vm8, %v2924_v1, %v12295_v30  ;;  %v3087_v6 = vmul.u32 %v15301_v61, %v3071_v12  ;;  %vm3089_vm9 = vc.u32 %v15346_v4, %v15337_v26  ;;  %v3010_v0 = vcvt.s32.f32 %v3003_v21 }
 0x2fe   : > { %v3008_v7 = vand.u32 2147483647, %v3007_v55  ;;  %v3091_v40 = vsel %vm3089_vm9, %v3090_v16, %v15338_v33  ;;  %vm3355_vm13 = vcmp.gt.s32.totalorder %v3354_v17, 0  ;;  %v2922_v23 = vsel %vm2920_vm11, %v12293_v20, %v2921_v24 }
 0x2ff   : > { %v6231_v56 = vsel %vm6229_vm6, %v12293_v20, %v2921_v24  ;;  %v3092_v32 = vadd.s32 %v3091_v40, %v3087_v6  ;;  %v3356_v3 = vsel %vm3355_vm13, %v3354_v17, 0  ;;  %vm2919_vm0 = vcmp.lt.s32.totalorder %v15274_v28, 2 }
 0x300   : > { %vm6228_vm14 = vcmp.lt.s32.totalorder %v15268_v47, 2  ;;  %v3011_v61 = vmul.f32 %v3010_v0, %v3008_v7  ;;  %v3358_v30 = vand.u32 31, %v3356_v3  ;;  %v15366_v63 = vand.u32 3, %v3021_v41 }
 0x301   : > { %v15368_v1 = vand.u32 3, %v3017_v27  ;;  %v3093_v33 = vadd.s32 536870912, %v3092_v32  ;;  %v3352_v29 = vor.u32 8388608, %v3351_v45  ;;  %v2926_v21 = vsel %vm2919_vm0, %v2922_v23, %v2925_v49 }
 0x302   : > { %v6235_v53 = vsel %vm6228_vm14, %v6231_v56, %v6234_v25  ;;  %v3012_v12 = vxor.u32 2147483648, %v3011_v61  ;;  %v3359_v16 = vsub.s32 32, %v3358_v30  ;;  %v3357_v20 = vshrl.u32 %v3356_v3, 5 }
 0x303   : > { %v15370_v55 = vshrl.u32 %v3093_v33, 30  ;;  %v3361_v24 = vshll.u32 %v17644_v42, %v3358_v30  ;;  %v3364_v28 = vshll.u32 %v17638_v52, %v3358_v30  ;;  %v3367_v41 = vshll.u32 %v17639_v36, %v3358_v30 }
 0x304   : > { %v3013_v47 = vsel %vm2930_vm7, %v3012_v12, %v3011_v61  ;;  %v3362_v17 = vshrl.u32 %v17638_v52, %v3359_v16  ;;  %v3365_v27 = vshrl.u32 %v17639_v36, %v3359_v16  ;;  %vm2916_vm5 = vweird.f32 %v14922_v35 }
 0x305   : > { %v3016_v45 = vsel %vm15305_vm12, %v15036_v59, %v3013_v47  ;;  %v3095_v49 = vshll.u32 %v15370_v55, 30  ;;  %v3368_v25 = vshrl.u32 %v17640_v13, %v3359_v16  ;;  %v3370_v6 = vshll.u32 %v17640_v13, %v3358_v30 }
 0x306   : > { %12296 = vcosq.f32 %v3016_v45  ;;  %v3363_v7 = vor.u32 %v3362_v17, %v3361_v24  ;;  %v3366_v0 = vor.u32 %v3365_v27, %v3364_v28  ;;  %v3371_v40 = vshrl.u32 %v17641_v31, %v3359_v16 }
 0x307   : > { %12298 = vsinq.f32 %v3016_v45  ;;  %v15387_v23 = vsub.s32 %v3092_v32, %v3095_v49  ;;  %v3369_v56 = vor.u32 %v3368_v25, %v3367_v41  ;;  %v15389_v3 = vshll.u32 %v3352_v29, 8 }
 0x308   : > { %v3360_v22 = vshrl.u32 %v17644_v42, %v3359_v16  ;;  %v3372_v61 = vor.u32 %v3371_v40, %v3370_v6  ;;  %v3373_v33 = vshll.u32 %v17641_v31, %v3358_v30  ;;  %v3374_v12 = vshrl.u32 %v17642_v5, %v3359_v16 }
 0x309   : > { %v3098_v47 = vsub.s32 0, %v15387_v23  ;;  %vm3376_vm7 = vcmp.lt.s32.totalorder %v3357_v20, 1  ;;  %vm3378_vm12 = vcmp.lt.s32.totalorder %v3357_v20, 3  ;;  %vm3379_vm10 = vcmp.lt.s32.totalorder %v3357_v20, 4 }
 0x30a   : > { %v3375_v24 = vor.u32 %v3374_v12, %v3373_v33  ;;  %v3381_v28 = vsel %vm3379_vm10, %v3369_v56, 2102212464  ;;  %v3384_v17 = vsel %vm3376_vm7, %v3363_v7, %v3366_v0  ;;  %v3385_v32 = vsel %vm3379_vm10, %v3372_v61, 920167782 }
 0x30b   : > { %v10953_v27 = vmin.u32 %v3098_v47, %v15387_v23  ;;  %vm3377_vm6 = vcmp.lt.s32.totalorder %v3357_v20, 2  ;;  %v3386_v29 = vsel %vm3378_vm12, %v3369_v56, %v3385_v32  ;;  %v3388_v41 = vsel %vm3376_vm7, %v3366_v0, %v3369_v56 }
 0x30c   : > { %vm6331_vm8 = vcmp.lt.s32.totalorder %v15368_v1, 2  ;;  %v3380_v30 = vsel %vm3376_vm7, %v3360_v22, %v3363_v7  ;;  %v3382_v16 = vsel %vm3378_vm12, %v3366_v0, %v3381_v28  ;;  %v3387_v45 = vsel %vm3377_vm6, %v3384_v17, %v3386_v29 }
 0x30d   : > { %v3389_v49 = vsel %vm3379_vm10, %v3375_v24, 1326507024  ;;  %vm3020_vm11 = vweird.f32 %v15036_v59  ;;  %v3100_v25 = vclz %v10953_v27  ;;  %v2927_v56 = vsel %vm2916_vm5, nan, %v2926_v21 }
 0x30e   : > { %v3390_v6 = vsel %vm3378_vm12, %v3372_v61, %v3389_v49  ;;  %v15403_v40 = vmul.u32.u64.low %v15389_v3, %v3387_v45  ;;  %v15404_v33 = vmul.u32.u64.high %v15389_v3, %v3387_v45, %v15403_v40  ;;  %v6236_v7 = vsel %vm2916_vm5, nan, %v6235_v53 }
 0x30f   : > { %vm6332_vm4 = vcmp.eq.s32.totalorder %v15368_v1, 0  ;;  %v3391_v0 = vsel %vm3377_vm6, %v3388_v41, %v3390_v6  ;;  %vm6335_vm9 = vcmp.eq.s32.totalorder %v15368_v1, 2  ;;  %v10954_v22 = vadd.s32 4294967294, %v3100_v25 }
 0x310   : > { %v15415_v61 = vmul.u32.u64.low %v15389_v3, %v3391_v0  ;;  %v15416_v12 = vmul.u32.u64.high %v15389_v3, %v3391_v0, %v15415_v61  ;;  %v12297_v47 = vpop.eup %12296  ;;  %vm3023_vm13 = vcmp.lt.s32.totalorder %v15366_v63, 2  ;;  %vm3024_vm0 = vcmp.eq.s32.totalorder %v15366_v63, 0 }
 0x311   : > { %vm3027_vm14 = vcmp.eq.s32.totalorder %v15366_v63, 2  ;;  %v3383_v35 = vsel %vm3377_vm6, %v3380_v30, %v3382_v16  ;;  %v12299_v21 = vpop.eup %12298  ;;  %v7599_v53 = vsel %vm7580_vm15, %v2927_v56, %v6236_v7  ;;  %v3028_v24 = vxor.u32 2147483648, %v12297_v47 }
 0x312   : > { %v3088_v28 = vadd.s32 %v15337_v26, %v15346_v4  ;;  %vm10955_vm5 = vcmp.lt.s32.totalorder %v10954_v22, 0  ;;  %v3025_v17 = vxor.u32 2147483648, %v12299_v21  ;;  %v3402_v27 = vadd.s32 1, %v15404_v33 }
 0x313   : > { %v3103_v32 = vsel %vm10955_vm5, 0, %v10954_v22  ;;  %v15429_v29 = vmul.f32 %v17733_v48, %v15264_v54  ;;  %v3029_v41 = vsel %vm3027_vm14, %v3028_v24, %v12299_v21  ;;  %v6337_v20 = vsel %vm6335_vm9, %v3028_v24, %v12299_v21 }
 0x314   : > { %v3104_v30 = vsub.s32 32, %v3103_v32  ;;  %v3399_v16 = vmul.u32 %v15389_v3, %v3383_v35  ;;  %v3026_v45 = vsel %vm3024_vm0, %v12297_v47, %v3025_v17  ;;  %v6334_v26 = vsel %vm6332_vm4, %v12297_v47, %v3025_v17 }
 0x315   : > { %v3105_v4 = vshll.u32 %v15387_v23, %v3103_v32  ;;  %v3108_v49 = vsub.s32 4294967266, %v3103_v32  ;;  %v3030_v25 = vsel %vm3023_vm13, %v3026_v45, %v3029_v41  ;;  %v6338_v6 = vsel %vm6331_vm8, %v6334_v26, %v6337_v20  ;;  %v846_v32 = vpop.permute.xlu1 %845 }
 0x316   : > { %v3106_v56 = vshrl.u32 %v3088_v28, %v3104_v30  ;;  %vm3401_vm7 = vc.u32 %v15416_v12, %v15403_v40  ;;  %v3031_v3 = vsel %vm3020_vm11, nan, %v3030_v25  ;;  %v6339_v7 = vsel %vm3020_vm11, nan, %v6338_v6 }
 0x317   : > { %v3109_v0 = vadd.s32 127, %v3108_v49  ;;  %v3403_v23 = vsel %vm3401_vm7, %v3402_v27, %v15404_v33  ;;  %vm17798_vm12 = vcmp.eq.s32.totalorder %v12533_v11, 1  ;;  %v7600_v1 = vsel %vm7580_vm15, %v3031_v3, %v6339_v7  ;;  %v681_v33 = vpop.permute.xlu0 %680 }
 0x318   : > { %v7636_v63 = vsel %vm17798_vm12, %v14903_v46, %v7599_v53  ;;  %v3404_v22 = vadd.s32 %v3403_v23, %v3399_v16  ;;  %vm17799_vm10 = vmmov %vm17798_vm12  ;;  %v3107_v47 = vor.u32 %v3106_v56, %v3105_v4  ;;  %v3139_v59 = vand.u32 2139095040, %v15429_v29 }
 0x319   : > { %v7637_v61 = vsel %vm17799_vm10, %v15020_v19, %v7600_v1  ;;  %v3110_v35 = vshll.u32 %v3109_v0, 23  ;;  %v3118_v46 = vsub.s32 4, %v15370_v55  ;;  %v741_v53 = vsel %vm17602_vm1, %v15153_v18, %v681_v33 }
 0x31a   : > { %v15459_v21 = vpack.c.bf16 %v7637_v61, %v7636_v63  ;;  %v3405_v24 = vadd.s32 536870912, %v3404_v22  ;;  %v3140_v17 = vshrl.u32 %v3139_v59, 23  ;;  %v3114_v41 = vcvt.s32.f32 %v3107_v47 }
 0x31b   : > { %v3111_v28 = vor.u32 4788187, %v3110_v35  ;;  %v17596_v20 = vand.u32 2147483647, %v15429_v29  ;;  %v15473_v45 = vsel %vm17601_vm2, %v846_v32, %v741_v53  ;;  %vm3034_vm6 = vcmp.lt.s32.totalorder %v15162_v2, 0 }
 0x31c   : > { %17800 = vst [vmem:[#allocation19_spill] sm:$0xff] %v15459_v21  ;;  %v15465_v27 = vshrl.u32 %v3405_v24, 30  ;;  %11594 = vmatmul.mubr.msk.bf16.gmra.mrb[16].mxu0 %vm7693_vm3, %v15459_v21  ;;  %v10956_v30 = vadd.s32 4294967169, %v3140_v17  ;;  %v3119_v4 = vsel %vm3034_vm6, %v3118_v46, %v15370_v55  ;;  %v15481_v56 = vmul.f32 %v17733_v48, %v15473_v45 }
 0x31d   : > { %v3112_v19 = vand.u32 2147483647, %v3111_v28  ;;  %v3143_v6 = vand.u32 8388607, %v17596_v20  ;;  %vm3033_vm11 = vcmp.le.f32.partialorder %v3032_v10, 0.7853982  ;;  %v3400_v55 = vadd.s32 %v15403_v40, %v15416_v12 }
 0x31e   : > { %v3407_v16 = vshll.u32 %v15465_v27, 30  ;;  %v3146_v18 = vadd.s32 1, %v10956_v30  ;;  %v15487_v1 = vsel %vm3033_vm11, 0, %v3119_v4  ;;  %v3243_v35 = vand.u32 2139095040, %v15481_v56 }
 0x31f   : > { %v3115_v26 = vmul.f32 %v3114_v41, %v3112_v19  ;;  %vm3346_vm5 = vcmp.lt.s32.totalorder %v15272_v37, 0  ;;  %vm15558_vm10 = vcmp.le.f32.partialorder %v3344_v15, 0.7853982 }
 0x320   : > { %v3408_v49 = vsub.s32 %v3404_v22, %v3407_v16  ;;  %vm3147_vm8 = vcmp.gt.s32.totalorder %v3146_v18, 0  ;;  %v3144_v22 = vor.u32 8388608, %v3143_v6 }
 0x321   : > { %v3116_v25 = vxor.u32 2147483648, %v3115_v26  ;;  %v3148_v7 = vsel %vm3147_vm8, %v3146_v18, 0 }
 0x322   : > { %v3410_v3 = vsub.s32 0, %v3408_v49  ;;  %v3150_v23 = vand.u32 31, %v3148_v7  ;;  %v15489_v61 = vshrl.u32 %v3148_v7, 5 }
 0x323   : > { %v3117_v0 = vsel %vm3034_vm6, %v3116_v25, %v3115_v26 }
 0x324   : > { %v10965_v63 = vmin.u32 %v3410_v3, %v3408_v49  ;;  %v3151_v47 = vsub.s32 32, %v3150_v23  ;;  %v3120_v59 = vsel %vm3033_vm11, %v15162_v2, %v3117_v0  ;;  %v3153_v33 = vshll.u32 %v17644_v42, %v3150_v23 }
 0x325   : > { %v3156_v10 = vshll.u32 %v17638_v52, %v3150_v23  ;;  %v3159_v12 = vshll.u32 %v17639_v36, %v3150_v23  ;;  %v3162_v46 = vshll.u32 %v17640_v13, %v3150_v23  ;;  %v3165_v26 = vshll.u32 %v17641_v31, %v3150_v23 }
 0x326   : > { %v3412_v24 = vclz %v10965_v63  ;;  %v3154_v28 = vshrl.u32 %v17638_v52, %v3151_v47  ;;  %v3157_v40 = vshrl.u32 %v17639_v36, %v3151_v47  ;;  %v3160_v17 = vshrl.u32 %v17640_v13, %v3151_v47 }
 0x327   : > { %v3163_v53 = vshrl.u32 %v17641_v31, %v3151_v47  ;;  %v3166_v19 = vshrl.u32 %v17642_v5, %v3151_v47  ;;  %12300 = vcosq.f32 %v3120_v59  ;;  %v3152_v18 = vshrl.u32 %v17644_v42, %v3151_v47 }
 0x328   : > { %v10966_v32 = vadd.s32 4294967294, %v3412_v24  ;;  %v3155_v41 = vor.u32 %v3154_v28, %v3153_v33  ;;  %v3158_v30 = vor.u32 %v3157_v40, %v3156_v10  ;;  %v3161_v16 = vor.u32 %v3160_v17, %v3159_v12  ;;  %v554_v40 = vpop.permute.xlu1 %553 }
 0x329   : > { %v3164_v4 = vor.u32 %v3163_v53, %v3162_v46  ;;  %v3167_v6 = vor.u32 %v3166_v19, %v3165_v26  ;;  %vm3168_vm9 = vcmp.lt.s32.totalorder %v15489_v61, 1  ;;  %vm3169_vm13 = vcmp.lt.s32.totalorder %v15489_v61, 2 }
 0x32a   : > { %vm10967_vm4 = vcmp.lt.s32.totalorder %v10966_v32, 0  ;;  %vm3170_vm0 = vcmp.lt.s32.totalorder %v15489_v61, 3  ;;  %vm3171_vm14 = vcmp.lt.s32.totalorder %v15489_v61, 4  ;;  %v3176_v23 = vsel %vm3168_vm9, %v3155_v41, %v3158_v30 }
 0x32b   : > { %v3415_v25 = vsel %vm10967_vm4, 0, %v10966_v32  ;;  %v3173_v63 = vsel %vm3171_vm14, %v3161_v16, 2102212464  ;;  %v3177_v24 = vsel %vm3171_vm14, %v3164_v4, 920167782  ;;  %v3180_v28 = vsel %vm3168_vm9, %v3158_v30, %v3161_v16 }
 0x32c   : > { %v3416_v3 = vsub.s32 32, %v3415_v25  ;;  %v3420_v7 = vsub.s32 4294967266, %v3415_v25  ;;  %v3417_v0 = vshll.u32 %v3408_v49, %v3415_v25  ;;  %v3178_v10 = vsel %vm3170_vm0, %v3161_v16, %v3177_v24 }
 0x32d   : > { %v3179_v12 = vsel %vm3169_vm13, %v3176_v23, %v3178_v10  ;;  %v3181_v17 = vsel %vm3171_vm14, %v3167_v6, 1326507024  ;;  %v3184_v32 = vshll.u32 %v3144_v22, 8  ;;  %v3244_v49 = vshrl.u32 %v3243_v35, 23  ;;  %v689_v23 = vpop.permute.xlu1 %688 }
 0x32e   : > { %v3418_v47 = vshrl.u32 %v3400_v55, %v3416_v3  ;;  %v3421_v33 = vadd.s32 127, %v3420_v7  ;;  %v3172_v19 = vsel %vm3168_vm9, %v3152_v18, %v3155_v41  ;;  %v3182_v55 = vsel %vm3170_vm0, %v3164_v4, %v3181_v17 }
 0x32f   : > { %v3174_v26 = vsel %vm3170_vm0, %v3158_v30, %v3173_v63  ;;  %v3183_v16 = vsel %vm3169_vm13, %v3180_v28, %v3182_v55  ;;  %v15524_v25 = vmul.u32.u64.low %v3184_v32, %v3179_v12  ;;  %v15525_v3 = vmul.u32.u64.high %v3184_v32, %v3179_v12, %v15524_v25 }
 0x330   : > { %v3419_v46 = vor.u32 %v3418_v47, %v3417_v0  ;;  %v3422_v53 = vshll.u32 %v3421_v33, 23  ;;  %12302 = vsinq.f32 %v3120_v59  ;;  %v3125_v35 = vadd.s32 3, %v15487_v1  ;;  %v697_v59 = vpop.permute.xlu0 %696 }
 0x331   : > { %v15529_v6 = vmul.u32.u64.low %v3184_v32, %v3183_v16  ;;  %v15530_v7 = vmul.u32.u64.high %v3184_v32, %v3183_v16, %v15529_v6  ;;  %v10960_v41 = vadd.s32 4294967169, %v3244_v49  ;;  %v15532_v18 = vpop.eup %12300  ;;  %v3430_v30 = vsub.s32 4, %v15465_v27 }
 0x332   : > { %v3423_v22 = vor.u32 4788187, %v3422_v53  ;;  %v3426_v0 = vcvt.s32.f32 %v3419_v46  ;;  %v3175_v63 = vsel %vm3169_vm13, %v3172_v19, %v3174_v26  ;;  %v3194_v24 = vadd.s32 1, %v15525_v3  ;;  %v17801_v46 = vld [vmem:[#allocation29_spill] sm:$0xff]  ;;  %v693_v26 = vpop.permute.xlu1 %692 }
 0x333   : > { %v17595_v33 = vand.u32 2147483647, %v15481_v56  ;;  %v3191_v10 = vmul.u32 %v3184_v32, %v3175_v63  ;;  %vm3193_vm7 = vc.u32 %v15530_v7, %v15524_v25  ;;  %v3250_v28 = vadd.s32 1, %v10960_v41 }
 0x334   : > { %v3424_v4 = vand.u32 2147483647, %v3423_v22  ;;  %v3431_v12 = vsel %vm3346_vm5, %v3430_v30, %v15465_v27  ;;  %v15545_v61 = vand.u32 3, %v3125_v35  ;;  %v15548_v17 = vand.u32 3, %v15487_v1 }
 0x335   : > { %v3195_v49 = vsel %vm3193_vm7, %v3194_v24, %v15525_v3  ;;  %v15554_v53 = vsel %vm17602_vm1, %v17801_v46, %v697_v59  ;;  %vm3251_vm12 = vcmp.gt.s32.totalorder %v3250_v28, 0  ;;  %v15564_v1 = vand.u32 8388607, %v17595_v33 }
 0x336   : > { %v3427_v47 = vmul.f32 %v3426_v0, %v3424_v4  ;;  %v3196_v32 = vadd.s32 %v3195_v49, %v3191_v10  ;;  %v3252_v55 = vsel %vm3251_vm12, %v3250_v28, 0  ;;  %v3132_v16 = vxor.u32 2147483648, %v15532_v18  ;;  %v17804_v0 = vld [vmem:[#allocation28_spill] sm:$0xff] }
 0x337   : > { %v3433_v22 = vsel %vm15558_vm10, 0, %v3431_v12  ;;  %v3254_v35 = vand.u32 31, %v3252_v55  ;;  %vm3128_vm6 = vcmp.eq.s32.totalorder %v15545_v61, 0  ;;  %vm6435_vm8 = vcmp.eq.s32.totalorder %v15548_v17, 0 }
 0x338   : > { %v3428_v27 = vxor.u32 2147483648, %v3427_v47  ;;  %v3197_v3 = vadd.s32 536870912, %v3196_v32  ;;  %vm6438_vm11 = vcmp.eq.s32.totalorder %v15548_v17, 2  ;;  %v15574_v15 = vsel %vm17602_vm1, %v554_v40, %v689_v23 }
 0x339   : > { %vm3127_vm4 = vcmp.lt.s32.totalorder %v15545_v61, 2  ;;  %vm3131_vm9 = vcmp.eq.s32.totalorder %v15545_v61, 2  ;;  %vm6434_vm13 = vcmp.lt.s32.totalorder %v15548_v17, 2  ;;  %v3255_v4 = vsub.s32 32, %v3254_v35 }
 0x33a   : > { %v12303_v6 = vpop.eup %12302  ;;  %v15579_v41 = vshrl.u32 %v3197_v3, 30  ;;  %v744_v30 = vsel %vm17602_vm1, %v17804_v0, %v693_v26  ;;  %v3429_v63 = vsel %vm3346_vm5, %v3428_v27, %v3427_v47  ;;  %v3437_v24 = vadd.s32 3, %v3433_v22 }
 0x33b   : > { %v15586_v59 = vand.u32 3, %v3433_v22  ;;  %v3248_v40 = vor.u32 8388608, %v15564_v1  ;;  %v3129_v23 = vxor.u32 2147483648, %v12303_v6  ;;  %v3133_v10 = vsel %vm3131_vm9, %v3132_v16, %v12303_v6 }
 0x33c   : > { %v3199_v28 = vshll.u32 %v15579_v41, 30  ;;  %v3266_v12 = vshll.u32 %v17640_v13, %v3254_v35  ;;  %vm3124_vm0 = vweird.f32 %v15162_v2  ;;  %v3258_v49 = vshrl.u32 %v17638_v52, %v3255_v4 }
 0x33d   : > { %v3261_v46 = vshrl.u32 %v17639_v36, %v3255_v4  ;;  %v3264_v26 = vshrl.u32 %v17640_v13, %v3255_v4  ;;  %v3267_v47 = vshrl.u32 %v17641_v31, %v3255_v4  ;;  %v3432_v27 = vsel %vm15558_vm10, %v15272_v37, %v3429_v63 }
 0x33e   : > { %v6440_v1 = vsel %vm6438_vm11, %v3132_v16, %v12303_v6  ;;  %v15601_v3 = vsub.s32 %v3196_v32, %v3199_v28  ;;  %v15603_v22 = vshrl.u32 %v3252_v55, 5  ;;  %v3257_v0 = vshll.u32 %v17644_v42, %v3254_v35  ;;  %v15616_v16 = vpop.permute.xlu1 %568 }
 0x33f   : > { %v3260_v33 = vshll.u32 %v17638_v52, %v3254_v35  ;;  %v3263_v20 = vshll.u32 %v17639_v36, %v3254_v35  ;;  %v3268_v21 = vor.u32 %v3267_v47, %v3266_v12  ;;  %v3130_v38 = vsel %vm3128_vm6, %v15532_v18, %v3129_v23 }
 0x340   : > { %v6437_v19 = vsel %vm6435_vm8, %v15532_v18, %v3129_v23  ;;  %v3202_v32 = vsub.s32 0, %v15601_v3  ;;  %v3270_v55 = vshrl.u32 %v17642_v5, %v3255_v4  ;;  %v3259_v6 = vor.u32 %v3258_v49, %v3257_v0 }
 0x341   : > { %v3262_v63 = vor.u32 %v3261_v46, %v3260_v33  ;;  %v3265_v28 = vor.u32 %v3264_v26, %v3263_v20  ;;  %v15621_v12 = vsel %vm17601_vm2, %v17805_v14, %v744_v30  ;;  %12304 = vcosq.f32 %v3432_v27 }
 0x342   : > { %v10957_v47 = vmin.u32 %v3202_v32, %v15601_v3  ;;  %v3269_v62 = vshll.u32 %v17641_v31, %v3254_v35  ;;  %vm3275_vm14 = vcmp.lt.s32.totalorder %v15603_v22, 4  ;;  %12306 = vsinq.f32 %v3432_v27  ;;  %v15651_v49 = vpop.permute.xlu1 %700 }
 0x343   : > { %v3134_v18 = vsel %vm3127_vm4, %v3130_v38, %v3133_v10  ;;  %v6441_v33 = vsel %vm6434_vm13, %v6437_v19, %v6440_v1  ;;  %v3281_v20 = vsel %vm3275_vm14, %v3268_v21, 920167782  ;;  %vm3138_vm5 = vcmp.lt.s32.totalorder %v15429_v29, 0 }
 0x344   : > { %v3204_v14 = vclz %v10957_v47  ;;  %v3271_v30 = vor.u32 %v3270_v55, %v3269_v62  ;;  %vm3272_vm7 = vcmp.lt.s32.totalorder %v15603_v22, 1  ;;  %vm3274_vm12 = vcmp.lt.s32.totalorder %v15603_v22, 3 }
 0x345   : > { %v15635_v35 = vand.u32 3, %v3437_v24  ;;  %v3280_v61 = vsel %vm3272_vm7, %v3259_v6, %v3262_v63  ;;  %v3282_v38 = vsel %vm3274_vm12, %v3265_v28, %v3281_v20  ;;  %v15643_v17 = vmul.f32 %v17733_v48, %v15621_v12 }
 0x346   : > { %v3135_v23 = vsel %vm3124_vm0, nan, %v3134_v18  ;;  %v6442_v62 = vsel %vm3124_vm0, nan, %v6441_v33  ;;  %v3192_v24 = vadd.s32 %v15524_v25, %v15530_v7  ;;  %v10958_v10 = vadd.s32 4294967294, %v3204_v14 }
 0x347   : > { %v17806_v46 = vand.u32 2147483647, %v15429_v29  ;;  %v3256_v27 = vshrl.u32 %v17644_v42, %v3255_v4  ;;  %vm3273_vm6 = vcmp.lt.s32.totalorder %v15603_v22, 2  ;;  %v3277_v2 = vsel %vm3275_vm14, %v3265_v28, 2102212464 }
 0x348   : > { %v3288_v1 = vshll.u32 %v3248_v40, 8  ;;  %vm10959_vm8 = vcmp.lt.s32.totalorder %v10958_v10, 0  ;;  %v3283_v25 = vsel %vm3273_vm6, %v3280_v61, %v3282_v38  ;;  %v3284_v7 = vsel %vm3272_vm7, %v3262_v63, %v3265_v28 }
 0x349   : > { %vm15655_vm10 = vcmp.le.f32.partialorder %v17806_v46, 0.7853982  ;;  %v3285_v0 = vsel %vm3275_vm14, %v3271_v30, 1326507024  ;;  %v3207_v19 = vsel %vm10959_vm8, 0, %v10958_v10  ;;  %v3222_v32 = vsub.s32 4, %v15579_v41 }
 0x34a   : > { %v3286_v4 = vsel %vm3274_vm12, %v3268_v21, %v3285_v0  ;;  %v3555_v55 = vand.u32 2139095040, %v15643_v17  ;;  %v3208_v47 = vsub.s32 32, %v3207_v19  ;;  %v3212_v40 = vsub.s32 4294967266, %v3207_v19  ;;  %v854_v0 = vpop.permute.xlu1 %853 }
 0x34b   : > { %v3276_v18 = vsel %vm3272_vm7, %v3256_v27, %v3259_v6  ;;  %v3278_v33 = vsel %vm3274_vm12, %v3262_v63, %v3277_v2  ;;  %v3209_v28 = vshll.u32 %v15601_v3, %v3207_v19  ;;  %v3287_v20 = vsel %vm3273_vm6, %v3284_v7, %v3286_v4  ;;  %v12305_v21 = vpop.eup %12304 }
 0x34c   : > { %v15680_v14 = vmul.u32.u64.low %v3288_v1, %v3283_v25  ;;  %v15681_v30 = vmul.u32.u64.high %v3288_v1, %v3283_v25, %v15680_v14  ;;  %v3210_v61 = vshrl.u32 %v3192_v24, %v3208_v47  ;;  %v3213_v38 = vadd.s32 127, %v3212_v40  ;;  %v12307_v6 = vpop.eup %12306 }
 0x34d   : > { %v15684_v10 = vmul.u32.u64.low %v3288_v1, %v3287_v20  ;;  %v15685_v46 = vmul.u32.u64.high %v3288_v1, %v3287_v20, %v15684_v10  ;;  %v3223_v63 = vsel %vm3138_vm5, %v3222_v32, %v15579_v41  ;;  %vm3440_vm11 = vcmp.eq.s32.totalorder %v15635_v35, 0 }
 0x34e   : > { %v3279_v3 = vsel %vm3273_vm6, %v3276_v18, %v3278_v33  ;;  %v3556_v27 = vshrl.u32 %v3555_v55, 23  ;;  %v7601_v2 = vsel %vm7580_vm15, %v3135_v23, %v6442_v62  ;;  %v3211_v24 = vor.u32 %v3210_v61, %v3209_v28  ;;  %v862_v20 = vpop.permute.xlu1 %861 }
 0x34f   : > { %v3214_v25 = vshll.u32 %v3213_v38, 23  ;;  %vm3443_vm4 = vcmp.eq.s32.totalorder %v15635_v35, 2  ;;  %vm3439_vm9 = vcmp.lt.s32.totalorder %v15635_v35, 2  ;;  %v3298_v7 = vadd.s32 1, %v15681_v30 }
 0x350   : > { %v17603_v19 = vand.u32 2147483647, %v15643_v17  ;;  %v10972_v41 = vadd.s32 4294967169, %v3556_v27  ;;  %v15702_v22 = vsel %vm17601_vm2, %v854_v0, %v15574_v15  ;;  %v3225_v23 = vsel %vm15655_vm10, 0, %v3223_v63 }
 0x351   : > { %v3215_v32 = vor.u32 4788187, %v3214_v25  ;;  %v3295_v62 = vmul.u32 %v3288_v1, %v3279_v3  ;;  %vm3297_vm13 = vc.u32 %v15685_v46, %v15680_v14  ;;  %v3441_v4 = vxor.u32 2147483648, %v12307_v6 }
 0x352   : > { %v3444_v55 = vxor.u32 2147483648, %v12305_v21  ;;  %v3299_v47 = vsel %vm3297_vm13, %v3298_v7, %v15681_v30  ;;  %v3562_v40 = vadd.s32 1, %v10972_v41  ;;  %v3218_v33 = vcvt.s32.f32 %v3211_v24 }
 0x353   : > { %v3216_v18 = vand.u32 2147483647, %v3215_v32  ;;  %vm6744_vm0 = vcmp.eq.s32.totalorder %v15586_v59, 0  ;;  %v3300_v28 = vadd.s32 %v3299_v47, %v3295_v62  ;;  %v3229_v15 = vadd.s32 3, %v3225_v23 }
 0x354   : > { %vm6747_vm14 = vcmp.eq.s32.totalorder %v15586_v59, 2  ;;  %vm3563_vm7 = vcmp.gt.s32.totalorder %v3562_v40, 0  ;;  %v15713_v1 = vmul.f32 %v17733_v48, %v15702_v22  ;;  %vm17809_vm12 = vcmp.eq.s32.totalorder %v12533_v11, 1 }
 0x355   : > { %v15718_v61 = vsel %vm17809_vm12, %v15145_v58, %v7601_v2  ;;  %v3219_v30 = vmul.f32 %v3218_v33, %v3216_v18  ;;  %v3301_v38 = vadd.s32 536870912, %v3300_v28  ;;  %v3564_v10 = vsel %vm3563_vm7, %v3562_v40, 0 }
 0x356   : > { %v3442_v0 = vsel %vm3440_vm11, %v12305_v21, %v3441_v4  ;;  %v3445_v63 = vsel %vm3443_vm4, %v3444_v55, %v12307_v6  ;;  %vm6743_vm6 = vcmp.lt.s32.totalorder %v15586_v59, 2  ;;  %v3559_v3 = vand.u32 8388607, %v17603_v19 }
 0x357   : > { %v3566_v27 = vand.u32 31, %v3564_v10  ;;  %v3220_v24 = vxor.u32 2147483648, %v3219_v30  ;;  %v15727_v25 = vand.u32 3, %v3225_v23  ;;  %v15729_v58 = vshrl.u32 %v3301_v38, 30 }
 0x358   : > { %v15734_v2 = vsel %vm17601_vm2, %v862_v20, %v15554_v53  ;;  %v15736_v7 = vand.u32 3, %v3229_v15  ;;  %v6746_v41 = vsel %vm6744_vm0, %v12305_v21, %v3441_v4  ;;  %v3451_v62 = vand.u32 2139095040, %v15713_v1 }
 0x359   : > { %v3567_v32 = vsub.s32 32, %v3566_v27  ;;  %v3221_v47 = vsel %vm3138_vm5, %v3220_v24, %v3219_v30  ;;  %v15745_v23 = vsel %vm3439_vm9, %v3442_v0, %v3445_v63  ;;  %v6749_v40 = vsel %vm6747_vm14, %v3444_v55, %v12307_v6 }
 0x35a   : > { %v3303_v53 = vshll.u32 %v15729_v58, 30  ;;  %v3224_v18 = vsel %vm15655_vm10, %v15429_v29, %v3221_v47  ;;  %v3560_v21 = vor.u32 8388608, %v3559_v3  ;;  %v3569_v35 = vshll.u32 %v17644_v42, %v3566_v27 }
 0x35b   : > { %v3570_v4 = vshrl.u32 %v17638_v52, %v3567_v32  ;;  %v3573_v33 = vshrl.u32 %v17639_v36, %v3567_v32  ;;  %12308 = vcosq.f32 %v3224_v18  ;;  %v3576_v20 = vshrl.u32 %v17640_v13, %v3567_v32 }
 0x35c   : > { %v15755_v15 = vsub.s32 %v3300_v28, %v3303_v53  ;;  %12310 = vsinq.f32 %v3224_v18  ;;  %v15759_v6 = vshrl.u32 %v3564_v10, 5  ;;  %v3572_v55 = vshll.u32 %v17638_v52, %v3566_v27 }
 0x35d   : > { %v3452_v30 = vshrl.u32 %v3451_v62, 23  ;;  %v3571_v38 = vor.u32 %v3570_v4, %v3569_v35  ;;  %v3575_v0 = vshll.u32 %v17639_v36, %v3566_v27  ;;  %v3578_v63 = vshll.u32 %v17640_v13, %v3566_v27 }
 0x35e   : > { %v3306_v26 = vsub.s32 0, %v15755_v15  ;;  %v3574_v3 = vor.u32 %v3573_v33, %v3572_v55  ;;  %v3579_v28 = vshrl.u32 %v17641_v31, %v3567_v32  ;;  %v3581_v24 = vshll.u32 %v17641_v31, %v3566_v27 }
 0x35f   : > { %v3582_v47 = vshrl.u32 %v17642_v5, %v3567_v32  ;;  %vm3235_vm5 = vcmp.eq.s32.totalorder %v15736_v7, 2  ;;  %vm6541_vm10 = vcmp.eq.s32.totalorder %v15727_v25, 2  ;;  %v15772_v10 = vsel %vm6743_vm6, %v6746_v41, %v6749_v40 }
 0x360   : > { %v10961_v62 = vmin.u32 %v3306_v26, %v15755_v15  ;;  %v3577_v53 = vor.u32 %v3576_v20, %v3575_v0  ;;  %v3448_v18 = vand.u32 2147483647, %v15713_v1  ;;  %vm3232_vm8 = vcmp.eq.s32.totalorder %v15736_v7, 0 }
 0x361   : > { %vm6538_vm11 = vcmp.eq.s32.totalorder %v15727_v25, 0  ;;  %v3296_v27 = vadd.s32 %v15680_v14, %v15685_v46  ;;  %v3580_v4 = vor.u32 %v3579_v28, %v3578_v63  ;;  %v3583_v33 = vor.u32 %v3582_v47, %v3581_v24 }
 0x362   : > { %v15780_v35 = vshll.u32 %v3560_v21, 8  ;;  %vm3231_vm4 = vcmp.lt.s32.totalorder %v15736_v7, 2  ;;  %vm6537_vm9 = vcmp.lt.s32.totalorder %v15727_v25, 2  ;;  %v3308_v59 = vclz %v10961_v62 }
 0x363   : > { %v3326_v41 = vsub.s32 4, %v15729_v58  ;;  %vm3584_vm13 = vcmp.lt.s32.totalorder %v15759_v6, 1  ;;  %v10968_v40 = vadd.s32 4294967169, %v3452_v30  ;;  %vm3228_vm0 = vweird.f32 %v15429_v29 }
 0x364   : > { %v3568_v20 = vshrl.u32 %v17644_v42, %v3567_v32  ;;  %vm3586_vm14 = vcmp.lt.s32.totalorder %v15759_v6, 3  ;;  %vm3587_vm7 = vcmp.lt.s32.totalorder %v15759_v6, 4  ;;  %v3592_v14 = vsel %vm3584_vm13, %v3571_v38, %v3574_v3 }
 0x365   : > { %vm3242_vm12 = vcmp.lt.s32.totalorder %v15481_v56, 0  ;;  %v10962_v46 = vadd.s32 4294967294, %v3308_v59  ;;  %v3589_v21 = vsel %vm3587_vm7, %v3577_v53, 2102212464  ;;  %v3593_v55 = vsel %vm3587_vm7, %v3580_v4, 920167782  ;;  %v12309_v28 = vpop.eup %12308 }
 0x366   : > { %v3596_v26 = vsel %vm3584_vm13, %v3574_v3, %v3577_v53  ;;  %vm3585_vm6 = vcmp.lt.s32.totalorder %v15759_v6, 2  ;;  %v3588_v0 = vsel %vm3584_vm13, %v3568_v20, %v3571_v38  ;;  %v3594_v30 = vsel %vm3586_vm14, %v3577_v53, %v3593_v55  ;;  %v12311_v62 = vpop.eup %12310 }
 0x367   : > { %v3597_v63 = vsel %vm3587_vm7, %v3583_v33, 1326507024  ;;  %vm3436_vm2 = vweird.f32 %v15272_v37  ;;  %vm10963_vm1 = vcmp.lt.s32.totalorder %v10962_v46, 0  ;;  %v3590_v32 = vsel %vm3586_vm14, %v3574_v3, %v3589_v21 }
 0x368   : > { %v3598_v24 = vsel %vm3586_vm14, %v3580_v4, %v3597_v63  ;;  %v3458_v47 = vadd.s32 1, %v10968_v40  ;;  %v3236_v59 = vxor.u32 2147483648, %v12309_v28  ;;  %v3311_v19 = vsel %vm10963_vm1, 0, %v10962_v46 }
 0x369   : > { %v3595_v38 = vsel %vm3585_vm6, %v3592_v14, %v3594_v30  ;;  %v3599_v53 = vsel %vm3585_vm6, %v3596_v26, %v3598_v24  ;;  %v3233_v33 = vxor.u32 2147483648, %v12311_v62  ;;  %v17810_v20 = vand.u32 2147483647, %v15481_v56 }
 0x36a   : > { %v3312_v3 = vsub.s32 32, %v3311_v19  ;;  %v3313_v4 = vshll.u32 %v15755_v15, %v3311_v19  ;;  %v3316_v40 = vsub.s32 4294967266, %v3311_v19  ;;  %v3237_v46 = vsel %vm3235_vm5, %v3236_v59, %v12311_v62 }
 0x36b   : > { %vm15805_vm13 = vcmp.le.f32.partialorder %v17810_v20, 0.7853982  ;;  %v6543_v14 = vsel %vm6541_vm10, %v3236_v59, %v12311_v62  ;;  %v15815_v21 = vmul.u32.u64.low %v15780_v35, %v3599_v53  ;;  %v15816_v26 = vmul.u32.u64.high %v15780_v35, %v3599_v53, %v15815_v21 }
 0x36c   : > { %v3234_v30 = vsel %vm3232_vm8, %v12309_v28, %v3233_v33  ;;  %v6540_v63 = vsel %vm6538_vm11, %v12309_v28, %v3233_v33  ;;  %v3314_v24 = vshrl.u32 %v3296_v27, %v3312_v3  ;;  %v3317_v20 = vadd.s32 127, %v3316_v40 }
 0x36d   : > { %v3238_v19 = vsel %vm3231_vm4, %v3234_v30, %v3237_v46  ;;  %v6544_v15 = vsel %vm6537_vm9, %v6540_v63, %v6543_v14  ;;  %v15827_v62 = vmul.u32.u64.low %v15780_v35, %v3595_v38  ;;  %v15828_v59 = vmul.u32.u64.high %v15780_v35, %v3595_v38, %v15827_v62 }
 0x36e   : > { %v3239_v53 = vsel %vm3228_vm0, nan, %v3238_v19  ;;  %v6545_v21 = vsel %vm3228_vm0, nan, %v6544_v15  ;;  %v3315_v28 = vor.u32 %v3314_v24, %v3313_v4  ;;  %v3318_v27 = vshll.u32 %v3317_v20, 23 }
 0x36f   : > { %v7602_v7 = vsel %vm7580_vm15, %v3239_v53, %v6545_v21  ;;  %v3327_v25 = vsel %vm3242_vm12, %v3326_v41, %v15729_v58  ;;  %v3591_v38 = vsel %vm3585_vm6, %v3588_v0, %v3590_v32  ;;  %vm3459_vm1 = vcmp.gt.s32.totalorder %v3458_v47, 0 }
 0x370   : > { %vm17813_vm5 = vcmp.eq.s32.totalorder %v12533_v11, 1  ;;  %v3319_v3 = vor.u32 4788187, %v3318_v27  ;;  %vm3609_vm10 = vc.u32 %v15816_v26, %v15827_v62  ;;  %v3460_v29 = vsel %vm3459_vm1, %v3458_v47, 0 }
 0x371   : > { %v7639_v33 = vsel %vm17813_vm5, %v15264_v54, %v7602_v7  ;;  %v15853_v58 = vsel %vm3436_vm2, nan, %v15745_v23  ;;  %v3610_v6 = vadd.s32 1, %v15828_v59  ;;  %v3462_v41 = vand.u32 31, %v3460_v29 }
 0x372   : > { %v15848_v4 = vpack.c.bf16 %v7639_v33, %v15718_v61  ;;  %v6751_v54 = vsel %vm3436_vm2, nan, %v15772_v10  ;;  %v3320_v0 = vand.u32 2147483647, %v3319_v3  ;;  %v3322_v32 = vcvt.s32.f32 %v3315_v28 }
 0x373   : > { %v3607_v40 = vmul.u32 %v15780_v35, %v3591_v38  ;;  %v3329_v61 = vsel %vm15805_vm13, 0, %v3327_v25  ;;  %v3611_v47 = vsel %vm3609_vm10, %v3610_v6, %v15828_v59  ;;  %v3455_v23 = vand.u32 8388607, %v3448_v18 }
 0x374   : > { %17814 = vst [vmem:[#allocation25_spill] sm:$0xff] %v15848_v4  ;;  %v3463_v46 = vsub.s32 32, %v3462_v41  ;;  %11597 = vmatprep.mubr.msk.bf16.mxu0 %vm7693_vm3, %v15848_v4  ;;  %v3323_v14 = vmul.f32 %v3322_v32, %v3320_v0  ;;  %v3461_v37 = vshrl.u32 %v3460_v29, 5  ;;  %v3465_v10 = vshll.u32 %v17644_v42, %v3462_v41 }
 0x375   : > { %v3612_v30 = vadd.s32 %v3611_v47, %v3607_v40  ;;  %v3468_v35 = vshll.u32 %v17638_v52, %v3462_v41  ;;  %v3474_v59 = vshll.u32 %v17640_v13, %v3462_v41  ;;  %v3471_v27 = vshll.u32 %v17639_v36, %v3462_v41 }
 0x376   : > { %v3466_v63 = vshrl.u32 %v17638_v52, %v3463_v46  ;;  %v3469_v24 = vshrl.u32 %v17639_v36, %v3463_v46  ;;  %v3472_v20 = vshrl.u32 %v17640_v13, %v3463_v46  ;;  %v3324_v19 = vxor.u32 2147483648, %v3323_v14 }
 0x377   : > { %v3613_v15 = vadd.s32 536870912, %v3612_v30  ;;  %v3475_v53 = vshrl.u32 %v17641_v31, %v3463_v46  ;;  %v3478_v7 = vshrl.u32 %v17642_v5, %v3463_v46  ;;  %v3456_v33 = vor.u32 8388608, %v3455_v23 }
 0x378   : > { %v3467_v21 = vor.u32 %v3466_v63, %v3465_v10  ;;  %v3470_v28 = vor.u32 %v3469_v24, %v3468_v35  ;;  %v3325_v25 = vsel %vm3242_vm12, %v3324_v19, %v3323_v14  ;;  %v3473_v6 = vor.u32 %v3472_v20, %v3471_v27 }
 0x379   : > { %v15878_v38 = vshrl.u32 %v3613_v15, 30  ;;  %v3476_v3 = vor.u32 %v3475_v53, %v3474_v59  ;;  %v3328_v29 = vsel %vm15805_vm13, %v15481_v56, %v3325_v25  ;;  %v3477_v0 = vshll.u32 %v17641_v31, %v3462_v41 }
 0x37a   : > { %v15886_v32 = vmul.f32 %v17733_v48, %v15734_v2  ;;  %12312 = vcosq.f32 %v3328_v29  ;;  %v3333_v40 = vadd.s32 3, %v3329_v61  ;;  %vm3480_vm2 = vcmp.lt.s32.totalorder %v3461_v37, 1 }
 0x37b   : > { %v3615_v47 = vshll.u32 %v15878_v38, 30  ;;  %12314 = vsinq.f32 %v3328_v29  ;;  %v3479_v14 = vor.u32 %v3478_v7, %v3477_v0  ;;  %vm3483_vm8 = vcmp.lt.s32.totalorder %v3461_v37, 4 }
 0x37c   : > { %v3488_v23 = vsel %vm3480_vm2, %v3467_v21, %v3470_v28  ;;  %vm3482_vm11 = vcmp.lt.s32.totalorder %v3461_v37, 3  ;;  %v3489_v55 = vsel %vm3483_vm8, %v3476_v3, 920167782  ;;  %v15892_v63 = vshll.u32 %v3456_v33, 8 }
 0x37d   : > { %v15890_v10 = vsub.s32 %v3612_v30, %v3615_v47  ;;  %vm3481_vm4 = vcmp.lt.s32.totalorder %v3461_v37, 2  ;;  %v3485_v41 = vsel %vm3483_vm8, %v3473_v6, 2102212464  ;;  %v3490_v35 = vsel %vm3482_vm11, %v3473_v6, %v3489_v55 }
 0x37e   : > { %v3659_v24 = vand.u32 2139095040, %v15886_v32  ;;  %v6639_v20 = vand.u32 3, %v3329_v61  ;;  %v3464_v15 = vshrl.u32 %v17644_v42, %v3463_v46  ;;  %v3491_v59 = vsel %vm3481_vm4, %v3488_v23, %v3490_v35 }
 0x37f   : > { %v3618_v19 = vsub.s32 0, %v15890_v10  ;;  %v3334_v53 = vand.u32 3, %v3333_v40  ;;  %v3493_v30 = vsel %vm3483_vm8, %v3479_v14, 1326507024  ;;  %v3486_v29 = vsel %vm3482_vm11, %v3470_v28, %v3485_v41 }
 0x380   : > { %v15900_v27 = vmul.u32.u64.low %v15892_v63, %v3491_v59  ;;  %v15901_v7 = vmul.u32.u64.high %v15892_v63, %v3491_v59, %v15900_v27  ;;  %v3484_v33 = vsel %vm3480_vm2, %v3464_v15, %v3467_v21  ;;  %v3492_v61 = vsel %vm3480_vm2, %v3470_v28, %v3473_v6 }
 0x381   : > { %v10973_v25 = vmin.u32 %v3618_v19, %v15890_v10  ;;  %v7604_v46 = vsel %vm7580_vm15, %v15853_v58, %v6751_v54  ;;  %vm3332_vm9 = vweird.f32 %v15481_v56  ;;  %v3494_v0 = vsel %vm3482_vm11, %v3476_v3, %v3493_v30 }
 0x382   : > { %v17605_v40 = vand.u32 2147483647, %v15886_v32  ;;  %v3660_v47 = vshrl.u32 %v3659_v24, 23  ;;  %vm6640_vm0 = vcmp.lt.s32.totalorder %v6639_v20, 2  ;;  %vm6641_vm14 = vcmp.eq.s32.totalorder %v6639_v20, 0 }
 0x383   : > { %vm6644_vm7 = vcmp.eq.s32.totalorder %v6639_v20, 2  ;;  %v3620_v14 = vclz %v10973_v25  ;;  %vm3335_vm12 = vcmp.lt.s32.totalorder %v3334_v53, 2  ;;  %v3487_v21 = vsel %vm3481_vm4, %v3484_v33, %v3486_v29 }
 0x384   : > { %v3495_v28 = vsel %vm3481_vm4, %v3492_v61, %v3494_v0  ;;  %v10976_v6 = vadd.s32 4294967169, %v3660_v47  ;;  %v12313_v23 = vpop.eup %12312  ;;  %vm3336_vm6 = vcmp.eq.s32.totalorder %v3334_v53, 0  ;;  %vm3339_vm13 = vcmp.eq.s32.totalorder %v3334_v53, 2 }
 0x385   : > { %v10974_v58 = vadd.s32 4294967294, %v3620_v14  ;;  %v15917_v54 = vmul.u32.u64.low %v15892_v63, %v3495_v28  ;;  %v15918_v55 = vmul.u32.u64.high %v15892_v63, %v3495_v28, %v15917_v54  ;;  %v12315_v3 = vpop.eup %12314  ;;  %v3340_v41 = vxor.u32 2147483648, %v12313_v23 }
 0x386   : > { %v3608_v35 = vadd.s32 %v15827_v62, %v15816_v26  ;;  %v3666_v24 = vadd.s32 1, %v10976_v6  ;;  %v3337_v19 = vxor.u32 2147483648, %v12315_v3  ;;  %v3638_v37 = vsub.s32 4, %v15878_v38 }
 0x387   : > { %vm10975_vm1 = vcmp.lt.s32.totalorder %v10974_v58, 0  ;;  %v3503_v15 = vmul.u32 %v15892_v63, %v3487_v21  ;;  %v3341_v59 = vsel %vm3339_vm13, %v3340_v41, %v12315_v3  ;;  %v6646_v30 = vsel %vm6644_vm7, %v3340_v41, %v12315_v3 }
 0x388   : > { %v3623_v25 = vsel %vm10975_vm1, 0, %v10974_v58  ;;  %v3506_v33 = vadd.s32 1, %v15901_v7  ;;  %v3338_v29 = vsel %vm3336_vm6, %v12313_v23, %v3337_v19  ;;  %v6643_v61 = vsel %vm6641_vm14, %v12313_v23, %v3337_v19  ;;  %v866_v19 = vpop.permute.xlu1 %865 }
 0x389   : > { %v3624_v0 = vsub.s32 32, %v3623_v25  ;;  %vm3667_vm5 = vcmp.gt.s32.totalorder %v3666_v24, 0  ;;  %v3342_v26 = vsel %vm3335_vm12, %v3338_v29, %v3341_v59  ;;  %v6647_v62 = vsel %vm6640_vm0, %v6643_v61, %v6646_v30 }
 0x38a   : > { %v3625_v47 = vshll.u32 %v15890_v10, %v3623_v25  ;;  %v3628_v14 = vsub.s32 4294967266, %v3623_v25  ;;  %v3343_v63 = vsel %vm3332_vm9, nan, %v3342_v26  ;;  %v6648_v21 = vsel %vm3332_vm9, nan, %v6647_v62 }
 0x38b   : > { %v3626_v28 = vshrl.u32 %v3608_v35, %v3624_v0  ;;  %vm3505_vm10 = vc.u32 %v15918_v55, %v15900_v27  ;;  %v7603_v6 = vsel %vm7580_vm15, %v3343_v63, %v6648_v21  ;;  %v3668_v23 = vsel %vm3667_vm5, %v3666_v24, 0 }
 0x38c   : > { %v3629_v53 = vadd.s32 127, %v3628_v14  ;;  %v3507_v20 = vsel %vm3505_vm10, %v3506_v33, %v15901_v7  ;;  %vm17815_vm2 = vcmp.eq.s32.totalorder %v12533_v11, 1  ;;  %vm3554_vm11 = vcmp.lt.s32.totalorder %v15643_v17, 0 }
 0x38d   : > { %v7641_v10 = vsel %vm17815_vm2, %v15232_v44, %v7604_v46  ;;  %vm17816_vm8 = vmmov %vm17815_vm2  ;;  %v3508_v58 = vadd.s32 %v3507_v20, %v3503_v15  ;;  %v3627_v3 = vor.u32 %v3626_v28, %v3625_v47  ;;  %v3670_v35 = vand.u32 31, %v3668_v23 }
 0x38e   : > { %v7640_v56 = vsel %vm17816_vm8, %v15473_v45, %v7603_v6  ;;  %v3630_v41 = vshll.u32 %v3629_v53, 23  ;;  %v3639_v7 = vsel %vm3554_vm11, %v3638_v37, %v15878_v38  ;;  %v3663_v44 = vand.u32 8388607, %v17605_v40 }
 0x38f   : > { %v15947_v54 = vpack.c.bf16 %v7641_v10, %v7640_v56  ;;  %v3509_v24 = vadd.s32 536870912, %v3508_v58  ;;  %v3671_v46 = vsub.s32 32, %v3670_v35  ;;  %v17818_v45 = vand.u32 2147483647, %v15643_v17 }
 0x390   : > { %v3631_v59 = vor.u32 4788187, %v3630_v41  ;;  %vm17821_vm9 = vcmp.eq.s32.totalorder %v12642_v50, 1  ;;  %v3634_v25 = vcvt.s32.f32 %v3627_v3  ;;  %vm17822_vm0 = vcmp.eq.s32.totalorder %v12645_v51, 1 }
 0x391   : > { %17817 = vst [vmem:[#allocation18_spill] sm:$0xff] %v15947_v54  ;;  %11598 = vmatmul.mubr.msk.bf16.gmra.mrb[20].mxu0 %vm7693_vm3, %v15947_v54  ;;  %vm15958_vm4 = vcmp.le.f32.partialorder %v17818_v45, 0.7853982  ;;  %v746_v38 = vsel %vm17821_vm9, %v15616_v16, %v15651_v49  ;;  %v15966_v37 = vshrl.u32 %v3509_v24, 30  ;;  %v3674_v0 = vshrl.u32 %v17638_v52, %v3671_v46 }
 0x392   : > { %v3632_v30 = vand.u32 2147483647, %v3631_v59  ;;  %v15970_v33 = vsel %vm15958_vm4, 0, %v3639_v7  ;;  %v15974_v29 = vsel %vm17822_vm0, %v866_v19, %v746_v38  ;;  %v3677_v26 = vshrl.u32 %v17639_v36, %v3671_v46 }
 0x393   : > { %v3511_v61 = vshll.u32 %v15966_v37, 30  ;;  %v3680_v16 = vshrl.u32 %v17640_v13, %v3671_v46  ;;  %v3664_v62 = vor.u32 8388608, %v3663_v44  ;;  %v3673_v47 = vshll.u32 %v17644_v42, %v3670_v35 }
 0x394   : > { %v3635_v49 = vmul.f32 %v3634_v25, %v3632_v30  ;;  %v3683_v14 = vshrl.u32 %v17641_v31, %v3671_v46  ;;  %v3676_v21 = vshll.u32 %v17638_v52, %v3670_v35  ;;  %v3679_v28 = vshll.u32 %v17639_v36, %v3670_v35 }
 0x395   : > { %v15982_v63 = vsub.s32 %v3508_v58, %v3511_v61  ;;  %v3686_v6 = vshrl.u32 %v17642_v5, %v3671_v46  ;;  %v3669_v20 = vshrl.u32 %v3668_v23, 5  ;;  %v3682_v10 = vshll.u32 %v17640_v13, %v3670_v35 }
 0x396   : > { %v3636_v53 = vxor.u32 2147483648, %v3635_v49  ;;  %v3685_v56 = vshll.u32 %v17641_v31, %v3670_v35  ;;  %v3675_v41 = vor.u32 %v3674_v0, %v3673_v47  ;;  %v3678_v7 = vor.u32 %v3677_v26, %v3676_v21 }
 0x397   : > { %v3514_v3 = vsub.s32 0, %v15982_v63  ;;  %v3681_v24 = vor.u32 %v3680_v16, %v3679_v28  ;;  %v3645_v19 = vadd.s32 3, %v15970_v33  ;;  %v3684_v59 = vor.u32 %v3683_v14, %v3682_v10 }
 0x398   : > { %v3637_v58 = vsel %vm3554_vm11, %v3636_v53, %v3635_v49  ;;  %v3704_v44 = vshll.u32 %v3664_v62, 8  ;;  %v3687_v38 = vor.u32 %v3686_v6, %v3685_v56  ;;  %v15999_v35 = vmul.f32 %v17733_v48, %v15974_v29 }
 0x399   : > { %v3640_v23 = vsel %vm15958_vm4, %v15643_v17, %v3637_v58  ;;  %v10969_v45 = vmin.u32 %v3514_v3, %v15982_v63  ;;  %vm3688_vm14 = vcmp.lt.s32.totalorder %v3669_v20, 1  ;;  %vm3689_vm7 = vcmp.lt.s32.totalorder %v3669_v20, 2 }
 0x39a   : > { %12316 = vcosq.f32 %v3640_v23  ;;  %vm3691_vm12 = vcmp.lt.s32.totalorder %v3669_v20, 4  ;;  %v3696_v61 = vsel %vm3688_vm14, %v3675_v41, %v3678_v7  ;;  %v3672_v0 = vshrl.u32 %v17644_v42, %v3671_v46 }
 0x39b   : > { %12318 = vsinq.f32 %v3640_v23  ;;  %v3516_v30 = vclz %v10969_v45  ;;  %v3693_v25 = vsel %vm3691_vm12, %v3681_v24, 2102212464  ;;  %vm3690_vm6 = vcmp.lt.s32.totalorder %v3669_v20, 3 }
 0x39c   : > { %v3697_v15 = vsel %vm3691_vm12, %v3684_v59, 920167782  ;;  %v3700_v26 = vsel %vm3688_vm14, %v3678_v7, %v3681_v24  ;;  %v3534_v49 = vsub.s32 4, %v15966_v37  ;;  %v3701_v47 = vsel %vm3691_vm12, %v3687_v38, 1326507024 }
 0x39d   : > { %v10970_v16 = vadd.s32 4294967294, %v3516_v30  ;;  %v3698_v62 = vsel %vm3690_vm6, %v3681_v24, %v3697_v15  ;;  %v3692_v14 = vsel %vm3688_vm14, %v3672_v0, %v3675_v41  ;;  %v3694_v21 = vsel %vm3690_vm6, %v3678_v7, %v3693_v25  ;;  %v16013_v24 = vpop.permute.xlu0 %708 }
 0x39e   : > { %v3699_v28 = vsel %vm3689_vm7, %v3696_v61, %v3698_v62  ;;  %v3702_v6 = vsel %vm3690_vm6, %v3684_v59, %v3701_v47  ;;  %v3763_v23 = vand.u32 2139095040, %v15999_v35  ;;  %v3504_v41 = vadd.s32 %v15900_v27, %v15918_v55  ;;  %v16028_v61 = vpop.permute.xlu1 %578 }
 0x39f   : > { %vm10971_vm13 = vcmp.lt.s32.totalorder %v10970_v16, 0  ;;  %v3703_v53 = vsel %vm3689_vm7, %v3700_v26, %v3702_v6  ;;  %v16005_v10 = vmul.u32.u64.low %v3704_v44, %v3699_v28  ;;  %v16006_v56 = vmul.u32.u64.high %v3704_v44, %v3699_v28, %v16005_v10 }
 0x3a0   : > { %v3519_v46 = vsel %vm10971_vm13, 0, %v10970_v16  ;;  %v16009_v3 = vmul.u32.u64.low %v3704_v44, %v3703_v53  ;;  %v16010_v58 = vmul.u32.u64.high %v3704_v44, %v3703_v53, %v16009_v3  ;;  %v3695_v45 = vsel %vm3689_vm7, %v3692_v14, %v3694_v21 }
 0x3a1   : > { %v3520_v7 = vsub.s32 32, %v3519_v46  ;;  %v3524_v59 = vsub.s32 4294967266, %v3519_v46  ;;  %v16019_v38 = vand.u32 3, %v15970_v33  ;;  %vm16023_vm1 = vcmp.le.f32.partialorder %v3448_v18, 0.7853982  ;;  %v16040_v53 = vpop.permute.xlu0 %712 }
 0x3a2   : > { %vm3450_vm5 = vcmp.lt.s32.totalorder %v15713_v1, 0  ;;  %v3764_v25 = vshrl.u32 %v3763_v23, 23  ;;  %v3521_v27 = vshll.u32 %v15982_v63, %v3519_v46  ;;  %v3714_v20 = vadd.s32 1, %v16006_v56 }
 0x3a3   : > { %v3522_v55 = vshrl.u32 %v3504_v41, %v3520_v7  ;;  %v3525_v0 = vadd.s32 127, %v3524_v59  ;;  %v3535_v33 = vsel %vm3450_vm5, %v3534_v49, %v15966_v37  ;;  %v3711_v18 = vmul.u32 %v3704_v44, %v3695_v45 }
 0x3a4   : > { %v12317_v15 = vpop.eup %12316  ;;  %vm3713_vm10 = vc.u32 %v16010_v58, %v16005_v10  ;;  %v10980_v26 = vadd.s32 4294967169, %v3764_v25  ;;  %v3646_v62 = vand.u32 3, %v3645_v19  ;;  %vm6949_vm2 = vcmp.lt.s32.totalorder %v16019_v38, 2 }
 0x3a5   : > { %v12319_v16 = vpop.eup %12318  ;;  %v3523_v47 = vor.u32 %v3522_v55, %v3521_v27  ;;  %v3526_v14 = vshll.u32 %v3525_v0, 23  ;;  %v3715_v63 = vsel %vm3713_vm10, %v3714_v20, %v16006_v56  ;;  %v17604_v28 = vand.u32 2147483647, %v15999_v35  ;;  %v705_v56 = vpop.permute.xlu1 %704  ;;  %v17825_v0 = vld [vmem:[#allocation30_spill] sm:$0xff] }
 0x3a6   : > { %v3716_v21 = vadd.s32 %v3715_v63, %v3711_v18  ;;  %v3770_v6 = vadd.s32 1, %v10980_v26  ;;  %v3652_v37 = vxor.u32 2147483648, %v12317_v15  ;;  %vm6950_vm8 = vcmp.eq.s32.totalorder %v16019_v38, 0 }
 0x3a7   : > { %v3527_v44 = vor.u32 4788187, %v3526_v14  ;;  %v3537_v49 = vsel %vm16023_vm1, 0, %v3535_v33  ;;  %v3649_v19 = vxor.u32 2147483648, %v12319_v16  ;;  %vm6953_vm11 = vcmp.eq.s32.totalorder %v16019_v38, 2  ;;  %v870_v33 = vpop.permute.xlu0 %869 }
 0x3a8   : > { %v3717_v46 = vadd.s32 536870912, %v3716_v21  ;;  %vm3771_vm4 = vcmp.gt.s32.totalorder %v3770_v6, 0  ;;  %vm3648_vm9 = vcmp.eq.s32.totalorder %v3646_v62, 0  ;;  %v3530_v23 = vcvt.s32.f32 %v3523_v47 }
 0x3a9   : > { %v3528_v3 = vand.u32 2147483647, %v3527_v44  ;;  %v3772_v41 = vsel %vm3771_vm4, %v3770_v6, 0  ;;  %vm3644_vm0 = vweird.f32 %v15643_v17  ;;  %vm3651_vm14 = vcmp.eq.s32.totalorder %v3646_v62, 2 }
 0x3aa   : > { %v3541_v7 = vadd.s32 3, %v3537_v49  ;;  %v16047_v59 = vshrl.u32 %v3717_v46, 30  ;;  %v3767_v45 = vand.u32 8388607, %v17604_v28  ;;  %v3653_v25 = vsel %vm3651_vm14, %v3652_v37, %v12319_v16 }
 0x3ab   : > { %v3531_v27 = vmul.f32 %v3530_v23, %v3528_v3  ;;  %v3774_v55 = vand.u32 31, %v3772_v41  ;;  %vm17826_vm7 = vcmp.eq.s32.totalorder %v12642_v50, 1  ;;  %v3650_v18 = vsel %vm3648_vm9, %v12317_v15, %v3649_v19 }
 0x3ac   : > { %v747_v20 = vsel %vm17826_vm7, %v17825_v0, %v705_v56  ;;  %v6952_v26 = vsel %vm6950_vm8, %v12317_v15, %v3649_v19  ;;  %v6955_v47 = vsel %vm6953_vm11, %v3652_v37, %v12319_v16  ;;  %v3719_v14 = vshll.u32 %v16047_v59, 30 }
 0x3ad   : > { %vm3647_vm12 = vcmp.lt.s32.totalorder %v3646_v62, 2  ;;  %v3532_v63 = vxor.u32 2147483648, %v3531_v27  ;;  %v16059_v6 = vand.u32 3, %v3537_v49  ;;  %v3775_v44 = vsub.s32 32, %v3774_v55 }
 0x3ae   : > { %v16061_v46 = vand.u32 3, %v3541_v7  ;;  %v16063_v3 = vsub.s32 %v3716_v21, %v3719_v14  ;;  %v3768_v56 = vor.u32 8388608, %v3767_v45  ;;  %vm17827_vm6 = vcmp.eq.s32.totalorder %v12645_v51, 1 }
 0x3af   : > { %v16067_v23 = vsel %vm17827_vm6, %v870_v33, %v747_v20  ;;  %v3654_v15 = vsel %vm3647_vm12, %v3650_v18, %v3653_v25  ;;  %v6956_v16 = vsel %vm6949_vm2, %v6952_v26, %v6955_v47  ;;  %v3533_v62 = vsel %vm3450_vm5, %v3532_v63, %v3531_v27 }
 0x3b0   : > { %17828 = vst [vmem:[#allocation16_spill] sm:$0xff] %v16067_v23  ;;  %v3712_v37 = vadd.s32 %v16005_v10, %v16010_v58  ;;  %v3536_v21 = vsel %vm16023_vm1, %v15713_v1, %v3533_v62  ;;  %v3722_v49 = vsub.s32 0, %v16063_v3  ;;  %v16079_v19 = vshrl.u32 %v3772_v41, 5 }
 0x3b1   : > { %v3778_v7 = vshrl.u32 %v17638_v52, %v3775_v44  ;;  %12320 = vcosq.f32 %v3536_v21  ;;  %v3777_v38 = vshll.u32 %v17644_v42, %v3774_v55  ;;  %v3781_v45 = vshrl.u32 %v17639_v36, %v3775_v44 }
 0x3b2   : > { %v3784_v25 = vshrl.u32 %v17640_v13, %v3775_v44  ;;  %12322 = vsinq.f32 %v3536_v21  ;;  %v10977_v10 = vmin.u32 %v3722_v49, %v16063_v3  ;;  %v3780_v58 = vshll.u32 %v17638_v52, %v3774_v55 }
 0x3b3   : > { %v3783_v30 = vshll.u32 %v17639_v36, %v3774_v55  ;;  %v16090_v41 = vsel %vm3644_vm0, nan, %v3654_v15  ;;  %v6957_v27 = vsel %vm3644_vm0, nan, %v6956_v16  ;;  %v16094_v0 = vshll.u32 %v3768_v56, 8 }
 0x3b4   : > { %v16098_v20 = vmul.f32 %v17733_v48, %v16067_v23  ;;  %v3724_v33 = vclz %v10977_v10  ;;  %v3779_v18 = vor.u32 %v3778_v7, %v3777_v38  ;;  %v3782_v26 = vor.u32 %v3781_v45, %v3780_v58 }
 0x3b5   : > { %v3785_v47 = vor.u32 %v3784_v25, %v3783_v30  ;;  %vm3547_vm13 = vcmp.eq.s32.totalorder %v16061_v46, 2  ;;  %vm6850_vm1 = vcmp.eq.s32.totalorder %v16059_v6, 2  ;;  %v3786_v14 = vshll.u32 %v17640_v13, %v3774_v55 }
 0x3b6   : > { %v3787_v63 = vshrl.u32 %v17641_v31, %v3775_v44  ;;  %v3789_v17 = vshll.u32 %v17641_v31, %v3774_v55  ;;  %v3790_v56 = vshrl.u32 %v17642_v5, %v3775_v44  ;;  %vm3544_vm5 = vcmp.eq.s32.totalorder %v16061_v46, 0 }
 0x3b7   : > { %vm6847_vm10 = vcmp.eq.s32.totalorder %v16059_v6, 0  ;;  %v10978_v15 = vadd.s32 4294967294, %v3724_v33  ;;  %v3742_v16 = vsub.s32 4, %v16047_v59  ;;  %v3776_v62 = vshrl.u32 %v17644_v42, %v3775_v44 }
 0x3b8   : > { %vm3792_vm2 = vcmp.lt.s32.totalorder %v16079_v19, 1  ;;  %vm3543_vm8 = vcmp.lt.s32.totalorder %v16061_v46, 2  ;;  %vm6846_vm11 = vcmp.lt.s32.totalorder %v16059_v6, 2  ;;  %v3788_v21 = vor.u32 %v3787_v63, %v3786_v14 }
 0x3b9   : > { %v3791_v49 = vor.u32 %v3790_v56, %v3789_v17  ;;  %vm3793_vm4 = vcmp.lt.s32.totalorder %v16079_v19, 2  ;;  %vm3795_vm9 = vcmp.lt.s32.totalorder %v16079_v19, 4  ;;  %vm3540_vm0 = vweird.f32 %v15713_v1 }
 0x3ba   : > { %vm10979_vm14 = vcmp.lt.s32.totalorder %v10978_v15, 0  ;;  %vm3794_vm7 = vcmp.lt.s32.totalorder %v16079_v19, 3  ;;  %v3797_v55 = vsel %vm3795_vm9, %v3785_v47, 2102212464  ;;  %v3800_v44 = vsel %vm3792_vm2, %v3779_v18, %v3782_v26 }
 0x3bb   : > { %v3727_v7 = vsel %vm10979_vm14, 0, %v10978_v15  ;;  %v3801_v38 = vsel %vm3795_vm9, %v3788_v21, 920167782  ;;  %v3804_v45 = vsel %vm3792_vm2, %v3782_v26, %v3785_v47  ;;  %v3805_v25 = vsel %vm3795_vm9, %v3791_v49, 1326507024  ;;  %v12321_v14 = vpop.eup %12320 }
 0x3bc   : > { %vm3658_vm12 = vcmp.lt.s32.totalorder %v15886_v32, 0  ;;  %v3728_v10 = vsub.s32 32, %v3727_v7  ;;  %v3732_v58 = vsub.s32 4294967266, %v3727_v7  ;;  %v3796_v30 = vsel %vm3792_vm2, %v3776_v62, %v3779_v18  ;;  %v12323_v49 = vpop.eup %12322 }
 0x3bd   : > { %v3802_v33 = vsel %vm3794_vm7, %v3785_v47, %v3801_v38  ;;  %v3729_v63 = vshll.u32 %v16063_v3, %v3727_v7  ;;  %v3798_v17 = vsel %vm3794_vm7, %v3782_v26, %v3797_v55  ;;  %v3806_v15 = vsel %vm3794_vm7, %v3788_v21, %v3805_v25  ;;  %v16135_v47 = vpop.permute.xlu1 %583 }
 0x3be   : > { %v3803_v56 = vsel %vm3793_vm4, %v3800_v44, %v3802_v33  ;;  %v3548_v28 = vxor.u32 2147483648, %v12321_v14  ;;  %v3730_v40 = vshrl.u32 %v3712_v37, %v3728_v10  ;;  %v3733_v54 = vadd.s32 127, %v3732_v58 }
 0x3bf   : > { %v3807_v18 = vsel %vm3793_vm4, %v3804_v45, %v3806_v15  ;;  %v3545_v62 = vxor.u32 2147483648, %v12323_v49  ;;  %v3867_v26 = vand.u32 2139095040, %v16098_v20  ;;  %v7606_v58 = vsel %vm7580_vm15, %v16090_v41, %v6957_v27 }
 0x3c0   : > { %v16138_v3 = vmul.u32.u64.low %v16094_v0, %v3807_v18  ;;  %v16139_v7 = vmul.u32.u64.high %v16094_v0, %v3807_v18, %v16138_v3  ;;  %v3549_v55 = vsel %vm3547_vm13, %v3548_v28, %v12323_v49  ;;  %v6852_v21 = vsel %vm6850_vm1, %v3548_v28, %v12323_v49 }
 0x3c1   : > { %v3731_v37 = vor.u32 %v3730_v40, %v3729_v63  ;;  %v3734_v44 = vshll.u32 %v3733_v54, 23  ;;  %v3546_v38 = vsel %vm3544_vm5, %v12321_v14, %v3545_v62  ;;  %v6849_v45 = vsel %vm6847_vm10, %v12321_v14, %v3545_v62  ;;  %v589_v6 = vpop.permute.xlu1 %588 }
 0x3c2   : > { %v16151_v25 = vmul.u32.u64.low %v16094_v0, %v3803_v56  ;;  %v16152_v10 = vmul.u32.u64.high %v16094_v0, %v3803_v56, %v16151_v25  ;;  %v3550_v33 = vsel %vm3543_vm8, %v3546_v38, %v3549_v55  ;;  %v6853_v40 = vsel %vm6846_vm11, %v6849_v45, %v6852_v21 }
 0x3c3   : > { %v3735_v54 = vor.u32 4788187, %v3734_v44  ;;  %v3551_v28 = vsel %vm3540_vm0, nan, %v3550_v33  ;;  %v6854_v14 = vsel %vm3540_vm0, nan, %v6853_v40  ;;  %v3738_v63 = vcvt.s32.f32 %v3731_v37  ;;  %v882_v40 = vpop.permute.xlu0 %881 }
 0x3c4   : > { %v3799_v56 = vsel %vm3793_vm4, %v3796_v30, %v3798_v17  ;;  %v7605_v41 = vsel %vm7580_vm15, %v3551_v28, %v6854_v14  ;;  %vm3817_vm6 = vc.u32 %v16139_v7, %v16151_v25  ;;  %v3868_v46 = vshrl.u32 %v3867_v26, 23 }
 0x3c5   : > { %v3736_v27 = vand.u32 2147483647, %v3735_v54  ;;  %vm17829_vm13 = vcmp.eq.s32.totalorder %v12533_v11, 1  ;;  %v3743_v19 = vsel %vm3658_vm12, %v3742_v16, %v16047_v59  ;;  %v3818_v30 = vadd.s32 1, %v16152_v10  ;;  %v717_v37 = vpop.permute.xlu1 %716 }
 0x3c6   : > { %v7643_v15 = vsel %vm17829_vm13, %v15621_v12, %v7606_v58  ;;  %vm17830_vm1 = vmmov %vm17829_vm13  ;;  %v3815_v18 = vmul.u32 %v16094_v0, %v3799_v56  ;;  %v10984_v62 = vadd.s32 4294967169, %v3868_v46  ;;  %v17832_v3 = vand.u32 2147483647, %v15886_v32 }
 0x3c7   : > { %v7642_v1 = vsel %vm17830_vm1, %v15702_v22, %v7605_v41  ;;  %v3739_v49 = vmul.f32 %v3738_v63, %v3736_v27  ;;  %v3819_v12 = vsel %vm3817_vm6, %v3818_v30, %v16152_v10  ;;  %v17607_v38 = vand.u32 2147483647, %v16098_v20 }
 0x3c8   : > { %v16180_v17 = vpack.c.bf16 %v7643_v15, %v7642_v1  ;;  %vm3657_vm5 = vcmp.le.f32.partialorder %v17832_v3, 0.7853982  ;;  %v3820_v22 = vadd.s32 %v3819_v12, %v3815_v18  ;;  %v3874_v21 = vadd.s32 1, %v10984_v62 }
 0x3c9   : > { %v3740_v26 = vxor.u32 2147483648, %v3739_v49  ;;  %v3745_v55 = vsel %vm3657_vm5, 0, %v3743_v19  ;;  %vm17833_vm2 = vcmp.eq.s32.totalorder %v12642_v50, 1  ;;  %v3871_v63 = vand.u32 8388607, %v17607_v38  ;;  %v874_v18 = vpop.permute.xlu1 %873 }
 0x3ca   : > { %17831 = vst [vmem:[#allocation14_spill] sm:$0xff] %v16180_v17  ;;  %11601 = vmatprep.mubr.msk.bf16.mxu0 %vm7693_vm3, %v16180_v17  ;;  %v3821_v16 = vadd.s32 536870912, %v3820_v22  ;;  %vm3875_vm10 = vcmp.gt.s32.totalorder %v3874_v21, 0  ;;  %v3749_v44 = vadd.s32 3, %v3745_v55  ;;  %v750_v33 = vsel %vm17833_vm2, %v589_v6, %v717_v37  ;;  %vm17834_vm8 = vmmov %vm17833_vm2 }
 0x3cb   : > { %v3741_v59 = vsel %vm3658_vm12, %v3740_v26, %v3739_v49  ;;  %v3876_v45 = vsel %vm3875_vm10, %v3874_v21, 0  ;;  %v16198_v56 = vand.u32 3, %v3745_v55  ;;  %v748_v27 = vsel %vm17834_vm8, %v16028_v61, %v16013_v24 }
 0x3cc   : > { %v3744_v0 = vsel %vm3657_vm5, %v15886_v32, %v3741_v59  ;;  %v3822_v10 = vshrl.u32 %v3821_v16, 30  ;;  %v3878_v58 = vand.u32 31, %v3876_v45  ;;  %v16194_v14 = vand.u32 3, %v3749_v44 }
 0x3cd   : > { %12324 = vcosq.f32 %v3744_v0  ;;  %vm17835_vm11 = vcmp.eq.s32.totalorder %v12645_v51, 1  ;;  %v17837_v6 = vand.u32 2147483647, %v15999_v35  ;;  %vm3762_vm9 = vcmp.lt.s32.totalorder %v15999_v35, 0 }
 0x3ce   : > { %v3823_v54 = vshll.u32 %v3822_v10, 30  ;;  %v3879_v28 = vsub.s32 32, %v3878_v58  ;;  %12326 = vsinq.f32 %v3744_v0  ;;  %v16208_v46 = vsel %vm17835_vm11, %v882_v40, %v750_v33  ;;  %vm17840_vm7 = vmmov %vm17835_vm11 }
 0x3cf   : > { %17836 = vst [vmem:[#allocation17_spill] sm:$0xff] %v16208_v46  ;;  %vm16212_vm4 = vcmp.le.f32.partialorder %v17837_v6, 0.7853982  ;;  %v3846_v1 = vsub.s32 4, %v3822_v10  ;;  %v3816_v30 = vadd.s32 %v16151_v25, %v16139_v7  ;;  %vm3755_vm0 = vcmp.eq.s32.totalorder %v16194_v14, 2 }
 0x3d0   : > { %v16200_v41 = vsub.s32 %v3820_v22, %v3823_v54  ;;  %v3891_v19 = vshrl.u32 %v17641_v31, %v3879_v28  ;;  %v3882_v24 = vshrl.u32 %v17638_v52, %v3879_v28  ;;  %v3885_v61 = vshrl.u32 %v17639_v36, %v3879_v28 }
 0x3d1   : > { %v3872_v62 = vor.u32 8388608, %v3871_v63  ;;  %v3888_v3 = vshrl.u32 %v17640_v13, %v3879_v28  ;;  %v3890_v12 = vshll.u32 %v17640_v13, %v3878_v58  ;;  %v16227_v26 = vmul.f32 %v17733_v48, %v16208_v46 }
 0x3d2   : > { %v3826_v49 = vsub.s32 0, %v16200_v41  ;;  %vm7056_vm14 = vcmp.eq.s32.totalorder %v16198_v56, 2  ;;  %v3877_v25 = vshrl.u32 %v3876_v45, 5  ;;  %v3881_v55 = vshll.u32 %v17644_v42, %v3878_v58 }
 0x3d3   : > { %v3884_v22 = vshll.u32 %v17638_v52, %v3878_v58  ;;  %v3847_v21 = vsel %vm3762_vm9, %v3846_v1, %v3822_v10  ;;  %v3887_v59 = vshll.u32 %v17639_v36, %v3878_v58  ;;  %v3892_v16 = vor.u32 %v3891_v19, %v3890_v12 }
 0x3d4   : > { %v10981_v7 = vmin.u32 %v3826_v49, %v16200_v41  ;;  %v16238_v37 = vsel %vm17840_vm7, %v874_v18, %v748_v27  ;;  %v3883_v33 = vor.u32 %v3882_v24, %v3881_v55  ;;  %v3894_v45 = vshrl.u32 %v17642_v5, %v3879_v28 }
 0x3d5   : > { %17841 = vst [vmem:[#allocation21_spill] sm:$0xff] %v16238_v37  ;;  %v3886_v40 = vor.u32 %v3885_v61, %v3884_v22  ;;  %vm3752_vm12 = vcmp.eq.s32.totalorder %v16194_v14, 0  ;;  %vm7053_vm6 = vcmp.eq.s32.totalorder %v16198_v56, 0  ;;  %v3889_v54 = vor.u32 %v3888_v3, %v3887_v59 }
 0x3d6   : > { %v3828_v44 = vclz %v10981_v7  ;;  %v16243_v63 = vshll.u32 %v3872_v62, 8  ;;  %v4179_v6 = vand.u32 2139095040, %v16227_v26  ;;  %v3893_v19 = vshll.u32 %v17641_v31, %v3878_v58 }
 0x3d7   : > { %v12325_v0 = vpop.eup %12324  ;;  %vm3899_vm13 = vcmp.lt.s32.totalorder %v3877_v25, 4  ;;  %v16250_v24 = vsel %vm16212_vm4, 0, %v3847_v21  ;;  %v3880_v61 = vshrl.u32 %v17644_v42, %v3879_v28  ;;  %vm3896_vm1 = vcmp.lt.s32.totalorder %v3877_v25, 1 }
 0x3d8   : > { %v3756_v1 = vxor.u32 2147483648, %v12325_v0  ;;  %v10982_v27 = vadd.s32 4294967294, %v3828_v44  ;;  %v12327_v49 = vpop.eup %12326  ;;  %v3905_v18 = vsel %vm3899_vm13, %v3892_v16, 920167782  ;;  %vm7052_vm5 = vcmp.lt.s32.totalorder %v16198_v56, 2 }
 0x3d9   : > { %v3895_v62 = vor.u32 %v3894_v45, %v3893_v19  ;;  %vm3898_vm2 = vcmp.lt.s32.totalorder %v3877_v25, 3  ;;  %v3904_v3 = vsel %vm3896_vm1, %v3883_v33, %v3886_v40  ;;  %vm3897_vm8 = vcmp.lt.s32.totalorder %v3877_v25, 2 }
 0x3da   : > { %vm10983_vm10 = vcmp.lt.s32.totalorder %v10982_v27, 0  ;;  %v3901_v58 = vsel %vm3899_vm13, %v3889_v54, 2102212464  ;;  %v3906_v7 = vsel %vm3898_vm2, %v3889_v54, %v3905_v18  ;;  %v3753_v55 = vxor.u32 2147483648, %v12327_v49 }
 0x3db   : > { %v3831_v12 = vsel %vm10983_vm10, 0, %v10982_v27  ;;  %v3757_v28 = vsel %vm3755_vm0, %v3756_v1, %v12327_v49  ;;  %v3900_v21 = vsel %vm3896_vm1, %v3880_v61, %v3883_v33  ;;  %v7058_v59 = vsel %vm7056_vm14, %v3756_v1, %v12327_v49 }
 0x3dc   : > { %v3832_v22 = vsub.s32 32, %v3831_v12  ;;  %v3836_v44 = vsub.s32 4294967266, %v3831_v12  ;;  %v3907_v45 = vsel %vm3897_vm8, %v3904_v3, %v3906_v7  ;;  %v3908_v27 = vsel %vm3896_vm1, %v3886_v40, %v3889_v54 }
 0x3dd   : > { %v3833_v19 = vshll.u32 %v16200_v41, %v3831_v12  ;;  %v3902_v18 = vsel %vm3898_vm2, %v3886_v40, %v3901_v58  ;;  %v3909_v10 = vsel %vm3899_vm13, %v3895_v62, 1326507024  ;;  %v3754_v1 = vsel %vm3752_vm12, %v12325_v0, %v3753_v55 }
 0x3de   : > { %v3834_v38 = vshrl.u32 %v3816_v30, %v3832_v22  ;;  %v3837_v17 = vadd.s32 127, %v3836_v44  ;;  %v3910_v4 = vsel %vm3898_vm2, %v3892_v16, %v3909_v10  ;;  %v7055_v54 = vsel %vm7053_vm6, %v12325_v0, %v3753_v55 }
 0x3df   : > { %v16270_v33 = vmul.u32.u64.low %v16243_v63, %v3907_v45  ;;  %v16271_v61 = vmul.u32.u64.high %v16243_v63, %v3907_v45, %v16270_v33  ;;  %v3911_v41 = vsel %vm3897_vm8, %v3908_v27, %v3910_v4  ;;  %v4180_v30 = vshrl.u32 %v4179_v6, 23 }
 0x3e0   : > { %v3835_v40 = vor.u32 %v3834_v38, %v3833_v19  ;;  %v3838_v49 = vshll.u32 %v3837_v17, 23  ;;  %v16280_v62 = vmul.u32.u64.low %v16243_v63, %v3911_v41  ;;  %v16281_v3 = vmul.u32.u64.high %v16243_v63, %v3911_v41, %v16280_v62 }
 0x3e1   : > { %vm3751_vm11 = vcmp.lt.s32.totalorder %v16194_v14, 2  ;;  %v3903_v16 = vsel %vm3897_vm8, %v3900_v21, %v3902_v18  ;;  %v10996_v10 = vadd.s32 4294967169, %v4180_v30  ;;  %v16287_v12 = vmul.f32 %v17733_v48, %v16238_v37 }
 0x3e2   : > { %v3758_v58 = vsel %vm3751_vm11, %v3754_v1, %v3757_v28  ;;  %v7059_v4 = vsel %vm7052_vm5, %v7055_v54, %v7058_v59  ;;  %v3839_v0 = vor.u32 4788187, %v3838_v49  ;;  %v3922_v17 = vadd.s32 1, %v16271_v61 }
 0x3e3   : > { %vm3748_vm0 = vweird.f32 %v15886_v32  ;;  %v3853_v38 = vadd.s32 3, %v16250_v24  ;;  %v17842_v14 = vand.u32 2147483647, %v16227_v26  ;;  %v4186_v6 = vadd.s32 1, %v10996_v10 }
 0x3e4   : > { %v3840_v7 = vand.u32 2147483647, %v3839_v0  ;;  %v3842_v55 = vcvt.s32.f32 %v3835_v40  ;;  %v3919_v22 = vmul.u32 %v16243_v63, %v3903_v16  ;;  %vm3921_vm14 = vc.u32 %v16281_v3, %v16270_v33 }
 0x3e5   : > { %v16296_v25 = vand.u32 8388607, %v17842_v14  ;;  %v3759_v56 = vsel %vm3748_vm0, nan, %v3758_v58  ;;  %v7060_v28 = vsel %vm3748_vm0, nan, %v7059_v4  ;;  %v3923_v21 = vsel %vm3921_vm14, %v3922_v17, %v16271_v61  ;;  %v12188_v58 = vld [vmem:[%s17508_s3] sm:$0xff]  }
 0x3e6   : > { %vm4187_vm7 = vcmp.gt.s32.totalorder %v4186_v6, 0  ;;  %v3843_v32 = vmul.f32 %v3842_v55, %v3840_v7  ;;  %v3924_v59 = vadd.s32 %v3923_v21, %v3919_v22  ;;  %v3971_v45 = vand.u32 2139095040, %v16287_v12  ;;  %11609 = vmatprep.subr.bf16.mxu1 %v12188_v58 }
 0x3e7   : > { %v4188_v44 = vsel %vm4187_vm7, %v4186_v6, 0  ;;  %v7607_v1 = vsel %vm7580_vm15, %v3759_v56, %v7060_v28  ;;  %v16305_v63 = vand.u32 3, %v3853_v38  ;;  %v16308_v54 = vand.u32 3, %v16250_v24  ;;  %v16333_v6 = vpop.f32.mrb[0].mxu0  ;;  %11610 = vmatpush3.bf16.msra.mxu1 %v12188_v58 }
 0x3e8   : > { %v4190_v27 = vand.u32 31, %v4188_v44  ;;  %v3844_v19 = vxor.u32 2147483648, %v3843_v32  ;;  %v3925_v18 = vadd.s32 536870912, %v3924_v59  ;;  %v4184_v40 = vor.u32 8388608, %v16296_v25  ;;  %v12189_v25 = vld [vmem:[%s17508_s3 + $0x8] sm:$0xff]   ;;  %v16339_v28 = vpop.f32.mrb[1].mxu0 }
 0x3e9   : > { %v3972_v49 = vshrl.u32 %v3971_v45, 23  ;;  %v4189_v55 = vshrl.u32 %v4188_v44, 5  ;;  %11611 = vmatprep.subr.bf16.mxu1 %v12189_v25  ;;  %vm7159_vm12 = vcmp.eq.s32.totalorder %v16308_v54, 2  ;;  %vm3856_vm6 = vcmp.eq.s32.totalorder %v16305_v63, 0 }
 0x3ea   : > { %v4191_v41 = vsub.s32 32, %v4190_v27  ;;  %v3845_v61 = vsel %vm3762_vm9, %v3844_v19, %v3843_v32  ;;  %v16312_v30 = vshrl.u32 %v3925_v18, 30  ;;  %v4193_v16 = vshll.u32 %v17644_v42, %v4190_v27  ;;  %v16341_v18 = vpop.f32.mrb[2].mxu0 }
 0x3eb   : > { %v3848_v62 = vsel %vm16212_vm4, %v15999_v35, %v3845_v61  ;;  %v4196_v0 = vshll.u32 %v17638_v52, %v4190_v27  ;;  %v4199_v15 = vshll.u32 %v17639_v36, %v4190_v27  ;;  %v4202_v38 = vshll.u32 %v17640_v13, %v4190_v27  ;;  %11612 = vmatpush3.bf16.msra.mxu1 %v12189_v25 }
 0x3ec   : > { %v4194_v10 = vshrl.u32 %v17638_v52, %v4191_v41  ;;  %v4197_v24 = vshrl.u32 %v17639_v36, %v4191_v41  ;;  %12328 = vcosq.f32 %v3848_v62  ;;  %v3927_v4 = vshll.u32 %v16312_v30, 30 }
 0x3ed   : > { %v4200_v17 = vshrl.u32 %v17640_v13, %v4191_v41  ;;  %12330 = vsinq.f32 %v3848_v62  ;;  %v4203_v14 = vshrl.u32 %v17641_v31, %v4191_v41  ;;  %v4205_v22 = vshll.u32 %v17641_v31, %v4190_v27  ;;  %v16354_v62 = vpop.f32.mrb[3].mxu0 }
 0x3ee   : > { %v16335_v7 = vsub.s32 %v3924_v59, %v3927_v4  ;;  %v4206_v56 = vshrl.u32 %v17642_v5, %v4191_v41  ;;  %v4195_v21 = vor.u32 %v4194_v10, %v4193_v16  ;;  %v4198_v32 = vor.u32 %v4197_v24, %v4196_v0  ;;  %v12190_v59 = vld [vmem:[%s17508_s3 + $0x10] sm:$0xff]  }
 0x3ef   : > { %v4201_v45 = vor.u32 %v4200_v17, %v4199_v15  ;;  %v4204_v19 = vor.u32 %v4203_v14, %v4202_v38  ;;  %vm17843_vm4 = vcmp.eq.s32.totalorder %v12533_v11, 1  ;;  %vm3859_vm9 = vcmp.eq.s32.totalorder %v16305_v63, 2  ;;  %11613 = vmatprep.subr.bf16.mxu1 %v12190_v59 }
 0x3f0   : > { %v16349_v44 = vsel %vm17843_vm4, %v15734_v2, %v7607_v1  ;;  %v3930_v27 = vsub.s32 0, %v16335_v7  ;;  %v10988_v61 = vadd.s32 4294967169, %v3972_v49  ;;  %vm7156_vm13 = vcmp.eq.s32.totalorder %v16308_v54, 0  ;;  %v16362_v1 = vpop.f32.mrb[4].mxu0  ;;  %11614 = vmatpush3.bf16.msra.mxu1 %v12190_v59 }
 0x3f1   : > { %v4192_v16 = vshrl.u32 %v17644_v42, %v4191_v41  ;;  %v4207_v10 = vor.u32 %v4206_v56, %v4205_v22  ;;  %v16359_v24 = vshll.u32 %v4184_v40, 8  ;;  %vm3855_vm1 = vcmp.lt.s32.totalorder %v16305_v63, 2  ;;  %v16369_v41 = vpop.f32.mrb[5].mxu0 }
 0x3f2   : > { %vm7155_vm5 = vcmp.lt.s32.totalorder %v16308_v54, 2  ;;  %v3920_v49 = vadd.s32 %v16270_v33, %v16281_v3  ;;  %v10985_v58 = vmin.u32 %v3930_v27, %v16335_v7  ;;  %vm4208_vm10 = vcmp.lt.s32.totalorder %v4189_v55, 1  ;;  %v12191_v33 = vld [vmem:[%s17508_s3 + $0x18] sm:$0xff]   ;;  %v16377_v3 = vpop.f32.mrb[6].mxu0 }
 0x3f3   : > { %vm4211_vm2 = vcmp.lt.s32.totalorder %v4189_v55, 4  ;;  %vm3852_vm8 = vweird.f32 %v15999_v35  ;;  %v4212_v40 = vsel %vm4208_vm10, %v4192_v16, %v4195_v21  ;;  %v4216_v0 = vsel %vm4208_vm10, %v4195_v21, %v4198_v32  ;;  %v16379_v25 = vpop.f32.mrb[7].mxu0  ;;  %11615 = vmatprep.subr.bf16.mxu1 %v12191_v33 }
 0x3f4   : > { %v4213_v4 = vsel %vm4211_vm2, %v4201_v45, 2102212464  ;;  %v4217_v17 = vsel %vm4211_vm2, %v4204_v19, 920167782  ;;  %v3932_v15 = vclz %v10985_v58  ;;  %vm4210_vm11 = vcmp.lt.s32.totalorder %v4189_v55, 3  ;;  %v16382_v27 = vpop.f32.mrb[8].mxu0  ;;  %11616 = vmatpush3.bf16.msra.mxu1 %v12191_v33 }
 0x3f5   : > { %v4220_v38 = vsel %vm4208_vm10, %v4198_v32, %v4201_v45  ;;  %v3978_v14 = vadd.s32 1, %v10988_v61  ;;  %vm4209_vm0 = vcmp.lt.s32.totalorder %v4189_v55, 2  ;;  %v4214_v22 = vsel %vm4210_vm11, %v4198_v32, %v4213_v4  ;;  %v16384_v60 = vpop.f32.mrb[9].mxu0 }
 0x3f6   : > { %v4218_v56 = vsel %vm4210_vm11, %v4201_v45, %v4217_v17  ;;  %v4221_v21 = vsel %vm4211_vm2, %v4207_v10, 1326507024  ;;  %v12329_v16 = vpop.eup %12328  ;;  %v10986_v2 = vadd.s32 4294967294, %v3932_v15  ;;  %v4215_v43 = vsel %vm4209_vm0, %v4212_v40, %v4214_v22  ;;  %v16391_v55 = vpop.f32.mrb[10].mxu0 }
 0x3f7   : > { %v4219_v9 = vsel %vm4209_vm0, %v4216_v0, %v4218_v56  ;;  %v4222_v34 = vsel %vm4210_vm11, %v4204_v19, %v4221_v21  ;;  %v12331_v58 = vpop.eup %12330  ;;  %v3860_v57 = vxor.u32 2147483648, %v12329_v16  ;;  %v16397_v19 = vpop.f32.mrb[11].mxu0  ;;  %vm3979_vm7 = vcmp.gt.s32.totalorder %v3978_v14, 0 }
 0x3f8   : > { %v4223_v61 = vsel %vm4209_vm0, %v4220_v38, %v4222_v34  ;;  %v16387_v39 = vmul.u32.u64.low %v16359_v24, %v4219_v9  ;;  %v16388_v46 = vmul.u32.u64.high %v16359_v24, %v4219_v9, %v16387_v39  ;;  %v3857_v32 = vxor.u32 2147483648, %v12331_v58  ;;  %v16403_v40 = vpop.f32.mrb[12].mxu0 }
 0x3f9   : > { %vm10987_vm14 = vcmp.lt.s32.totalorder %v10986_v2, 0  ;;  %v16394_v45 = vmul.u32.u64.low %v16359_v24, %v4223_v61  ;;  %v16395_v10 = vmul.u32.u64.high %v16359_v24, %v4223_v61, %v16394_v45  ;;  %v3861_v59 = vsel %vm3859_vm9, %v3860_v57, %v12331_v58  ;;  %v16410_v38 = vpop.f32.mrb[13].mxu0 }
 0x3fa   : > { %v7161_v34 = vsel %vm7159_vm12, %v3860_v57, %v12331_v58  ;;  %v3935_v9 = vsel %vm10987_vm14, 0, %v10986_v2  ;;  %v3858_v4 = vsel %vm3856_vm6, %v12329_v16, %v3857_v32  ;;  %v7158_v0 = vsel %vm7156_vm13, %v12329_v16, %v3857_v32  ;;  %v16417_v21 = vpop.f32.mrb[14].mxu0 }
 0x3fb   : > { %v3936_v17 = vsub.s32 32, %v3935_v9  ;;  %v4231_v15 = vmul.u32 %v16359_v24, %v4215_v43  ;;  %v3862_v22 = vsel %vm3855_vm1, %v3858_v4, %v3861_v59  ;;  %v7162_v57 = vsel %vm7155_vm5, %v7158_v0, %v7161_v34  ;;  %v16424_v58 = vpop.f32.mrb[15].mxu0 }
 0x3fc   : > { %v3940_v2 = vsub.s32 4294967266, %v3935_v9  ;;  %v4234_v56 = vadd.s32 1, %v16388_v46  ;;  %v3863_v16 = vsel %vm3852_vm8, nan, %v3862_v22  ;;  %v7163_v43 = vsel %vm3852_vm8, nan, %v7162_v57  ;;  %v16431_v32 = vpop.f32.mrb[16].mxu0 }
 0x3fd   : > { %v3937_v24 = vshll.u32 %v16335_v7, %v3935_v9  ;;  %v3938_v33 = vshrl.u32 %v3920_v49, %v3936_v17  ;;  %v7608_v63 = vsel %vm7580_vm15, %v3863_v16, %v7163_v43  ;;  %vm4233_vm4 = vc.u32 %v16395_v10, %v16387_v39  ;;  %v16439_v34 = vpop.f32.mrb[17].mxu0  ;;  %v878_v17 = vpop.permute.xlu1 %877 }
 0x3fe   : > { %v3941_v54 = vadd.s32 127, %v3940_v2  ;;  %v3980_v61 = vsel %vm3979_vm7, %v3978_v14, 0  ;;  %vm17844_vm9 = vcmp.eq.s32.totalorder %v12533_v11, 1  ;;  %v4235_v7 = vsel %vm4233_vm4, %v4234_v56, %v16388_v46  ;;  %v16444_v22 = vpop.f32.mrb[18].mxu0 }
 0x3ff   : > { %v7645_v35 = vsel %vm17844_vm9, %v15974_v29, %v7608_v63  ;;  %v3939_v45 = vor.u32 %v3938_v33, %v3937_v24  ;;  %v17845_v49 = vand.u32 2147483647, %v16287_v12  ;;  %v4236_v0 = vadd.s32 %v4235_v7, %v4231_v15  ;;  %v16446_v57 = vpop.f32.mrb[19].mxu0 }
 0x400   : > { %v16442_v9 = vpack.c.bf16 %v7645_v35, %v16349_v44  ;;  %v3942_v4 = vshll.u32 %v3941_v54, 23  ;;  %v3982_v14 = vand.u32 31, %v3980_v61  ;;  %vm17847_vm12 = vcmp.eq.s32.totalorder %v12642_v50, 1 }
 0x401   : > { %v3975_v59 = vand.u32 8388607, %v17845_v49  ;;  %v749_v46 = vsel %vm17847_vm12, %v16135_v47, %v16040_v53  ;;  %v4237_v2 = vadd.s32 536870912, %v4236_v0  ;;  %vm17848_vm6 = vcmp.eq.s32.totalorder %v12645_v51, 1 }
 0x402   : > { %17846 = vst [vmem:[#allocation7_spill] sm:$0xff] %v16442_v9  ;;  %v3943_v29 = vor.u32 4788187, %v3942_v4  ;;  %v3983_v56 = vsub.s32 32, %v3982_v14  ;;  %11602 = vmatmul.mubr.msk.bf16.gmra.mrb[24].mxu0 %vm7693_vm3, %v16442_v9  ;;  %v16456_v44 = vsel %vm17848_vm6, %v878_v17, %v749_v46  ;;  %v3946_v16 = vcvt.s32.f32 %v3939_v45 }
 0x403   : > { %17849 = vst [vmem:[#allocation23_spill] sm:$0xff] %v16456_v44  ;;  %v16458_v43 = vshrl.u32 %v4237_v2, 30  ;;  %v3976_v24 = vor.u32 8388608, %v3975_v59  ;;  %v3981_v54 = vshrl.u32 %v3980_v61, 5  ;;  %v3985_v51 = vshll.u32 %v17644_v42, %v3982_v14 }
 0x404   : > { %v3944_v15 = vand.u32 2147483647, %v3943_v29  ;;  %v3986_v33 = vshrl.u32 %v17638_v52, %v3983_v56  ;;  %v3989_v63 = vshrl.u32 %v17639_v36, %v3983_v56  ;;  %v3992_v50 = vshrl.u32 %v17640_v13, %v3983_v56 }
 0x405   : > { %v3995_v53 = vshrl.u32 %v17641_v31, %v3983_v56  ;;  %v4239_v47 = vshll.u32 %v16458_v43, 30  ;;  %v3994_v35 = vshll.u32 %v17640_v13, %v3982_v14  ;;  %v3988_v45 = vshll.u32 %v17638_v52, %v3982_v14 }
 0x406   : > { %v3947_v7 = vmul.f32 %v3946_v16, %v3944_v15  ;;  %v3991_v49 = vshll.u32 %v17639_v36, %v3982_v14  ;;  %v3998_v59 = vshrl.u32 %v17642_v5, %v3983_v56  ;;  %v3987_v29 = vor.u32 %v3986_v33, %v3985_v51 }
 0x407   : > { %v16470_v4 = vsub.s32 %v4236_v0, %v4239_v47  ;;  %v3996_v17 = vor.u32 %v3995_v53, %v3994_v35  ;;  %v3990_v46 = vor.u32 %v3989_v63, %v3988_v45  ;;  %v3997_v9 = vshll.u32 %v17641_v31, %v3982_v14 }
 0x408   : > { %v3993_v2 = vor.u32 %v3992_v50, %v3991_v49  ;;  %v17850_v61 = vand.u32 2147483647, %v16098_v20  ;;  %vm3866_vm1 = vcmp.lt.s32.totalorder %v16098_v20, 0  ;;  %v16483_v0 = vmul.f32 %v17733_v48, %v16456_v44 }
 0x409   : > { %v4242_v15 = vsub.s32 0, %v16470_v4  ;;  %v3948_v16 = vxor.u32 2147483648, %v3947_v7  ;;  %v3999_v33 = vor.u32 %v3998_v59, %v3997_v9  ;;  %vm4003_vm5 = vcmp.lt.s32.totalorder %v3981_v54, 4 }
 0x40a   : > { %vm16475_vm13 = vcmp.le.f32.partialorder %v17850_v61, 0.7853982  ;;  %v4016_v63 = vshll.u32 %v3976_v24, 8  ;;  %v3984_v50 = vshrl.u32 %v17644_v42, %v3983_v56  ;;  %vm4000_vm10 = vcmp.lt.s32.totalorder %v3981_v54, 1 }
 0x40b   : > { %v10997_v14 = vmin.u32 %v4242_v15, %v16470_v4  ;;  %v4009_v53 = vsel %vm4003_vm5, %v3996_v17, 920167782  ;;  %v3950_v47 = vsub.s32 4, %v16312_v30  ;;  %vm4001_vm2 = vcmp.lt.s32.totalorder %v3981_v54, 2 }
 0x40c   : > { %v4005_v51 = vsel %vm4003_vm5, %v3993_v2, 2102212464  ;;  %v4008_v35 = vsel %vm4000_vm10, %v3987_v29, %v3990_v46  ;;  %vm4002_vm8 = vcmp.lt.s32.totalorder %v3981_v54, 3  ;;  %v4004_v48 = vsel %vm4000_vm10, %v3984_v50, %v3987_v29 }
 0x40d   : > { %v4244_v45 = vclz %v10997_v14  ;;  %v4012_v49 = vsel %vm4000_vm10, %v3990_v46, %v3993_v2  ;;  %v3949_v9 = vsel %vm3866_vm1, %v3948_v16, %v3947_v7  ;;  %v4010_v24 = vsel %vm4002_vm8, %v3993_v2, %v4009_v53 }
 0x40e   : > { %v4013_v59 = vsel %vm4003_vm5, %v3999_v33, 1326507024  ;;  %v4075_v56 = vand.u32 2139095040, %v16483_v0  ;;  %v4006_v15 = vsel %vm4002_vm8, %v3990_v46, %v4005_v51  ;;  %v4011_v44 = vsel %vm4001_vm2, %v4008_v35, %v4010_v24 }
 0x40f   : > { %v10998_v61 = vadd.s32 4294967294, %v4244_v45  ;;  %v4014_v11 = vsel %vm4002_vm8, %v3996_v17, %v4013_v59  ;;  %v16496_v8 = vmul.u32.u64.low %v4016_v63, %v4011_v44  ;;  %v16497_v14 = vmul.u32.u64.high %v4016_v63, %v4011_v44, %v16496_v8 }
 0x410   : > { %v4015_v23 = vsel %vm4001_vm2, %v4012_v49, %v4014_v11  ;;  %v4076_v29 = vshrl.u32 %v4075_v56, 23  ;;  %v3952_v7 = vsel %vm16475_vm13, %v16098_v20, %v3949_v9  ;;  %v4007_v33 = vsel %vm4001_vm2, %v4004_v48, %v4006_v15 }
 0x411   : > { %vm10999_vm11 = vcmp.lt.s32.totalorder %v10998_v61, 0  ;;  %v16502_v2 = vmul.u32.u64.low %v4016_v63, %v4015_v23  ;;  %v16503_v16 = vmul.u32.u64.high %v4016_v63, %v4015_v23, %v16502_v2  ;;  %v17622_v17 = vand.u32 2147483647, %v16483_v0 }
 0x412   : > { %v10992_v46 = vadd.s32 4294967169, %v4076_v29  ;;  %v4247_v50 = vsel %vm10999_vm11, 0, %v10998_v61  ;;  %v3951_v11 = vsel %vm3866_vm1, %v3950_v47, %v16312_v30  ;;  %12332 = vcosq.f32 %v3952_v7  ;;  %v16520_v47 = vld [vmem:[%s17509_s4] ss:$0 sm:$0xff] }
 0x413   : > { %v4026_v44 = vadd.s32 1, %v16497_v14  ;;  %v4023_v51 = vmul.u32 %v4016_v63, %v4007_v33  ;;  %vm4025_vm0 = vc.u32 %v16503_v16, %v16496_v8  ;;  %v4252_v35 = vsub.s32 4294967266, %v4247_v50 }
 0x414   : > { %v4082_v53 = vadd.s32 1, %v10992_v46  ;;  %v3953_v54 = vsel %vm16475_vm13, 0, %v3951_v11  ;;  %12334 = vsinq.f32 %v3952_v7  ;;  %v4079_v48 = vand.u32 8388607, %v17622_v17 }
 0x415   : > { %v4027_v23 = vsel %vm4025_vm0, %v4026_v44, %v16497_v14  ;;  %v4248_v63 = vsub.s32 32, %v4247_v50  ;;  %v3957_v49 = vadd.s32 3, %v3953_v54  ;;  %v4253_v9 = vadd.s32 127, %v4252_v35 }
 0x416   : > { %vm4083_vm14 = vcmp.gt.s32.totalorder %v4082_v53, 0  ;;  %v4028_v45 = vadd.s32 %v4027_v23, %v4023_v51  ;;  %v4232_v59 = vadd.s32 %v16387_v39, %v16395_v10  ;;  %v4080_v37 = vor.u32 8388608, %v4079_v48 }
 0x417   : > { %v4084_v30 = vsel %vm4083_vm14, %v4082_v53, 0  ;;  %v16526_v61 = vadd.f32 %v16333_v6, %v16520_v47  ;;  %v16532_v2 = vand.u32 3, %v3953_v54  ;;  %v4254_v33 = vshll.u32 %v4253_v9, 23 }
 0x418   : > { %v4029_v24 = vadd.s32 536870912, %v4028_v45  ;;  %v4086_v56 = vand.u32 31, %v4084_v30  ;;  %v4250_v14 = vshrl.u32 %v4232_v59, %v4248_v63  ;;  %v16535_v11 = vand.u32 3, %v3957_v49 }
 0x419   : > { %v4249_v39 = vshll.u32 %v16470_v4, %v4247_v50  ;;  %v16538_v10 = vshll.u32 %v4080_v37, 8  ;;  %v16547_v35 = vadd.f32 %v16520_v47, %v16339_v28  ;;  %v4024_v4 = vadd.s32 %v16496_v8, %v16503_v16 }
 0x41a   : > { %v16528_v15 = vshrl.u32 %v4029_v24, 30  ;;  %v4087_v29 = vsub.s32 32, %v4086_v56  ;;  %v4255_v63 = vor.u32 4788187, %v4254_v33  ;;  %v4089_v49 = vshll.u32 %v17644_v42, %v4086_v56 }
 0x41b   : > { %v4251_v48 = vor.u32 %v4250_v14, %v4249_v39  ;;  %v4092_v9 = vshll.u32 %v17638_v52, %v4086_v56  ;;  %v4085_v24 = vshrl.u32 %v4084_v30, 5  ;;  %v4095_v28 = vshll.u32 %v17639_v36, %v4086_v56 }
 0x41c   : > { %v16530_v7 = vpop.eup %12332  ;;  %v4031_v46 = vshll.u32 %v16528_v15, 30  ;;  %v4090_v53 = vshrl.u32 %v17638_v52, %v4087_v29  ;;  %v4093_v51 = vshrl.u32 %v17639_v36, %v4087_v29  ;;  %v4096_v50 = vshrl.u32 %v17640_v13, %v4087_v29 }
 0x41d   : > { %v4098_v59 = vshll.u32 %v17640_v13, %v4086_v56  ;;  %v4099_v37 = vshrl.u32 %v17641_v31, %v4087_v29  ;;  %v4101_v17 = vshll.u32 %v17641_v31, %v4086_v56  ;;  %v4102_v54 = vshrl.u32 %v17642_v5, %v4087_v29 }
 0x41e   : > { %v16541_v44 = vsub.s32 %v4028_v45, %v4031_v46  ;;  %v16549_v23 = vpop.eup %12334  ;;  %v4091_v16 = vor.u32 %v4090_v53, %v4089_v49  ;;  %v4094_v46 = vor.u32 %v4093_v51, %v4092_v9  ;;  %v4097_v33 = vor.u32 %v4096_v50, %v4095_v28 }
 0x41f   : > { %v4100_v39 = vor.u32 %v4099_v37, %v4098_v59  ;;  %v4256_v52 = vand.u32 2147483647, %v4255_v63  ;;  %v4258_v30 = vcvt.s32.f32 %v4251_v48  ;;  %v7794_v36 = vadd.f32 %v16341_v18, %v16520_v47 }
 0x420   : > { %v4034_v45 = vsub.s32 0, %v16541_v44  ;;  %v4103_v13 = vor.u32 %v4102_v54, %v4101_v17  ;;  %vm4104_vm7 = vcmp.lt.s32.totalorder %v4085_v24, 1  ;;  %vm4105_vm4 = vcmp.lt.s32.totalorder %v4085_v24, 2 }
 0x421   : > { %vm4107_vm9 = vcmp.lt.s32.totalorder %v4085_v24, 4  ;;  %vm4106_vm12 = vcmp.lt.s32.totalorder %v4085_v24, 3  ;;  %v4112_v53 = vsel %vm4104_vm7, %v4091_v16, %v4094_v46  ;;  %vm3960_vm6 = vcmp.eq.s32.totalorder %v16535_v11, 0 }
 0x422   : > { %v10989_v8 = vmin.u32 %v4034_v45, %v16541_v44  ;;  %v4113_v51 = vsel %vm4107_vm9, %v4100_v39, 920167782  ;;  %vm7262_vm13 = vcmp.eq.s32.totalorder %v16532_v2, 2  ;;  %v4109_v5 = vsel %vm4107_vm9, %v4097_v33, 2102212464 }
 0x423   : > { %v4114_v31 = vsel %vm4106_vm12, %v4097_v33, %v4113_v51  ;;  %v4116_v56 = vsel %vm4104_vm7, %v4094_v46, %v4097_v33  ;;  %v4117_v48 = vsel %vm4107_vm9, %v4103_v13, 1326507024  ;;  %vm7259_vm1 = vcmp.eq.s32.totalorder %v16532_v2, 0 }
 0x424   : > { %v4036_v6 = vclz %v10989_v8  ;;  %vm3970_vm5 = vcmp.lt.s32.totalorder %v16287_v12, 0  ;;  %v4088_v18 = vshrl.u32 %v17644_v42, %v4087_v29  ;;  %v4115_v17 = vsel %vm4105_vm4, %v4112_v53, %v4114_v31 }
 0x425   : > { %v16578_v63 = vmul.u32.u64.low %v16538_v10, %v4115_v17  ;;  %v16579_v45 = vmul.u32.u64.high %v16538_v10, %v4115_v17, %v16578_v63  ;;  %v4110_v59 = vsel %vm4106_vm12, %v4094_v46, %v4109_v5  ;;  %v7912_v37 = vmax.f32 %v7794_v36, 0.0 }
 0x426   : > { %v10990_v14 = vadd.s32 4294967294, %v4036_v6  ;;  %v4118_v6 = vsel %vm4106_vm12, %v4100_v39, %v4117_v48  ;;  %v4108_v28 = vsel %vm4104_vm7, %v4088_v18, %v4091_v16  ;;  %v4259_v8 = vmul.f32 %v4258_v30, %v4256_v52 }
 0x427   : > { %v4119_v50 = vsel %vm4105_vm4, %v4116_v56, %v4118_v6  ;;  %v4054_v53 = vsub.s32 4, %v16528_v15  ;;  %v4111_v51 = vsel %vm4105_vm4, %v4108_v28, %v4110_v59  ;;  %v4130_v16 = vadd.s32 1, %v16579_v45 }
 0x428   : > { %vm10991_vm10 = vcmp.lt.s32.totalorder %v10990_v14, 0  ;;  %v16585_v42 = vmul.u32.u64.low %v16538_v10, %v4119_v50  ;;  %v16586_v29 = vmul.u32.u64.high %v16538_v10, %v4119_v50, %v16585_v42  ;;  %v17853_v46 = vmax.f32 %v16526_v61, 0.0 }
 0x429   : > { %v4039_v54 = vsel %vm10991_vm10, 0, %v10990_v14  ;;  %v7786_v14 = vadd.f32 %v16520_v47, %v16354_v62  ;;  %vm3963_vm2 = vcmp.eq.s32.totalorder %v16535_v11, 2  ;;  %v17854_v36 = vand.u32 2147483647, %v16287_v12 }
 0x42a   : > { %v4040_v49 = vsub.s32 32, %v4039_v54  ;;  %v4044_v9 = vsub.s32 4294967266, %v4039_v54  ;;  %v4041_v33 = vshll.u32 %v16541_v44, %v4039_v54  ;;  %v7942_v5 = vpack.c.bf16 %v7912_v37, %v17853_v46 }
 0x42b   : > { %vm16599_vm8 = vcmp.le.f32.partialorder %v17854_v36, 0.7853982  ;;  %v7909_v52 = vmax.f32 %v16547_v35, 0.0  ;;  %v17857_v24 = vxor.u32 2147483648, %v16530_v7  ;;  %vm4178_vm11 = vcmp.lt.s32.totalorder %v16227_v26, 0 }
 0x42c   : > { %v4042_v39 = vshrl.u32 %v4024_v4, %v4040_v49  ;;  %v4045_v13 = vadd.s32 127, %v4044_v9  ;;  %vm4129_vm0 = vc.u32 %v16586_v29, %v16578_v63  ;;  %v7910_v61 = vmax.f32 %v7786_v14, 0.0 }
 0x42d   : > { %v3965_v30 = vsel %vm3963_vm2, %v17857_v24, %v16549_v23  ;;  %v7807_v31 = vadd.f32 %v16362_v1, %v16520_v47  ;;  %v17858_v56 = vxor.u32 2147483648, %v16549_v23  ;;  %v17859_v35 = vmov %v17857_v24 }
 0x42e   : > { %v4043_v44 = vor.u32 %v4042_v39, %v4041_v33  ;;  %v4046_v4 = vshll.u32 %v4045_v13, 23  ;;  %v7264_v18 = vsel %vm7262_vm13, %v17859_v35, %v16549_v23  ;;  %v4127_v6 = vmul.u32 %v16538_v10, %v4111_v51 }
 0x42f   : > { %v3962_v48 = vsel %vm3960_vm6, %v16530_v7, %v17858_v56  ;;  %v17860_v54 = vmov %v17858_v56  ;;  %v4260_v50 = vxor.u32 2147483648, %v4259_v8  ;;  %v4055_v49 = vsel %vm3970_vm5, %v4054_v53, %v16528_v15 }
 0x430   : > { %v4047_v17 = vor.u32 4788187, %v4046_v4  ;;  %v7261_v1 = vsel %vm7259_vm1, %v16530_v7, %v17860_v54  ;;  %v4131_v9 = vsel %vm4129_vm0, %v4130_v16, %v16579_v45  ;;  %v4050_v59 = vcvt.s32.f32 %v4043_v44 }
 0x431   : > { %v4132_v42 = vadd.s32 %v4131_v9, %v4127_v6  ;;  %v7799_v37 = vadd.f32 %v16520_v47, %v16369_v41  ;;  %v7915_v10 = vmax.f32 %v7807_v31, 0.0  ;;  %v7810_v23 = vadd.f32 %v16377_v3, %v16520_v47 }
 0x432   : > { %v4048_v28 = vand.u32 2147483647, %v4047_v17  ;;  %v7941_v14 = vpack.c.bf16 %v7910_v61, %v7909_v52  ;;  %vm7997_vm14 = vcmask 523264   ;;  %v17861_v7 = vand.u32 2147483647, %v16227_v26 }
 0x433   : > { %v4133_v45 = vadd.s32 536870912, %v4132_v42  ;;  %v7913_v39 = vmax.f32 %v7799_v37, 0.0  ;;  %v7802_v13 = vadd.f32 %v16520_v47, %v16379_v25  ;;  %v7916_v53 = vmax.f32 %v7810_v23, 0.0 }
 0x434   : > { %vm16638_vm7 = vcmp.le.f32.partialorder %v17861_v7, 0.7853982  ;;  %v4051_v15 = vmul.f32 %v4050_v59, %v4048_v28  ;;  %11617 = vmatprep.mubr.msk.bf16.mxu1 %vm7997_vm14, %v7941_v14  ;;  %v7823_v41 = vadd.f32 %v16382_v27, %v16520_v47  ;;  %v7815_v3 = vadd.f32 %v16520_v47, %v16384_v60 }
 0x435   : > { %v7826_v51 = vadd.f32 %v16391_v55, %v16520_v47  ;;  %v16651_v46 = vshrl.u32 %v4133_v45, 30  ;;  %v7914_v36 = vmax.f32 %v7802_v13, 0.0  ;;  %11618 = vmatmul.mubr.msk.bf16.vlgmr.msra.gmra.mrb[0].mxu1 %vm7997_vm14, %v7942_v5  ;;  %v7818_v25 = vadd.f32 %v16520_v47, %v16397_v19 }
 0x436   : > { %v4052_v16 = vxor.u32 2147483648, %v4051_v15  ;;  %vm3956_vm4 = vweird.f32 %v16098_v20  ;;  %v4057_v27 = vsel %vm16599_vm8, 0, %v4055_v49  ;;  %v7944_v44 = vpack.c.bf16 %v7916_v53, %v7915_v10 }
 0x437   : > { %v7919_v4 = vmax.f32 %v7823_v41, 0.0  ;;  %v7920_v60 = vmax.f32 %v7826_v51, 0.0  ;;  %v4261_v55 = vsel %vm4178_vm11, %v4260_v50, %v4259_v8  ;;  %v4135_v24 = vshll.u32 %v16651_v46, 30 }
 0x438   : > { %v4053_v52 = vsel %vm3970_vm5, %v4052_v16, %v4051_v15  ;;  %v7943_v5 = vpack.c.bf16 %v7914_v36, %v7913_v39  ;;  %v7917_v61 = vmax.f32 %v7815_v3, 0.0  ;;  %v7918_v56 = vmax.f32 %v7818_v25, 0.0 }
 0x439   : > { %v4056_v19 = vsel %vm16599_vm8, %v16287_v12, %v4053_v52  ;;  %v7946_v31 = vpack.c.bf16 %v7920_v60, %v7919_v4  ;;  %v4061_v35 = vadd.s32 3, %v4057_v27  ;;  %v16667_v17 = vsub.s32 %v4132_v42, %v4135_v24 }
 0x43a   : > { %12336 = vcosq.f32 %v4056_v19  ;;  %11621 = vmatprep.mubr.msk.bf16.mxu1 %vm7997_vm14, %v7943_v5  ;;  %v7839_v8 = vadd.f32 %v16403_v40, %v16520_v47  ;;  %vm3959_vm9 = vcmp.lt.s32.totalorder %v16535_v11, 2  ;;  %v7945_v6 = vpack.c.bf16 %v7918_v56, %v7917_v61  ;;  %v12192_v5 = vld [vmem:[%s17508_s3 + $0x20] sm:$0xff]  }
 0x43b   : > { %12338 = vsinq.f32 %v4056_v19  ;;  %v7831_v62 = vadd.f32 %v16520_v47, %v16410_v38  ;;  %v3966_v54 = vsel %vm3959_vm9, %v3962_v48, %v3965_v30  ;;  %vm7258_vm12 = vcmp.lt.s32.totalorder %v16532_v2, 2  ;;  %11649 = vmatprep.subr.bf16.mxu0 %v12192_v5 }
 0x43c   : > { %v4262_v50 = vsub.s32 4, %v16458_v43  ;;  %v4138_v49 = vsub.s32 0, %v16667_v17  ;;  %v7265_v9 = vsel %vm7258_vm12, %v7261_v1, %v7264_v18  ;;  %v4264_v28 = vsel %vm16638_vm7, %v16227_v26, %v4261_v55  ;;  %11650 = vmatpush3.bf16.msra.mxu0 %v12192_v5 }
 0x43d   : > { %v7842_v40 = vadd.f32 %v16417_v21, %v16520_v47  ;;  %v7834_v11 = vadd.f32 %v16520_v47, %v16424_v58  ;;  %v4062_v59 = vand.u32 3, %v4061_v35  ;;  %v7360_v38 = vand.u32 3, %v4057_v27  ;;  %11622 = vmatmul.mubr.msk.bf16.gmra.mrb[4].mxu1 %vm7997_vm14, %v7944_v44 }
 0x43e   : > { %v10993_v30 = vmin.u32 %v4138_v49, %v16667_v17  ;;  %v7923_v2 = vmax.f32 %v7839_v8, 0.0  ;;  %11625 = vmatprep.mubr.msk.bf16.mxu1 %vm7997_vm14, %v7945_v6  ;;  %v7921_v48 = vmax.f32 %v7831_v62, 0.0  ;;  %v7855_v42 = vadd.f32 %v16431_v32, %v16520_v47  ;;  %v17865_v6 = vld [vmem:[#allocation16_spill] sm:$0xff]  ;;  %v17866_v62 = vld [vmem:[#allocation3_spill] sm:$0xff] }
 0x43f   : > { %v7924_v18 = vmax.f32 %v7842_v40, 0.0  ;;  %v7922_v1 = vmax.f32 %v7834_v11, 0.0  ;;  %v3967_v21 = vsel %vm3956_vm4, nan, %v3966_v54  ;;  %v7266_v58 = vsel %vm3956_vm4, nan, %v7265_v9  ;;  %v17868_v9 = vld [vmem:[#allocation21_spill] sm:$0xff] }
 0x440   : > { %12340 = vcosq.f32 %v4264_v28  ;;  %v4140_v37 = vclz %v10993_v30  ;;  %vm4060_vm6 = vweird.f32 %v16287_v12  ;;  %v7847_v14 = vadd.f32 %v16520_v47, %v16439_v34 }
 0x441   : > { %v7948_v10 = vpack.c.bf16 %v7924_v18, %v7923_v2  ;;  %v7947_v23 = vpack.c.bf16 %v7922_v1, %v7921_v48  ;;  %v7858_v7 = vadd.f32 %v16444_v22, %v16520_v47  ;;  %vm7361_vm13 = vcmp.lt.s32.totalorder %v7360_v38, 2 }
 0x442   : > { %vm7362_vm1 = vcmp.eq.s32.totalorder %v7360_v38, 0  ;;  %v10994_v32 = vadd.s32 4294967294, %v4140_v37  ;;  %v7850_v15 = vadd.f32 %v16520_v47, %v16446_v57  ;;  %vm4063_vm5 = vcmp.lt.s32.totalorder %v4062_v59, 2 }
 0x443   : > { %vm7365_vm10 = vcmp.eq.s32.totalorder %v7360_v38, 2  ;;  %v7927_v20 = vmax.f32 %v7855_v42, 0.0  ;;  %v7928_v45 = vmax.f32 %v7858_v7, 0.0  ;;  %vm4064_vm2 = vcmp.eq.s32.totalorder %v4062_v59, 0 }
 0x444   : > { %v12337_v39 = vpop.eup %12336  ;;  %vm4067_vm8 = vcmp.eq.s32.totalorder %v4062_v59, 2  ;;  %vm10995_vm0 = vcmp.lt.s32.totalorder %v10994_v32, 0  ;;  %v7926_v13 = vmax.f32 %v7850_v15, 0.0  ;;  %v7925_v3 = vmax.f32 %v7847_v14, 0.0 }
 0x445   : > { %v12339_v53 = vpop.eup %12338  ;;  %v4068_v34 = vxor.u32 2147483648, %v12337_v39  ;;  %v4143_v41 = vsel %vm10995_vm0, 0, %v10994_v32  ;;  %v7950_v22 = vpack.c.bf16 %v7928_v45, %v7927_v20  ;;  %v4128_v16 = vadd.s32 %v16578_v63, %v16586_v29  ;;  %11626 = vmatmul.mubr.msk.bf16.gmra.mrb[8].mxu1 %vm7997_vm14, %v7946_v31 }
 0x446   : > { %v4065_v51 = vxor.u32 2147483648, %v12339_v53  ;;  %v4144_v36 = vsub.s32 32, %v4143_v41  ;;  %v4148_v57 = vsub.s32 4294967266, %v4143_v41  ;;  %v4145_v44 = vshll.u32 %v16667_v17, %v4143_v41  ;;  %11629 = vmatprep.mubr.msk.bf16.mxu1 %vm7997_vm14, %v7947_v23 }
 0x447   : > { %v4069_v25 = vsel %vm4067_vm8, %v4068_v34, %v12339_v53  ;;  %v7367_v27 = vsel %vm7365_vm10, %v4068_v34, %v12339_v53  ;;  %v7949_v4 = vpack.c.bf16 %v7926_v13, %v7925_v3  ;;  %v7609_v63 = vsel %vm7580_vm15, %v3967_v21, %v7266_v58 }
 0x448   : > { %v4066_v60 = vsel %vm4064_vm2, %v12337_v39, %v4065_v51  ;;  %v7364_v55 = vsel %vm7362_vm1, %v12337_v39, %v4065_v51  ;;  %v4146_v52 = vshrl.u32 %v4128_v16, %v4144_v36  ;;  %v4149_v24 = vadd.s32 127, %v4148_v57 }
 0x449   : > { %12342 = vsinq.f32 %v4264_v28  ;;  %v4070_v29 = vsel %vm4063_vm5, %v4066_v60, %v4069_v25  ;;  %v7368_v19 = vsel %vm7361_vm13, %v7364_v55, %v7367_v27  ;;  %vm17867_vm4 = vcmp.eq.s32.totalorder %v17866_v62, 1 }
 0x44a   : > { %v12341_v61 = vpop.eup %12340  ;;  %v4071_v31 = vsel %vm4060_vm6, nan, %v4070_v29  ;;  %v7369_v56 = vsel %vm4060_vm6, nan, %v7368_v19  ;;  %v4147_v35 = vor.u32 %v4146_v52, %v4145_v44  ;;  %v4150_v17 = vshll.u32 %v4149_v24, 23  ;;  %vm17869_vm9 = vmmov %vm17867_vm4 }
 0x44b   : > { %v7610_v8 = vsel %vm7580_vm15, %v4071_v31, %v7369_v56  ;;  %v7646_v54 = vsel %vm17867_vm4, %v17865_v6, %v7609_v63  ;;  %v4263_v49 = vsel %vm4178_vm11, %v4262_v50, %v16458_v43  ;;  %v4158_v50 = vsub.s32 4, %v16651_v46 }
 0x44c   : > { %v7647_v12 = vsel %vm17869_vm9, %v17868_v9, %v7610_v8  ;;  %v4151_v28 = vor.u32 4788187, %v4150_v17  ;;  %v4154_v59 = vcvt.s32.f32 %v4147_v35  ;;  %v4265_v38 = vsel %vm16638_vm7, 0, %v4263_v49  ;;  %v17871_v8 = vld [vmem:[#allocation17_spill] sm:$0xff] }
 0x44d   : > { %v16730_v40 = vpack.c.bf16 %v7647_v12, %v7646_v54  ;;  %11630 = vmatmul.mubr.msk.bf16.gmra.mrb[12].mxu1 %vm7997_vm14, %v7948_v10  ;;  %v4269_v30 = vadd.s32 3, %v4265_v38  ;;  %vm4074_vm11 = vcmp.lt.s32.totalorder %v16483_v0, 0  ;;  %v17870_v18 = vand.u32 2147483647, %v16483_v0  ;;  %v17873_v54 = vld [vmem:[#allocation23_spill] sm:$0xff] }
 0x44e   : > { %v4152_v11 = vand.u32 2147483647, %v4151_v28  ;;  %11633 = vmatprep.mubr.msk.bf16.mxu1 %vm7997_vm14, %v7949_v4  ;;  %v4159_v33 = vsel %vm4074_vm11, %v4158_v50, %v16651_v46  ;;  %v7566_v42 = vand.u32 3, %v4265_v38  ;;  %v4276_v10 = vxor.u32 2147483648, %v12341_v61  ;;  %v12195_v38 = vld [vmem:[%s17508_s3 + $0x38] sm:$0xff]  }
 0x44f   : > { %11605 = vmatprep.mubr.msk.bf16.mxu0 %vm7693_vm3, %v16730_v40  ;;  %vm4073_vm12 = vcmp.le.f32.partialorder %v17870_v18, 0.7853982  ;;  %v4270_v58 = vand.u32 3, %v4269_v30  ;;  %vm4268_vm2 = vweird.f32 %v16227_v26  ;;  %vm4164_vm8 = vweird.f32 %v16483_v0 }
 0x450   : > { %v4155_v43 = vmul.f32 %v4154_v59, %v4152_v11  ;;  %v4161_v23 = vsel %vm4073_vm12, 0, %v4159_v33  ;;  %vm7568_vm7 = vcmp.eq.s32.totalorder %v7566_v42, 0  ;;  %vm7571_vm1 = vcmp.eq.s32.totalorder %v7566_v42, 2  ;;  %v12194_v59 = vld [vmem:[%s17508_s3 + $0x30] sm:$0xff]  }
 0x451   : > { %vm4272_vm6 = vcmp.eq.s32.totalorder %v4270_v58, 0  ;;  %vm4275_vm13 = vcmp.eq.s32.totalorder %v4270_v58, 2  ;;  %v4165_v14 = vadd.s32 3, %v4161_v23  ;;  %vm4271_vm5 = vcmp.lt.s32.totalorder %v4270_v58, 2 }
 0x452   : > { %v4156_v2 = vxor.u32 2147483648, %v4155_v43  ;;  %vm7567_vm10 = vcmp.lt.s32.totalorder %v7566_v42, 2  ;;  %v7463_v20 = vand.u32 3, %v4161_v23 }
 0x453   : > { %v12343_v48 = vpop.eup %12342  ;;  %v4166_v13 = vand.u32 3, %v4165_v14  ;;  %v16793_v14 = vld [vmem:[%s17509_s4 + $0x1] ss:$0 sm:$0xff] }
 0x454   : > { %v4157_v1 = vsel %vm4074_vm11, %v4156_v2, %v4155_v43  ;;  %v4273_v37 = vxor.u32 2147483648, %v12343_v48  ;;  %v4277_v32 = vsel %vm4275_vm13, %v4276_v10, %v12343_v48  ;;  %v7573_v46 = vsel %vm7571_vm1, %v4276_v10, %v12343_v48 }
 0x455   : > { %v4160_v21 = vsel %vm4073_vm12, %v16483_v0, %v4157_v1  ;;  %11634 = vmatmul.mubr.msk.bf16.gmra.mrb[16].mxu1 %vm7997_vm14, %v7950_v22  ;;  %vm7464_vm0 = vcmp.lt.s32.totalorder %v7463_v20, 2  ;;  %vm4171_vm4 = vcmp.eq.s32.totalorder %v4166_v13, 2  ;;  %vm7465_vm9 = vcmp.eq.s32.totalorder %v7463_v20, 0 }
 0x456   : > { %12344 = vcosq.f32 %v4160_v21  ;;  %v4274_v7 = vsel %vm4272_vm6, %v12341_v61, %v4273_v37  ;;  %v7570_v15 = vsel %vm7568_vm7, %v12341_v61, %v4273_v37  ;;  %vm7468_vm11 = vcmp.eq.s32.totalorder %v7463_v20, 2 }
 0x457   : > { %12346 = vsinq.f32 %v4160_v21  ;;  %v4278_v45 = vsel %vm4271_vm5, %v4274_v7, %v4277_v32  ;;  %v7574_v39 = vsel %vm7567_vm10, %v7570_v15, %v7573_v46  ;;  %vm4168_vm12 = vcmp.eq.s32.totalorder %v4166_v13, 0 }
 0x458   : > { %v4279_v41 = vsel %vm4268_vm2, nan, %v4278_v45  ;;  %v7575_v3 = vsel %vm4268_vm2, nan, %v7574_v39  ;;  %vm4167_vm7 = vcmp.lt.s32.totalorder %v4166_v13, 2  ;;  %vm17872_vm6 = vcmp.eq.s32.totalorder %v17866_v62, 1  ;;  %v12193_v62 = vld [vmem:[%s17508_s3 + $0x28] sm:$0xff]  }
 0x459   : > { %v7612_v55 = vsel %vm7580_vm15, %v4279_v41, %v7575_v3  ;;  %vm17874_vm13 = vmmov %vm17872_vm6  ;;  %11651 = vmatprep.subr.bf16.mxu0 %v12193_v62 }
 0x45a   : > { %v7649_v6 = vsel %vm17872_vm6, %v17871_v8, %v7612_v55  ;;  %11652 = vmatpush3.bf16.msra.mxu0 %v12193_v62 }
 0x45b   : > { %11653 = vmatprep.subr.bf16.mxu0 %v12194_v59 }
 0x45e   : > { %11654 = vmatpush3.bf16.msra.mxu0 %v12194_v59 }
 0x45f   : > { %11655 = vmatprep.subr.bf16.mxu0 %v12195_v38 }
 0x460   : > { %v12345_v53 = vpop.eup %12344 }
 0x461   : > { %v12347_v34 = vpop.eup %12346  ;;  %v4172_v22 = vxor.u32 2147483648, %v12345_v53 }
 0x462   : > { %v4169_v51 = vxor.u32 2147483648, %v12347_v34  ;;  %11656 = vmatpush3.bf16.msra.mxu0 %v12195_v38 }
 0x463   : > { %v4173_v36 = vsel %vm4171_vm4, %v4172_v22, %v12347_v34  ;;  %v7470_v57 = vsel %vm7468_vm11, %v4172_v22, %v12347_v34 }
 0x464   : > { %v11599_v16 = vpop.f32.mrb[20].mxu0  ;;  %v4170_v26 = vsel %vm4168_vm12, %v12345_v53, %v4169_v51  ;;  %v7467_v44 = vsel %vm7465_vm9, %v12345_v53, %v4169_v51 }
 0x465   : > { %v7871_v25 = vadd.f32 %v11599_v16, %v16520_v47  ;;  %v7862_v27 = vpop.f32.mrb[21].mxu0  ;;  %v4174_v52 = vsel %vm4167_vm7, %v4170_v26, %v4173_v36  ;;  %v7471_v24 = vsel %vm7464_vm0, %v7467_v44, %v7470_v57 }
 0x466   : > { %v7863_v4 = vadd.f32 %v16520_v47, %v7862_v27  ;;  %v11600_v60 = vpop.f32.mrb[22].mxu0  ;;  %v4175_v19 = vsel %vm4164_vm8, nan, %v4174_v52  ;;  %v7472_v61 = vsel %vm4164_vm8, nan, %v7471_v24 }
 0x467   : > { %v7874_v63 = vadd.f32 %v11600_v60, %v16520_v47  ;;  %v7865_v29 = vpop.f32.mrb[23].mxu0  ;;  %v7611_v56 = vsel %vm7580_vm15, %v4175_v19, %v7472_v61  ;;  %v7931_v35 = vmax.f32 %v7871_v25, 0.0  ;;  %vm10239_vm15 = vcmask 130048  }
 0x468   : > { %v7866_v31 = vadd.f32 %v16520_v47, %v7865_v29  ;;  %v7648_v49 = vsel %vm17874_vm13, %v17873_v54, %v7611_v56  ;;  %v7929_v9 = vmax.f32 %v7863_v4, 0.0 }
 0x469   : > { %v7932_v17 = vmax.f32 %v7874_v63, 0.0  ;;  %v16766_v28 = vpack.c.bf16 %v7649_v6, %v7648_v49 }
 0x46a   : > { %v7930_v12 = vmax.f32 %v7866_v31, 0.0 }
 0x46b   : > { %v7952_v0 = vpack.c.bf16 %v7932_v17, %v7931_v35  ;;  %11606 = vmatmul.mubr.msk.bf16.gmra.mrb[28].mxu0 %vm7693_vm3, %v16766_v28 }
 0x46c   : > { %v7951_v11 = vpack.c.bf16 %v7930_v12, %v7929_v9 }
 0x46e   : > { %11637 = vmatprep.mubr.msk.bf16.mxu1 %vm7997_vm14, %v7951_v11 }
 0x46f   : > { %11638 = vmatmul.mubr.msk.bf16.gmra.mrb[20].mxu1 %vm7997_vm14, %v7952_v0 }
 0x4d5   : > { %v11603_v43 = vpop.f32.mrb[24].mxu0 }
 0x4d6   : > { %v7887_v50 = vadd.f32 %v11603_v43, %v16520_v47  ;;  %v7878_v30 = vpop.f32.mrb[25].mxu0 }
 0x4d7   : > { %v7879_v2 = vadd.f32 %v16520_v47, %v7878_v30  ;;  %v11604_v48 = vpop.f32.mrb[26].mxu0 }
 0x4d8   : > { %v7890_v18 = vadd.f32 %v11604_v48, %v16520_v47  ;;  %v7881_v1 = vpop.f32.mrb[27].mxu0  ;;  %v7935_v42 = vmax.f32 %v7887_v50, 0.0 }
 0x4d9   : > { %v7882_v33 = vadd.f32 %v16520_v47, %v7881_v1  ;;  %v7933_v58 = vmax.f32 %v7879_v2, 0.0 }
 0x4da   : > { %v7936_v21 = vmax.f32 %v7890_v18, 0.0 }
 0x4db   : > { %v7934_v37 = vmax.f32 %v7882_v33, 0.0 }
 0x4dc   : > { %v7954_v10 = vpack.c.bf16 %v7936_v21, %v7935_v42 }
 0x4dd   : > { %v7953_v23 = vpack.c.bf16 %v7934_v37, %v7933_v58 }
 0x4df   : > { %11641 = vmatprep.mubr.msk.bf16.mxu1 %vm7997_vm14, %v7953_v23 }
 0x4e0   : > { %11642 = vmatmul.mubr.msk.bf16.gmra.mrb[24].mxu1 %vm7997_vm14, %v7954_v10 }
 0x508   : > { %v11619_v7 = vpop.f32.mrb[0].mxu1 }
 0x509   : > { %v8089_v32 = vadd.f32 %v11619_v7, %v16793_v14  ;;  %v8080_v15 = vpop.f32.mrb[1].mxu1 }
 0x50a   : > { %v8081_v46 = vadd.f32 %v16793_v14, %v8080_v15  ;;  %v11620_v20 = vpop.f32.mrb[2].mxu1 }
 0x50b   : > { %v8092_v45 = vadd.f32 %v11620_v20, %v16793_v14  ;;  %v8083_v39 = vpop.f32.mrb[3].mxu1  ;;  %v8209_v53 = vmax.f32 %v8089_v32, 0.0 }
 0x50c   : > { %v8084_v13 = vadd.f32 %v16793_v14, %v8083_v39  ;;  %v8207_v41 = vmax.f32 %v8081_v46, 0.0 }
 0x50d   : > { %v8210_v34 = vmax.f32 %v8092_v45, 0.0 }
 0x50e   : > { %v8208_v3 = vmax.f32 %v8084_v13, 0.0 }
 0x50f   : > { %v8240_v22 = vpack.c.bf16 %v8210_v34, %v8209_v53 }
 0x510   : > { %v8239_v51 = vpack.c.bf16 %v8208_v3, %v8207_v41  ;;  %v11623_v16 = vpop.f32.mrb[4].mxu1 }
 0x511   : > { %v8105_v36 = vadd.f32 %v11623_v16, %v16793_v14  ;;  %v8096_v57 = vpop.f32.mrb[5].mxu1 }
 0x512   : > { %v8097_v25 = vadd.f32 %v16793_v14, %v8096_v57  ;;  %v11624_v27 = vpop.f32.mrb[6].mxu1  ;;  %11657 = vmatprep.mubr.msk.bf16.mxu0 %vm7997_vm14, %v8239_v51 }
 0x513   : > { %v8108_v26 = vadd.f32 %v11624_v27, %v16793_v14  ;;  %v8099_v44 = vpop.f32.mrb[7].mxu1  ;;  %11658 = vmatmul.mubr.msk.bf16.vlgmr.msra.gmra.mrb[32].mxu0 %vm7997_vm14, %v8240_v22  ;;  %v8213_v60 = vmax.f32 %v8105_v36, 0.0 }
 0x514   : > { %v8100_v4 = vadd.f32 %v16793_v14, %v8099_v44  ;;  %v8211_v52 = vmax.f32 %v8097_v25, 0.0 }
 0x515   : > { %v8214_v55 = vmax.f32 %v8108_v26, 0.0 }
 0x516   : > { %v8212_v24 = vmax.f32 %v8100_v4, 0.0 }
 0x517   : > { %v8242_v63 = vpack.c.bf16 %v8214_v55, %v8213_v60 }
 0x518   : > { %v8241_v29 = vpack.c.bf16 %v8212_v24, %v8211_v52  ;;  %v11627_v19 = vpop.f32.mrb[8].mxu1 }
 0x519   : > { %v8121_v61 = vadd.f32 %v11627_v19, %v16793_v14  ;;  %v8112_v31 = vpop.f32.mrb[9].mxu1 }
 0x51a   : > { %11661 = vmatprep.mubr.msk.bf16.mxu0 %vm7997_vm14, %v8241_v29  ;;  %v8113_v56 = vadd.f32 %v16793_v14, %v8112_v31  ;;  %v11628_v35 = vpop.f32.mrb[10].mxu1 }
 0x51b   : > { %11662 = vmatmul.mubr.msk.bf16.gmra.mrb[36].mxu0 %vm7997_vm14, %v8242_v63  ;;  %v8124_v17 = vadd.f32 %v11628_v35, %v16793_v14  ;;  %v8115_v8 = vpop.f32.mrb[11].mxu1  ;;  %v8217_v54 = vmax.f32 %v8121_v61, 0.0 }
 0x51c   : > { %v8116_v6 = vadd.f32 %v16793_v14, %v8115_v8  ;;  %v8215_v9 = vmax.f32 %v8113_v56, 0.0 }
 0x51d   : > { %v8218_v49 = vmax.f32 %v8124_v17, 0.0 }
 0x51e   : > { %v8216_v12 = vmax.f32 %v8116_v6, 0.0 }
 0x51f   : > { %v8244_v0 = vpack.c.bf16 %v8218_v49, %v8217_v54  ;;  %v12196_v49 = vld [vmem:[%s17508_s3 + $0x40] sm:$0xff]  }
 0x520   : > { %v8243_v11 = vpack.c.bf16 %v8216_v12, %v8215_v9  ;;  %v11631_v5 = vpop.f32.mrb[12].mxu1  ;;  %v12197_v9 = vld [vmem:[%s17508_s3 + $0x48] sm:$0xff]   ;;  %11689 = vmatprep.subr.bf16.mxu1 %v12196_v49  ;;  %v12198_v12 = vld [vmem:[%s17508_s3 + $0x50] sm:$0xff]  }
 0x521   : > { %v8137_v62 = vadd.f32 %v11631_v5, %v16793_v14  ;;  %v8128_v59 = vpop.f32.mrb[13].mxu1  ;;  %11690 = vmatpush3.bf16.msra.mxu1 %v12196_v49 }
 0x522   : > { %11665 = vmatprep.mubr.msk.bf16.mxu0 %vm7997_vm14, %v8243_v11  ;;  %v8129_v38 = vadd.f32 %v16793_v14, %v8128_v59  ;;  %v11632_v43 = vpop.f32.mrb[14].mxu1  ;;  %11691 = vmatprep.subr.bf16.mxu1 %v12197_v9 }
 0x523   : > { %11666 = vmatmul.mubr.msk.bf16.gmra.mrb[40].mxu0 %vm7997_vm14, %v8244_v0  ;;  %v8140_v50 = vadd.f32 %v11632_v43, %v16793_v14  ;;  %v8131_v30 = vpop.f32.mrb[15].mxu1  ;;  %v8221_v48 = vmax.f32 %v8137_v62, 0.0  ;;  %v12199_v0 = vld [vmem:[%s17508_s3 + $0x58] sm:$0xff]  }
 0x524   : > { %v8132_v2 = vadd.f32 %v16793_v14, %v8131_v30  ;;  %v8219_v1 = vmax.f32 %v8129_v38, 0.0  ;;  %v12200_v43 = vld [vmem:[%s17507_s2 + $0x14] sm:$0xff]  }
 0x525   : > { %v8222_v18 = vmax.f32 %v8140_v50, 0.0  ;;  %11692 = vmatpush3.bf16.msra.mxu1 %v12197_v9 }
 0x526   : > { %v8220_v33 = vmax.f32 %v8132_v2, 0.0  ;;  %11693 = vmatprep.subr.bf16.mxu1 %v12198_v12 }
 0x527   : > { %v8246_v42 = vpack.c.bf16 %v8222_v18, %v8221_v48 }
 0x528   : > { %v8245_v21 = vpack.c.bf16 %v8220_v33, %v8219_v1  ;;  %v11635_v58 = vpop.f32.mrb[16].mxu1 }
 0x529   : > { %v8153_v37 = vadd.f32 %v11635_v58, %v16793_v14  ;;  %v8144_v10 = vpop.f32.mrb[17].mxu1  ;;  %11694 = vmatpush3.bf16.msra.mxu1 %v12198_v12  ;;  %v16861_v58 = vld [vmem:[%s17509_s4 + $0x2] ss:$0 sm:$0xff] }
 0x52a   : > { %11669 = vmatprep.mubr.msk.bf16.mxu0 %vm7997_vm14, %v8245_v21  ;;  %v8145_v23 = vadd.f32 %v16793_v14, %v8144_v10  ;;  %v11636_v7 = vpop.f32.mrb[18].mxu1  ;;  %11695 = vmatprep.subr.bf16.mxu1 %v12199_v0 }
 0x52b   : > { %11670 = vmatmul.mubr.msk.bf16.gmra.mrb[44].mxu0 %vm7997_vm14, %v8246_v42  ;;  %v8156_v32 = vadd.f32 %v11636_v7, %v16793_v14  ;;  %v8147_v15 = vpop.f32.mrb[19].mxu1  ;;  %v8225_v20 = vmax.f32 %v8153_v37, 0.0 }
 0x52c   : > { %v8148_v46 = vadd.f32 %v16793_v14, %v8147_v15  ;;  %v8223_v39 = vmax.f32 %v8145_v23, 0.0 }
 0x52d   : > { %v8226_v45 = vmax.f32 %v8156_v32, 0.0  ;;  %11696 = vmatpush3.bf16.msra.mxu1 %v12199_v0 }
 0x52e   : > { %v8224_v13 = vmax.f32 %v8148_v46, 0.0  ;;  %11729 = vmatprep.subr.bf16.mxu1 %v12200_v43 }
 0x52f   : > { %v8248_v53 = vpack.c.bf16 %v8226_v45, %v8225_v20 }
 0x530   : > { %v8247_v34 = vpack.c.bf16 %v8224_v13, %v8223_v39 }
 0x532   : > { %11673 = vmatprep.mubr.msk.bf16.mxu0 %vm7997_vm14, %v8247_v34 }
 0x533   : > { %11674 = vmatmul.mubr.msk.bf16.gmra.mrb[48].mxu0 %vm7997_vm14, %v8248_v53 }
 0x53e   : > { %v11607_v41 = vpop.f32.mrb[28].mxu0 }
 0x53f   : > { %v7903_v3 = vadd.f32 %v11607_v41, %v16520_v47  ;;  %v7894_v22 = vpop.f32.mrb[29].mxu0 }
 0x540   : > { %v7895_v51 = vadd.f32 %v16520_v47, %v7894_v22  ;;  %v11608_v16 = vpop.f32.mrb[30].mxu0 }
 0x541   : > { %v7906_v57 = vadd.f32 %v11608_v16, %v16520_v47  ;;  %v7897_v25 = vpop.f32.mrb[31].mxu0  ;;  %v7939_v55 = vmax.f32 %v7903_v3, 0.0 }
 0x542   : > { %v11639_v36 = vpop.f32.mrb[20].mxu1  ;;  %v7898_v44 = vadd.f32 %v16520_v47, %v7897_v25  ;;  %v7937_v29 = vmax.f32 %v7895_v51, 0.0 }
 0x543   : > { %v8169_v27 = vadd.f32 %v11639_v36, %v16793_v14  ;;  %v8160_v26 = vpop.f32.mrb[21].mxu1  ;;  %v7940_v52 = vmax.f32 %v7906_v57, 0.0 }
 0x544   : > { %v8161_v4 = vadd.f32 %v16793_v14, %v8160_v26  ;;  %v11640_v60 = vpop.f32.mrb[22].mxu1  ;;  %v7938_v19 = vmax.f32 %v7898_v44, 0.0 }
 0x545   : > { %v8172_v24 = vadd.f32 %v11640_v60, %v16793_v14  ;;  %v8163_v63 = vpop.f32.mrb[23].mxu1  ;;  %v7956_v31 = vpack.c.bf16 %v7940_v52, %v7939_v55  ;;  %v8229_v56 = vmax.f32 %v8169_v27, 0.0 }
 0x546   : > { %v8164_v61 = vadd.f32 %v16793_v14, %v8163_v63  ;;  %v7955_v17 = vpack.c.bf16 %v7938_v19, %v7937_v29  ;;  %v8227_v8 = vmax.f32 %v8161_v4, 0.0 }
 0x547   : > { %v8230_v35 = vmax.f32 %v8172_v24, 0.0 }
 0x548   : > { %v8228_v6 = vmax.f32 %v8164_v61, 0.0  ;;  %11645 = vmatprep.mubr.msk.bf16.mxu1 %vm7997_vm14, %v7955_v17 }
 0x549   : > { %v8250_v54 = vpack.c.bf16 %v8230_v35, %v8229_v56  ;;  %11646 = vmatmul.mubr.msk.bf16.gmra.mrb[28].mxu1 %vm7997_vm14, %v7956_v31 }
 0x54a   : > { %v8249_v47 = vpack.c.bf16 %v8228_v6, %v8227_v8 }
 0x54c   : > { %11677 = vmatprep.mubr.msk.bf16.mxu0 %vm7997_vm14, %v8249_v47 }
 0x54d   : > { %11678 = vmatmul.mubr.msk.bf16.gmra.mrb[52].mxu0 %vm7997_vm14, %v8250_v54 }
 0x5b3   : > { %v11643_v11 = vpop.f32.mrb[24].mxu1 }
 0x5b4   : > { %v8185_v5 = vadd.f32 %v11643_v11, %v16793_v14  ;;  %v8176_v62 = vpop.f32.mrb[25].mxu1 }
 0x5b5   : > { %v8177_v59 = vadd.f32 %v16793_v14, %v8176_v62  ;;  %v11644_v38 = vpop.f32.mrb[26].mxu1 }
 0x5b6   : > { %v8188_v50 = vadd.f32 %v11644_v38, %v16793_v14  ;;  %v8179_v30 = vpop.f32.mrb[27].mxu1  ;;  %v8233_v48 = vmax.f32 %v8185_v5, 0.0 }
 0x5b7   : > { %v8180_v2 = vadd.f32 %v16793_v14, %v8179_v30  ;;  %v8231_v1 = vmax.f32 %v8177_v59, 0.0 }
 0x5b8   : > { %v8234_v18 = vmax.f32 %v8188_v50, 0.0 }
 0x5b9   : > { %v8232_v33 = vmax.f32 %v8180_v2, 0.0 }
 0x5ba   : > { %v8252_v42 = vpack.c.bf16 %v8234_v18, %v8233_v48 }
 0x5bb   : > { %v8251_v21 = vpack.c.bf16 %v8232_v33, %v8231_v1 }
 0x5bd   : > { %11681 = vmatprep.mubr.msk.bf16.mxu0 %vm7997_vm14, %v8251_v21 }
 0x5be   : > { %11682 = vmatmul.mubr.msk.bf16.gmra.mrb[56].mxu0 %vm7997_vm14, %v8252_v42 }
 0x5e6   : > { %v11659_v37 = vpop.f32.mrb[32].mxu0 }
 0x5e7   : > { %v8387_v10 = vadd.f32 %v11659_v37, %v16861_v58  ;;  %v8378_v23 = vpop.f32.mrb[33].mxu0 }
 0x5e8   : > { %v8379_v7 = vadd.f32 %v16861_v58, %v8378_v23  ;;  %v11660_v32 = vpop.f32.mrb[34].mxu0 }
 0x5e9   : > { %v8390_v15 = vadd.f32 %v11660_v32, %v16861_v58  ;;  %v8381_v46 = vpop.f32.mrb[35].mxu0  ;;  %v8507_v45 = vmax.f32 %v8387_v10, 0.0 }
 0x5ea   : > { %v8382_v20 = vadd.f32 %v16861_v58, %v8381_v46  ;;  %v8505_v13 = vmax.f32 %v8379_v7, 0.0 }
 0x5eb   : > { %v8508_v39 = vmax.f32 %v8390_v15, 0.0 }
 0x5ec   : > { %v8506_v53 = vmax.f32 %v8382_v20, 0.0 }
 0x5ed   : > { %v8544_v34 = vpack.c.bf16 %v8508_v39, %v8507_v45 }
 0x5ee   : > { %v8543_v41 = vpack.c.bf16 %v8506_v53, %v8505_v13  ;;  %v11663_v3 = vpop.f32.mrb[36].mxu0  ;;  %v12201_v13 = vld [vmem:[%s17507_s2 + $0x1c] sm:$0xff]   ;;  %v12202_v53 = vld [vmem:[%s17507_s2 + $0x24] ss:$0 sps:$4 sm:$0x11]  }
 0x5ef   : > { %v8403_v22 = vadd.f32 %v11663_v3, %v16861_v58  ;;  %v8394_v51 = vpop.f32.mrb[37].mxu0 }
 0x5f0   : > { %v8395_v16 = vadd.f32 %v16861_v58, %v8394_v51  ;;  %v11664_v36 = vpop.f32.mrb[38].mxu0  ;;  %11697 = vmatprep.mubr.msk.bf16.mxu1 %vm7997_vm14, %v8543_v41 }
 0x5f1   : > { %v8406_v57 = vadd.f32 %v11664_v36, %v16861_v58  ;;  %v8397_v25 = vpop.f32.mrb[39].mxu0  ;;  %11698 = vmatmul.mubr.msk.bf16.vlgmr.msra.gmra.mrb[32].mxu1 %vm7997_vm14, %v8544_v34  ;;  %v8511_v26 = vmax.f32 %v8403_v22, 0.0  ;;  %v17875_v34 = vld [vmem:[#allocation5_spill] sm:$0xff] }
 0x5f2   : > { %v8398_v27 = vadd.f32 %v16861_v58, %v8397_v25  ;;  %11730 = vmatpush3.bf16.msra.mxu1 %v12200_v43  ;;  %v8509_v4 = vmax.f32 %v8395_v16, 0.0  ;;  %v8817_v41 = vand.u32 %v12202_v53, %v17875_v34 }
 0x5f3   : > { %v8512_v44 = vmax.f32 %v8406_v57, 0.0  ;;  %11731 = vmatprep.subr.bf16.mxu1 %v12201_v13 }
 0x5f4   : > { %v8510_v60 = vmax.f32 %v8398_v27, 0.0 }
 0x5f5   : > { %v8546_v55 = vpack.c.bf16 %v8512_v44, %v8511_v26 }
 0x5f6   : > { %v8545_v52 = vpack.c.bf16 %v8510_v60, %v8509_v4  ;;  %v11667_v24 = vpop.f32.mrb[40].mxu0  ;;  %11732 = vmatpush3.bf16.msra.mxu1 %v12201_v13 }
 0x5f7   : > { %v8419_v63 = vadd.f32 %v11667_v24, %v16861_v58  ;;  %v8410_v29 = vpop.f32.mrb[41].mxu0  ;;  %11733 = vmatprep.subr.bf16.mxu1 %v8817_v41 }
 0x5f8   : > { %11701 = vmatprep.mubr.msk.bf16.mxu1 %vm7997_vm14, %v8545_v52  ;;  %v8411_v19 = vadd.f32 %v16861_v58, %v8410_v29  ;;  %v11668_v61 = vpop.f32.mrb[42].mxu0 }
 0x5f9   : > { %11702 = vmatmul.mubr.msk.bf16.gmra.mrb[36].mxu1 %vm7997_vm14, %v8546_v55  ;;  %v8422_v31 = vadd.f32 %v11668_v61, %v16861_v58  ;;  %v8413_v56 = vpop.f32.mrb[43].mxu0  ;;  %v8515_v17 = vmax.f32 %v8419_v63, 0.0 }
 0x5fa   : > { %v8414_v35 = vadd.f32 %v16861_v58, %v8413_v56  ;;  %v8513_v6 = vmax.f32 %v8411_v19, 0.0  ;;  %11734 = vmatpush3.bf16.msra.mxu1 %v8817_v41  ;;  %v17876_v41 = vld [vmem:[#allocation12_spill] sm:$0xff] }
 0x5fb   : > { %v8516_v8 = vmax.f32 %v8422_v31, 0.0 }
 0x5fc   : > { %v8514_v54 = vmax.f32 %v8414_v35, 0.0 }
 0x5fd   : > { %v8548_v47 = vpack.c.bf16 %v8516_v8, %v8515_v17 }
 0x5fe   : > { %v8547_v49 = vpack.c.bf16 %v8514_v54, %v8513_v6  ;;  %v11671_v9 = vpop.f32.mrb[44].mxu0 }
 0x5ff   : > { %v8435_v12 = vadd.f32 %v11671_v9, %v16861_v58  ;;  %v8426_v0 = vpop.f32.mrb[45].mxu0 }
 0x600   : > { %11705 = vmatprep.mubr.msk.bf16.mxu1 %vm7997_vm14, %v8547_v49  ;;  %v8427_v11 = vadd.f32 %v16861_v58, %v8426_v0  ;;  %v11672_v5 = vpop.f32.mrb[46].mxu0 }
 0x601   : > { %11706 = vmatmul.mubr.msk.bf16.gmra.mrb[40].mxu1 %vm7997_vm14, %v8548_v47  ;;  %v8438_v62 = vadd.f32 %v11672_v5, %v16861_v58  ;;  %v8429_v59 = vpop.f32.mrb[47].mxu0  ;;  %v8519_v43 = vmax.f32 %v8435_v12, 0.0 }
 0x602   : > { %v8430_v38 = vadd.f32 %v16861_v58, %v8429_v59  ;;  %v8517_v30 = vmax.f32 %v8427_v11, 0.0 }
 0x603   : > { %v8520_v50 = vmax.f32 %v8438_v62, 0.0 }
 0x604   : > { %v8518_v2 = vmax.f32 %v8430_v38, 0.0 }
 0x605   : > { %v8550_v48 = vpack.c.bf16 %v8520_v50, %v8519_v43 }
 0x606   : > { %v8549_v18 = vpack.c.bf16 %v8518_v2, %v8517_v30  ;;  %v11675_v1 = vpop.f32.mrb[48].mxu0 }
 0x607   : > { %v8451_v33 = vadd.f32 %v11675_v1, %v16861_v58  ;;  %v8442_v42 = vpop.f32.mrb[49].mxu0  ;;  %v12204_v1 = vld [vmem:[%s17508_s3 + $0x68] sm:$0xff]  }
 0x608   : > { %11709 = vmatprep.mubr.msk.bf16.mxu1 %vm7997_vm14, %v8549_v18  ;;  %v8443_v21 = vadd.f32 %v16861_v58, %v8442_v42  ;;  %v11676_v37 = vpop.f32.mrb[50].mxu0  ;;  %v12203_v18 = vld [vmem:[%s17508_s3 + $0x60] sm:$0xff]   ;;  %v12206_v42 = vld [vmem:[%s17508_s3 + $0x78] sm:$0xff]  }
 0x609   : > { %11710 = vmatmul.mubr.msk.bf16.gmra.mrb[44].mxu1 %vm7997_vm14, %v8550_v48  ;;  %v8454_v10 = vadd.f32 %v11676_v37, %v16861_v58  ;;  %v8445_v23 = vpop.f32.mrb[51].mxu0  ;;  %v8523_v32 = vmax.f32 %v8451_v33, 0.0  ;;  %11767 = vmatprep.subr.bf16.mxu0 %v12203_v18  ;;  %v12205_v33 = vld [vmem:[%s17508_s3 + $0x70] sm:$0xff]  }
 0x60a   : > { %v8446_v7 = vadd.f32 %v16861_v58, %v8445_v23  ;;  %v8521_v46 = vmax.f32 %v8443_v21, 0.0  ;;  %11768 = vmatpush3.bf16.msra.mxu0 %v12203_v18 }
 0x60b   : > { %v8524_v15 = vmax.f32 %v8454_v10, 0.0  ;;  %11769 = vmatprep.subr.bf16.mxu0 %v12204_v1 }
 0x60c   : > { %v8522_v20 = vmax.f32 %v8446_v7, 0.0 }
 0x60d   : > { %v8552_v45 = vpack.c.bf16 %v8524_v15, %v8523_v32 }
 0x60e   : > { %v8551_v39 = vpack.c.bf16 %v8522_v20, %v8521_v46  ;;  %11770 = vmatpush3.bf16.msra.mxu0 %v12204_v1 }
 0x60f   : > { %11771 = vmatprep.subr.bf16.mxu0 %v12205_v33 }
 0x610   : > { %11713 = vmatprep.mubr.msk.bf16.mxu1 %vm7997_vm14, %v8551_v39 }
 0x611   : > { %11714 = vmatmul.mubr.msk.bf16.gmra.mrb[48].mxu1 %vm7997_vm14, %v8552_v45 }
 0x612   : > { %11772 = vmatpush3.bf16.msra.mxu0 %v12205_v33 }
 0x613   : > { %11773 = vmatprep.subr.bf16.mxu0 %v12206_v42 }
 0x616   : > { %11774 = vmatpush3.bf16.msra.mxu0 %v12206_v42  ;;  %v12210_v42 = vld [vmem:[%s17508_s3 + $0x98] sm:$0xff]  }
 0x61c   : > { %v11647_v3 = vpop.f32.mrb[28].mxu1 }
 0x61d   : > { %v8201_v22 = vadd.f32 %v11647_v3, %v16793_v14  ;;  %v8192_v51 = vpop.f32.mrb[29].mxu1  ;;  %v17877_v3 = vld [vmem:[#allocation6_spill] sm:$0xff] }
 0x61e   : > { %v8193_v16 = vadd.f32 %v16793_v14, %v8192_v51  ;;  %v11648_v36 = vpop.f32.mrb[30].mxu1  ;;  %v17880_v51 = vld [vmem:[#allocation4_spill] sm:$0xff] }
 0x61f   : > { %v8204_v25 = vadd.f32 %v11648_v36, %v16793_v14  ;;  %v8195_v27 = vpop.f32.mrb[31].mxu1  ;;  %v8237_v52 = vmax.f32 %v8201_v22, 0.0  ;;  %v17878_v22 = vld [vmem:[#allocation24_spill] sm:$0xff] }
 0x620   : > { %v11679_v57 = vpop.f32.mrb[52].mxu0  ;;  %v8196_v4 = vadd.f32 %v16793_v14, %v8195_v27  ;;  %v8235_v19 = vmax.f32 %v8193_v16, 0.0  ;;  %v17881_v16 = vld [vmem:[#allocation8_spill] sm:$0xff]  ;;  %v17885_v27 = vld [vmem:[#allocation19_spill] sm:$0xff] }
 0x621   : > { %v8467_v26 = vadd.f32 %v11679_v57, %v16861_v58  ;;  %v8458_v44 = vpop.f32.mrb[53].mxu0  ;;  %v8238_v24 = vmax.f32 %v8204_v25, 0.0  ;;  %v17882_v36 = vld [vmem:[#allocation20_spill] sm:$0xff]  ;;  %v17883_v57 = vld [vmem:[#allocation15_spill] sm:$0xff]  ;;  %v17884_v25 = vld [vmem:[#allocation13_spill] sm:$0xff] }
 0x622   : > { %v8459_v60 = vadd.f32 %v16861_v58, %v8458_v44  ;;  %v11680_v55 = vpop.f32.mrb[54].mxu0  ;;  %v8236_v61 = vmax.f32 %v8196_v4, 0.0  ;;  %v17887_v44 = vld [vmem:[#allocation18_spill] sm:$0xff] }
 0x623   : > { %v8470_v63 = vadd.f32 %v11680_v55, %v16861_v58  ;;  %v8461_v29 = vpop.f32.mrb[55].mxu0  ;;  %v8254_v56 = vpack.c.bf16 %v8238_v24, %v8237_v52  ;;  %v8527_v35 = vmax.f32 %v8467_v26, 0.0  ;;  %v17886_v26 = vld [vmem:[#allocation25_spill] sm:$0xff]  ;;  %v17888_v4 = vld [vmem:[#allocation14_spill] sm:$0xff] }
 0x624   : > { %v8462_v31 = vadd.f32 %v16861_v58, %v8461_v29  ;;  %v8253_v8 = vpack.c.bf16 %v8236_v61, %v8235_v19  ;;  %v8525_v6 = vmax.f32 %v8459_v60, 0.0  ;;  %v17889_v60 = vld [vmem:[#allocation7_spill] sm:$0xff]  ;;  %v12207_v55 = vld [vmem:[%s17508_s3 + $0x80] sm:$0xff]  }
 0x625   : > { %v8528_v17 = vmax.f32 %v8470_v63, 0.0  ;;  %11807 = vmatprep.subr.bf16.mxu0 %v12207_v55  ;;  %v16974_v52 = vld [vmem:[%s17509_s4 + $0x3] ss:$0 sm:$0xff] }
 0x626   : > { %v8526_v54 = vmax.f32 %v8462_v31, 0.0  ;;  %11685 = vmatprep.mubr.msk.bf16.mxu0 %vm7997_vm14, %v8253_v8 }
 0x627   : > { %v8554_v47 = vpack.c.bf16 %v8528_v17, %v8527_v35  ;;  %11686 = vmatmul.mubr.msk.bf16.gmra.mrb[60].mxu0 %vm7997_vm14, %v8254_v56 }
 0x628   : > { %v8553_v14 = vpack.c.bf16 %v8526_v54, %v8525_v6 }
 0x62a   : > { %11717 = vmatprep.mubr.msk.bf16.mxu1 %vm7997_vm14, %v8553_v14 }
 0x62b   : > { %11718 = vmatmul.mubr.msk.bf16.gmra.mrb[52].mxu1 %vm7997_vm14, %v8554_v47 }
 0x691   : > { %v11683_v49 = vpop.f32.mrb[56].mxu0 }
 0x692   : > { %v8483_v9 = vadd.f32 %v11683_v49, %v16861_v58  ;;  %v8474_v12 = vpop.f32.mrb[57].mxu0 }
 0x693   : > { %v8475_v0 = vadd.f32 %v16861_v58, %v8474_v12  ;;  %v11684_v11 = vpop.f32.mrb[58].mxu0 }
 0x694   : > { %v8486_v5 = vadd.f32 %v11684_v11, %v16861_v58  ;;  %v8477_v62 = vpop.f32.mrb[59].mxu0  ;;  %v8531_v38 = vmax.f32 %v8483_v9, 0.0  ;;  %v12208_v9 = vld [vmem:[%s17508_s3 + $0x88] sm:$0xff]  }
 0x695   : > { %v8478_v59 = vadd.f32 %v16861_v58, %v8477_v62  ;;  %v8529_v50 = vmax.f32 %v8475_v0, 0.0 }
 0x696   : > { %v8532_v43 = vmax.f32 %v8486_v5, 0.0 }
 0x697   : > { %v8530_v30 = vmax.f32 %v8478_v59, 0.0 }
 0x698   : > { %v8556_v2 = vpack.c.bf16 %v8532_v43, %v8531_v38  ;;  %v12209_v43 = vld [vmem:[%s17508_s3 + $0x90] sm:$0xff]  }
 0x699   : > { %v8555_v48 = vpack.c.bf16 %v8530_v30, %v8529_v50 }
 0x69b   : > { %11721 = vmatprep.mubr.msk.bf16.mxu1 %vm7997_vm14, %v8555_v48 }
 0x69c   : > { %11722 = vmatmul.mubr.msk.bf16.gmra.mrb[56].mxu1 %vm7997_vm14, %v8556_v2 }
 0x6fa   : > { %v11687_v21 = vpop.f32.mrb[60].mxu0 }
 0x6fb   : > { %v8499_v37 = vadd.f32 %v11687_v21, %v16861_v58  ;;  %v8490_v10 = vpop.f32.mrb[61].mxu0 }
 0x6fc   : > { %v8491_v23 = vadd.f32 %v16861_v58, %v8490_v10  ;;  %v11688_v7 = vpop.f32.mrb[62].mxu0 }
 0x6fd   : > { %v8502_v32 = vadd.f32 %v11688_v7, %v16861_v58  ;;  %v8493_v15 = vpop.f32.mrb[63].mxu0  ;;  %v8535_v20 = vmax.f32 %v8499_v37, 0.0 }
 0x6fe   : > { %v8494_v46 = vadd.f32 %v16861_v58, %v8493_v15  ;;  %v8533_v39 = vmax.f32 %v8491_v23, 0.0  ;;  %v17879_v58 = vld [vmem:[#allocation31_spill] sm:$0xff] }
 0x6ff   : > { %v8536_v45 = vmax.f32 %v8502_v32, 0.0 }
 0x700   : > { %v8534_v13 = vmax.f32 %v8494_v46, 0.0 }
 0x701   : > { %v8558_v53 = vpack.c.bf16 %v8536_v45, %v8535_v20 }
 0x702   : > { %v8557_v34 = vpack.c.bf16 %v8534_v13, %v8533_v39 }
 0x704   : > { %11725 = vmatprep.mubr.msk.bf16.mxu1 %vm7997_vm14, %v8557_v34 }
 0x705   : > { %11726 = vmatmul.mubr.msk.bf16.gmra.mrb[60].mxu1 %vm7997_vm14, %v8558_v53 }
 0x706   : > { %11735 = vmatprep.mubr.msk.bf16.mxu1 %vm7693_vm3, %v17876_v41 }
 0x70d   : > { %11736 = vmatmul.mubr.msk.bf16.vlgmr.msra.gmra.mrb[32].mxu1 %vm7693_vm3, %v17877_v3 }
 0x70e   : > { %11739 = vmatprep.mubr.msk.bf16.mxu1 %vm7693_vm3, %v17878_v22 }
 0x715   : > { %11740 = vmatmul.mubr.msk.bf16.gmra.mrb[36].mxu1 %vm7693_vm3, %v17879_v58 }
 0x716   : > { %11743 = vmatprep.mubr.msk.bf16.mxu1 %vm7693_vm3, %v17880_v51 }
 0x71d   : > { %11744 = vmatmul.mubr.msk.bf16.gmra.mrb[40].mxu1 %vm7693_vm3, %v17881_v16 }
 0x71e   : > { %11747 = vmatprep.mubr.msk.bf16.mxu1 %vm7693_vm3, %v17882_v36 }
 0x725   : > { %11748 = vmatmul.mubr.msk.bf16.gmra.mrb[44].mxu1 %vm7693_vm3, %v17883_v57 }
 0x726   : > { %11751 = vmatprep.mubr.msk.bf16.mxu1 %vm7693_vm3, %v17884_v25 }
 0x72d   : > { %11752 = vmatmul.mubr.msk.bf16.gmra.mrb[48].mxu1 %vm7693_vm3, %v17885_v27 }
 0x72e   : > { %11755 = vmatprep.mubr.msk.bf16.mxu1 %vm7693_vm3, %v17886_v26 }
 0x735   : > { %11756 = vmatmul.mubr.msk.bf16.gmra.mrb[52].mxu1 %vm7693_vm3, %v17887_v44 }
 0x736   : > { %11759 = vmatprep.mubr.msk.bf16.mxu1 %vm7693_vm3, %v17888_v4 }
 0x73d   : > { %11760 = vmatmul.mubr.msk.bf16.gmra.mrb[56].mxu1 %vm7693_vm3, %v17889_v60 }
 0x73e   : > { %11763 = vmatprep.mubr.msk.bf16.mxu1 %vm7693_vm3, %v16730_v40 }
 0x745   : > { %11764 = vmatmul.mubr.msk.bf16.gmra.mrb[60].mxu1 %vm7693_vm3, %v16766_v28 }
 0x7e0   : > { %v11737_v24 = vpop.f32.mrb[32].mxu1 }
 0x7e1   : > { %v8990_v63 = vadd.f32 %v11737_v24, %v16974_v52  ;;  %v8853_v29 = vpop.f32.mrb[33].mxu1 }
 0x7e2   : > { %v8988_v19 = vadd.f32 %v16974_v52, %v8853_v29  ;;  %v11738_v40 = vpop.f32.mrb[34].mxu1 }
 0x7e3   : > { %v8991_v61 = vadd.f32 %v11738_v40, %v16974_v52  ;;  %v8856_v28 = vpop.f32.mrb[35].mxu1  ;;  %v9022_v56 = vmax.f32 %v8990_v63, 0.0 }
 0x7e4   : > { %v8989_v31 = vadd.f32 %v16974_v52, %v8856_v28  ;;  %v9020_v17 = vmax.f32 %v8988_v19, 0.0 }
 0x7e5   : > { %v9023_v35 = vmax.f32 %v8991_v61, 0.0 }
 0x7e6   : > { %v9021_v8 = vmax.f32 %v8989_v31, 0.0 }
 0x7e7   : > { %v9053_v6 = vpack.c.bf16 %v9023_v35, %v9022_v56 }
 0x7e8   : > { %v9052_v54 = vpack.c.bf16 %v9021_v8, %v9020_v17  ;;  %v11741_v47 = vpop.f32.mrb[36].mxu1 }
 0x7e9   : > { %v8994_v14 = vadd.f32 %v11741_v47, %v16974_v52  ;;  %v8869_v49 = vpop.f32.mrb[37].mxu1 }
 0x7ea   : > { %v8992_v12 = vadd.f32 %v16974_v52, %v8869_v49  ;;  %v11742_v0 = vpop.f32.mrb[38].mxu1  ;;  %11775 = vmatprep.mubr.msk.bf16.mxu0 %vm7997_vm14, %v9052_v54 }
 0x7eb   : > { %v8995_v11 = vadd.f32 %v11742_v0, %v16974_v52  ;;  %v8872_v5 = vpop.f32.mrb[39].mxu1  ;;  %11776 = vmatmul.mubr.msk.bf16.vlgmr.msra.gmra.mrb[64].mxu0 %vm7997_vm14, %v9053_v6  ;;  %v9026_v59 = vmax.f32 %v8994_v14, 0.0 }
 0x7ec   : > { %v8993_v62 = vadd.f32 %v16974_v52, %v8872_v5  ;;  %11808 = vmatpush3.bf16.msra.mxu0 %v12207_v55  ;;  %v9024_v50 = vmax.f32 %v8992_v12, 0.0 }
 0x7ed   : > { %v9027_v38 = vmax.f32 %v8995_v11, 0.0  ;;  %11809 = vmatprep.subr.bf16.mxu0 %v12208_v9 }
 0x7ee   : > { %v9025_v30 = vmax.f32 %v8993_v62, 0.0 }
 0x7ef   : > { %v9055_v2 = vpack.c.bf16 %v9027_v38, %v9026_v59 }
 0x7f0   : > { %v9054_v48 = vpack.c.bf16 %v9025_v30, %v9024_v50  ;;  %v11745_v18 = vpop.f32.mrb[40].mxu1  ;;  %11810 = vmatpush3.bf16.msra.mxu0 %v12208_v9 }
 0x7f1   : > { %v8998_v1 = vadd.f32 %v11745_v18, %v16974_v52  ;;  %v8885_v33 = vpop.f32.mrb[41].mxu1  ;;  %11811 = vmatprep.subr.bf16.mxu0 %v12209_v43 }
 0x7f2   : > { %v8996_v21 = vadd.f32 %v16974_v52, %v8885_v33  ;;  %v11746_v37 = vpop.f32.mrb[42].mxu1  ;;  %11779 = vmatprep.mubr.msk.bf16.mxu0 %vm7997_vm14, %v9054_v48 }
 0x7f3   : > { %v8999_v10 = vadd.f32 %v11746_v37, %v16974_v52  ;;  %v8888_v23 = vpop.f32.mrb[43].mxu1  ;;  %11780 = vmatmul.mubr.msk.bf16.gmra.mrb[68].mxu0 %vm7997_vm14, %v9055_v2  ;;  %v9030_v32 = vmax.f32 %v8998_v1, 0.0 }
 0x7f4   : > { %v8997_v7 = vadd.f32 %v16974_v52, %v8888_v23  ;;  %11812 = vmatpush3.bf16.msra.mxu0 %v12209_v43  ;;  %v9028_v46 = vmax.f32 %v8996_v21, 0.0 }
 0x7f5   : > { %v9031_v15 = vmax.f32 %v8999_v10, 0.0  ;;  %11813 = vmatprep.subr.bf16.mxu0 %v12210_v42 }
 0x7f6   : > { %v9029_v20 = vmax.f32 %v8997_v7, 0.0 }
 0x7f7   : > { %v9057_v45 = vpack.c.bf16 %v9031_v15, %v9030_v32 }
 0x7f8   : > { %v9056_v39 = vpack.c.bf16 %v9029_v20, %v9028_v46  ;;  %v11749_v13 = vpop.f32.mrb[44].mxu1  ;;  %11814 = vmatpush3.bf16.msra.mxu0 %v12210_v42 }
 0x7f9   : > { %v9002_v53 = vadd.f32 %v11749_v13, %v16974_v52  ;;  %v8901_v34 = vpop.f32.mrb[45].mxu1 }
 0x7fa   : > { %v9000_v41 = vadd.f32 %v16974_v52, %v8901_v34  ;;  %v11750_v3 = vpop.f32.mrb[46].mxu1  ;;  %11783 = vmatprep.mubr.msk.bf16.mxu0 %vm7997_vm14, %v9056_v39 }
 0x7fb   : > { %v9003_v22 = vadd.f32 %v11750_v3, %v16974_v52  ;;  %v8904_v58 = vpop.f32.mrb[47].mxu1  ;;  %11784 = vmatmul.mubr.msk.bf16.gmra.mrb[72].mxu0 %vm7997_vm14, %v9057_v45  ;;  %v9034_v16 = vmax.f32 %v9002_v53, 0.0 }
 0x7fc   : > { %v9001_v51 = vadd.f32 %v16974_v52, %v8904_v58  ;;  %v9032_v57 = vmax.f32 %v9000_v41, 0.0 }
 0x7fd   : > { %v9035_v36 = vmax.f32 %v9003_v22, 0.0 }
 0x7fe   : > { %v9033_v25 = vmax.f32 %v9001_v51, 0.0  ;;  %v12211_v51 = vld [vmem:[%s17510_s5] sm:$0xff]  }
 0x7ff   : > { %v9059_v27 = vpack.c.bf16 %v9035_v36, %v9034_v16  ;;  %v12212_v16 = vld [vmem:[%s17510_s5 + $0x8] sm:$0xff]   ;;  %11847 = vmatprep.subr.bf16.mxu1 %v12211_v51  ;;  %v12214_v36 = vld [vmem:[%s17510_s5 + $0x18] sm:$0xff]  }
 0x800   : > { %v9058_v26 = vpack.c.bf16 %v9033_v25, %v9032_v57  ;;  %v11753_v44 = vpop.f32.mrb[48].mxu1  ;;  %11848 = vmatpush3.bf16.msra.mxu1 %v12211_v51  ;;  %v17048_v57 = vld [vmem:[%s17509_s4 + $0x4] ss:$0 sm:$0xff] }
 0x801   : > { %v9006_v4 = vadd.f32 %v11753_v44, %v16974_v52  ;;  %v8917_v60 = vpop.f32.mrb[49].mxu1  ;;  %11849 = vmatprep.subr.bf16.mxu1 %v12212_v16 }
 0x802   : > { %v9004_v55 = vadd.f32 %v16974_v52, %v8917_v60  ;;  %v11754_v24 = vpop.f32.mrb[50].mxu1  ;;  %11787 = vmatprep.mubr.msk.bf16.mxu0 %vm7997_vm14, %v9058_v26 }
 0x803   : > { %v9007_v63 = vadd.f32 %v11754_v24, %v16974_v52  ;;  %v8920_v29 = vpop.f32.mrb[51].mxu1  ;;  %11788 = vmatmul.mubr.msk.bf16.gmra.mrb[76].mxu0 %vm7997_vm14, %v9059_v27  ;;  %v9038_v40 = vmax.f32 %v9006_v4, 0.0 }
 0x804   : > { %v9005_v19 = vadd.f32 %v16974_v52, %v8920_v29  ;;  %v9036_v28 = vmax.f32 %v9004_v55, 0.0  ;;  %11850 = vmatpush3.bf16.msra.mxu1 %v12212_v16 }
 0x805   : > { %v9039_v61 = vmax.f32 %v9007_v63, 0.0 }
 0x806   : > { %v9037_v31 = vmax.f32 %v9005_v19, 0.0 }
 0x807   : > { %v9061_v56 = vpack.c.bf16 %v9039_v61, %v9038_v40 }
 0x808   : > { %v9060_v35 = vpack.c.bf16 %v9037_v31, %v9036_v28  ;;  %v11757_v17 = vpop.f32.mrb[52].mxu1 }
 0x809   : > { %v9010_v8 = vadd.f32 %v11757_v17, %v16974_v52  ;;  %v8933_v6 = vpop.f32.mrb[53].mxu1 }
 0x80a   : > { %v9008_v54 = vadd.f32 %v16974_v52, %v8933_v6  ;;  %v11758_v47 = vpop.f32.mrb[54].mxu1  ;;  %11791 = vmatprep.mubr.msk.bf16.mxu0 %vm7997_vm14, %v9060_v35 }
 0x80b   : > { %v9011_v14 = vadd.f32 %v11758_v47, %v16974_v52  ;;  %v8936_v49 = vpop.f32.mrb[55].mxu1  ;;  %11792 = vmatmul.mubr.msk.bf16.gmra.mrb[80].mxu0 %vm7997_vm14, %v9061_v56  ;;  %v9042_v12 = vmax.f32 %v9010_v8, 0.0 }
 0x80c   : > { %v9009_v9 = vadd.f32 %v16974_v52, %v8936_v49  ;;  %v9040_v11 = vmax.f32 %v9008_v54, 0.0 }
 0x80d   : > { %v9043_v0 = vmax.f32 %v9011_v14, 0.0 }
 0x80e   : > { %v9041_v5 = vmax.f32 %v9009_v9, 0.0 }
 0x80f   : > { %v9063_v62 = vpack.c.bf16 %v9043_v0, %v9042_v12 }
 0x810   : > { %v9062_v59 = vpack.c.bf16 %v9041_v5, %v9040_v11  ;;  %v11761_v38 = vpop.f32.mrb[56].mxu1 }
 0x811   : > { %v9014_v43 = vadd.f32 %v11761_v38, %v16974_v52  ;;  %v8949_v50 = vpop.f32.mrb[57].mxu1 }
 0x812   : > { %v9012_v30 = vadd.f32 %v16974_v52, %v8949_v50  ;;  %v11762_v2 = vpop.f32.mrb[58].mxu1  ;;  %11795 = vmatprep.mubr.msk.bf16.mxu0 %vm7997_vm14, %v9062_v59 }
 0x813   : > { %v9015_v48 = vadd.f32 %v11762_v2, %v16974_v52  ;;  %v8952_v18 = vpop.f32.mrb[59].mxu1  ;;  %11796 = vmatmul.mubr.msk.bf16.gmra.mrb[84].mxu0 %vm7997_vm14, %v9063_v62  ;;  %v9046_v33 = vmax.f32 %v9014_v43, 0.0 }
 0x814   : > { %v9013_v1 = vadd.f32 %v16974_v52, %v8952_v18  ;;  %v9044_v21 = vmax.f32 %v9012_v30, 0.0 }
 0x815   : > { %v9047_v42 = vmax.f32 %v9015_v48, 0.0 }
 0x816   : > { %v9045_v37 = vmax.f32 %v9013_v1, 0.0 }
 0x817   : > { %v9065_v10 = vpack.c.bf16 %v9047_v42, %v9046_v33 }
 0x818   : > { %v9064_v23 = vpack.c.bf16 %v9045_v37, %v9044_v21  ;;  %v11765_v7 = vpop.f32.mrb[60].mxu1 }
 0x819   : > { %v9018_v32 = vadd.f32 %v11765_v7, %v16974_v52  ;;  %v8965_v15 = vpop.f32.mrb[61].mxu1 }
 0x81a   : > { %v9016_v46 = vadd.f32 %v16974_v52, %v8965_v15  ;;  %v11766_v20 = vpop.f32.mrb[62].mxu1  ;;  %11799 = vmatprep.mubr.msk.bf16.mxu0 %vm7997_vm14, %v9064_v23 }
 0x81b   : > { %v9019_v45 = vadd.f32 %v11766_v20, %v16974_v52  ;;  %v8968_v39 = vpop.f32.mrb[63].mxu1  ;;  %11800 = vmatmul.mubr.msk.bf16.gmra.mrb[88].mxu0 %vm7997_vm14, %v9065_v10  ;;  %v9050_v53 = vmax.f32 %v9018_v32, 0.0 }
 0x81c   : > { %v9017_v13 = vadd.f32 %v16974_v52, %v8968_v39  ;;  %v9048_v41 = vmax.f32 %v9016_v46, 0.0  ;;  %v12213_v52 = vld [vmem:[%s17510_s5 + $0x10] sm:$0xff]  }
 0x81d   : > { %v9051_v34 = vmax.f32 %v9019_v45, 0.0  ;;  %11851 = vmatprep.subr.bf16.mxu1 %v12213_v52 }
 0x81e   : > { %v9049_v3 = vmax.f32 %v9017_v13, 0.0  ;;  %11852 = vmatpush3.bf16.msra.mxu1 %v12213_v52 }
 0x81f   : > { %v9067_v22 = vpack.c.bf16 %v9051_v34, %v9050_v53  ;;  %11853 = vmatprep.subr.bf16.mxu1 %v12214_v36 }
 0x820   : > { %v9066_v58 = vpack.c.bf16 %v9049_v3, %v9048_v41 }
 0x822   : > { %11803 = vmatprep.mubr.msk.bf16.mxu0 %vm7997_vm14, %v9066_v58  ;;  %11854 = vmatpush3.bf16.msra.mxu1 %v12214_v36 }
 0x823   : > { %11804 = vmatmul.mubr.msk.bf16.gmra.mrb[92].mxu0 %vm7997_vm14, %v9067_v22 }
 0x8be   : > { %v11777_v25 = vpop.f32.mrb[64].mxu0 }
 0x8bf   : > { %v9200_v27 = vadd.f32 %v11777_v25, %v17048_v57  ;;  %v9191_v26 = vpop.f32.mrb[65].mxu0 }
 0x8c0   : > { %v9192_v44 = vadd.f32 %v17048_v57, %v9191_v26  ;;  %v11778_v4 = vpop.f32.mrb[66].mxu0 }
 0x8c1   : > { %v9203_v60 = vadd.f32 %v11778_v4, %v17048_v57  ;;  %v9194_v55 = vpop.f32.mrb[67].mxu0  ;;  %v9320_v63 = vmax.f32 %v9200_v27, 0.0 }
 0x8c2   : > { %v9195_v24 = vadd.f32 %v17048_v57, %v9194_v55  ;;  %v9318_v19 = vmax.f32 %v9192_v44, 0.0 }
 0x8c3   : > { %v9321_v29 = vmax.f32 %v9203_v60, 0.0 }
 0x8c4   : > { %v9319_v40 = vmax.f32 %v9195_v24, 0.0 }
 0x8c5   : > { %v9351_v61 = vpack.c.bf16 %v9321_v29, %v9320_v63 }
 0x8c6   : > { %v9350_v28 = vpack.c.bf16 %v9319_v40, %v9318_v19  ;;  %v11781_v31 = vpop.f32.mrb[68].mxu0 }
 0x8c7   : > { %v9216_v56 = vadd.f32 %v11781_v31, %v17048_v57  ;;  %v9207_v35 = vpop.f32.mrb[69].mxu0 }
 0x8c8   : > { %v9208_v17 = vadd.f32 %v17048_v57, %v9207_v35  ;;  %v11782_v8 = vpop.f32.mrb[70].mxu0  ;;  %11815 = vmatprep.mubr.msk.bf16.mxu0 %vm7997_vm14, %v9350_v28 }
 0x8c9   : > { %v9219_v6 = vadd.f32 %v11782_v8, %v17048_v57  ;;  %v9210_v54 = vpop.f32.mrb[71].mxu0  ;;  %11816 = vmatmul.mubr.msk.bf16.vlgmr.msra.gmra.mrb[96].mxu0 %vm7997_vm14, %v9351_v61  ;;  %v9324_v14 = vmax.f32 %v9216_v56, 0.0 }
 0x8ca   : > { %v9211_v47 = vadd.f32 %v17048_v57, %v9210_v54  ;;  %v9322_v9 = vmax.f32 %v9208_v17, 0.0 }
 0x8cb   : > { %v9325_v49 = vmax.f32 %v9219_v6, 0.0 }
 0x8cc   : > { %v9323_v12 = vmax.f32 %v9211_v47, 0.0 }
 0x8cd   : > { %v9353_v0 = vpack.c.bf16 %v9325_v49, %v9324_v14 }
 0x8ce   : > { %v9352_v11 = vpack.c.bf16 %v9323_v12, %v9322_v9  ;;  %v11785_v5 = vpop.f32.mrb[72].mxu0 }
 0x8cf   : > { %v9232_v62 = vadd.f32 %v11785_v5, %v17048_v57  ;;  %v9223_v59 = vpop.f32.mrb[73].mxu0 }
 0x8d0   : > { %v9224_v38 = vadd.f32 %v17048_v57, %v9223_v59  ;;  %v11786_v43 = vpop.f32.mrb[74].mxu0  ;;  %11819 = vmatprep.mubr.msk.bf16.mxu0 %vm7997_vm14, %v9352_v11 }
 0x8d1   : > { %v9235_v50 = vadd.f32 %v11786_v43, %v17048_v57  ;;  %v9226_v30 = vpop.f32.mrb[75].mxu0  ;;  %11820 = vmatmul.mubr.msk.bf16.gmra.mrb[100].mxu0 %vm7997_vm14, %v9353_v0  ;;  %v9328_v48 = vmax.f32 %v9232_v62, 0.0 }
 0x8d2   : > { %v9227_v2 = vadd.f32 %v17048_v57, %v9226_v30  ;;  %v9326_v1 = vmax.f32 %v9224_v38, 0.0 }
 0x8d3   : > { %v9329_v18 = vmax.f32 %v9235_v50, 0.0 }
 0x8d4   : > { %v9327_v33 = vmax.f32 %v9227_v2, 0.0 }
 0x8d5   : > { %v9355_v42 = vpack.c.bf16 %v9329_v18, %v9328_v48 }
 0x8d6   : > { %v9354_v21 = vpack.c.bf16 %v9327_v33, %v9326_v1  ;;  %v11789_v37 = vpop.f32.mrb[76].mxu0 }
 0x8d7   : > { %v9248_v10 = vadd.f32 %v11789_v37, %v17048_v57  ;;  %v9239_v23 = vpop.f32.mrb[77].mxu0 }
 0x8d8   : > { %v9240_v7 = vadd.f32 %v17048_v57, %v9239_v23  ;;  %v11790_v32 = vpop.f32.mrb[78].mxu0  ;;  %11823 = vmatprep.mubr.msk.bf16.mxu0 %vm7997_vm14, %v9354_v21 }
 0x8d9   : > { %v9251_v15 = vadd.f32 %v11790_v32, %v17048_v57  ;;  %v9242_v46 = vpop.f32.mrb[79].mxu0  ;;  %11824 = vmatmul.mubr.msk.bf16.gmra.mrb[104].mxu0 %vm7997_vm14, %v9355_v42  ;;  %v9332_v45 = vmax.f32 %v9248_v10, 0.0 }
 0x8da   : > { %v9243_v20 = vadd.f32 %v17048_v57, %v9242_v46  ;;  %v9330_v13 = vmax.f32 %v9240_v7, 0.0 }
 0x8db   : > { %v9333_v39 = vmax.f32 %v9251_v15, 0.0 }
 0x8dc   : > { %v9331_v53 = vmax.f32 %v9243_v20, 0.0  ;;  %v12215_v20 = vld [vmem:[%s17512_s7] sm:$0xff]  }
 0x8dd   : > { %v9357_v34 = vpack.c.bf16 %v9333_v39, %v9332_v45  ;;  %v12216_v45 = vld [vmem:[%s17512_s7 + $0x8] sm:$0xff]   ;;  %11887 = vmatprep.subr.bf16.mxu0 %v12215_v20  ;;  %v12218_v39 = vld [vmem:[%s17512_s7 + $0x18] sm:$0xff]  }
 0x8de   : > { %v9356_v41 = vpack.c.bf16 %v9331_v53, %v9330_v13  ;;  %v11793_v3 = vpop.f32.mrb[80].mxu0  ;;  %11888 = vmatpush3.bf16.msra.mxu0 %v12215_v20  ;;  %v17113_v13 = vld [vmem:[%s17509_s4 + $0x5] ss:$0 sm:$0xff] }
 0x8df   : > { %v9264_v22 = vadd.f32 %v11793_v3, %v17048_v57  ;;  %v9255_v58 = vpop.f32.mrb[81].mxu0  ;;  %11889 = vmatprep.subr.bf16.mxu0 %v12216_v45 }
 0x8e0   : > { %v9256_v51 = vadd.f32 %v17048_v57, %v9255_v58  ;;  %v11794_v16 = vpop.f32.mrb[82].mxu0  ;;  %11827 = vmatprep.mubr.msk.bf16.mxu0 %vm7997_vm14, %v9356_v41 }
 0x8e1   : > { %v9267_v52 = vadd.f32 %v11794_v16, %v17048_v57  ;;  %v9258_v36 = vpop.f32.mrb[83].mxu0  ;;  %11828 = vmatmul.mubr.msk.bf16.gmra.mrb[108].mxu0 %vm7997_vm14, %v9357_v34  ;;  %v9336_v27 = vmax.f32 %v9264_v22, 0.0 }
 0x8e2   : > { %v9259_v25 = vadd.f32 %v17048_v57, %v9258_v36  ;;  %v9334_v44 = vmax.f32 %v9256_v51, 0.0  ;;  %11890 = vmatpush3.bf16.msra.mxu0 %v12216_v45 }
 0x8e3   : > { %v9337_v26 = vmax.f32 %v9267_v52, 0.0 }
 0x8e4   : > { %v9335_v4 = vmax.f32 %v9259_v25, 0.0 }
 0x8e5   : > { %v9359_v60 = vpack.c.bf16 %v9337_v26, %v9336_v27 }
 0x8e6   : > { %v9358_v55 = vpack.c.bf16 %v9335_v4, %v9334_v44  ;;  %v11797_v24 = vpop.f32.mrb[84].mxu0 }
 0x8e7   : > { %v9280_v63 = vadd.f32 %v11797_v24, %v17048_v57  ;;  %v9271_v29 = vpop.f32.mrb[85].mxu0 }
 0x8e8   : > { %v9272_v19 = vadd.f32 %v17048_v57, %v9271_v29  ;;  %v11798_v40 = vpop.f32.mrb[86].mxu0  ;;  %11831 = vmatprep.mubr.msk.bf16.mxu0 %vm7997_vm14, %v9358_v55 }
 0x8e9   : > { %v9283_v61 = vadd.f32 %v11798_v40, %v17048_v57  ;;  %v9274_v28 = vpop.f32.mrb[87].mxu0  ;;  %11832 = vmatmul.mubr.msk.bf16.gmra.mrb[112].mxu0 %vm7997_vm14, %v9359_v60  ;;  %v9340_v56 = vmax.f32 %v9280_v63, 0.0 }
 0x8ea   : > { %v9275_v31 = vadd.f32 %v17048_v57, %v9274_v28  ;;  %v9338_v17 = vmax.f32 %v9272_v19, 0.0 }
 0x8eb   : > { %v9341_v35 = vmax.f32 %v9283_v61, 0.0 }
 0x8ec   : > { %v9339_v8 = vmax.f32 %v9275_v31, 0.0 }
 0x8ed   : > { %v9361_v6 = vpack.c.bf16 %v9341_v35, %v9340_v56 }
 0x8ee   : > { %v9360_v54 = vpack.c.bf16 %v9339_v8, %v9338_v17  ;;  %v11801_v47 = vpop.f32.mrb[88].mxu0 }
 0x8ef   : > { %v9296_v14 = vadd.f32 %v11801_v47, %v17048_v57  ;;  %v9287_v49 = vpop.f32.mrb[89].mxu0 }
 0x8f0   : > { %v9288_v9 = vadd.f32 %v17048_v57, %v9287_v49  ;;  %v11802_v12 = vpop.f32.mrb[90].mxu0  ;;  %11835 = vmatprep.mubr.msk.bf16.mxu0 %vm7997_vm14, %v9360_v54 }
 0x8f1   : > { %v9299_v0 = vadd.f32 %v11802_v12, %v17048_v57  ;;  %v9290_v11 = vpop.f32.mrb[91].mxu0  ;;  %11836 = vmatmul.mubr.msk.bf16.gmra.mrb[116].mxu0 %vm7997_vm14, %v9361_v6  ;;  %v9344_v62 = vmax.f32 %v9296_v14, 0.0 }
 0x8f2   : > { %v9291_v5 = vadd.f32 %v17048_v57, %v9290_v11  ;;  %v9342_v38 = vmax.f32 %v9288_v9, 0.0 }
 0x8f3   : > { %v9345_v59 = vmax.f32 %v9299_v0, 0.0 }
 0x8f4   : > { %v9343_v43 = vmax.f32 %v9291_v5, 0.0 }
 0x8f5   : > { %v9363_v50 = vpack.c.bf16 %v9345_v59, %v9344_v62 }
 0x8f6   : > { %v9362_v30 = vpack.c.bf16 %v9343_v43, %v9342_v38  ;;  %v11805_v2 = vpop.f32.mrb[92].mxu0 }
 0x8f7   : > { %v9312_v48 = vadd.f32 %v11805_v2, %v17048_v57  ;;  %v9303_v18 = vpop.f32.mrb[93].mxu0 }
 0x8f8   : > { %v9304_v1 = vadd.f32 %v17048_v57, %v9303_v18  ;;  %v11806_v33 = vpop.f32.mrb[94].mxu0  ;;  %11839 = vmatprep.mubr.msk.bf16.mxu0 %vm7997_vm14, %v9362_v30 }
 0x8f9   : > { %v9315_v42 = vadd.f32 %v11806_v33, %v17048_v57  ;;  %v9306_v21 = vpop.f32.mrb[95].mxu0  ;;  %11840 = vmatmul.mubr.msk.bf16.gmra.mrb[120].mxu0 %vm7997_vm14, %v9363_v50  ;;  %v9348_v10 = vmax.f32 %v9312_v48, 0.0 }
 0x8fa   : > { %v9307_v37 = vadd.f32 %v17048_v57, %v9306_v21  ;;  %v9346_v7 = vmax.f32 %v9304_v1, 0.0  ;;  %v12217_v57 = vld [vmem:[%s17512_s7 + $0x10] sm:$0xff]  }
 0x8fb   : > { %v9349_v23 = vmax.f32 %v9315_v42, 0.0  ;;  %11891 = vmatprep.subr.bf16.mxu0 %v12217_v57 }
 0x8fc   : > { %v9347_v32 = vmax.f32 %v9307_v37, 0.0  ;;  %11892 = vmatpush3.bf16.msra.mxu0 %v12217_v57 }
 0x8fd   : > { %v9365_v15 = vpack.c.bf16 %v9349_v23, %v9348_v10  ;;  %11893 = vmatprep.subr.bf16.mxu0 %v12218_v39 }
 0x8fe   : > { %v9364_v46 = vpack.c.bf16 %v9347_v32, %v9346_v7 }
 0x900   : > { %11843 = vmatprep.mubr.msk.bf16.mxu0 %vm7997_vm14, %v9364_v46  ;;  %11894 = vmatpush3.bf16.msra.mxu0 %v12218_v39 }
 0x901   : > { %11844 = vmatmul.mubr.msk.bf16.gmra.mrb[124].mxu0 %vm7997_vm14, %v9365_v15 }
 0x99c   : > { %v11817_v53 = vpop.f32.mrb[96].mxu0 }
 0x99d   : > { %v9498_v34 = vadd.f32 %v11817_v53, %v17113_v13  ;;  %v9489_v41 = vpop.f32.mrb[97].mxu0 }
 0x99e   : > { %v9490_v3 = vadd.f32 %v17113_v13, %v9489_v41  ;;  %v11818_v22 = vpop.f32.mrb[98].mxu0 }
 0x99f   : > { %v9501_v58 = vadd.f32 %v11818_v22, %v17113_v13  ;;  %v9492_v51 = vpop.f32.mrb[99].mxu0  ;;  %v9618_v52 = vmax.f32 %v9498_v34, 0.0 }
 0x9a0   : > { %v9493_v16 = vadd.f32 %v17113_v13, %v9492_v51  ;;  %v9616_v25 = vmax.f32 %v9490_v3, 0.0 }
 0x9a1   : > { %v9619_v36 = vmax.f32 %v9501_v58, 0.0 }
 0x9a2   : > { %v9617_v27 = vmax.f32 %v9493_v16, 0.0 }
 0x9a3   : > { %v9649_v26 = vpack.c.bf16 %v9619_v36, %v9618_v52 }
 0x9a4   : > { %v9648_v44 = vpack.c.bf16 %v9617_v27, %v9616_v25  ;;  %v11821_v4 = vpop.f32.mrb[100].mxu0 }
 0x9a5   : > { %v9514_v60 = vadd.f32 %v11821_v4, %v17113_v13  ;;  %v9505_v55 = vpop.f32.mrb[101].mxu0 }
 0x9a6   : > { %v9506_v24 = vadd.f32 %v17113_v13, %v9505_v55  ;;  %v11822_v63 = vpop.f32.mrb[102].mxu0  ;;  %11855 = vmatprep.mubr.msk.bf16.mxu1 %vm7997_vm14, %v9648_v44 }
 0x9a7   : > { %v9517_v29 = vadd.f32 %v11822_v63, %v17113_v13  ;;  %v9508_v19 = vpop.f32.mrb[103].mxu0  ;;  %11856 = vmatmul.mubr.msk.bf16.vlgmr.msra.gmra.mrb[64].mxu1 %vm7997_vm14, %v9649_v26  ;;  %v9622_v61 = vmax.f32 %v9514_v60, 0.0 }
 0x9a8   : > { %v9509_v40 = vadd.f32 %v17113_v13, %v9508_v19  ;;  %v9620_v31 = vmax.f32 %v9506_v24, 0.0 }
 0x9a9   : > { %v9623_v28 = vmax.f32 %v9517_v29, 0.0 }
 0x9aa   : > { %v9621_v56 = vmax.f32 %v9509_v40, 0.0 }
 0x9ab   : > { %v9651_v35 = vpack.c.bf16 %v9623_v28, %v9622_v61 }
 0x9ac   : > { %v9650_v17 = vpack.c.bf16 %v9621_v56, %v9620_v31  ;;  %v11825_v8 = vpop.f32.mrb[104].mxu0 }
 0x9ad   : > { %v9530_v6 = vadd.f32 %v11825_v8, %v17113_v13  ;;  %v9521_v54 = vpop.f32.mrb[105].mxu0 }
 0x9ae   : > { %v9522_v47 = vadd.f32 %v17113_v13, %v9521_v54  ;;  %v11826_v14 = vpop.f32.mrb[106].mxu0  ;;  %11859 = vmatprep.mubr.msk.bf16.mxu1 %vm7997_vm14, %v9650_v17 }
 0x9af   : > { %v9533_v49 = vadd.f32 %v11826_v14, %v17113_v13  ;;  %v9524_v9 = vpop.f32.mrb[107].mxu0  ;;  %11860 = vmatmul.mubr.msk.bf16.gmra.mrb[68].mxu1 %vm7997_vm14, %v9651_v35  ;;  %v9626_v0 = vmax.f32 %v9530_v6, 0.0 }
 0x9b0   : > { %v9525_v12 = vadd.f32 %v17113_v13, %v9524_v9  ;;  %v9624_v5 = vmax.f32 %v9522_v47, 0.0 }
 0x9b1   : > { %v9627_v11 = vmax.f32 %v9533_v49, 0.0 }
 0x9b2   : > { %v9625_v62 = vmax.f32 %v9525_v12, 0.0 }
 0x9b3   : > { %v9653_v59 = vpack.c.bf16 %v9627_v11, %v9626_v0 }
 0x9b4   : > { %v9652_v38 = vpack.c.bf16 %v9625_v62, %v9624_v5  ;;  %v11829_v43 = vpop.f32.mrb[108].mxu0 }
 0x9b5   : > { %v9546_v50 = vadd.f32 %v11829_v43, %v17113_v13  ;;  %v9537_v30 = vpop.f32.mrb[109].mxu0 }
 0x9b6   : > { %v9538_v2 = vadd.f32 %v17113_v13, %v9537_v30  ;;  %v11830_v48 = vpop.f32.mrb[110].mxu0  ;;  %11863 = vmatprep.mubr.msk.bf16.mxu1 %vm7997_vm14, %v9652_v38 }
 0x9b7   : > { %v9549_v18 = vadd.f32 %v11830_v48, %v17113_v13  ;;  %v9540_v1 = vpop.f32.mrb[111].mxu0  ;;  %11864 = vmatmul.mubr.msk.bf16.gmra.mrb[72].mxu1 %vm7997_vm14, %v9653_v59  ;;  %v9630_v42 = vmax.f32 %v9546_v50, 0.0 }
 0x9b8   : > { %v9541_v33 = vadd.f32 %v17113_v13, %v9540_v1  ;;  %v9628_v37 = vmax.f32 %v9538_v2, 0.0 }
 0x9b9   : > { %v9631_v21 = vmax.f32 %v9549_v18, 0.0 }
 0x9ba   : > { %v9629_v10 = vmax.f32 %v9541_v33, 0.0  ;;  %v12432_v33 = vmov 64  }
 0x9bb   : > { %v9655_v23 = vpack.c.bf16 %v9631_v21, %v9630_v42  ;;  %12183 = vset.pattern.permute.xlu1 %v12432_v33  ;;  %12184 = vset.pattern.permute.xlu0 %v12432_v33  ;;  %v17166_v42 = vld [vmem:[%s17511_s6] ss:$0 sm:$0xff] }
 0x9bc   : > { %v9654_v7 = vpack.c.bf16 %v9629_v10, %v9628_v37  ;;  %v11833_v32 = vpop.f32.mrb[112].mxu0 }
 0x9bd   : > { %v9562_v15 = vadd.f32 %v11833_v32, %v17113_v13  ;;  %v9553_v46 = vpop.f32.mrb[113].mxu0 }
 0x9be   : > { %v9554_v20 = vadd.f32 %v17113_v13, %v9553_v46  ;;  %v11834_v45 = vpop.f32.mrb[114].mxu0  ;;  %11867 = vmatprep.mubr.msk.bf16.mxu1 %vm7997_vm14, %v9654_v7 }
 0x9bf   : > { %v9565_v57 = vadd.f32 %v11834_v45, %v17113_v13  ;;  %v9556_v39 = vpop.f32.mrb[115].mxu0  ;;  %11868 = vmatmul.mubr.msk.bf16.gmra.mrb[76].mxu1 %vm7997_vm14, %v9655_v23  ;;  %v9634_v34 = vmax.f32 %v9562_v15, 0.0 }
 0x9c0   : > { %v9557_v53 = vadd.f32 %v17113_v13, %v9556_v39  ;;  %v9632_v3 = vmax.f32 %v9554_v20, 0.0 }
 0x9c1   : > { %v9635_v41 = vmax.f32 %v9565_v57, 0.0 }
 0x9c2   : > { %v9633_v22 = vmax.f32 %v9557_v53, 0.0 }
 0x9c3   : > { %v9657_v58 = vpack.c.bf16 %v9635_v41, %v9634_v34 }
 0x9c4   : > { %v9656_v51 = vpack.c.bf16 %v9633_v22, %v9632_v3  ;;  %v11837_v16 = vpop.f32.mrb[116].mxu0 }
 0x9c5   : > { %v9578_v52 = vadd.f32 %v11837_v16, %v17113_v13  ;;  %v9569_v36 = vpop.f32.mrb[117].mxu0 }
 0x9c6   : > { %v9570_v25 = vadd.f32 %v17113_v13, %v9569_v36  ;;  %v11838_v27 = vpop.f32.mrb[118].mxu0  ;;  %11871 = vmatprep.mubr.msk.bf16.mxu1 %vm7997_vm14, %v9656_v51 }
 0x9c7   : > { %v9581_v26 = vadd.f32 %v11838_v27, %v17113_v13  ;;  %v9572_v44 = vpop.f32.mrb[119].mxu0  ;;  %11872 = vmatmul.mubr.msk.bf16.gmra.mrb[80].mxu1 %vm7997_vm14, %v9657_v58  ;;  %v9638_v60 = vmax.f32 %v9578_v52, 0.0 }
 0x9c8   : > { %v9573_v4 = vadd.f32 %v17113_v13, %v9572_v44  ;;  %v9636_v24 = vmax.f32 %v9570_v25, 0.0 }
 0x9c9   : > { %v9639_v55 = vmax.f32 %v9581_v26, 0.0 }
 0x9ca   : > { %v9637_v63 = vmax.f32 %v9573_v4, 0.0 }
 0x9cb   : > { %v9659_v29 = vpack.c.bf16 %v9639_v55, %v9638_v60 }
 0x9cc   : > { %v9658_v19 = vpack.c.bf16 %v9637_v63, %v9636_v24  ;;  %v11841_v40 = vpop.f32.mrb[120].mxu0 }
 0x9cd   : > { %v9594_v61 = vadd.f32 %v11841_v40, %v17113_v13  ;;  %v9585_v28 = vpop.f32.mrb[121].mxu0 }
 0x9ce   : > { %v9586_v31 = vadd.f32 %v17113_v13, %v9585_v28  ;;  %v11842_v56 = vpop.f32.mrb[122].mxu0  ;;  %11875 = vmatprep.mubr.msk.bf16.mxu1 %vm7997_vm14, %v9658_v19 }
 0x9cf   : > { %v9597_v35 = vadd.f32 %v11842_v56, %v17113_v13  ;;  %v9588_v17 = vpop.f32.mrb[123].mxu0  ;;  %11876 = vmatmul.mubr.msk.bf16.gmra.mrb[84].mxu1 %vm7997_vm14, %v9659_v29  ;;  %v9642_v6 = vmax.f32 %v9594_v61, 0.0 }
 0x9d0   : > { %v9589_v8 = vadd.f32 %v17113_v13, %v9588_v17  ;;  %v9640_v47 = vmax.f32 %v9586_v31, 0.0 }
 0x9d1   : > { %v9643_v54 = vmax.f32 %v9597_v35, 0.0 }
 0x9d2   : > { %v9641_v14 = vmax.f32 %v9589_v8, 0.0 }
 0x9d3   : > { %v9661_v49 = vpack.c.bf16 %v9643_v54, %v9642_v6 }
 0x9d4   : > { %v9660_v9 = vpack.c.bf16 %v9641_v14, %v9640_v47  ;;  %v11845_v12 = vpop.f32.mrb[124].mxu0 }
 0x9d5   : > { %v9610_v0 = vadd.f32 %v11845_v12, %v17113_v13  ;;  %v9601_v11 = vpop.f32.mrb[125].mxu0 }
 0x9d6   : > { %v9602_v5 = vadd.f32 %v17113_v13, %v9601_v11  ;;  %v11846_v62 = vpop.f32.mrb[126].mxu0  ;;  %11879 = vmatprep.mubr.msk.bf16.mxu1 %vm7997_vm14, %v9660_v9 }
 0x9d7   : > { %v9613_v59 = vadd.f32 %v11846_v62, %v17113_v13  ;;  %v9604_v38 = vpop.f32.mrb[127].mxu0  ;;  %11880 = vmatmul.mubr.msk.bf16.gmra.mrb[88].mxu1 %vm7997_vm14, %v9661_v49  ;;  %v9646_v50 = vmax.f32 %v9610_v0, 0.0 }
 0x9d8   : > { %v9605_v43 = vadd.f32 %v17113_v13, %v9604_v38  ;;  %v9644_v2 = vmax.f32 %v9602_v5, 0.0 }
 0x9d9   : > { %v9647_v30 = vmax.f32 %v9613_v59, 0.0 }
 0x9da   : > { %v9645_v48 = vmax.f32 %v9605_v43, 0.0 }
 0x9db   : > { %v9663_v18 = vpack.c.bf16 %v9647_v30, %v9646_v50 }
 0x9dc   : > { %v9662_v1 = vpack.c.bf16 %v9645_v48, %v9644_v2 }
 0x9de   : > { %11883 = vmatprep.mubr.msk.bf16.mxu1 %vm7997_vm14, %v9662_v1 }
 0x9df   : > { %11884 = vmatmul.mubr.msk.bf16.gmra.mrb[92].mxu1 %vm7997_vm14, %v9663_v18 }
 0xa7a   : > { %v11857_v21 = vpop.f32.mrb[64].mxu1 }
 0xa7b   : > { %v9794_v13 = vadd.f32 %v11857_v21, %v17166_v42  ;;  %v9785_v37 = vpop.f32.mrb[65].mxu1 }
 0xa7c   : > { %v11858_v10 = vpop.f32.mrb[66].mxu1  ;;  %v9786_v7 = vadd.f32 %v17166_v42, %v9785_v37  ;;  %v12219_v37 = vld [vmem:[%s17514_s9] sm:$0xff]  }
 0xa7d   : > { %v10454_v23 = vmax.f32 %v9794_v13, 0.0  ;;  %v9797_v32 = vadd.f32 %v11858_v10, %v17166_v42  ;;  %v9788_v15 = vpop.f32.mrb[67].mxu1  ;;  %11927 = vmatprep.subr.bf16.mxu1 %v12219_v37 }
 0xa7e   : > { %v9789_v46 = vadd.f32 %v17166_v42, %v9788_v15  ;;  %v10452_v39 = vmax.f32 %v9786_v7, 0.0  ;;  %11928 = vmatpush3.bf16.msra.mxu1 %v12219_v37 }
 0xa7f   : > { %v9913_v20 = vpack.c.bf16 %v9797_v32, %v9794_v13  ;;  %10594 = vperm.xlu1 %12183, %v10454_v23   ;;  %v10455_v22 = vmax.f32 %v9797_v32, 0.0 }
 0xa80   : > { %v9912_v45 = vpack.c.bf16 %v9789_v46, %v9786_v7  ;;  %v10453_v57 = vmax.f32 %v9789_v46, 0.0 }
 0xa82   : > { %v11861_v53 = vpop.f32.mrb[68].mxu1  ;;  %10589 = vperm.xlu0 %12184, %v10453_v57   ;;  %11895 = vmatprep.mubr.msk.bf16.mxu0 %vm7997_vm14, %v9912_v45 }
 0xa83   : > { %v9810_v34 = vadd.f32 %v11861_v53, %v17166_v42  ;;  %v9801_v41 = vpop.f32.mrb[69].mxu1  ;;  %10584 = vperm.xlu1 %12183, %v10452_v39   ;;  %11896 = vmatmul.mubr.msk.bf16.vlgmr.msra.gmra.mrb[128].mxu0 %vm7997_vm14, %v9913_v20 }
 0xa84   : > { %v11862_v3 = vpop.f32.mrb[70].mxu1  ;;  %v9802_v51 = vadd.f32 %v17166_v42, %v9801_v41 }
 0xa85   : > { %v10458_v58 = vmax.f32 %v9810_v34, 0.0  ;;  %v9813_v16 = vadd.f32 %v11862_v3, %v17166_v42  ;;  %v9804_v52 = vpop.f32.mrb[71].mxu1 }
 0xa86   : > { %v9805_v36 = vadd.f32 %v17166_v42, %v9804_v52  ;;  %v10456_v26 = vmax.f32 %v9802_v51, 0.0 }
 0xa87   : > { %v9915_v25 = vpack.c.bf16 %v9813_v16, %v9810_v34  ;;  %10614 = vperm.xlu0 %12184, %v10458_v58   ;;  %10599 = vperm.xlu1 %12183, %v10455_v22   ;;  %v10459_v44 = vmax.f32 %v9813_v16, 0.0 }
 0xa88   : > { %v9914_v27 = vpack.c.bf16 %v9805_v36, %v9802_v51  ;;  %v10457_v63 = vmax.f32 %v9805_v36, 0.0 }
 0xa8a   : > { %v11865_v4 = vpop.f32.mrb[72].mxu1  ;;  %11899 = vmatprep.mubr.msk.bf16.mxu0 %vm7997_vm14, %v9914_v27 }
 0xa8b   : > { %v9826_v60 = vadd.f32 %v11865_v4, %v17166_v42  ;;  %v9817_v55 = vpop.f32.mrb[73].mxu1  ;;  %10604 = vperm.xlu0 %12184, %v10456_v26   ;;  %10619 = vperm.xlu1 %12183, %v10459_v44  }
 0xa8c   : > { %11900 = vmatmul.mubr.msk.bf16.gmra.mrb[132].mxu0 %vm7997_vm14, %v9915_v25  ;;  %v11866_v24 = vpop.f32.mrb[74].mxu1  ;;  %v9818_v19 = vadd.f32 %v17166_v42, %v9817_v55 }
 0xa8d   : > { %v10462_v29 = vmax.f32 %v9826_v60, 0.0  ;;  %v9829_v40 = vadd.f32 %v11866_v24, %v17166_v42  ;;  %v9820_v61 = vpop.f32.mrb[75].mxu1 }
 0xa8e   : > { %v9821_v28 = vadd.f32 %v17166_v42, %v9820_v61  ;;  %v10460_v35 = vmax.f32 %v9818_v19, 0.0 }
 0xa8f   : > { %v9917_v31 = vpack.c.bf16 %v9829_v40, %v9826_v60  ;;  %10634 = vperm.xlu0 %12184, %v10462_v29   ;;  %10609 = vperm.xlu1 %12183, %v10457_v63   ;;  %v10463_v17 = vmax.f32 %v9829_v40, 0.0 }
 0xa90   : > { %v9916_v56 = vpack.c.bf16 %v9821_v28, %v9818_v19  ;;  %v10461_v14 = vmax.f32 %v9821_v28, 0.0 }
 0xa92   : > { %v11869_v8 = vpop.f32.mrb[76].mxu1  ;;  %11903 = vmatprep.mubr.msk.bf16.mxu0 %vm7997_vm14, %v9916_v56 }
 0xa93   : > { %v9842_v6 = vadd.f32 %v11869_v8, %v17166_v42  ;;  %v9833_v54 = vpop.f32.mrb[77].mxu1  ;;  %10624 = vperm.xlu0 %12184, %v10460_v35   ;;  %10639 = vperm.xlu1 %12183, %v10463_v17  }
 0xa94   : > { %11904 = vmatmul.mubr.msk.bf16.gmra.mrb[136].mxu0 %vm7997_vm14, %v9917_v31  ;;  %v11870_v47 = vpop.f32.mrb[78].mxu1  ;;  %v9834_v9 = vadd.f32 %v17166_v42, %v9833_v54 }
 0xa95   : > { %v10466_v49 = vmax.f32 %v9842_v6, 0.0  ;;  %v9845_v12 = vadd.f32 %v11870_v47, %v17166_v42  ;;  %v9836_v0 = vpop.f32.mrb[79].mxu1 }
 0xa96   : > { %v9837_v11 = vadd.f32 %v17166_v42, %v9836_v0  ;;  %v10464_v59 = vmax.f32 %v9834_v9, 0.0 }
 0xa97   : > { %v9919_v5 = vpack.c.bf16 %v9845_v12, %v9842_v6  ;;  %10654 = vperm.xlu0 %12184, %v10466_v49   ;;  %10629 = vperm.xlu1 %12183, %v10461_v14   ;;  %v10467_v38 = vmax.f32 %v9845_v12, 0.0 }
 0xa98   : > { %v9918_v62 = vpack.c.bf16 %v9837_v11, %v9834_v9  ;;  %v10465_v48 = vmax.f32 %v9837_v11, 0.0  ;;  %v17222_v11 = vld [vmem:[%s17513_s8] ss:$0 sm:$0xff] }
 0xa9a   : > { %v11873_v43 = vpop.f32.mrb[80].mxu1  ;;  %11907 = vmatprep.mubr.msk.bf16.mxu0 %vm7997_vm14, %v9918_v62 }
 0xa9b   : > { %v9858_v50 = vadd.f32 %v11873_v43, %v17166_v42  ;;  %v9849_v30 = vpop.f32.mrb[81].mxu1  ;;  %10644 = vperm.xlu0 %12184, %v10464_v59   ;;  %10659 = vperm.xlu1 %12183, %v10467_v38  }
 0xa9c   : > { %11908 = vmatmul.mubr.msk.bf16.gmra.mrb[140].mxu0 %vm7997_vm14, %v9919_v5  ;;  %v11874_v2 = vpop.f32.mrb[82].mxu1  ;;  %v9850_v1 = vadd.f32 %v17166_v42, %v9849_v30 }
 0xa9d   : > { %v10470_v18 = vmax.f32 %v9858_v50, 0.0  ;;  %v9861_v33 = vadd.f32 %v11874_v2, %v17166_v42  ;;  %v9852_v21 = vpop.f32.mrb[83].mxu1 }
 0xa9e   : > { %v9853_v13 = vadd.f32 %v17166_v42, %v9852_v21  ;;  %v10468_v7 = vmax.f32 %v9850_v1, 0.0 }
 0xa9f   : > { %v9921_v10 = vpack.c.bf16 %v9861_v33, %v9858_v50  ;;  %10674 = vperm.xlu0 %12184, %v10470_v18   ;;  %10649 = vperm.xlu1 %12183, %v10465_v48   ;;  %v10471_v32 = vmax.f32 %v9861_v33, 0.0 }
 0xaa0   : > { %v9920_v23 = vpack.c.bf16 %v9853_v13, %v9850_v1  ;;  %v10469_v57 = vmax.f32 %v9853_v13, 0.0 }
 0xaa2   : > { %v11877_v15 = vpop.f32.mrb[84].mxu1  ;;  %11911 = vmatprep.mubr.msk.bf16.mxu0 %vm7997_vm14, %v9920_v23 }
 0xaa3   : > { %v9874_v46 = vadd.f32 %v11877_v15, %v17166_v42  ;;  %v9865_v20 = vpop.f32.mrb[85].mxu1  ;;  %10664 = vperm.xlu0 %12184, %v10468_v7   ;;  %10679 = vperm.xlu1 %12183, %v10471_v32  }
 0xaa4   : > { %11912 = vmatmul.mubr.msk.bf16.gmra.mrb[144].mxu0 %vm7997_vm14, %v9921_v10  ;;  %v11878_v45 = vpop.f32.mrb[86].mxu1  ;;  %v9866_v53 = vadd.f32 %v17166_v42, %v9865_v20 }
 0xaa5   : > { %v10474_v39 = vmax.f32 %v9874_v46, 0.0  ;;  %v9877_v34 = vadd.f32 %v11878_v45, %v17166_v42  ;;  %v9868_v41 = vpop.f32.mrb[87].mxu1 }
 0xaa6   : > { %v9869_v3 = vadd.f32 %v17166_v42, %v9868_v41  ;;  %v10472_v51 = vmax.f32 %v9866_v53, 0.0 }
 0xaa7   : > { %v9923_v22 = vpack.c.bf16 %v9877_v34, %v9874_v46  ;;  %10694 = vperm.xlu0 %12184, %v10474_v39   ;;  %10669 = vperm.xlu1 %12183, %v10469_v57   ;;  %v10475_v16 = vmax.f32 %v9877_v34, 0.0 }
 0xaa8   : > { %v9922_v58 = vpack.c.bf16 %v9869_v3, %v9866_v53  ;;  %v10473_v26 = vmax.f32 %v9869_v3, 0.0 }
 0xaaa   : > { %v11881_v52 = vpop.f32.mrb[88].mxu1  ;;  %11915 = vmatprep.mubr.msk.bf16.mxu0 %vm7997_vm14, %v9922_v58 }
 0xaab   : > { %v9890_v36 = vadd.f32 %v11881_v52, %v17166_v42  ;;  %v9881_v25 = vpop.f32.mrb[89].mxu1  ;;  %10684 = vperm.xlu0 %12184, %v10472_v51   ;;  %10699 = vperm.xlu1 %12183, %v10475_v16  }
 0xaac   : > { %11916 = vmatmul.mubr.msk.bf16.gmra.mrb[148].mxu0 %vm7997_vm14, %v9923_v22  ;;  %v11882_v27 = vpop.f32.mrb[90].mxu1  ;;  %v9882_v4 = vadd.f32 %v17166_v42, %v9881_v25 }
 0xaad   : > { %v10478_v44 = vmax.f32 %v9890_v36, 0.0  ;;  %v9893_v60 = vadd.f32 %v11882_v27, %v17166_v42  ;;  %v9884_v55 = vpop.f32.mrb[91].mxu1 }
 0xaae   : > { %v9885_v24 = vadd.f32 %v17166_v42, %v9884_v55  ;;  %v10476_v19 = vmax.f32 %v9882_v4, 0.0 }
 0xaaf   : > { %v9925_v63 = vpack.c.bf16 %v9893_v60, %v9890_v36  ;;  %10714 = vperm.xlu0 %12184, %v10478_v44   ;;  %10689 = vperm.xlu1 %12183, %v10473_v26   ;;  %v10479_v40 = vmax.f32 %v9893_v60, 0.0 }
 0xab0   : > { %v9924_v29 = vpack.c.bf16 %v9885_v24, %v9882_v4  ;;  %v10477_v35 = vmax.f32 %v9885_v24, 0.0 }
 0xab2   : > { %v11885_v61 = vpop.f32.mrb[92].mxu1  ;;  %11919 = vmatprep.mubr.msk.bf16.mxu0 %vm7997_vm14, %v9924_v29 }
 0xab3   : > { %10704 = vperm.xlu0 %12184, %v10476_v19   ;;  %10719 = vperm.xlu1 %12183, %v10479_v40   ;;  %v9897_v28 = vpop.f32.mrb[93].mxu1  ;;  %v9906_v17 = vadd.f32 %v11885_v61, %v17166_v42 }
 0xab4   : > { %v9898_v31 = vadd.f32 %v17166_v42, %v9897_v28  ;;  %11920 = vmatmul.mubr.msk.bf16.gmra.mrb[152].mxu0 %vm7997_vm14, %v9925_v63  ;;  %v11886_v56 = vpop.f32.mrb[94].mxu1 }
 0xab5   : > { %v9909_v8 = vadd.f32 %v11886_v56, %v17166_v42  ;;  %v9900_v6 = vpop.f32.mrb[95].mxu1  ;;  %v10482_v12 = vmax.f32 %v9906_v17, 0.0 }
 0xab6   : > { %v10480_v54 = vmax.f32 %v9898_v31, 0.0  ;;  %v9901_v47 = vadd.f32 %v17166_v42, %v9900_v6 }
 0xab7   : > { %v9927_v14 = vpack.c.bf16 %v9909_v8, %v9906_v17  ;;  %10709 = vperm.xlu1 %12183, %v10477_v35   ;;  %v10483_v0 = vmax.f32 %v9909_v8, 0.0 }
 0xab8   : > { %v9926_v49 = vpack.c.bf16 %v9901_v47, %v9898_v31  ;;  %v10481_v9 = vmax.f32 %v9901_v47, 0.0  ;;  %10724 = vperm.xlu0 %12184, %v10480_v54  }
 0xaba   : > { %11923 = vmatprep.mubr.msk.bf16.mxu0 %vm7997_vm14, %v9926_v49 }
 0xabb   : > { %10729 = vperm.xlu1 %12183, %v10481_v9  }
 0xabc   : > { %11924 = vmatmul.mubr.msk.bf16.gmra.mrb[156].mxu0 %vm7997_vm14, %v9927_v14  ;;  %10734 = vperm.xlu0 %12184, %v10482_v12   ;;  %vm10774_vm14 = vcmask 31744  }
 0xabf   : > { %10739 = vperm.xlu1 %12183, %v10483_v0  }
 0xb56   : > { %v11897_v42 = vpop.f32.mrb[128].mxu0 }
 0xb57   : > { %v10058_v5 = vadd.f32 %v11897_v42, %v17222_v11  ;;  %v10049_v62 = vpop.f32.mrb[129].mxu0 }
 0xb58   : > { %v10050_v59 = vadd.f32 %v17222_v11, %v10049_v62  ;;  %v11898_v38 = vpop.f32.mrb[130].mxu0 }
 0xb59   : > { %v10061_v43 = vadd.f32 %v11898_v38, %v17222_v11  ;;  %v10052_v50 = vpop.f32.mrb[131].mxu0  ;;  %v10178_v2 = vmax.f32 %v10058_v5, 0.0 }
 0xb5a   : > { %v10053_v30 = vadd.f32 %v17222_v11, %v10052_v50  ;;  %v10176_v18 = vmax.f32 %v10050_v59, 0.0 }
 0xb5b   : > { %v10179_v48 = vmax.f32 %v10061_v43, 0.0 }
 0xb5c   : > { %v10177_v1 = vmax.f32 %v10053_v30, 0.0 }
 0xb5d   : > { %v10209_v33 = vpack.c.bf16 %v10179_v48, %v10178_v2 }
 0xb5e   : > { %v10208_v21 = vpack.c.bf16 %v10177_v1, %v10176_v18 }
 0xb5f   : > { %v11901_v13 = vpop.f32.mrb[132].mxu0 }
 0xb60   : > { %v10074_v37 = vadd.f32 %v11901_v13, %v17222_v11  ;;  %v10065_v10 = vpop.f32.mrb[133].mxu0  ;;  %11929 = vmatprep.mubr.msk.bf16.mxu1 %vm10239_vm15, %v10208_v21 }
 0xb61   : > { %v10066_v23 = vadd.f32 %v17222_v11, %v10065_v10  ;;  %v11902_v7 = vpop.f32.mrb[134].mxu0  ;;  %11930 = vmatmul.mubr.msk.bf16.vlgmr.msra.gmra.mrb[96].mxu1 %vm10239_vm15, %v10209_v33 }
 0xb62   : > { %v10077_v32 = vadd.f32 %v11902_v7, %v17222_v11  ;;  %v10068_v15 = vpop.f32.mrb[135].mxu0  ;;  %v10182_v20 = vmax.f32 %v10074_v37, 0.0 }
 0xb63   : > { %v10069_v46 = vadd.f32 %v17222_v11, %v10068_v15  ;;  %v10180_v57 = vmax.f32 %v10066_v23, 0.0 }
 0xb64   : > { %v10183_v45 = vmax.f32 %v10077_v32, 0.0 }
 0xb65   : > { %v10181_v39 = vmax.f32 %v10069_v46, 0.0 }
 0xb66   : > { %v10211_v53 = vpack.c.bf16 %v10183_v45, %v10182_v20 }
 0xb67   : > { %v10210_v34 = vpack.c.bf16 %v10181_v39, %v10180_v57  ;;  %v11905_v41 = vpop.f32.mrb[136].mxu0 }
 0xb68   : > { %v10090_v3 = vadd.f32 %v11905_v41, %v17222_v11  ;;  %v10081_v22 = vpop.f32.mrb[137].mxu0 }
 0xb69   : > { %v10082_v58 = vadd.f32 %v17222_v11, %v10081_v22  ;;  %v11906_v51 = vpop.f32.mrb[138].mxu0  ;;  %11933 = vmatprep.mubr.msk.bf16.mxu1 %vm10239_vm15, %v10210_v34 }
 0xb6a   : > { %v10093_v16 = vadd.f32 %v11906_v51, %v17222_v11  ;;  %v10084_v52 = vpop.f32.mrb[139].mxu0  ;;  %11934 = vmatmul.mubr.msk.bf16.gmra.mrb[100].mxu1 %vm10239_vm15, %v10211_v53  ;;  %v10186_v25 = vmax.f32 %v10090_v3, 0.0 }
 0xb6b   : > { %v10085_v36 = vadd.f32 %v17222_v11, %v10084_v52  ;;  %v10184_v26 = vmax.f32 %v10082_v58, 0.0 }
 0xb6c   : > { %v10187_v27 = vmax.f32 %v10093_v16, 0.0 }
 0xb6d   : > { %v10185_v44 = vmax.f32 %v10085_v36, 0.0 }
 0xb6e   : > { %v10213_v4 = vpack.c.bf16 %v10187_v27, %v10186_v25 }
 0xb6f   : > { %v10212_v60 = vpack.c.bf16 %v10185_v44, %v10184_v26  ;;  %v11909_v55 = vpop.f32.mrb[140].mxu0 }
 0xb70   : > { %v10106_v24 = vadd.f32 %v11909_v55, %v17222_v11  ;;  %v10097_v63 = vpop.f32.mrb[141].mxu0 }
 0xb71   : > { %v10098_v29 = vadd.f32 %v17222_v11, %v10097_v63  ;;  %v11910_v19 = vpop.f32.mrb[142].mxu0  ;;  %11937 = vmatprep.mubr.msk.bf16.mxu1 %vm10239_vm15, %v10212_v60 }
 0xb72   : > { %v10109_v40 = vadd.f32 %v11910_v19, %v17222_v11  ;;  %v10100_v61 = vpop.f32.mrb[143].mxu0  ;;  %11938 = vmatmul.mubr.msk.bf16.gmra.mrb[104].mxu1 %vm10239_vm15, %v10213_v4  ;;  %v10190_v31 = vmax.f32 %v10106_v24, 0.0 }
 0xb73   : > { %v10101_v28 = vadd.f32 %v17222_v11, %v10100_v61  ;;  %v10188_v35 = vmax.f32 %v10098_v29, 0.0 }
 0xb74   : > { %v10191_v56 = vmax.f32 %v10109_v40, 0.0 }
 0xb75   : > { %v10189_v17 = vmax.f32 %v10101_v28, 0.0  ;;  %v10595_v28 = vpop.permute.xlu1 %10594 }
 0xb76   : > { %v10215_v8 = vpack.c.bf16 %v10191_v56, %v10190_v31  ;;  %v17272_v56 = vpop.permute.xlu0 %10589 }
 0xb77   : > { %v10214_v6 = vpack.c.bf16 %v10189_v17, %v10188_v35  ;;  %v11913_v54 = vpop.f32.mrb[144].mxu0 }
 0xb78   : > { %v10122_v47 = vadd.f32 %v11913_v54, %v17222_v11  ;;  %v10113_v14 = vpop.f32.mrb[145].mxu0 }
 0xb79   : > { %v10114_v49 = vadd.f32 %v17222_v11, %v10113_v14  ;;  %v11914_v9 = vpop.f32.mrb[146].mxu0  ;;  %11941 = vmatprep.mubr.msk.bf16.mxu1 %vm10239_vm15, %v10214_v6  ;;  %v10585_v31 = vpop.permute.xlu1 %10584 }
 0xb7a   : > { %v10125_v12 = vadd.f32 %v11914_v9, %v17222_v11  ;;  %v10116_v0 = vpop.f32.mrb[147].mxu0  ;;  %11942 = vmatmul.mubr.msk.bf16.gmra.mrb[108].mxu1 %vm10239_vm15, %v10215_v8  ;;  %v10194_v5 = vmax.f32 %v10122_v47, 0.0  ;;  %v17274_v17 = vpop.permute.xlu0 %10614 }
 0xb7b   : > { %v10117_v42 = vadd.f32 %v17222_v11, %v10116_v0  ;;  %v10192_v59 = vmax.f32 %v10114_v49, 0.0 }
 0xb7c   : > { %v10195_v62 = vmax.f32 %v10125_v12, 0.0 }
 0xb7d   : > { %v10193_v38 = vmax.f32 %v10117_v42, 0.0  ;;  %v10600_v35 = vpop.permute.xlu1 %10599 }
 0xb7e   : > { %v10217_v43 = vpack.c.bf16 %v10195_v62, %v10194_v5  ;;  %v17284_v14 = vpop.permute.xlu0 %10604 }
 0xb7f   : > { %v10216_v50 = vpack.c.bf16 %v10193_v38, %v10192_v59  ;;  %v11917_v30 = vpop.f32.mrb[148].mxu0 }
 0xb80   : > { %v10138_v2 = vadd.f32 %v11917_v30, %v17222_v11  ;;  %v10129_v48 = vpop.f32.mrb[149].mxu0  ;;  %v17890_v30 = vlaneseq }
 0xb81   : > { %v10130_v18 = vadd.f32 %v17222_v11, %v10129_v48  ;;  %v11918_v1 = vpop.f32.mrb[150].mxu0  ;;  %11945 = vmatprep.mubr.msk.bf16.mxu1 %vm10239_vm15, %v10216_v50  ;;  %v17276_v8 = vpop.permute.xlu1 %10619 }
 0xb82   : > { %v10141_v33 = vadd.f32 %v11918_v1, %v17222_v11  ;;  %v10132_v21 = vpop.f32.mrb[151].mxu0  ;;  %11946 = vmatmul.mubr.msk.bf16.gmra.mrb[112].mxu1 %vm10239_vm15, %v10217_v43  ;;  %v10198_v37 = vmax.f32 %v10138_v2, 0.0  ;;  %v17291_v62 = vpop.permute.xlu0 %10634  ;;  %v17297_v2 = vand.u32 127, %v17890_v30 }
 0xb83   : > { %v10133_v13 = vadd.f32 %v17222_v11, %v10132_v21  ;;  %v10196_v23 = vmax.f32 %v10130_v18, 0.0 }
 0xb84   : > { %v10199_v10 = vmax.f32 %v10141_v33, 0.0  ;;  %vm10451_vm3 = vcmp.eq.s32.totalorder %v17297_v2, 0 }
 0xb85   : > { %v10197_v7 = vmax.f32 %v10133_v13, 0.0  ;;  %v17288_v42 = vpop.permute.xlu1 %10609 }
 0xb86   : > { %v10219_v32 = vpack.c.bf16 %v10199_v10, %v10198_v37  ;;  %v17302_v10 = vpop.permute.xlu0 %10624 }
 0xb87   : > { %v10218_v15 = vpack.c.bf16 %v10197_v7, %v10196_v23  ;;  %v11921_v46 = vpop.f32.mrb[152].mxu0 }
 0xb88   : > { %v10154_v20 = vadd.f32 %v11921_v46, %v17222_v11  ;;  %v10145_v45 = vpop.f32.mrb[153].mxu0 }
 0xb89   : > { %v10146_v57 = vadd.f32 %v17222_v11, %v10145_v45  ;;  %v11922_v39 = vpop.f32.mrb[154].mxu0  ;;  %11949 = vmatprep.mubr.msk.bf16.mxu1 %vm10239_vm15, %v10218_v15  ;;  %v17293_v38 = vpop.permute.xlu1 %10639 }
 0xb8a   : > { %v10157_v53 = vadd.f32 %v11922_v39, %v17222_v11  ;;  %v10148_v34 = vpop.f32.mrb[155].mxu0  ;;  %11950 = vmatmul.mubr.msk.bf16.gmra.mrb[116].mxu1 %vm10239_vm15, %v10219_v32  ;;  %v10202_v3 = vmax.f32 %v10154_v20, 0.0 }
 0xb8b   : > { %v10149_v41 = vadd.f32 %v17222_v11, %v10148_v34  ;;  %v10200_v58 = vmax.f32 %v10146_v57, 0.0 }
 0xb8c   : > { %v10203_v22 = vmax.f32 %v10157_v53, 0.0 }
 0xb8d   : > { %v10201_v51 = vmax.f32 %v10149_v41, 0.0  ;;  %v17312_v46 = vpop.permute.xlu1 %10629 }
 0xb8e   : > { %v10221_v16 = vpack.c.bf16 %v10203_v22, %v10202_v3 }
 0xb8f   : > { %v10220_v52 = vpack.c.bf16 %v10201_v51, %v10200_v58  ;;  %v11925_v36 = vpop.f32.mrb[156].mxu0 }
 0xb90   : > { %v10170_v25 = vadd.f32 %v11925_v36, %v17222_v11  ;;  %v10161_v27 = vpop.f32.mrb[157].mxu0  ;;  %v17322_v36 = vpop.permute.xlu0 %10654 }
 0xb91   : > { %v10162_v26 = vadd.f32 %v17222_v11, %v10161_v27  ;;  %v11926_v44 = vpop.f32.mrb[158].mxu0  ;;  %11953 = vmatprep.mubr.msk.bf16.mxu1 %vm10239_vm15, %v10220_v52 }
 0xb92   : > { %v10173_v4 = vadd.f32 %v11926_v44, %v17222_v11  ;;  %v10164_v60 = vpop.f32.mrb[159].mxu0  ;;  %11954 = vmatmul.mubr.msk.bf16.gmra.mrb[120].mxu1 %vm10239_vm15, %v10221_v16  ;;  %v10206_v24 = vmax.f32 %v10170_v25, 0.0 }
 0xb93   : > { %v10165_v55 = vadd.f32 %v17222_v11, %v10164_v60  ;;  %v10204_v29 = vmax.f32 %v10162_v26, 0.0  ;;  %v17281_v11 = vld [vmem:[%s17515_s10] ss:$0 sm:$0xff] }
 0xb94   : > { %v10207_v63 = vmax.f32 %v10173_v4, 0.0 }
 0xb95   : > { %v10205_v19 = vmax.f32 %v10165_v55, 0.0  ;;  %v17335_v55 = vpop.permute.xlu1 %10659 }
 0xb96   : > { %v10223_v40 = vpack.c.bf16 %v10207_v63, %v10206_v24 }
 0xb97   : > { %v10222_v61 = vpack.c.bf16 %v10205_v19, %v10204_v29 }
 0xb99   : > { %11957 = vmatprep.mubr.msk.bf16.mxu1 %vm10239_vm15, %v10222_v61 }
 0xb9a   : > { %11958 = vmatmul.mubr.msk.bf16.gmra.mrb[124].mxu1 %vm10239_vm15, %v10223_v40 }
 0xc34   : > { %v11931_v6 = vpop.f32.mrb[96].mxu1 }
 0xc35   : > { %v10331_v54 = vadd.f32 %v11931_v6, %v17281_v11  ;;  %v10322_v47 = vpop.f32.mrb[97].mxu1 }
 0xc36   : > { %v10323_v49 = vadd.f32 %v17281_v11, %v10322_v47  ;;  %v11932_v9 = vpop.f32.mrb[98].mxu1 }
 0xc37   : > { %12348 = vtanh.f32 %v10331_v54  ;;  %v10334_v12 = vadd.f32 %v11932_v9, %v17281_v11  ;;  %v10325_v0 = vpop.f32.mrb[99].mxu1 }
 0xc38   : > { %12350 = vtanh.f32 %v10323_v49  ;;  %v10326_v5 = vadd.f32 %v17281_v11, %v10325_v0 }
 0xc39   : > { %12352 = vtanh.f32 %v10334_v12 }
 0xc3a   : > { %12354 = vtanh.f32 %v10326_v5  ;;  %v17346_v5 = vpop.permute.xlu1 %10649 }
 0xc3d   : > { %v11935_v59 = vpop.f32.mrb[100].mxu1 }
 0xc3e   : > { %v10347_v43 = vadd.f32 %v11935_v59, %v17281_v11  ;;  %v10338_v50 = vpop.f32.mrb[101].mxu1 }
 0xc3f   : > { %v10339_v48 = vadd.f32 %v17281_v11, %v10338_v50  ;;  %v11936_v18 = vpop.f32.mrb[102].mxu1 }
 0xc40   : > { %12356 = vtanh.f32 %v10347_v43  ;;  %v10350_v1 = vadd.f32 %v11936_v18, %v17281_v11  ;;  %v10341_v33 = vpop.f32.mrb[103].mxu1 }
 0xc41   : > { %v12349_v21 = vpop.eup %12348  ;;  %12358 = vtanh.f32 %v10339_v48  ;;  %v10342_v13 = vadd.f32 %v17281_v11, %v10341_v33 }
 0xc42   : > { %v12351_v37 = vpop.eup %12350  ;;  %v10518_v23 = vadd.f32 1.0, %v12349_v21  ;;  %12360 = vtanh.f32 %v10350_v1 }
 0xc43   : > { %v12353_v7 = vpop.eup %12352  ;;  %v10516_v32 = vadd.f32 1.0, %v12351_v37  ;;  %12362 = vtanh.f32 %v10342_v13 }
 0xc44   : > { %v12355_v15 = vpop.eup %12354  ;;  %v10550_v20 = vmul.f32 0.5, %v10518_v23  ;;  %v10519_v45 = vadd.f32 1.0, %v12353_v7 }
 0xc45   : > { %v10548_v57 = vmul.f32 0.5, %v10516_v32  ;;  %v10517_v39 = vadd.f32 1.0, %v12355_v15  ;;  %v11939_v53 = vpop.f32.mrb[104].mxu1  ;;  %v17369_v15 = vpop.permute.xlu1 %10679 }
 0xc46   : > { %v10744_v34 = vsel %vm10451_vm3, %v10595_v28, %v10550_v20  ;;  %v10551_v41 = vmul.f32 0.5, %v10519_v45  ;;  %v10363_v3 = vadd.f32 %v11939_v53, %v17281_v11  ;;  %v10354_v22 = vpop.f32.mrb[105].mxu1 }
 0xc47   : > { %10777 = vst.msk [vmem:[%s17310_s18 + $0x10] sm:$0xff] %vm10774_vm14, %v10744_v34  ;;  %v10742_v58 = vsel %vm10451_vm3, %v10585_v31, %v10548_v57  ;;  %v10549_v51 = vmul.f32 0.5, %v10517_v39  ;;  %v10355_v16 = vadd.f32 %v17281_v11, %v10354_v22  ;;  %v11940_v52 = vpop.f32.mrb[106].mxu1 }
 0xc48   : > { %10775 = vst.msk [vmem:[%s17310_s18] sm:$0xff] %vm10774_vm14, %v10742_v58  ;;  %v10745_v25 = vsel %vm10451_vm3, %v10600_v35, %v10551_v41  ;;  %12364 = vtanh.f32 %v10363_v3  ;;  %v10366_v27 = vadd.f32 %v11940_v52, %v17281_v11  ;;  %v10357_v26 = vpop.f32.mrb[107].mxu1 }
 0xc49   : > { %10778 = vst.msk [vmem:[%s17310_s18 + $0x18] sm:$0xff] %vm10774_vm14, %v10745_v25  ;;  %v10743_v44 = vsel %vm10451_vm3, %v17272_v56, %v10549_v51  ;;  %12366 = vtanh.f32 %v10355_v16  ;;  %v10358_v4 = vadd.f32 %v17281_v11, %v10357_v26  ;;  %v17339_v56 = vpop.permute.xlu0 %10644 }
 0xc4a   : > { %v12357_v60 = vpop.eup %12356  ;;  %10776 = vst.msk [vmem:[%s17310_s18 + $0x8] sm:$0xff] %vm10774_vm14, %v10743_v44  ;;  %12368 = vtanh.f32 %v10366_v27 }
 0xc4b   : > { %v12359_v24 = vpop.eup %12358  ;;  %v10522_v63 = vadd.f32 1.0, %v12357_v60  ;;  %12370 = vtanh.f32 %v10358_v4 }
 0xc4c   : > { %v12361_v29 = vpop.eup %12360  ;;  %v10520_v19 = vadd.f32 1.0, %v12359_v24 }
 0xc4d   : > { %v12363_v40 = vpop.eup %12362  ;;  %v10554_v61 = vmul.f32 0.5, %v10522_v63  ;;  %v10523_v28 = vadd.f32 1.0, %v12361_v29  ;;  %v11943_v31 = vpop.f32.mrb[108].mxu1 }
 0xc4e   : > { %v10552_v35 = vmul.f32 0.5, %v10520_v19  ;;  %v10521_v6 = vadd.f32 1.0, %v12363_v40  ;;  %v10379_v54 = vadd.f32 %v11943_v31, %v17281_v11  ;;  %v10370_v47 = vpop.f32.mrb[109].mxu1  ;;  %v17367_v13 = vpop.permute.xlu0 %10674 }
 0xc4f   : > { %v10748_v49 = vsel %vm10451_vm3, %v17274_v17, %v10554_v61  ;;  %v10555_v9 = vmul.f32 0.5, %v10523_v28  ;;  %v10371_v12 = vadd.f32 %v17281_v11, %v10370_v47  ;;  %v11944_v0 = vpop.f32.mrb[110].mxu1 }
 0xc50   : > { %10781 = vst.msk [vmem:[%s17310_s18 + $0x30] sm:$0xff] %vm10774_vm14, %v10748_v49  ;;  %v10746_v59 = vsel %vm10451_vm3, %v17284_v14, %v10552_v35  ;;  %v10553_v43 = vmul.f32 0.5, %v10521_v6  ;;  %12372 = vtanh.f32 %v10379_v54  ;;  %v10382_v50 = vadd.f32 %v11944_v0, %v17281_v11  ;;  %v10373_v30 = vpop.f32.mrb[111].mxu1 }
 0xc51   : > { %10779 = vst.msk [vmem:[%s17310_s18 + $0x20] sm:$0xff] %vm10774_vm14, %v10746_v59  ;;  %v10749_v17 = vsel %vm10451_vm3, %v17276_v8, %v10555_v9  ;;  %12374 = vtanh.f32 %v10371_v12  ;;  %v10374_v48 = vadd.f32 %v17281_v11, %v10373_v30 }
 0xc52   : > { %v12365_v18 = vpop.eup %12364  ;;  %10782 = vst.msk [vmem:[%s17310_s18 + $0x38] sm:$0xff] %vm10774_vm14, %v10749_v17  ;;  %v10747_v14 = vsel %vm10451_vm3, %v17288_v42, %v10553_v43  ;;  %12376 = vtanh.f32 %v10382_v50  ;;  %v10665_v25 = vpop.permute.xlu0 %10664 }
 0xc53   : > { %v12367_v1 = vpop.eup %12366  ;;  %10780 = vst.msk [vmem:[%s17310_s18 + $0x28] sm:$0xff] %vm10774_vm14, %v10747_v14  ;;  %v10526_v33 = vadd.f32 1.0, %v12365_v18  ;;  %12378 = vtanh.f32 %v10374_v48 }
 0xc54   : > { %v12369_v21 = vpop.eup %12368  ;;  %v10524_v8 = vadd.f32 1.0, %v12367_v1 }
 0xc55   : > { %v12371_v37 = vpop.eup %12370  ;;  %v10558_v23 = vmul.f32 0.5, %v10526_v33  ;;  %v10527_v7 = vadd.f32 1.0, %v12369_v21  ;;  %v11947_v32 = vpop.f32.mrb[112].mxu1 }
 0xc56   : > { %v10556_v20 = vmul.f32 0.5, %v10524_v8  ;;  %v10525_v42 = vadd.f32 1.0, %v12371_v37  ;;  %v10395_v45 = vadd.f32 %v11947_v32, %v17281_v11  ;;  %v10386_v57 = vpop.f32.mrb[113].mxu1  ;;  %v17402_v54 = vpop.permute.xlu0 %10694 }
 0xc57   : > { %v10752_v39 = vsel %vm10451_vm3, %v17291_v62, %v10558_v23  ;;  %v10559_v53 = vmul.f32 0.5, %v10527_v7  ;;  %v10387_v34 = vadd.f32 %v17281_v11, %v10386_v57  ;;  %v11948_v41 = vpop.f32.mrb[114].mxu1 }
 0xc58   : > { %10785 = vst.msk [vmem:[%s17310_s18 + $0x50] sm:$0xff] %vm10774_vm14, %v10752_v39  ;;  %v10750_v3 = vsel %vm10451_vm3, %v17302_v10, %v10556_v20  ;;  %v10557_v22 = vmul.f32 0.5, %v10525_v42  ;;  %12380 = vtanh.f32 %v10395_v45  ;;  %v10398_v58 = vadd.f32 %v11948_v41, %v17281_v11  ;;  %v10389_v51 = vpop.f32.mrb[115].mxu1 }
 0xc59   : > { %10783 = vst.msk [vmem:[%s17310_s18 + $0x40] sm:$0xff] %vm10774_vm14, %v10750_v3  ;;  %v10753_v62 = vsel %vm10451_vm3, %v17293_v38, %v10559_v53  ;;  %12382 = vtanh.f32 %v10387_v34  ;;  %v10390_v16 = vadd.f32 %v17281_v11, %v10389_v51  ;;  %v17395_v38 = vpop.permute.xlu1 %10669 }
 0xc5a   : > { %v12373_v52 = vpop.eup %12372  ;;  %10786 = vst.msk [vmem:[%s17310_s18 + $0x58] sm:$0xff] %vm10774_vm14, %v10753_v62  ;;  %v10751_v10 = vsel %vm10451_vm3, %v17312_v46, %v10557_v22  ;;  %12384 = vtanh.f32 %v10398_v58  ;;  %v10685_v33 = vpop.permute.xlu0 %10684 }
 0xc5b   : > { %v12375_v27 = vpop.eup %12374  ;;  %10784 = vst.msk [vmem:[%s17310_s18 + $0x48] sm:$0xff] %vm10774_vm14, %v10751_v10  ;;  %v10530_v26 = vadd.f32 1.0, %v12373_v52  ;;  %12386 = vtanh.f32 %v10390_v16 }
 0xc5c   : > { %v12377_v44 = vpop.eup %12376  ;;  %v10528_v4 = vadd.f32 1.0, %v12375_v27 }
 0xc5d   : > { %v12379_v60 = vpop.eup %12378  ;;  %v10562_v24 = vmul.f32 0.5, %v10530_v26  ;;  %v10531_v63 = vadd.f32 1.0, %v12377_v44  ;;  %v11951_v29 = vpop.f32.mrb[116].mxu1 }
 0xc5e   : > { %v10560_v19 = vmul.f32 0.5, %v10528_v4  ;;  %v10529_v40 = vadd.f32 1.0, %v12379_v60  ;;  %v10411_v46 = vadd.f32 %v11951_v29, %v17281_v11  ;;  %v10402_v61 = vpop.f32.mrb[117].mxu1  ;;  %v17416_v43 = vpop.permute.xlu1 %10699 }
 0xc5f   : > { %v10756_v28 = vsel %vm10451_vm3, %v17322_v36, %v10562_v24  ;;  %v10563_v31 = vmul.f32 0.5, %v10531_v63  ;;  %v10403_v35 = vadd.f32 %v17281_v11, %v10402_v61  ;;  %v11952_v6 = vpop.f32.mrb[118].mxu1  ;;  %v10715_v62 = vpop.permute.xlu0 %10714 }
 0xc60   : > { %10789 = vst.msk [vmem:[%s17310_s18 + $0x70] sm:$0xff] %vm10774_vm14, %v10756_v28  ;;  %v10754_v47 = vsel %vm10451_vm3, %v17339_v56, %v10560_v19  ;;  %v10561_v49 = vmul.f32 0.5, %v10529_v40  ;;  %12388 = vtanh.f32 %v10411_v46  ;;  %v10414_v9 = vadd.f32 %v11952_v6, %v17281_v11  ;;  %v10405_v12 = vpop.f32.mrb[119].mxu1 }
 0xc61   : > { %10787 = vst.msk [vmem:[%s17310_s18 + $0x60] sm:$0xff] %vm10774_vm14, %v10754_v47  ;;  %v10757_v36 = vsel %vm10451_vm3, %v17335_v55, %v10563_v31  ;;  %12390 = vtanh.f32 %v10403_v35  ;;  %v10406_v0 = vadd.f32 %v17281_v11, %v10405_v12 }
 0xc62   : > { %v12381_v59 = vpop.eup %12380  ;;  %10790 = vst.msk [vmem:[%s17310_s18 + $0x78] sm:$0xff] %vm10774_vm14, %v10757_v36  ;;  %v10755_v56 = vsel %vm10451_vm3, %v17346_v5, %v10561_v49  ;;  %12392 = vtanh.f32 %v10414_v9  ;;  %v10690_v42 = vpop.permute.xlu1 %10689 }
 0xc63   : > { %v12383_v50 = vpop.eup %12382  ;;  %10788 = vst.msk [vmem:[%s17310_s18 + $0x68] sm:$0xff] %vm10774_vm14, %v10755_v56  ;;  %v10534_v30 = vadd.f32 1.0, %v12381_v59  ;;  %12394 = vtanh.f32 %v10406_v0  ;;  %v10705_v6 = vpop.permute.xlu0 %10704 }
 0xc64   : > { %v12385_v17 = vpop.eup %12384  ;;  %v10532_v55 = vadd.f32 1.0, %v12383_v50 }
 0xc65   : > { %v12387_v48 = vpop.eup %12386  ;;  %v10566_v18 = vmul.f32 0.5, %v10534_v30  ;;  %v10535_v14 = vadd.f32 1.0, %v12385_v17  ;;  %v11955_v1 = vpop.f32.mrb[120].mxu1 }
 0xc66   : > { %v10564_v21 = vmul.f32 0.5, %v10532_v55  ;;  %v10533_v8 = vadd.f32 1.0, %v12387_v48  ;;  %v10427_v37 = vadd.f32 %v11955_v1, %v17281_v11  ;;  %v10418_v5 = vpop.f32.mrb[121].mxu1  ;;  %v10720_v27 = vpop.permute.xlu1 %10719 }
 0xc67   : > { %v10760_v23 = vsel %vm10451_vm3, %v17367_v13, %v10566_v18  ;;  %v10567_v7 = vmul.f32 0.5, %v10535_v14  ;;  %v10419_v32 = vadd.f32 %v17281_v11, %v10418_v5  ;;  %v11956_v20 = vpop.f32.mrb[122].mxu1  ;;  %v10725_v17 = vpop.permute.xlu0 %10724 }
 0xc68   : > { %10793 = vst.msk [vmem:[%s17310_s18 + $0x90] sm:$0xff] %vm10774_vm14, %v10760_v23  ;;  %v10758_v45 = vsel %vm10451_vm3, %v10665_v25, %v10564_v21  ;;  %v10565_v57 = vmul.f32 0.5, %v10533_v8  ;;  %12396 = vtanh.f32 %v10427_v37  ;;  %v10430_v39 = vadd.f32 %v11956_v20, %v17281_v11  ;;  %v10421_v53 = vpop.f32.mrb[123].mxu1 }
 0xc69   : > { %10791 = vst.msk [vmem:[%s17310_s18 + $0x80] sm:$0xff] %vm10774_vm14, %v10758_v45  ;;  %v10761_v13 = vsel %vm10451_vm3, %v17369_v15, %v10567_v7  ;;  %12398 = vtanh.f32 %v10419_v32  ;;  %v10422_v34 = vadd.f32 %v17281_v11, %v10421_v53 }
 0xc6a   : > { %v12389_v41 = vpop.eup %12388  ;;  %10794 = vst.msk [vmem:[%s17310_s18 + $0x98] sm:$0xff] %vm10774_vm14, %v10761_v13  ;;  %v10759_v3 = vsel %vm10451_vm3, %v17395_v38, %v10565_v57  ;;  %12400 = vtanh.f32 %v10430_v39  ;;  %v10710_v12 = vpop.permute.xlu1 %10709 }
 0xc6b   : > { %v12391_v22 = vpop.eup %12390  ;;  %10792 = vst.msk [vmem:[%s17310_s18 + $0x88] sm:$0xff] %vm10774_vm14, %v10759_v3  ;;  %v10538_v58 = vadd.f32 1.0, %v12389_v41  ;;  %12402 = vtanh.f32 %v10422_v34  ;;  %v10735_v20 = vpop.permute.xlu0 %10734 }
 0xc6c   : > { %v12393_v51 = vpop.eup %12392  ;;  %v10536_v15 = vadd.f32 1.0, %v12391_v22 }
 0xc6d   : > { %v12395_v16 = vpop.eup %12394  ;;  %v10570_v52 = vmul.f32 0.5, %v10538_v58  ;;  %v10539_v25 = vadd.f32 1.0, %v12393_v51  ;;  %v11959_v10 = vpop.f32.mrb[124].mxu1 }
 0xc6e   : > { %v10568_v26 = vmul.f32 0.5, %v10536_v15  ;;  %v10537_v44 = vadd.f32 1.0, %v12395_v16  ;;  %v10443_v38 = vadd.f32 %v11959_v10, %v17281_v11  ;;  %v10434_v4 = vpop.f32.mrb[125].mxu1  ;;  %v10730_v1 = vpop.permute.xlu1 %10729 }
 0xc6f   : > { %v10764_v60 = vsel %vm10451_vm3, %v17402_v54, %v10570_v52  ;;  %v10571_v24 = vmul.f32 0.5, %v10539_v25  ;;  %v10435_v63 = vadd.f32 %v17281_v11, %v10434_v4  ;;  %v11960_v29 = vpop.f32.mrb[126].mxu1 }
 0xc70   : > { %10797 = vst.msk [vmem:[%s17310_s18 + $0xb0] sm:$0xff] %vm10774_vm14, %v10764_v60  ;;  %v10762_v19 = vsel %vm10451_vm3, %v10685_v33, %v10568_v26  ;;  %v10569_v40 = vmul.f32 0.5, %v10537_v44  ;;  %12404 = vtanh.f32 %v10443_v38  ;;  %v10446_v46 = vadd.f32 %v11960_v29, %v17281_v11  ;;  %v10437_v61 = vpop.f32.mrb[127].mxu1 }
 0xc71   : > { %10795 = vst.msk [vmem:[%s17310_s18 + $0xa0] sm:$0xff] %vm10774_vm14, %v10762_v19  ;;  %v10765_v28 = vsel %vm10451_vm3, %v17416_v43, %v10571_v24  ;;  %12406 = vtanh.f32 %v10435_v63  ;;  %v10438_v31 = vadd.f32 %v17281_v11, %v10437_v61 }
 0xc72   : > { %v12397_v35 = vpop.eup %12396  ;;  %10798 = vst.msk [vmem:[%s17310_s18 + $0xb8] sm:$0xff] %vm10774_vm14, %v10765_v28  ;;  %v10763_v54 = vsel %vm10451_vm3, %v10690_v42, %v10569_v40  ;;  %12408 = vtanh.f32 %v10446_v46  ;;  %v10740_v53 = vpop.permute.xlu1 %10739 }
 0xc73   : > { %v12399_v47 = vpop.eup %12398  ;;  %10796 = vst.msk [vmem:[%s17310_s18 + $0xa8] sm:$0xff] %vm10774_vm14, %v10763_v54  ;;  %v10542_v49 = vadd.f32 1.0, %v12397_v35  ;;  %12410 = vtanh.f32 %v10438_v31 }
 0xc74   : > { %v12401_v9 = vpop.eup %12400  ;;  %v10540_v36 = vadd.f32 1.0, %v12399_v47 }
 0xc75   : > { %v12403_v11 = vpop.eup %12402  ;;  %v10574_v0 = vmul.f32 0.5, %v10542_v49  ;;  %v10543_v59 = vadd.f32 1.0, %v12401_v9 }
 0xc76   : > { %v10572_v43 = vmul.f32 0.5, %v10540_v36  ;;  %v10541_v56 = vadd.f32 1.0, %v12403_v11 }
 0xc77   : > { %v10768_v50 = vsel %vm10451_vm3, %v10715_v62, %v10574_v0  ;;  %v10575_v30 = vmul.f32 0.5, %v10543_v59 }
 0xc78   : > { %10801 = vst.msk [vmem:[%s17310_s18 + $0xd0] sm:$0xff] %vm10774_vm14, %v10768_v50  ;;  %v10766_v55 = vsel %vm10451_vm3, %v10705_v6, %v10572_v43  ;;  %v10573_v48 = vmul.f32 0.5, %v10541_v56 }
 0xc79   : > { %10799 = vst.msk [vmem:[%s17310_s18 + $0xc0] sm:$0xff] %vm10774_vm14, %v10766_v55  ;;  %v10769_v18 = vsel %vm10451_vm3, %v10720_v27, %v10575_v30 }
 0xc7a   : > { %v12405_v14 = vpop.eup %12404  ;;  %10802 = vst.msk [vmem:[%s17310_s18 + $0xd8] sm:$0xff] %vm10774_vm14, %v10769_v18  ;;  %v10767_v33 = vsel %vm10451_vm3, %v10710_v12, %v10573_v48 }
 0xc7b   : > { %v12407_v21 = vpop.eup %12406  ;;  %10800 = vst.msk [vmem:[%s17310_s18 + $0xc8] sm:$0xff] %vm10774_vm14, %v10767_v33  ;;  %v10546_v8 = vadd.f32 1.0, %v12405_v14 }
 0xc7c   : > { %v12409_v37 = vpop.eup %12408  ;;  %v10544_v5 = vadd.f32 1.0, %v12407_v21 }
 0xc7d   : > { %v12411_v23 = vpop.eup %12410  ;;  %v10578_v7 = vmul.f32 0.5, %v10546_v8  ;;  %v10547_v32 = vadd.f32 1.0, %v12409_v37 }
 0xc7e   : > { %v10576_v42 = vmul.f32 0.5, %v10544_v5  ;;  %v10545_v45 = vadd.f32 1.0, %v12411_v23 }
 0xc7f   : > { %v10772_v57 = vsel %vm10451_vm3, %v10735_v20, %v10578_v7  ;;  %v10579_v39 = vmul.f32 0.5, %v10547_v32 }
 0xc80   : > { %10805 = vst.msk [vmem:[%s17310_s18 + $0xf0] sm:$0xff] %vm10774_vm14, %v10772_v57  ;;  %v10770_v13 = vsel %vm10451_vm3, %v10725_v17, %v10576_v42  ;;  %v10577_v34 = vmul.f32 0.5, %v10545_v45 }
 0xc81   : > { %10803 = vst.msk [vmem:[%s17310_s18 + $0xe0] sm:$0xff] %vm10774_vm14, %v10770_v13  ;;  %v10773_v41 = vsel %vm10451_vm3, %v10740_v53, %v10579_v39 }
 0xc82   : > { %10806 = vst.msk [vmem:[%s17310_s18 + $0xf8] sm:$0xff] %vm10774_vm14, %v10773_v41  ;;  %v10771_v3 = vsel %vm10451_vm3, %v10730_v1, %v10577_v34 }
 0xc83   : > { %10804 = vst.msk [vmem:[%s17310_s18 + $0xe8] sm:$0xff] %vm10774_vm14, %v10771_v3 }
 0xc84 PF: > { %s21_s17 = sadd.s32 1, %s12421_s17  }
 0xc85   : > { %p18_p4 = scmp.ge.s32.totalorder %s21_s17, 4  }
 0xc87   :  { %20 = sbr.rel (!%p18_p4) target bundleno = 1 (0x1), region = 104 }

</bundles_post_ra>
